<compile_context>
chip_gen: v6e
topology: v6e:2x2x1
jax: 0.10.0
libtpu: 0.0.40
codegen_flags: <defaults>
</compile_context>

<pallas_src>
import functools
import numpy as np
import jax
import jax.numpy as jnp
from jax import lax
from jax.experimental import pallas as pl
from jax.experimental.pallas import tpu as pltpu


# ----------------------------- config ------------------------------------- #
class Config:
    Mean = [123.68, 116.779, 103.939]
    img_max = 64
    img_min = 64
    num_cls = 4                      # includes background at index 0
    anchor_scales = [[8], [16], [32], [64], [128]]
    anchor_ratios = [[0.5, 1.0, 2.0]] * 5
    roi_nms_thresh = 0.7
    roi_train_pre_nms = 2000
    roi_train_post_nms = 1000
    roi_test_pre_nms = 64
    roi_test_post_nms = 16
    roi_min_size = [2.0, 2.0, 2.0]
    is_train = False


NUM_CLS = Config.num_cls
NUM_ANCHOR = 3                        # 1 scale x 3 ratios per level
STEM_CH = 8
BACKBONE_CH = [16, 32, 64, 128]       # C2..C5 (small stand-in for [256,512,1024,2048])
FPN_CH = 32                           # stand-in for 256
FAST_HIDDEN = 64                      # stand-in for 1024
MAX_DET = 8                           # stand-in for pre[:100]
LANE = 128                            # lane-dense head width (narrow N padded to this)
BBOX_XFORM_CLIP = float(np.log(1000.0 / 16.0))   # numerical guard for exp(dh/dw)
LOC_STD = [[1 / 10, 1 / 10, 1 / 5, 1 / 5],
           [1 / 20, 1 / 20, 1 / 10, 1 / 10],
           [1 / 30, 1 / 30, 1 / 15, 1 / 15]]
CASCADE_W = [1.0, 1.0, 1.0]


def _pick_tm():
    """Row-tile: bigger tiles -> fewer ~0.35us grid steps (workload is launch bound).
    v7x: one big block; v6e: 1024; v5e/other: 512."""
    try:
        kind = jax.devices()[0].device_kind.lower()
    except Exception:
        kind = ""
    if "v7" in kind or "7x" in kind:
        return 2048
    if "v6" in kind or "6e" in kind:
        return 1024
    return 512


_TM = _pick_tm()
_VMEM_LIMIT = 32 * 1024 * 1024


# ----------------------- Pallas matmul (+bias, +relu) ---------------------- #
def _mm_kernel(a_ref, b_ref, bias_ref, o_ref, *, relu):
    acc = jnp.dot(a_ref[...], b_ref[...], preferred_element_type=jnp.float32)
    acc = acc + bias_ref[...]
    if relu:
        acc = jnp.maximum(acc, 0.0)
    o_ref[...] = acc.astype(o_ref.dtype)


@functools.lru_cache(maxsize=None)
def _build_matmul(M, K, N, tm, relu, out_dtype):
    kernel = functools.partial(_mm_kernel, relu=relu)
    return pl.pallas_call(
        kernel,
        out_shape=jax.ShapeDtypeStruct((M, N), out_dtype),
        grid=(pl.cdiv(M, tm),),
        in_specs=[
            pl.BlockSpec((tm, K), lambda i: (i, 0)),    # activations (bf16), tiled on M
            pl.BlockSpec((K, N), lambda i: (0, 0)),     # weights, resident (bf16)
            pl.BlockSpec((1, N), lambda i: (0, 0)),     # bias (f32)
        ],
        out_specs=pl.BlockSpec((tm, N), lambda i: (i, 0)),
        compiler_params=pltpu.CompilerParams(
            dimension_semantics=("parallel",),
            vmem_limit_bytes=_VMEM_LIMIT),
    )


def pallas_matmul(a, w, bias, relu=False, out_dtype=jnp.float32):
    """out = act(a @ w + bias); a:(M,K), w:(K,N) bf16, bias:(1,N) f32."""
    M, K = a.shape
    Kw, N = w.shape
    assert K == Kw, (K, Kw)
    tm = M if M <= _TM else _TM
    a = a.astype(jnp.bfloat16)
    return _build_matmul(int(M), int(K), int(N), int(tm), bool(relu),
                         np.dtype(out_dtype))(a, w, bias)


# -------------------- fused two-matmul chain (x@w1 -> relu -> @w2) --------- #
def _chain2_kernel(x_ref, w1_ref, b1_ref, w2_ref, b2_ref, o_ref, *, relu_mid, relu_out):
    h = jnp.dot(x_ref[...], w1_ref[...], preferred_element_type=jnp.float32) + b1_ref[...]
    if relu_mid:
        h = jnp.maximum(h, 0.0)
    h = h.astype(jnp.bfloat16)
    out = jnp.dot(h, w2_ref[...], preferred_element_type=jnp.float32) + b2_ref[...]
    if relu_out:
        out = jnp.maximum(out, 0.0)
    o_ref[...] = out.astype(o_ref.dtype)


@functools.lru_cache(maxsize=None)
def _build_chain2(M, K, H, N, tm, relu_mid, relu_out, out_dtype):
    kernel = functools.partial(_chain2_kernel, relu_mid=relu_mid, relu_out=relu_out)
    return pl.pallas_call(
        kernel,
        out_shape=jax.ShapeDtypeStruct((M, N), out_dtype),
        grid=(pl.cdiv(M, tm),),
        in_specs=[
            pl.BlockSpec((tm, K), lambda i: (i, 0)),
            pl.BlockSpec((K, H), lambda i: (0, 0)),
            pl.BlockSpec((1, H), lambda i: (0, 0)),
            pl.BlockSpec((H, N), lambda i: (0, 0)),
            pl.BlockSpec((1, N), lambda i: (0, 0)),
        ],
        out_specs=pl.BlockSpec((tm, N), lambda i: (i, 0)),
        compiler_params=pltpu.CompilerParams(
            dimension_semantics=("parallel",),
            vmem_limit_bytes=_VMEM_LIMIT),
    )


def pallas_chain2(x, w1, b1, w2, b2, relu_mid=True, relu_out=False,
                  out_dtype=jnp.float32):
    M, K = x.shape
    H = w1.shape[1]
    N = w2.shape[1]
    tm = M if M <= _TM else _TM
    x = x.astype(jnp.bfloat16)
    return _build_chain2(int(M), int(K), int(H), int(N), int(tm),
                         bool(relu_mid), bool(relu_out),
                         np.dtype(out_dtype))(x, w1, b1, w2, b2)


# --------------------- fused cascade-head FC chain kernel ------------------ #
def _fast_head_kernel(x_ref, w1_ref, b1_ref, w2_ref, b2_ref, w3_ref, b3_ref, o_ref):
    h = jnp.dot(x_ref[...], w1_ref[...], preferred_element_type=jnp.float32) + b1_ref[...]
    h = jnp.maximum(h, 0.0).astype(jnp.bfloat16)
    h = jnp.dot(h, w2_ref[...], preferred_element_type=jnp.float32) + b2_ref[...]
    h = jnp.maximum(h, 0.0).astype(jnp.bfloat16)
    o_ref[...] = (jnp.dot(h, w3_ref[...], preferred_element_type=jnp.float32)
                  + b3_ref[...])


@functools.lru_cache(maxsize=None)
def _build_fast_head(M, K, H, NOUT):
    return pl.pallas_call(
        _fast_head_kernel,
        out_shape=jax.ShapeDtypeStruct((M, NOUT), jnp.float32),
        grid=(1,),
        in_specs=[
            pl.BlockSpec((M, K), lambda i: (0, 0)),
            pl.BlockSpec((K, H), lambda i: (0, 0)),
            pl.BlockSpec((1, H), lambda i: (0, 0)),
            pl.BlockSpec((H, H), lambda i: (0, 0)),
            pl.BlockSpec((1, H), lambda i: (0, 0)),
            pl.BlockSpec((H, NOUT), lambda i: (0, 0)),
            pl.BlockSpec((1, NOUT), lambda i: (0, 0)),
        ],
        out_specs=pl.BlockSpec((M, NOUT), lambda i: (0, 0)),
        compiler_params=pltpu.CompilerParams(
            dimension_semantics=("arbitrary",),
            vmem_limit_bytes=_VMEM_LIMIT),
    )


# ----------------------------- conv via im2col ----------------------------- #
def _im2col(x, kh, kw, stride, pad):
    """x: (N,H,W,C) (bf16). Returns cols (N*Ho*Wo, kh*kw*C) and (N,Ho,Wo)."""
    n, h, w, c = x.shape
    xp = jnp.pad(x, ((0, 0), (pad, pad), (pad, pad), (0, 0)))
    ho = (h + 2 * pad - kh) // stride + 1
    wo = (w + 2 * pad - kw) // stride + 1
    cols = []
    for i in range(kh):
        for j in range(kw):
            cols.append(xp[:, i:i + (ho - 1) * stride + 1:stride,
                           j:j + (wo - 1) * stride + 1:stride, :])
    patches = jnp.concatenate(cols, axis=-1)
    return patches.reshape(n * ho * wo, kh * kw * c), (n, ho, wo)


def conv2d(x, params, name, k, stride=1, pad=0, relu=False, out_dtype=jnp.float32):
    w = params[name + '_w']                       # (k*k*cin, cout) bf16
    b = params[name + '_b']                       # (1, cout)      f32
    cout = w.shape[1]
    xb = x.astype(jnp.bfloat16)
    if k == 1 and stride == 1 and pad == 0:
        n, h, wd, c = x.shape
        out = pallas_matmul(xb.reshape(n * h * wd, c), w, b, relu=relu,
                            out_dtype=out_dtype)
        return out.reshape(n, h, wd, cout)
    cols, (n, ho, wo) = _im2col(xb, k, k, stride, pad)
    out = pallas_matmul(cols, w, b, relu=relu, out_dtype=out_dtype)
    return out.reshape(n, ho, wo, cout)


def maxpool_3x3_s2(x):
    # matches torch MaxPool2d(kernel_size=3, stride=2, padding=1)
    init = jnp.array(-jnp.inf, dtype=x.dtype)
    return lax.reduce_window(x, init, lax.max,
                             (1, 3, 3, 1), (1, 2, 2, 1),
                             [(0, 0), (1, 1), (1, 1), (0, 0)])


# ------------------------------- anchors ----------------------------------- #
def get_anchors(size, scales, ratios, stride):
    size = int(size)
    base = []
    for s in scales:
        for r in ratios:
            h = s * np.sqrt(r)
            w = s / np.sqrt(r)
            base.append([-w / 2, -h / 2, w / 2, h / 2])
    base = np.asarray(base, np.float32)                       # (A,4)
    ctr = (np.arange(size, dtype=np.float32) + 0.5) * stride
    cx, cy = np.meshgrid(ctr, ctr)                            # (size,size)
    shift = np.stack([cx, cy, cx, cy], axis=-1)               # (size,size,4)
    anchors = shift[:, :, None, :] + base[None, None, :, :]   # (size,size,A,4)
    return jnp.asarray(anchors)


# ------------------------------ box utilities ------------------------------ #
def loc2bbox(pre_loc, anchor):
    c_hw = anchor[..., 2:4] - anchor[..., 0:2]
    c_yx = anchor[..., :2] + c_hw / 2
    yx = pre_loc[..., :2] * c_hw + c_yx
    # clamp dw/dh (torchvision-style) so exp never overflows with random weights
    dhw = jnp.clip(pre_loc[..., 2:4], -BBOX_XFORM_CLIP, BBOX_XFORM_CLIP)
    hw = jnp.exp(dhw) * c_hw
    return jnp.concatenate([yx - hw / 2, yx + hw / 2], axis=-1)


def clip_boxes(boxes, h, w):
    x1 = jnp.clip(boxes[..., 0], 0, w)
    y1 = jnp.clip(boxes[..., 1], 0, h)
    x2 = jnp.clip(boxes[..., 2], 0, w)
    y2 = jnp.clip(boxes[..., 3], 0, h)
    return jnp.stack([x1, y1, x2, y2], axis=-1)


def filter_bboxes(roi, img_size, min_size):
    h, w = img_size
    roi = clip_boxes(roi, h, w)
    hw = roi[:, 2:4] - roi[:, :2]
    valid = jnp.all(hw >= min_size, axis=-1)
    return roi, valid


# ------------------------------- ROI align --------------------------------- #
def _interp_matrix(coords, size, padded_size):
    """coords (K,S) continuous positions -> (K,S,padded_size) bilinear weights.
    Weight columns beyond `size` stay zero (coords clipped to size-1); the
    equality test is exact because c0/c1 are small exact-integer floats."""
    c = jnp.clip(coords, 0.0, size - 1.0)
    c0 = jnp.floor(c)
    l = c - c0
    c1 = jnp.minimum(c0 + 1.0, size - 1.0)
    grid = jnp.arange(padded_size, dtype=jnp.float32)[None, None, :]
    w0 = jnp.where(grid == c0[..., None], (1.0 - l)[..., None], 0.0)
    w1 = jnp.where(grid == c1[..., None], l[..., None], 0.0)
    return w0 + w1


def multiscale_roi_align(P_stack, level_hw, rois, out_size, sr=2):
    """Batched over the 4 pyramid levels.
    P_stack: (L, maxH, maxW, C) bf16, zero-padded per level.
    level_hw: static list of (H, W) actual per-level sizes.
    TODO(synk): data-dependent per-ROI level dispatch kept as a masked sum;
    true dynamic gather would need data-dependent shapes."""
    L, maxH, maxW, C = P_stack.shape
    K = rois.shape[0]
    area = jnp.maximum(rois[:, 2] - rois[:, 0], 0.0) * \
           jnp.maximum(rois[:, 3] - rois[:, 1], 0.0)
    lvl = jnp.floor(4.0 + jnp.log2(jnp.sqrt(area) / 224.0 + 1e-6))
    lvl = jnp.clip(lvl, 2.0, 5.0) - 2.0

    S = out_size * sr
    idx = jnp.arange(S)
    frac = (idx // sr).astype(jnp.float32) + ((idx % sr).astype(jnp.float32) + 0.5) / sr

    Wy_l, Wx_l = [], []
    for l in range(L):
        scale = 1.0 / (4 * 2 ** l)
        Hl, Wl = level_hw[l]
        x1 = rois[:, 0] * scale
        y1 = rois[:, 1] * scale
        x2 = rois[:, 2] * scale
        y2 = rois[:, 3] * scale
        bw = jnp.maximum(x2 - x1, 1.0) / out_size
        bh = jnp.maximum(y2 - y1, 1.0) / out_size
        ys = y1[:, None] + frac[None, :] * bh[:, None]            # (K,S)
        xs = x1[:, None] + frac[None, :] * bw[:, None]            # (K,S)
        Wy_l.append(_interp_matrix(ys, Hl, maxH))                 # (K,S,maxH)
        Wx_l.append(_interp_matrix(xs, Wl, maxW))                 # (K,S,maxW)
    Wy = jnp.stack(Wy_l, axis=0).astype(jnp.bfloat16)             # (L,K,S,maxH)
    Wx = jnp.stack(Wx_l, axis=0).astype(jnp.bfloat16)             # (L,K,S,maxW)

    feat = P_stack.astype(jnp.bfloat16)
    tmp = jnp.einsum('lksh,lhwc->lkswc', Wy, feat,
                     preferred_element_type=jnp.float32)
    vals = jnp.einsum('lktw,lkswc->lkstc', Wx, tmp,
                      preferred_element_type=jnp.float32)
    vals = vals.reshape(L, K, out_size, sr, out_size, sr, C).mean(axis=(3, 5))
    onehot = (lvl[None, :] == jnp.arange(L, dtype=jnp.float32)[:, None])   # (L,K)
    out = jnp.sum(jnp.where(onehot[..., None, None, None], vals, 0.0), axis=0)
    return out                                                    # (K,out,out,C) f32


# -------------------------------- heads ------------------------------------ #
def fast_net(params, prefix, feat):
    # feat (K,7,7,C) NHWC -> flatten as (K, C*7*7) to mimic the NCHW flatten.
    K = feat.shape[0]
    x = jnp.transpose(feat, (0, 3, 1, 2)).reshape(K, -1).astype(jnp.bfloat16)
    out = _build_fast_head(int(K), int(x.shape[1]), int(FAST_HIDDEN), LANE)(
        x, params[prefix + '_fc1_w'], params[prefix + '_fc1_b'],
        params[prefix + '_fc2_w'], params[prefix + '_fc2_b'],
        params[prefix + '_head_w'], params[prefix + '_head_b'])
    logits = out[:, :NUM_CLS]
    loc = out[:, NUM_CLS:NUM_CLS * 5].reshape(K, NUM_CLS, 4)
    return logits, loc


def mask_net_fwd(params, feat):
    x = feat                                                     # (K,14,14,C)
    for i in range(4):
        x = conv2d(x, params, 'mask_c%d' % i, k=3, stride=1, pad=1, relu=True,
                   out_dtype=jnp.bfloat16)
    # ConvTranspose2d(k=2,s=2) (as 1x1 to 4C) + ReLU + mask_out 1x1 fused into
    # ONE two-matmul kernel via a block-diagonal second weight; the per-subpixel
    # group structure is preserved because ReLU is elementwise.
    k, h, w, c = x.shape
    y = pallas_chain2(x.reshape(-1, c), params['mask_deconv_w'],
                      params['mask_deconv_b'], params['mask_head_w'],
                      params['mask_head_b'], relu_mid=True, relu_out=False,
                      out_dtype=jnp.float32)                     # (k*h*w, 128)
    y = y[:, :4 * NUM_CLS]
    y = y.reshape(k, h, w, 2, 2, NUM_CLS).transpose(0, 1, 3, 2, 4, 5)
    return y.reshape(k, 2 * h, 2 * w, NUM_CLS)                   # (K,28,28,NUM_CLS)


def predict(bboxes, scores, h, w, c_thresh, max_det):
    # TODO(synk): per-class NMS from `predict` is data dependent; this keeps a
    # fixed-size top-k by score (rows below c_thresh get score 0).
    b = clip_boxes(bboxes, h, w)
    N, C = scores.shape
    cls_ids = jnp.broadcast_to(jnp.arange(C, dtype=jnp.float32)[None, :], (N, C))
    flat_s = scores.reshape(-1)
    flat_b = b.reshape(-1, 4)
    flat_c = cls_ids.reshape(-1)
    flat_s = jnp.where(flat_s >= c_thresh, flat_s, 0.0)
    order = jnp.argsort(-flat_s)[:max_det]
    pre = jnp.concatenate([flat_b[order], flat_s[order, None], flat_c[order, None]],
                          axis=-1)
    return pre


# ------------------------------- parameters -------------------------------- #
def init_params(key):
    """Weights pre-reshaped to (K, Cout) bf16, biases (1, Cout) f32.
    Narrow head weights are padded to 128 columns (lane-dense stores)."""
    p = {}
    keys = iter(jax.random.split(key, 64))

    def conv_w(kh, kw, cin, cout):
        w = jax.random.normal(next(keys), (kh, kw, cin, cout), jnp.float32) * 0.05
        return w.reshape(kh * kw * cin, cout)

    def conv_p(name, kh, kw, cin, cout):
        p[name + '_w'] = conv_w(kh, kw, cin, cout).astype(jnp.bfloat16)
        p[name + '_b'] = jnp.zeros((1, cout), jnp.float32)

    def lin_w(cin, cout):
        return jax.random.normal(next(keys), (cin, cout), jnp.float32) * 0.05

    def lin_p(name, cin, cout):
        p[name + '_w'] = lin_w(cin, cout).astype(jnp.bfloat16)
        p[name + '_b'] = jnp.zeros((1, cout), jnp.float32)

    def pad_cols(w, n):
        return jnp.pad(w, ((0, 0), (0, n - w.shape[1])))

    # backbone (small stand-in for resnet101)
    conv_p('stem', 7, 7, 3, STEM_CH)
    conv_p('l1', 3, 3, STEM_CH, BACKBONE_CH[0])
    conv_p('l2', 3, 3, BACKBONE_CH[0], BACKBONE_CH[1])
    conv_p('l3', 3, 3, BACKBONE_CH[1], BACKBONE_CH[2])
    conv_p('l4', 3, 3, BACKBONE_CH[2], BACKBONE_CH[3])
    # FPN laterals
    for i in range(4):
        conv_p('lat%d' % i, 1, 1, BACKBONE_CH[i], FPN_CH)
    # FPN output 3x3 convs: 4 per-level weights merged along N (-> 128 lanes)
    fpn_w = jnp.concatenate([conv_w(3, 3, FPN_CH, FPN_CH) for _ in range(4)], axis=1)
    p['fpn_out_w'] = fpn_w.astype(jnp.bfloat16)
    p['fpn_out_b'] = jnp.zeros((1, 4 * FPN_CH), jnp.float32)
    # RPN: 3x3 conv + merged [cls(6) | loc(12)] head padded to 128 lanes
    conv_p('rpn_conv', 3, 3, FPN_CH, FPN_CH)
    rpn_cls_w = conv_w(1, 1, FPN_CH, NUM_ANCHOR * 2)
    rpn_loc_w = conv_w(1, 1, FPN_CH, NUM_ANCHOR * 4)
    rpn_head = jnp.concatenate([rpn_cls_w, rpn_loc_w], axis=1)
    p['rpn_head_w'] = pad_cols(rpn_head, LANE).astype(jnp.bfloat16)
    p['rpn_head_b'] = jnp.zeros((1, LANE), jnp.float32)
    # cascade fast heads (fc1, fc2, merged [cls(4) | loc(16)] padded to 128)
    for s in range(3):
        pre = 'fast%d' % s
        lin_p(pre + '_fc1', FPN_CH * 7 * 7, FAST_HIDDEN)
        lin_p(pre + '_fc2', FAST_HIDDEN, FAST_HIDDEN)
        cls_w = lin_w(FAST_HIDDEN, NUM_CLS)
        loc_w = lin_w(FAST_HIDDEN, NUM_CLS * 4)
        hw = jnp.concatenate([cls_w, loc_w], axis=1)
        p[pre + '_head_w'] = pad_cols(hw, LANE).astype(jnp.bfloat16)
        p[pre + '_head_b'] = jnp.zeros((1, LANE), jnp.float32)
    # mask head
    for i in range(4):
        conv_p('mask_c%d' % i, 3, 3, FPN_CH, FPN_CH)
    lin_p('mask_deconv', FPN_CH, 4 * FPN_CH)
    # mask_out (C->NUM_CLS) fused behind the deconv: block-diag over the 4
    # subpixel groups, padded to 128 lanes.
    mo_w = lin_w(FPN_CH, NUM_CLS)
    mo_b = jnp.zeros((NUM_CLS,), jnp.float32)
    blk = jnp.zeros((4 * FPN_CH, 4 * NUM_CLS), jnp.float32)
    for g in range(4):
        blk = blk.at[g * FPN_CH:(g + 1) * FPN_CH,
                     g * NUM_CLS:(g + 1) * NUM_CLS].set(mo_w)
    p['mask_head_w'] = pad_cols(blk, LANE).astype(jnp.bfloat16)
    p['mask_head_b'] = jnp.pad(jnp.tile(mo_b, 4)[None, :],
                               ((0, 0), (0, LANE - 4 * NUM_CLS)))
    return p


# ------------------------------ process_im --------------------------------- #
def process_im(x, cfg):
    x = x[None]                      # (1,H,W,3)
    x = x[..., ::-1]                 # channel flip [2,1,0]  (matches reference)
    H, W = x.shape[1], x.shape[2]
    ma, mi = max(H, W), min(H, W)
    s = min(cfg.img_max / ma, cfg.img_min / mi)
    nh, nw = int(round(H * s)), int(round(W * s))
    scale = jnp.array([nw / W, nh / H, nw / W, nh / H], jnp.float32)
    x = jax.image.resize(x, (1, nh, nw, 3), method='nearest')
    return x, scale


# -------------------------------- forward ---------------------------------- #
def mask_rcnn_forward(params, cfg, anchors, x):
    x = x.astype(jnp.float32)
    x, scale = process_im(x, cfg)
    # reference order: flip -> subtract Mean -> flip again
    x = x - jnp.asarray(cfg.Mean, jnp.float32)
    x = x[..., ::-1]
    img_h, img_w = x.shape[1], x.shape[2]

    # backbone (bf16 activations between convs)
    c1 = conv2d(x, params, 'stem', k=7, stride=2, pad=3, relu=True,
                out_dtype=jnp.bfloat16)
    c1 = maxpool_3x3_s2(c1)
    c2 = conv2d(c1, params, 'l1', k=3, stride=1, pad=1, relu=True, out_dtype=jnp.bfloat16)
    c3 = conv2d(c2, params, 'l2', k=3, stride=2, pad=1, relu=True, out_dtype=jnp.bfloat16)
    c4 = conv2d(c3, params, 'l3', k=3, stride=2, pad=1, relu=True, out_dtype=jnp.bfloat16)
    c5 = conv2d(c4, params, 'l4', k=3, stride=2, pad=1, relu=True, out_dtype=jnp.bfloat16)
    C = [c2, c3, c4, c5]

    # FPN laterals + top-down
    lat = [conv2d(C[i], params, 'lat%d' % i, k=1, out_dtype=jnp.bfloat16)
           for i in range(4)]
    tops = [None] * 4
    tops[3] = lat[3]
    for i in (2, 1, 0):
        up = jnp.repeat(jnp.repeat(tops[i + 1], 2, axis=1), 2, axis=2)
        tops[i] = lat[i] + up

    # 4 fpn_out 3x3 convs batched into ONE lane-dense matmul (N = 4*32 = 128)
    cols_l, sizes = [], []
    for i in range(4):
        cols, shp = _im2col(tops[i].astype(jnp.bfloat16), 3, 3, 1, 1)
        cols_l.append(cols)
        sizes.append(shp)
    cols_fpn = jnp.concatenate(cols_l, axis=0)
    out_fpn = pallas_matmul(cols_fpn, params['fpn_out_w'], params['fpn_out_b'],
                            out_dtype=jnp.bfloat16)
    P, off = [], 0
    for i in range(4):
        n, ho, wo = sizes[i]
        m = n * ho * wo
        P.append(out_fpn[off:off + m, i * FPN_CH:(i + 1) * FPN_CH]
                 .reshape(n, ho, wo, FPN_CH))
        off += m
    pool = P[3][:, ::2, ::2, :]          # LastLevelMaxPool (k=1,s=2)
    feats_all = P + [pool]

    # RPN — all 5 levels batched; 3x3 conv + merged head fused in ONE kernel.
    cols_l = []
    for f in feats_all:
        cols, _ = _im2col(f.astype(jnp.bfloat16), 3, 3, 1, 1)
        cols_l.append(cols)
    cols_all = jnp.concatenate(cols_l, axis=0)                     # (341, 9*C)
    head = pallas_chain2(cols_all, params['rpn_conv_w'], params['rpn_conv_b'],
                         params['rpn_head_w'], params['rpn_head_b'],
                         relu_mid=True, relu_out=False, out_dtype=jnp.float32)
    rpn_logits = head[:, :NUM_ANCHOR * 2].reshape(-1, 2)
    rpn_loc = head[:, NUM_ANCHOR * 2:NUM_ANCHOR * 6].reshape(-1, 4)

    # anchors
    tanchors = []
    for i in range(5):
        H, W = feats_all[i].shape[1], feats_all[i].shape[2]
        tanchors.append(anchors[i][:H, :W].reshape(-1, 4))
    tanchors = jnp.concatenate(tanchors, axis=0)

    # ProposalCreator (simplified, fixed-size top-k)
    # TODO(synk): proposal NMS is data dependent; replaced by min-size filter + top-k.
    rpn_scores = jax.nn.softmax(rpn_logits, axis=-1)[:, 1]
    boxes = clip_boxes(loc2bbox(rpn_loc, tanchors), img_h, img_w)
    wh = boxes[:, 2:4] - boxes[:, :2]
    ok = jnp.all(wh >= cfg.roi_min_size[0], axis=-1)
    rpn_scores = jnp.where(ok, rpn_scores, -1.0)
    top = jnp.argsort(-rpn_scores)[:cfg.roi_test_post_nms]
    roi = boxes[top]
    valid = jnp.ones((roi.shape[0],), jnp.bool_)

    # padded pyramid stack for batched multi-level ROI align
    maxH, maxW = P[0].shape[1], P[0].shape[2]
    level_hw = tuple((int(p.shape[1]), int(p.shape[2])) for p in P)
    P_stack = jnp.stack(
        [jnp.pad(p[0], ((0, maxH - p.shape[1]), (0, maxW - p.shape[2]), (0, 0)))
         for p in P], axis=0).astype(jnp.bfloat16)

    # cascade heads (each stage = one fused Pallas FC-chain kernel)
    pre_bboxes = 0.0
    pre_score = 0.0
    for stage in range(3):
        feat = multiscale_roi_align(P_stack, level_hw, roi, 7)
        logits, loc = fast_net(params, 'fast%d' % stage, feat)
        loc = loc[:, 1:] * jnp.asarray(LOC_STD[stage], jnp.float32)
        boxes_s = loc2bbox(loc, roi[:, None])                    # (K,num_cls-1,4)
        score = jax.nn.softmax(logits, axis=-1)[:, 1:]
        pre_bboxes = pre_bboxes + boxes_s * CASCADE_W[stage]
        pre_score = pre_score + score * CASCADE_W[stage]
        inds = jnp.argmax(score, axis=-1)
        roi = jnp.take_along_axis(boxes_s, inds[:, None, None], axis=1)[:, 0]
        if stage < 2:
            roi, v = filter_bboxes(roi, (img_h, img_w), cfg.roi_min_size[0])
            valid = valid & v     # static-shape stand-in for boolean-mask filtering

    pre_bboxes = pre_bboxes / sum(CASCADE_W)
    pre_score = (pre_score / sum(CASCADE_W)) * valid[:, None].astype(jnp.float32)

    pre = predict(pre_bboxes, pre_score, img_h, img_w, c_thresh=0.05,
                  max_det=MAX_DET)

    roi = pre[:, :4]
    inds_b = pre[:, 5].astype(jnp.int32) + 1
    mfeat = multiscale_roi_align(P_stack, level_hw, roi, 14)
    net_mask = mask_net_fwd(params, mfeat)                       # (K,28,28,NUM_CLS)
    net_mask = jax.nn.sigmoid(net_mask)
    mask = jnp.take_along_axis(net_mask, inds_b[:, None, None, None], axis=-1)[..., 0]
    pre = jnp.concatenate([pre[:, :4] / scale, pre[:, 4:]], axis=-1)
    return pre, mask


# --------------------------------- main ------------------------------------ #
if __name__ == "__main__":
    cfg = Config()
    key = jax.random.PRNGKey(0)
    k_img, k_par = jax.random.split(key)

    params = init_params(k_par)

    anchors = []
    for i in range(5):
        stride = 4 * 2 ** i
        anchors.append(get_anchors(np.ceil(cfg.img_max / stride + 1),
                                   cfg.anchor_scales[i], cfg.anchor_ratios[i],
                                   stride=stride))

    x = jax.random.uniform(k_img, (cfg.img_max, cfg.img_max, 3),
                           jnp.float32, 0.0, 255.0)

    fwd = jax.jit(lambda p_, a_, x_: mask_rcnn_forward(p_, cfg, a_, x_))
    pre, mask = fwd(params, anchors, x)
    pre = jax.block_until_ready(pre)
    mask = jax.block_until_ready(mask)

    assert pre.shape == (MAX_DET, 6)
    assert mask.shape == (MAX_DET, 28, 28)
    assert bool(jnp.all(jnp.isfinite(pre))) and bool(jnp.all(jnp.isfinite(mask)))
    print("KERNEL_OK")
</pallas_src>

<mosaic_0001>
module attributes {stable_mosaic.version = 11 : i64} {
  func.func @_mm_kernel(%arg0: i32, %arg1: memref<512x147xbf16, #tpu.memory_space<vmem>>, %arg2: memref<147x8xbf16, #tpu.memory_space<vmem>>, %arg3: memref<1x8xf32, #tpu.memory_space<vmem>>, %arg4: memref<512x8xbf16, #tpu.memory_space<vmem>>) attributes {dimension_semantics = [#tpu.dimension_semantics<parallel>], iteration_bounds = array<i64: 2>, scalar_prefetch = 0 : i64, scratch_operands = 0 : i64, tpu.core_type = #tpu.core_type<tc>, window_params = [{transform_indices = @transform_0, window_bounds = array<i64: 512, 147>}, {pipeline_mode = #tpu.pipeline_mode<synchronous>, transform_indices = @transform_1, window_bounds = array<i64: 147, 8>}, {pipeline_mode = #tpu.pipeline_mode<synchronous>, transform_indices = @transform_2, window_bounds = array<i64: 1, 8>}, {transform_indices = @transform_3, window_bounds = array<i64: 512, 8>}]} {
    %c0 = arith.constant 0 : index
    %c0_0 = arith.constant 0 : index
    %0 = vector.load %arg1[%c0, %c0_0] : memref<512x147xbf16, #tpu.memory_space<vmem>>, vector<512x147xbf16>
    %c0_1 = arith.constant 0 : index
    %c0_2 = arith.constant 0 : index
    %1 = vector.load %arg2[%c0_1, %c0_2] : memref<147x8xbf16, #tpu.memory_space<vmem>>, vector<147x8xbf16>
    %cst = arith.constant dense<0.000000e+00> : vector<512x8xf32>
    %2 = tpu.matmul %0, %1, %cst {dimension_numbers = #tpu.dot_dimension_numbers<[1], [0], [0], [1], [0, 0, 1, 1], [], []>} : vector<512x147xbf16>, vector<147x8xbf16>, vector<512x8xf32> -> vector<512x8xf32>
    %c0_3 = arith.constant 0 : index
    %c0_4 = arith.constant 0 : index
    %3 = vector.load %arg3[%c0_3, %c0_4] : memref<1x8xf32, #tpu.memory_space<vmem>>, vector<1x8xf32>
    %4 = vector.broadcast %3 : vector<1x8xf32> to vector<512x8xf32>
    %5 = arith.addf %2, %4 : vector<512x8xf32>
    %cst_5 = arith.constant 0.000000e+00 : f32
    %6 = vector.broadcast %cst_5 : f32 to vector<512x8xf32>
    %7 = arith.maximumf %5, %6 : vector<512x8xf32>
    %8 = arith.truncf %7 : vector<512x8xf32> to vector<512x8xbf16>
    %c0_6 = arith.constant 0 : index
    %c0_7 = arith.constant 0 : index
    %9 = vector.load %arg4[%c0_6, %c0_7] : memref<512x8xbf16, #tpu.memory_space<vmem>>, vector<512x8xbf16>
    tpu.vector_store %arg4[%c0_6, %c0_7], %8 {strides = array<i32>} : memref<512x8xbf16, #tpu.memory_space<vmem>>, vector<512x8xbf16>,
    return
  }
  func.func @transform_0(%arg0: i32) -> (i32, i32) {
    %c0_i32 = arith.constant 0 : i32
    %c0_i32_0 = arith.constant 0 : i32
    return %arg0, %c0_i32 : i32, i32
  }
  func.func @transform_1(%arg0: i32) -> (i32, i32) {
    %c0_i32 = arith.constant 0 : i32
    %c0_i32_0 = arith.constant 0 : i32
    %c0_i32_1 = arith.constant 0 : i32
    return %c0_i32, %c0_i32_0 : i32, i32
  }
  func.func @transform_2(%arg0: i32) -> (i32, i32) {
    %c0_i32 = arith.constant 0 : i32
    %c0_i32_0 = arith.constant 0 : i32
    %c0_i32_1 = arith.constant 0 : i32
    return %c0_i32, %c0_i32_0 : i32, i32
  }
  func.func @transform_3(%arg0: i32) -> (i32, i32) {
    %c0_i32 = arith.constant 0 : i32
    %c0_i32_0 = arith.constant 0 : i32
    return %arg0, %c0_i32 : i32, i32
  }
}

module attributes {stable_mosaic.version = 11 : i64} {
  func.func @_mm_kernel(%arg0: i32, %arg1: memref<256x72xbf16, #tpu.memory_space<vmem>>, %arg2: memref<72x16xbf16, #tpu.memory_space<vmem>>, %arg3: memref<1x16xf32, #tpu.memory_space<vmem>>, %arg4: memref<256x16xbf16, #tpu.memory_space<vmem>>) attributes {dimension_semantics = [#tpu.dimension_semantics<parallel>], iteration_bounds = array<i64: 1>, scalar_prefetch = 0 : i64, scratch_operands = 0 : i64, tpu.core_type = #tpu.core_type<tc>, window_params = [{transform_indices = @transform_0, window_bounds = array<i64: 256, 72>}, {pipeline_mode = #tpu.pipeline_mode<synchronous>, transform_indices = @transform_1, window_bounds = array<i64: 72, 16>}, {pipeline_mode = #tpu.pipeline_mode<synchronous>, transform_indices = @transform_2, window_bounds = array<i64: 1, 16>}, {transform_indices = @transform_3, window_bounds = array<i64: 256, 16>}]} {
    %c0 = arith.constant 0 : index
    %c0_0 = arith.constant 0 : index
    %0 = vector.load %arg1[%c0, %c0_0] : memref<256x72xbf16, #tpu.memory_space<vmem>>, vector<256x72xbf16>
    %c0_1 = arith.constant 0 : index
    %c0_2 = arith.constant 0 : index
    %1 = vector.load %arg2[%c0_1, %c0_2] : memref<72x16xbf16, #tpu.memory_space<vmem>>, vector<72x16xbf16>
    %cst = arith.constant dense<0.000000e+00> : vector<256x16xf32>
    %2 = tpu.matmul %0, %1, %cst {dimension_numbers = #tpu.dot_dimension_numbers<[1], [0], [0], [1], [0, 0, 1, 1], [], []>} : vector<256x72xbf16>, vector<72x16xbf16>, vector<256x16xf32> -> vector<256x16xf32>
    %c0_3 = arith.constant 0 : index
    %c0_4 = arith.constant 0 : index
    %3 = vector.load %arg3[%c0_3, %c0_4] : memref<1x16xf32, #tpu.memory_space<vmem>>, vector<1x16xf32>
    %4 = vector.broadcast %3 : vector<1x16xf32> to vector<256x16xf32>
    %5 = arith.addf %2, %4 : vector<256x16xf32>
    %cst_5 = arith.constant 0.000000e+00 : f32
    %6 = vector.broadcast %cst_5 : f32 to vector<256x16xf32>
    %7 = arith.maximumf %5, %6 : vector<256x16xf32>
    %8 = arith.truncf %7 : vector<256x16xf32> to vector<256x16xbf16>
    %c0_6 = arith.constant 0 : index
    %c0_7 = arith.constant 0 : index
    %9 = vector.load %arg4[%c0_6, %c0_7] : memref<256x16xbf16, #tpu.memory_space<vmem>>, vector<256x16xbf16>
    tpu.vector_store %arg4[%c0_6, %c0_7], %8 {strides = array<i32>} : memref<256x16xbf16, #tpu.memory_space<vmem>>, vector<256x16xbf16>,
    return
  }
  func.func @transform_0(%arg0: i32) -> (i32, i32) {
    %c0_i32 = arith.constant 0 : i32
    %c0_i32_0 = arith.constant 0 : i32
    return %arg0, %c0_i32 : i32, i32
  }
  func.func @transform_1(%arg0: i32) -> (i32, i32) {
    %c0_i32 = arith.constant 0 : i32
    %c0_i32_0 = arith.constant 0 : i32
    %c0_i32_1 = arith.constant 0 : i32
    return %c0_i32, %c0_i32_0 : i32, i32
  }
  func.func @transform_2(%arg0: i32) -> (i32, i32) {
    %c0_i32 = arith.constant 0 : i32
    %c0_i32_0 = arith.constant 0 : i32
    %c0_i32_1 = arith.constant 0 : i32
    return %c0_i32, %c0_i32_0 : i32, i32
  }
  func.func @transform_3(%arg0: i32) -> (i32, i32) {
    %c0_i32 = arith.constant 0 : i32
    %c0_i32_0 = arith.constant 0 : i32
    return %arg0, %c0_i32 : i32, i32
  }
}

module attributes {stable_mosaic.version = 11 : i64} {
  func.func @_mm_kernel(%arg0: i32, %arg1: memref<64x144xbf16, #tpu.memory_space<vmem>>, %arg2: memref<144x32xbf16, #tpu.memory_space<vmem>>, %arg3: memref<1x32xf32, #tpu.memory_space<vmem>>, %arg4: memref<64x32xbf16, #tpu.memory_space<vmem>>) attributes {dimension_semantics = [#tpu.dimension_semantics<parallel>], iteration_bounds = array<i64: 1>, scalar_prefetch = 0 : i64, scratch_operands = 0 : i64, tpu.core_type = #tpu.core_type<tc>, window_params = [{transform_indices = @transform_0, window_bounds = array<i64: 64, 144>}, {pipeline_mode = #tpu.pipeline_mode<synchronous>, transform_indices = @transform_1, window_bounds = array<i64: 144, 32>}, {pipeline_mode = #tpu.pipeline_mode<synchronous>, transform_indices = @transform_2, window_bounds = array<i64: 1, 32>}, {transform_indices = @transform_3, window_bounds = array<i64: 64, 32>}]} {
    %c0 = arith.constant 0 : index
    %c0_0 = arith.constant 0 : index
    %0 = vector.load %arg1[%c0, %c0_0] : memref<64x144xbf16, #tpu.memory_space<vmem>>, vector<64x144xbf16>
    %c0_1 = arith.constant 0 : index
    %c0_2 = arith.constant 0 : index
    %1 = vector.load %arg2[%c0_1, %c0_2] : memref<144x32xbf16, #tpu.memory_space<vmem>>, vector<144x32xbf16>
    %cst = arith.constant dense<0.000000e+00> : vector<64x32xf32>
    %2 = tpu.matmul %0, %1, %cst {dimension_numbers = #tpu.dot_dimension_numbers<[1], [0], [0], [1], [0, 0, 1, 1], [], []>} : vector<64x144xbf16>, vector<144x32xbf16>, vector<64x32xf32> -> vector<64x32xf32>
    %c0_3 = arith.constant 0 : index
    %c0_4 = arith.constant 0 : index
    %3 = vector.load %arg3[%c0_3, %c0_4] : memref<1x32xf32, #tpu.memory_space<vmem>>, vector<1x32xf32>
    %4 = vector.broadcast %3 : vector<1x32xf32> to vector<64x32xf32>
    %5 = arith.addf %2, %4 : vector<64x32xf32>
    %cst_5 = arith.constant 0.000000e+00 : f32
    %6 = vector.broadcast %cst_5 : f32 to vector<64x32xf32>
    %7 = arith.maximumf %5, %6 : vector<64x32xf32>
    %8 = arith.truncf %7 : vector<64x32xf32> to vector<64x32xbf16>
    %c0_6 = arith.constant 0 : index
    %c0_7 = arith.constant 0 : index
    %9 = vector.load %arg4[%c0_6, %c0_7] : memref<64x32xbf16, #tpu.memory_space<vmem>>, vector<64x32xbf16>
    tpu.vector_store %arg4[%c0_6, %c0_7], %8 {strides = array<i32>} : memref<64x32xbf16, #tpu.memory_space<vmem>>, vector<64x32xbf16>,
    return
  }
  func.func @transform_0(%arg0: i32) -> (i32, i32) {
    %c0_i32 = arith.constant 0 : i32
    %c0_i32_0 = arith.constant 0 : i32
    return %arg0, %c0_i32 : i32, i32
  }
  func.func @transform_1(%arg0: i32) -> (i32, i32) {
    %c0_i32 = arith.constant 0 : i32
    %c0_i32_0 = arith.constant 0 : i32
    %c0_i32_1 = arith.constant 0 : i32
    return %c0_i32, %c0_i32_0 : i32, i32
  }
  func.func @transform_2(%arg0: i32) -> (i32, i32) {
    %c0_i32 = arith.constant 0 : i32
    %c0_i32_0 = arith.constant 0 : i32
    %c0_i32_1 = arith.constant 0 : i32
    return %c0_i32, %c0_i32_0 : i32, i32
  }
  func.func @transform_3(%arg0: i32) -> (i32, i32) {
    %c0_i32 = arith.constant 0 : i32
    %c0_i32_0 = arith.constant 0 : i32
    return %arg0, %c0_i32 : i32, i32
  }
}

module attributes {stable_mosaic.version = 11 : i64} {
  func.func @_mm_kernel(%arg0: i32, %arg1: memref<16x288xbf16, #tpu.memory_space<vmem>>, %arg2: memref<288x64xbf16, #tpu.memory_space<vmem>>, %arg3: memref<1x64xf32, #tpu.memory_space<vmem>>, %arg4: memref<16x64xbf16, #tpu.memory_space<vmem>>) attributes {dimension_semantics = [#tpu.dimension_semantics<parallel>], iteration_bounds = array<i64: 1>, scalar_prefetch = 0 : i64, scratch_operands = 0 : i64, tpu.core_type = #tpu.core_type<tc>, window_params = [{transform_indices = @transform_0, window_bounds = array<i64: 16, 288>}, {pipeline_mode = #tpu.pipeline_mode<synchronous>, transform_indices = @transform_1, window_bounds = array<i64: 288, 64>}, {pipeline_mode = #tpu.pipeline_mode<synchronous>, transform_indices = @transform_2, window_bounds = array<i64: 1, 64>}, {transform_indices = @transform_3, window_bounds = array<i64: 16, 64>}]} {
    %c0 = arith.constant 0 : index
    %c0_0 = arith.constant 0 : index
    %0 = vector.load %arg1[%c0, %c0_0] : memref<16x288xbf16, #tpu.memory_space<vmem>>, vector<16x288xbf16>
    %c0_1 = arith.constant 0 : index
    %c0_2 = arith.constant 0 : index
    %1 = vector.load %arg2[%c0_1, %c0_2] : memref<288x64xbf16, #tpu.memory_space<vmem>>, vector<288x64xbf16>
    %cst = arith.constant dense<0.000000e+00> : vector<16x64xf32>
    %2 = tpu.matmul %0, %1, %cst {dimension_numbers = #tpu.dot_dimension_numbers<[1], [0], [0], [1], [0, 0, 1, 1], [], []>} : vector<16x288xbf16>, vector<288x64xbf16>, vector<16x64xf32> -> vector<16x64xf32>
    %c0_3 = arith.constant 0 : index
    %c0_4 = arith.constant 0 : index
    %3 = vector.load %arg3[%c0_3, %c0_4] : memref<1x64xf32, #tpu.memory_space<vmem>>, vector<1x64xf32>
    %4 = vector.broadcast %3 : vector<1x64xf32> to vector<16x64xf32>
    %5 = arith.addf %2, %4 : vector<16x64xf32>
    %cst_5 = arith.constant 0.000000e+00 : f32
    %6 = vector.broadcast %cst_5 : f32 to vector<16x64xf32>
    %7 = arith.maximumf %5, %6 : vector<16x64xf32>
    %8 = arith.truncf %7 : vector<16x64xf32> to vector<16x64xbf16>
    %c0_6 = arith.constant 0 : index
    %c0_7 = arith.constant 0 : index
    %9 = vector.load %arg4[%c0_6, %c0_7] : memref<16x64xbf16, #tpu.memory_space<vmem>>, vector<16x64xbf16>
    tpu.vector_store %arg4[%c0_6, %c0_7], %8 {strides = array<i32>} : memref<16x64xbf16, #tpu.memory_space<vmem>>, vector<16x64xbf16>,
    return
  }
  func.func @transform_0(%arg0: i32) -> (i32, i32) {
    %c0_i32 = arith.constant 0 : i32
    %c0_i32_0 = arith.constant 0 : i32
    return %arg0, %c0_i32 : i32, i32
  }
  func.func @transform_1(%arg0: i32) -> (i32, i32) {
    %c0_i32 = arith.constant 0 : i32
    %c0_i32_0 = arith.constant 0 : i32
    %c0_i32_1 = arith.constant 0 : i32
    return %c0_i32, %c0_i32_0 : i32, i32
  }
  func.func @transform_2(%arg0: i32) -> (i32, i32) {
    %c0_i32 = arith.constant 0 : i32
    %c0_i32_0 = arith.constant 0 : i32
    %c0_i32_1 = arith.constant 0 : i32
    return %c0_i32, %c0_i32_0 : i32, i32
  }
  func.func @transform_3(%arg0: i32) -> (i32, i32) {
    %c0_i32 = arith.constant 0 : i32
    %c0_i32_0 = arith.constant 0 : i32
    return %arg0, %c0_i32 : i32, i32
  }
}

module attributes {stable_mosaic.version = 11 : i64} {
  func.func @_mm_kernel(%arg0: i32, %arg1: memref<4x128xbf16, #tpu.memory_space<vmem>>, %arg2: memref<128x32xbf16, #tpu.memory_space<vmem>>, %arg3: memref<1x32xf32, #tpu.memory_space<vmem>>, %arg4: memref<4x32xbf16, #tpu.memory_space<vmem>>) attributes {dimension_semantics = [#tpu.dimension_semantics<parallel>], iteration_bounds = array<i64: 1>, scalar_prefetch = 0 : i64, scratch_operands = 0 : i64, tpu.core_type = #tpu.core_type<tc>, window_params = [{transform_indices = @transform_0, window_bounds = array<i64: 4, 128>}, {pipeline_mode = #tpu.pipeline_mode<synchronous>, transform_indices = @transform_1, window_bounds = array<i64: 128, 32>}, {pipeline_mode = #tpu.pipeline_mode<synchronous>, transform_indices = @transform_2, window_bounds = array<i64: 1, 32>}, {transform_indices = @transform_3, window_bounds = array<i64: 4, 32>}]} {
    %c0 = arith.constant 0 : index
    %c0_0 = arith.constant 0 : index
    %0 = vector.load %arg1[%c0, %c0_0] : memref<4x128xbf16, #tpu.memory_space<vmem>>, vector<4x128xbf16>
    %c0_1 = arith.constant 0 : index
    %c0_2 = arith.constant 0 : index
    %1 = vector.load %arg2[%c0_1, %c0_2] : memref<128x32xbf16, #tpu.memory_space<vmem>>, vector<128x32xbf16>
    %cst = arith.constant dense<0.000000e+00> : vector<4x32xf32>
    %2 = tpu.matmul %0, %1, %cst {dimension_numbers = #tpu.dot_dimension_numbers<[1], [0], [0], [1], [0, 0, 1, 1], [], []>} : vector<4x128xbf16>, vector<128x32xbf16>, vector<4x32xf32> -> vector<4x32xf32>
    %c0_3 = arith.constant 0 : index
    %c0_4 = arith.constant 0 : index
    %3 = vector.load %arg3[%c0_3, %c0_4] : memref<1x32xf32, #tpu.memory_space<vmem>>, vector<1x32xf32>
    %4 = vector.broadcast %3 : vector<1x32xf32> to vector<4x32xf32>
    %5 = arith.addf %2, %4 : vector<4x32xf32>
    %6 = arith.truncf %5 : vector<4x32xf32> to vector<4x32xbf16>
    %c0_5 = arith.constant 0 : index
    %c0_6 = arith.constant 0 : index
    %7 = vector.load %arg4[%c0_5, %c0_6] : memref<4x32xbf16, #tpu.memory_space<vmem>>, vector<4x32xbf16>
    tpu.vector_store %arg4[%c0_5, %c0_6], %6 {strides = array<i32>} : memref<4x32xbf16, #tpu.memory_space<vmem>>, vector<4x32xbf16>,
    return
  }
  func.func @transform_0(%arg0: i32) -> (i32, i32) {
    %c0_i32 = arith.constant 0 : i32
    %c0_i32_0 = arith.constant 0 : i32
    return %arg0, %c0_i32 : i32, i32
  }
  func.func @transform_1(%arg0: i32) -> (i32, i32) {
    %c0_i32 = arith.constant 0 : i32
    %c0_i32_0 = arith.constant 0 : i32
    %c0_i32_1 = arith.constant 0 : i32
    return %c0_i32, %c0_i32_0 : i32, i32
  }
  func.func @transform_2(%arg0: i32) -> (i32, i32) {
    %c0_i32 = arith.constant 0 : i32
    %c0_i32_0 = arith.constant 0 : i32
    %c0_i32_1 = arith.constant 0 : i32
    return %c0_i32, %c0_i32_0 : i32, i32
  }
  func.func @transform_3(%arg0: i32) -> (i32, i32) {
    %c0_i32 = arith.constant 0 : i32
    %c0_i32_0 = arith.constant 0 : i32
    return %arg0, %c0_i32 : i32, i32
  }
}

module attributes {stable_mosaic.version = 11 : i64} {
  func.func @_mm_kernel(%arg0: i32, %arg1: memref<4x576xbf16, #tpu.memory_space<vmem>>, %arg2: memref<576x128xbf16, #tpu.memory_space<vmem>>, %arg3: memref<1x128xf32, #tpu.memory_space<vmem>>, %arg4: memref<4x128xbf16, #tpu.memory_space<vmem>>) attributes {dimension_semantics = [#tpu.dimension_semantics<parallel>], iteration_bounds = array<i64: 1>, scalar_prefetch = 0 : i64, scratch_operands = 0 : i64, tpu.core_type = #tpu.core_type<tc>, window_params = [{transform_indices = @transform_0, window_bounds = array<i64: 4, 576>}, {pipeline_mode = #tpu.pipeline_mode<synchronous>, transform_indices = @transform_1, window_bounds = array<i64: 576, 128>}, {pipeline_mode = #tpu.pipeline_mode<synchronous>, transform_indices = @transform_2, window_bounds = array<i64: 1, 128>}, {transform_indices = @transform_3, window_bounds = array<i64: 4, 128>}]} {
    %c0 = arith.constant 0 : index
    %c0_0 = arith.constant 0 : index
    %0 = vector.load %arg1[%c0, %c0_0] : memref<4x576xbf16, #tpu.memory_space<vmem>>, vector<4x576xbf16>
    %c0_1 = arith.constant 0 : index
    %c0_2 = arith.constant 0 : index
    %1 = vector.load %arg2[%c0_1, %c0_2] : memref<576x128xbf16, #tpu.memory_space<vmem>>, vector<576x128xbf16>
    %cst = arith.constant dense<0.000000e+00> : vector<4x128xf32>
    %2 = tpu.matmul %0, %1, %cst {dimension_numbers = #tpu.dot_dimension_numbers<[1], [0], [0], [1], [0, 0, 1, 1], [], []>} : vector<4x576xbf16>, vector<576x128xbf16>, vector<4x128xf32> -> vector<4x128xf32>
    %c0_3 = arith.constant 0 : index
    %c0_4 = arith.constant 0 : index
    %3 = vector.load %arg3[%c0_3, %c0_4] : memref<1x128xf32, #tpu.memory_space<vmem>>, vector<1x128xf32>
    %4 = vector.broadcast %3 : vector<1x128xf32> to vector<4x128xf32>
    %5 = arith.addf %2, %4 : vector<4x128xf32>
    %cst_5 = arith.constant 0.000000e+00 : f32
    %6 = vector.broadcast %cst_5 : f32 to vector<4x128xf32>
    %7 = arith.maximumf %5, %6 : vector<4x128xf32>
    %8 = arith.truncf %7 : vector<4x128xf32> to vector<4x128xbf16>
    %c0_6 = arith.constant 0 : index
    %c0_7 = arith.constant 0 : index
    %9 = vector.load %arg4[%c0_6, %c0_7] : memref<4x128xbf16, #tpu.memory_space<vmem>>, vector<4x128xbf16>
    tpu.vector_store %arg4[%c0_6, %c0_7], %8 {strides = array<i32>} : memref<4x128xbf16, #tpu.memory_space<vmem>>, vector<4x128xbf16>,
    return
  }
  func.func @transform_0(%arg0: i32) -> (i32, i32) {
    %c0_i32 = arith.constant 0 : i32
    %c0_i32_0 = arith.constant 0 : i32
    return %arg0, %c0_i32 : i32, i32
  }
  func.func @transform_1(%arg0: i32) -> (i32, i32) {
    %c0_i32 = arith.constant 0 : i32
    %c0_i32_0 = arith.constant 0 : i32
    %c0_i32_1 = arith.constant 0 : i32
    return %c0_i32, %c0_i32_0 : i32, i32
  }
  func.func @transform_2(%arg0: i32) -> (i32, i32) {
    %c0_i32 = arith.constant 0 : i32
    %c0_i32_0 = arith.constant 0 : i32
    %c0_i32_1 = arith.constant 0 : i32
    return %c0_i32, %c0_i32_0 : i32, i32
  }
  func.func @transform_3(%arg0: i32) -> (i32, i32) {
    %c0_i32 = arith.constant 0 : i32
    %c0_i32_0 = arith.constant 0 : i32
    return %arg0, %c0_i32 : i32, i32
  }
}

module attributes {stable_mosaic.version = 11 : i64} {
  func.func @_mm_kernel(%arg0: i32, %arg1: memref<16x64xbf16, #tpu.memory_space<vmem>>, %arg2: memref<64x32xbf16, #tpu.memory_space<vmem>>, %arg3: memref<1x32xf32, #tpu.memory_space<vmem>>, %arg4: memref<16x32xbf16, #tpu.memory_space<vmem>>) attributes {dimension_semantics = [#tpu.dimension_semantics<parallel>], iteration_bounds = array<i64: 1>, scalar_prefetch = 0 : i64, scratch_operands = 0 : i64, tpu.core_type = #tpu.core_type<tc>, window_params = [{transform_indices = @transform_0, window_bounds = array<i64: 16, 64>}, {pipeline_mode = #tpu.pipeline_mode<synchronous>, transform_indices = @transform_1, window_bounds = array<i64: 64, 32>}, {pipeline_mode = #tpu.pipeline_mode<synchronous>, transform_indices = @transform_2, window_bounds = array<i64: 1, 32>}, {transform_indices = @transform_3, window_bounds = array<i64: 16, 32>}]} {
    %c0 = arith.constant 0 : index
    %c0_0 = arith.constant 0 : index
    %0 = vector.load %arg1[%c0, %c0_0] : memref<16x64xbf16, #tpu.memory_space<vmem>>, vector<16x64xbf16>
    %c0_1 = arith.constant 0 : index
    %c0_2 = arith.constant 0 : index
    %1 = vector.load %arg2[%c0_1, %c0_2] : memref<64x32xbf16, #tpu.memory_space<vmem>>, vector<64x32xbf16>
    %cst = arith.constant dense<0.000000e+00> : vector<16x32xf32>
    %2 = tpu.matmul %0, %1, %cst {dimension_numbers = #tpu.dot_dimension_numbers<[1], [0], [0], [1], [0, 0, 1, 1], [], []>} : vector<16x64xbf16>, vector<64x32xbf16>, vector<16x32xf32> -> vector<16x32xf32>
    %c0_3 = arith.constant 0 : index
    %c0_4 = arith.constant 0 : index
    %3 = vector.load %arg3[%c0_3, %c0_4] : memref<1x32xf32, #tpu.memory_space<vmem>>, vector<1x32xf32>
    %4 = vector.broadcast %3 : vector<1x32xf32> to vector<16x32xf32>
    %5 = arith.addf %2, %4 : vector<16x32xf32>
    %6 = arith.truncf %5 : vector<16x32xf32> to vector<16x32xbf16>
    %c0_5 = arith.constant 0 : index
    %c0_6 = arith.constant 0 : index
    %7 = vector.load %arg4[%c0_5, %c0_6] : memref<16x32xbf16, #tpu.memory_space<vmem>>, vector<16x32xbf16>
    tpu.vector_store %arg4[%c0_5, %c0_6], %6 {strides = array<i32>} : memref<16x32xbf16, #tpu.memory_space<vmem>>, vector<16x32xbf16>,
    return
  }
  func.func @transform_0(%arg0: i32) -> (i32, i32) {
    %c0_i32 = arith.constant 0 : i32
    %c0_i32_0 = arith.constant 0 : i32
    return %arg0, %c0_i32 : i32, i32
  }
  func.func @transform_1(%arg0: i32) -> (i32, i32) {
    %c0_i32 = arith.constant 0 : i32
    %c0_i32_0 = arith.constant 0 : i32
    %c0_i32_1 = arith.constant 0 : i32
    return %c0_i32, %c0_i32_0 : i32, i32
  }
  func.func @transform_2(%arg0: i32) -> (i32, i32) {
    %c0_i32 = arith.constant 0 : i32
    %c0_i32_0 = arith.constant 0 : i32
    %c0_i32_1 = arith.constant 0 : i32
    return %c0_i32, %c0_i32_0 : i32, i32
  }
  func.func @transform_3(%arg0: i32) -> (i32, i32) {
    %c0_i32 = arith.constant 0 : i32
    %c0_i32_0 = arith.constant 0 : i32
    return %arg0, %c0_i32 : i32, i32
  }
}

module attributes {stable_mosaic.version = 11 : i64} {
  func.func @_mm_kernel(%arg0: i32, %arg1: memref<64x32xbf16, #tpu.memory_space<vmem>>, %arg2: memref<32x32xbf16, #tpu.memory_space<vmem>>, %arg3: memref<1x32xf32, #tpu.memory_space<vmem>>, %arg4: memref<64x32xbf16, #tpu.memory_space<vmem>>) attributes {dimension_semantics = [#tpu.dimension_semantics<parallel>], iteration_bounds = array<i64: 1>, scalar_prefetch = 0 : i64, scratch_operands = 0 : i64, tpu.core_type = #tpu.core_type<tc>, window_params = [{transform_indices = @transform_0, window_bounds = array<i64: 64, 32>}, {pipeline_mode = #tpu.pipeline_mode<synchronous>, transform_indices = @transform_1, window_bounds = array<i64: 32, 32>}, {pipeline_mode = #tpu.pipeline_mode<synchronous>, transform_indices = @transform_2, window_bounds = array<i64: 1, 32>}, {transform_indices = @transform_3, window_bounds = array<i64: 64, 32>}]} {
    %c0 = arith.constant 0 : index
    %c0_0 = arith.constant 0 : index
    %0 = vector.load %arg1[%c0, %c0_0] : memref<64x32xbf16, #tpu.memory_space<vmem>>, vector<64x32xbf16>
    %c0_1 = arith.constant 0 : index
    %c0_2 = arith.constant 0 : index
    %1 = vector.load %arg2[%c0_1, %c0_2] : memref<32x32xbf16, #tpu.memory_space<vmem>>, vector<32x32xbf16>
    %cst = arith.constant dense<0.000000e+00> : vector<64x32xf32>
    %2 = tpu.matmul %0, %1, %cst {dimension_numbers = #tpu.dot_dimension_numbers<[1], [0], [0], [1], [0, 0, 1, 1], [], []>} : vector<64x32xbf16>, vector<32x32xbf16>, vector<64x32xf32> -> vector<64x32xf32>
    %c0_3 = arith.constant 0 : index
    %c0_4 = arith.constant 0 : index
    %3 = vector.load %arg3[%c0_3, %c0_4] : memref<1x32xf32, #tpu.memory_space<vmem>>, vector<1x32xf32>
    %4 = vector.broadcast %3 : vector<1x32xf32> to vector<64x32xf32>
    %5 = arith.addf %2, %4 : vector<64x32xf32>
    %6 = arith.truncf %5 : vector<64x32xf32> to vector<64x32xbf16>
    %c0_5 = arith.constant 0 : index
    %c0_6 = arith.constant 0 : index
    %7 = vector.load %arg4[%c0_5, %c0_6] : memref<64x32xbf16, #tpu.memory_space<vmem>>, vector<64x32xbf16>
    tpu.vector_store %arg4[%c0_5, %c0_6], %6 {strides = array<i32>} : memref<64x32xbf16, #tpu.memory_space<vmem>>, vector<64x32xbf16>,
    return
  }
  func.func @transform_0(%arg0: i32) -> (i32, i32) {
    %c0_i32 = arith.constant 0 : i32
    %c0_i32_0 = arith.constant 0 : i32
    return %arg0, %c0_i32 : i32, i32
  }
  func.func @transform_1(%arg0: i32) -> (i32, i32) {
    %c0_i32 = arith.constant 0 : i32
    %c0_i32_0 = arith.constant 0 : i32
    %c0_i32_1 = arith.constant 0 : i32
    return %c0_i32, %c0_i32_0 : i32, i32
  }
  func.func @transform_2(%arg0: i32) -> (i32, i32) {
    %c0_i32 = arith.constant 0 : i32
    %c0_i32_0 = arith.constant 0 : i32
    %c0_i32_1 = arith.constant 0 : i32
    return %c0_i32, %c0_i32_0 : i32, i32
  }
  func.func @transform_3(%arg0: i32) -> (i32, i32) {
    %c0_i32 = arith.constant 0 : i32
    %c0_i32_0 = arith.constant 0 : i32
    return %arg0, %c0_i32 : i32, i32
  }
}

module attributes {stable_mosaic.version = 11 : i64} {
  func.func @_mm_kernel(%arg0: i32, %arg1: memref<256x16xbf16, #tpu.memory_space<vmem>>, %arg2: memref<16x32xbf16, #tpu.memory_space<vmem>>, %arg3: memref<1x32xf32, #tpu.memory_space<vmem>>, %arg4: memref<256x32xbf16, #tpu.memory_space<vmem>>) attributes {dimension_semantics = [#tpu.dimension_semantics<parallel>], iteration_bounds = array<i64: 1>, scalar_prefetch = 0 : i64, scratch_operands = 0 : i64, tpu.core_type = #tpu.core_type<tc>, window_params = [{transform_indices = @transform_0, window_bounds = array<i64: 256, 16>}, {pipeline_mode = #tpu.pipeline_mode<synchronous>, transform_indices = @transform_1, window_bounds = array<i64: 16, 32>}, {pipeline_mode = #tpu.pipeline_mode<synchronous>, transform_indices = @transform_2, window_bounds = array<i64: 1, 32>}, {transform_indices = @transform_3, window_bounds = array<i64: 256, 32>}]} {
    %c0 = arith.constant 0 : index
    %c0_0 = arith.constant 0 : index
    %0 = vector.load %arg1[%c0, %c0_0] : memref<256x16xbf16, #tpu.memory_space<vmem>>, vector<256x16xbf16>
    %c0_1 = arith.constant 0 : index
    %c0_2 = arith.constant 0 : index
    %1 = vector.load %arg2[%c0_1, %c0_2] : memref<16x32xbf16, #tpu.memory_space<vmem>>, vector<16x32xbf16>
    %cst = arith.constant dense<0.000000e+00> : vector<256x32xf32>
    %2 = tpu.matmul %0, %1, %cst {dimension_numbers = #tpu.dot_dimension_numbers<[1], [0], [0], [1], [0, 0, 1, 1], [], []>} : vector<256x16xbf16>, vector<16x32xbf16>, vector<256x32xf32> -> vector<256x32xf32>
    %c0_3 = arith.constant 0 : index
    %c0_4 = arith.constant 0 : index
    %3 = vector.load %arg3[%c0_3, %c0_4] : memref<1x32xf32, #tpu.memory_space<vmem>>, vector<1x32xf32>
    %4 = vector.broadcast %3 : vector<1x32xf32> to vector<256x32xf32>
    %5 = arith.addf %2, %4 : vector<256x32xf32>
    %6 = arith.truncf %5 : vector<256x32xf32> to vector<256x32xbf16>
    %c0_5 = arith.constant 0 : index
    %c0_6 = arith.constant 0 : index
    %7 = vector.load %arg4[%c0_5, %c0_6] : memref<256x32xbf16, #tpu.memory_space<vmem>>, vector<256x32xbf16>
    tpu.vector_store %arg4[%c0_5, %c0_6], %6 {strides = array<i32>} : memref<256x32xbf16, #tpu.memory_space<vmem>>, vector<256x32xbf16>,
    return
  }
  func.func @transform_0(%arg0: i32) -> (i32, i32) {
    %c0_i32 = arith.constant 0 : i32
    %c0_i32_0 = arith.constant 0 : i32
    return %arg0, %c0_i32 : i32, i32
  }
  func.func @transform_1(%arg0: i32) -> (i32, i32) {
    %c0_i32 = arith.constant 0 : i32
    %c0_i32_0 = arith.constant 0 : i32
    %c0_i32_1 = arith.constant 0 : i32
    return %c0_i32, %c0_i32_0 : i32, i32
  }
  func.func @transform_2(%arg0: i32) -> (i32, i32) {
    %c0_i32 = arith.constant 0 : i32
    %c0_i32_0 = arith.constant 0 : i32
    %c0_i32_1 = arith.constant 0 : i32
    return %c0_i32, %c0_i32_0 : i32, i32
  }
  func.func @transform_3(%arg0: i32) -> (i32, i32) {
    %c0_i32 = arith.constant 0 : i32
    %c0_i32_0 = arith.constant 0 : i32
    return %arg0, %c0_i32 : i32, i32
  }
}

module attributes {stable_mosaic.version = 11 : i64} {
  func.func @_mm_kernel(%arg0: i32, %arg1: memref<340x288xbf16, #tpu.memory_space<vmem>>, %arg2: memref<288x128xbf16, #tpu.memory_space<vmem>>, %arg3: memref<1x128xf32, #tpu.memory_space<vmem>>, %arg4: memref<340x128xbf16, #tpu.memory_space<vmem>>) attributes {dimension_semantics = [#tpu.dimension_semantics<parallel>], iteration_bounds = array<i64: 1>, scalar_prefetch = 0 : i64, scratch_operands = 0 : i64, tpu.core_type = #tpu.core_type<tc>, window_params = [{transform_indices = @transform_0, window_bounds = array<i64: 340, 288>}, {pipeline_mode = #tpu.pipeline_mode<synchronous>, transform_indices = @transform_1, window_bounds = array<i64: 288, 128>}, {pipeline_mode = #tpu.pipeline_mode<synchronous>, transform_indices = @transform_2, window_bounds = array<i64: 1, 128>}, {transform_indices = @transform_3, window_bounds = array<i64: 340, 128>}]} {
    %c0 = arith.constant 0 : index
    %c0_0 = arith.constant 0 : index
    %0 = vector.load %arg1[%c0, %c0_0] : memref<340x288xbf16, #tpu.memory_space<vmem>>, vector<340x288xbf16>
    %c0_1 = arith.constant 0 : index
    %c0_2 = arith.constant 0 : index
    %1 = vector.load %arg2[%c0_1, %c0_2] : memref<288x128xbf16, #tpu.memory_space<vmem>>, vector<288x128xbf16>
    %cst = arith.constant dense<0.000000e+00> : vector<340x128xf32>
    %2 = tpu.matmul %0, %1, %cst {dimension_numbers = #tpu.dot_dimension_numbers<[1], [0], [0], [1], [0, 0, 1, 1], [], []>} : vector<340x288xbf16>, vector<288x128xbf16>, vector<340x128xf32> -> vector<340x128xf32>
    %c0_3 = arith.constant 0 : index
    %c0_4 = arith.constant 0 : index
    %3 = vector.load %arg3[%c0_3, %c0_4] : memref<1x128xf32, #tpu.memory_space<vmem>>, vector<1x128xf32>
    %4 = vector.broadcast %3 : vector<1x128xf32> to vector<340x128xf32>
    %5 = arith.addf %2, %4 : vector<340x128xf32>
    %6 = arith.truncf %5 : vector<340x128xf32> to vector<340x128xbf16>
    %c0_5 = arith.constant 0 : index
    %c0_6 = arith.constant 0 : index
    %7 = vector.load %arg4[%c0_5, %c0_6] : memref<340x128xbf16, #tpu.memory_space<vmem>>, vector<340x128xbf16>
    tpu.vector_store %arg4[%c0_5, %c0_6], %6 {strides = array<i32>} : memref<340x128xbf16, #tpu.memory_space<vmem>>, vector<340x128xbf16>,
    return
  }
  func.func @transform_0(%arg0: i32) -> (i32, i32) {
    %c0_i32 = arith.constant 0 : i32
    %c0_i32_0 = arith.constant 0 : i32
    return %arg0, %c0_i32 : i32, i32
  }
  func.func @transform_1(%arg0: i32) -> (i32, i32) {
    %c0_i32 = arith.constant 0 : i32
    %c0_i32_0 = arith.constant 0 : i32
    %c0_i32_1 = arith.constant 0 : i32
    return %c0_i32, %c0_i32_0 : i32, i32
  }
  func.func @transform_2(%arg0: i32) -> (i32, i32) {
    %c0_i32 = arith.constant 0 : i32
    %c0_i32_0 = arith.constant 0 : i32
    %c0_i32_1 = arith.constant 0 : i32
    return %c0_i32, %c0_i32_0 : i32, i32
  }
  func.func @transform_3(%arg0: i32) -> (i32, i32) {
    %c0_i32 = arith.constant 0 : i32
    %c0_i32_0 = arith.constant 0 : i32
    return %arg0, %c0_i32 : i32, i32
  }
}

module attributes {stable_mosaic.version = 11 : i64} {
  func.func @_chain2_kernel(%arg0: i32, %arg1: memref<341x288xbf16, #tpu.memory_space<vmem>>, %arg2: memref<288x32xbf16, #tpu.memory_space<vmem>>, %arg3: memref<1x32xf32, #tpu.memory_space<vmem>>, %arg4: memref<32x128xbf16, #tpu.memory_space<vmem>>, %arg5: memref<1x128xf32, #tpu.memory_space<vmem>>, %arg6: memref<341x128xf32, #tpu.memory_space<vmem>>) attributes {dimension_semantics = [#tpu.dimension_semantics<parallel>], iteration_bounds = array<i64: 1>, scalar_prefetch = 0 : i64, scratch_operands = 0 : i64, tpu.core_type = #tpu.core_type<tc>, window_params = [{transform_indices = @transform_0, window_bounds = array<i64: 341, 288>}, {pipeline_mode = #tpu.pipeline_mode<synchronous>, transform_indices = @transform_1, window_bounds = array<i64: 288, 32>}, {pipeline_mode = #tpu.pipeline_mode<synchronous>, transform_indices = @transform_2, window_bounds = array<i64: 1, 32>}, {pipeline_mode = #tpu.pipeline_mode<synchronous>, transform_indices = @transform_3, window_bounds = array<i64: 32, 128>}, {pipeline_mode = #tpu.pipeline_mode<synchronous>, transform_indices = @transform_4, window_bounds = array<i64: 1, 128>}, {transform_indices = @transform_5, window_bounds = array<i64: 341, 128>}]} {
    %c0 = arith.constant 0 : index
    %c0_0 = arith.constant 0 : index
    %0 = vector.load %arg1[%c0, %c0_0] : memref<341x288xbf16, #tpu.memory_space<vmem>>, vector<341x288xbf16>
    %c0_1 = arith.constant 0 : index
    %c0_2 = arith.constant 0 : index
    %1 = vector.load %arg2[%c0_1, %c0_2] : memref<288x32xbf16, #tpu.memory_space<vmem>>, vector<288x32xbf16>
    %cst = arith.constant dense<0.000000e+00> : vector<341x32xf32>
    %2 = tpu.matmul %0, %1, %cst {dimension_numbers = #tpu.dot_dimension_numbers<[1], [0], [0], [1], [0, 0, 1, 1], [], []>} : vector<341x288xbf16>, vector<288x32xbf16>, vector<341x32xf32> -> vector<341x32xf32>
    %c0_3 = arith.constant 0 : index
    %c0_4 = arith.constant 0 : index
    %3 = vector.load %arg3[%c0_3, %c0_4] : memref<1x32xf32, #tpu.memory_space<vmem>>, vector<1x32xf32>
    %4 = vector.broadcast %3 : vector<1x32xf32> to vector<341x32xf32>
    %5 = arith.addf %2, %4 : vector<341x32xf32>
    %cst_5 = arith.constant 0.000000e+00 : f32
    %6 = vector.broadcast %cst_5 : f32 to vector<341x32xf32>
    %7 = arith.maximumf %5, %6 : vector<341x32xf32>
    %8 = arith.truncf %7 : vector<341x32xf32> to vector<341x32xbf16>
    %c0_6 = arith.constant 0 : index
    %c0_7 = arith.constant 0 : index
    %9 = vector.load %arg4[%c0_6, %c0_7] : memref<32x128xbf16, #tpu.memory_space<vmem>>, vector<32x128xbf16>
    %cst_8 = arith.constant dense<0.000000e+00> : vector<341x128xf32>
    %10 = tpu.matmul %8, %9, %cst_8 {dimension_numbers = #tpu.dot_dimension_numbers<[1], [0], [0], [1], [0, 0, 1, 1], [], []>} : vector<341x32xbf16>, vector<32x128xbf16>, vector<341x128xf32> -> vector<341x128xf32>
    %c0_9 = arith.constant 0 : index
    %c0_10 = arith.constant 0 : index
    %11 = vector.load %arg5[%c0_9, %c0_10] : memref<1x128xf32, #tpu.memory_space<vmem>>, vector<1x128xf32>
    %12 = vector.broadcast %11 : vector<1x128xf32> to vector<341x128xf32>
    %13 = arith.addf %10, %12 : vector<341x128xf32>
    %c0_11 = arith.constant 0 : index
    %c0_12 = arith.constant 0 : index
    %14 = vector.load %arg6[%c0_11, %c0_12] : memref<341x128xf32, #tpu.memory_space<vmem>>, vector<341x128xf32>
    tpu.vector_store %arg6[%c0_11, %c0_12], %13 {strides = array<i32>} : memref<341x128xf32, #tpu.memory_space<vmem>>, vector<341x128xf32>,
    return
  }
  func.func @transform_0(%arg0: i32) -> (i32, i32) {
    %c0_i32 = arith.constant 0 : i32
    %c0_i32_0 = arith.constant 0 : i32
    return %arg0, %c0_i32 : i32, i32
  }
  func.func @transform_1(%arg0: i32) -> (i32, i32) {
    %c0_i32 = arith.constant 0 : i32
    %c0_i32_0 = arith.constant 0 : i32
    %c0_i32_1 = arith.constant 0 : i32
    return %c0_i32, %c0_i32_0 : i32, i32
  }
  func.func @transform_2(%arg0: i32) -> (i32, i32) {
    %c0_i32 = arith.constant 0 : i32
    %c0_i32_0 = arith.constant 0 : i32
    %c0_i32_1 = arith.constant 0 : i32
    return %c0_i32, %c0_i32_0 : i32, i32
  }
  func.func @transform_3(%arg0: i32) -> (i32, i32) {
    %c0_i32 = arith.constant 0 : i32
    %c0_i32_0 = arith.constant 0 : i32
    %c0_i32_1 = arith.constant 0 : i32
    return %c0_i32, %c0_i32_0 : i32, i32
  }
  func.func @transform_4(%arg0: i32) -> (i32, i32) {
    %c0_i32 = arith.constant 0 : i32
    %c0_i32_0 = arith.constant 0 : i32
    %c0_i32_1 = arith.constant 0 : i32
    return %c0_i32, %c0_i32_0 : i32, i32
  }
  func.func @transform_5(%arg0: i32) -> (i32, i32) {
    %c0_i32 = arith.constant 0 : i32
    %c0_i32_0 = arith.constant 0 : i32
    return %arg0, %c0_i32 : i32, i32
  }
}

module attributes {stable_mosaic.version = 11 : i64} {
  func.func @_fast_head_kernel(%arg0: i32, %arg1: memref<16x1568xbf16, #tpu.memory_space<vmem>>, %arg2: memref<1568x64xbf16, #tpu.memory_space<vmem>>, %arg3: memref<1x64xf32, #tpu.memory_space<vmem>>, %arg4: memref<64x64xbf16, #tpu.memory_space<vmem>>, %arg5: memref<1x64xf32, #tpu.memory_space<vmem>>, %arg6: memref<64x128xbf16, #tpu.memory_space<vmem>>, %arg7: memref<1x128xf32, #tpu.memory_space<vmem>>, %arg8: memref<16x128xf32, #tpu.memory_space<vmem>>) attributes {dimension_semantics = [#tpu.dimension_semantics<arbitrary>], iteration_bounds = array<i64: 1>, scalar_prefetch = 0 : i64, scratch_operands = 0 : i64, tpu.core_type = #tpu.core_type<tc>, window_params = [{pipeline_mode = #tpu.pipeline_mode<synchronous>, transform_indices = @transform_0, window_bounds = array<i64: 16, 1568>}, {pipeline_mode = #tpu.pipeline_mode<synchronous>, transform_indices = @transform_1, window_bounds = array<i64: 1568, 64>}, {pipeline_mode = #tpu.pipeline_mode<synchronous>, transform_indices = @transform_2, window_bounds = array<i64: 1, 64>}, {pipeline_mode = #tpu.pipeline_mode<synchronous>, transform_indices = @transform_3, window_bounds = array<i64: 64, 64>}, {pipeline_mode = #tpu.pipeline_mode<synchronous>, transform_indices = @transform_4, window_bounds = array<i64: 1, 64>}, {pipeline_mode = #tpu.pipeline_mode<synchronous>, transform_indices = @transform_5, window_bounds = array<i64: 64, 128>}, {pipeline_mode = #tpu.pipeline_mode<synchronous>, transform_indices = @transform_6, window_bounds = array<i64: 1, 128>}, {pipeline_mode = #tpu.pipeline_mode<synchronous>, transform_indices = @transform_7, window_bounds = array<i64: 16, 128>}]} {
    %c0 = arith.constant 0 : index
    %c0_0 = arith.constant 0 : index
    %0 = vector.load %arg1[%c0, %c0_0] : memref<16x1568xbf16, #tpu.memory_space<vmem>>, vector<16x1568xbf16>
    %c0_1 = arith.constant 0 : index
    %c0_2 = arith.constant 0 : index
    %1 = vector.load %arg2[%c0_1, %c0_2] : memref<1568x64xbf16, #tpu.memory_space<vmem>>, vector<1568x64xbf16>
    %cst = arith.constant dense<0.000000e+00> : vector<16x64xf32>
    %2 = tpu.matmul %0, %1, %cst {dimension_numbers = #tpu.dot_dimension_numbers<[1], [0], [0], [1], [0, 0, 1, 1], [], []>} : vector<16x1568xbf16>, vector<1568x64xbf16>, vector<16x64xf32> -> vector<16x64xf32>
    %c0_3 = arith.constant 0 : index
    %c0_4 = arith.constant 0 : index
    %3 = vector.load %arg3[%c0_3, %c0_4] : memref<1x64xf32, #tpu.memory_space<vmem>>, vector<1x64xf32>
    %4 = vector.broadcast %3 : vector<1x64xf32> to vector<16x64xf32>
    %5 = arith.addf %2, %4 : vector<16x64xf32>
    %cst_5 = arith.constant 0.000000e+00 : f32
    %6 = vector.broadcast %cst_5 : f32 to vector<16x64xf32>
    %7 = arith.maximumf %5, %6 : vector<16x64xf32>
    %8 = arith.truncf %7 : vector<16x64xf32> to vector<16x64xbf16>
    %c0_6 = arith.constant 0 : index
    %c0_7 = arith.constant 0 : index
    %9 = vector.load %arg4[%c0_6, %c0_7] : memref<64x64xbf16, #tpu.memory_space<vmem>>, vector<64x64xbf16>
    %cst_8 = arith.constant dense<0.000000e+00> : vector<16x64xf32>
    %10 = tpu.matmul %8, %9, %cst_8 {dimension_numbers = #tpu.dot_dimension_numbers<[1], [0], [0], [1], [0, 0, 1, 1], [], []>} : vector<16x64xbf16>, vector<64x64xbf16>, vector<16x64xf32> -> vector<16x64xf32>
    %c0_9 = arith.constant 0 : index
    %c0_10 = arith.constant 0 : index
    %11 = vector.load %arg5[%c0_9, %c0_10] : memref<1x64xf32, #tpu.memory_space<vmem>>, vector<1x64xf32>
    %12 = vector.broadcast %11 : vector<1x64xf32> to vector<16x64xf32>
    %13 = arith.addf %10, %12 : vector<16x64xf32>
    %cst_11 = arith.constant 0.000000e+00 : f32
    %14 = vector.broadcast %cst_11 : f32 to vector<16x64xf32>
    %15 = arith.maximumf %13, %14 : vector<16x64xf32>
    %16 = arith.truncf %15 : vector<16x64xf32> to vector<16x64xbf16>
    %c0_12 = arith.constant 0 : index
    %c0_13 = arith.constant 0 : index
    %17 = vector.load %arg6[%c0_12, %c0_13] : memref<64x128xbf16, #tpu.memory_space<vmem>>, vector<64x128xbf16>
    %cst_14 = arith.constant dense<0.000000e+00> : vector<16x128xf32>
    %18 = tpu.matmul %16, %17, %cst_14 {dimension_numbers = #tpu.dot_dimension_numbers<[1], [0], [0], [1], [0, 0, 1, 1], [], []>} : vector<16x64xbf16>, vector<64x128xbf16>, vector<16x128xf32> -> vector<16x128xf32>
    %c0_15 = arith.constant 0 : index
    %c0_16 = arith.constant 0 : index
    %19 = vector.load %arg7[%c0_15, %c0_16] : memref<1x128xf32, #tpu.memory_space<vmem>>, vector<1x128xf32>
    %20 = vector.broadcast %19 : vector<1x128xf32> to vector<16x128xf32>
    %21 = arith.addf %18, %20 : vector<16x128xf32>
    %c0_17 = arith.constant 0 : index
    %c0_18 = arith.constant 0 : index
    %22 = vector.load %arg8[%c0_17, %c0_18] : memref<16x128xf32, #tpu.memory_space<vmem>>, vector<16x128xf32>
    tpu.vector_store %arg8[%c0_17, %c0_18], %21 {strides = array<i32>} : memref<16x128xf32, #tpu.memory_space<vmem>>, vector<16x128xf32>,
    return
  }
  func.func @transform_0(%arg0: i32) -> (i32, i32) {
    %c0_i32 = arith.constant 0 : i32
    %c0_i32_0 = arith.constant 0 : i32
    %c0_i32_1 = arith.constant 0 : i32
    return %c0_i32, %c0_i32_0 : i32, i32
  }
  func.func @transform_1(%arg0: i32) -> (i32, i32) {
    %c0_i32 = arith.constant 0 : i32
    %c0_i32_0 = arith.constant 0 : i32
    %c0_i32_1 = arith.constant 0 : i32
    return %c0_i32, %c0_i32_0 : i32, i32
  }
  func.func @transform_2(%arg0: i32) -> (i32, i32) {
    %c0_i32 = arith.constant 0 : i32
    %c0_i32_0 = arith.constant 0 : i32
    %c0_i32_1 = arith.constant 0 : i32
    return %c0_i32, %c0_i32_0 : i32, i32
  }
  func.func @transform_3(%arg0: i32) -> (i32, i32) {
    %c0_i32 = arith.constant 0 : i32
    %c0_i32_0 = arith.constant 0 : i32
    %c0_i32_1 = arith.constant 0 : i32
    return %c0_i32, %c0_i32_0 : i32, i32
  }
  func.func @transform_4(%arg0: i32) -> (i32, i32) {
    %c0_i32 = arith.constant 0 : i32
    %c0_i32_0 = arith.constant 0 : i32
    %c0_i32_1 = arith.constant 0 : i32
    return %c0_i32, %c0_i32_0 : i32, i32
  }
  func.func @transform_5(%arg0: i32) -> (i32, i32) {
    %c0_i32 = arith.constant 0 : i32
    %c0_i32_0 = arith.constant 0 : i32
    %c0_i32_1 = arith.constant 0 : i32
    return %c0_i32, %c0_i32_0 : i32, i32
  }
  func.func @transform_6(%arg0: i32) -> (i32, i32) {
    %c0_i32 = arith.constant 0 : i32
    %c0_i32_0 = arith.constant 0 : i32
    %c0_i32_1 = arith.constant 0 : i32
    return %c0_i32, %c0_i32_0 : i32, i32
  }
  func.func @transform_7(%arg0: i32) -> (i32, i32) {
    %c0_i32 = arith.constant 0 : i32
    %c0_i32_0 = arith.constant 0 : i32
    %c0_i32_1 = arith.constant 0 : i32
    return %c0_i32, %c0_i32_0 : i32, i32
  }
}

module attributes {stable_mosaic.version = 11 : i64} {
  func.func @_mm_kernel(%arg0: i32, %arg1: memref<512x288xbf16, #tpu.memory_space<vmem>>, %arg2: memref<288x32xbf16, #tpu.memory_space<vmem>>, %arg3: memref<1x32xf32, #tpu.memory_space<vmem>>, %arg4: memref<512x32xbf16, #tpu.memory_space<vmem>>) attributes {dimension_semantics = [#tpu.dimension_semantics<parallel>], iteration_bounds = array<i64: 4>, scalar_prefetch = 0 : i64, scratch_operands = 0 : i64, tpu.core_type = #tpu.core_type<tc>, window_params = [{transform_indices = @transform_0, window_bounds = array<i64: 512, 288>}, {pipeline_mode = #tpu.pipeline_mode<synchronous>, transform_indices = @transform_1, window_bounds = array<i64: 288, 32>}, {pipeline_mode = #tpu.pipeline_mode<synchronous>, transform_indices = @transform_2, window_bounds = array<i64: 1, 32>}, {transform_indices = @transform_3, window_bounds = array<i64: 512, 32>}]} {
    %c0 = arith.constant 0 : index
    %c0_0 = arith.constant 0 : index
    %0 = vector.load %arg1[%c0, %c0_0] : memref<512x288xbf16, #tpu.memory_space<vmem>>, vector<512x288xbf16>
    %c0_1 = arith.constant 0 : index
    %c0_2 = arith.constant 0 : index
    %1 = vector.load %arg2[%c0_1, %c0_2] : memref<288x32xbf16, #tpu.memory_space<vmem>>, vector<288x32xbf16>
    %cst = arith.constant dense<0.000000e+00> : vector<512x32xf32>
    %2 = tpu.matmul %0, %1, %cst {dimension_numbers = #tpu.dot_dimension_numbers<[1], [0], [0], [1], [0, 0, 1, 1], [], []>} : vector<512x288xbf16>, vector<288x32xbf16>, vector<512x32xf32> -> vector<512x32xf32>
    %c0_3 = arith.constant 0 : index
    %c0_4 = arith.constant 0 : index
    %3 = vector.load %arg3[%c0_3, %c0_4] : memref<1x32xf32, #tpu.memory_space<vmem>>, vector<1x32xf32>
    %4 = vector.broadcast %3 : vector<1x32xf32> to vector<512x32xf32>
    %5 = arith.addf %2, %4 : vector<512x32xf32>
    %cst_5 = arith.constant 0.000000e+00 : f32
    %6 = vector.broadcast %cst_5 : f32 to vector<512x32xf32>
    %7 = arith.maximumf %5, %6 : vector<512x32xf32>
    %8 = arith.truncf %7 : vector<512x32xf32> to vector<512x32xbf16>
    %c0_6 = arith.constant 0 : index
    %c0_7 = arith.constant 0 : index
    %9 = vector.load %arg4[%c0_6, %c0_7] : memref<512x32xbf16, #tpu.memory_space<vmem>>, vector<512x32xbf16>
    tpu.vector_store %arg4[%c0_6, %c0_7], %8 {strides = array<i32>} : memref<512x32xbf16, #tpu.memory_space<vmem>>, vector<512x32xbf16>,
    return
  }
  func.func @transform_0(%arg0: i32) -> (i32, i32) {
    %c0_i32 = arith.constant 0 : i32
    %c0_i32_0 = arith.constant 0 : i32
    return %arg0, %c0_i32 : i32, i32
  }
  func.func @transform_1(%arg0: i32) -> (i32, i32) {
    %c0_i32 = arith.constant 0 : i32
    %c0_i32_0 = arith.constant 0 : i32
    %c0_i32_1 = arith.constant 0 : i32
    return %c0_i32, %c0_i32_0 : i32, i32
  }
  func.func @transform_2(%arg0: i32) -> (i32, i32) {
    %c0_i32 = arith.constant 0 : i32
    %c0_i32_0 = arith.constant 0 : i32
    %c0_i32_1 = arith.constant 0 : i32
    return %c0_i32, %c0_i32_0 : i32, i32
  }
  func.func @transform_3(%arg0: i32) -> (i32, i32) {
    %c0_i32 = arith.constant 0 : i32
    %c0_i32_0 = arith.constant 0 : i32
    return %arg0, %c0_i32 : i32, i32
  }
}

module attributes {stable_mosaic.version = 11 : i64} {
  func.func @_chain2_kernel(%arg0: i32, %arg1: memref<512x32xbf16, #tpu.memory_space<vmem>>, %arg2: memref<32x128xbf16, #tpu.memory_space<vmem>>, %arg3: memref<1x128xf32, #tpu.memory_space<vmem>>, %arg4: memref<128x128xbf16, #tpu.memory_space<vmem>>, %arg5: memref<1x128xf32, #tpu.memory_space<vmem>>, %arg6: memref<512x128xf32, #tpu.memory_space<vmem>>) attributes {dimension_semantics = [#tpu.dimension_semantics<parallel>], iteration_bounds = array<i64: 4>, scalar_prefetch = 0 : i64, scratch_operands = 0 : i64, tpu.core_type = #tpu.core_type<tc>, window_params = [{transform_indices = @transform_0, window_bounds = array<i64: 512, 32>}, {pipeline_mode = #tpu.pipeline_mode<synchronous>, transform_indices = @transform_1, window_bounds = array<i64: 32, 128>}, {pipeline_mode = #tpu.pipeline_mode<synchronous>, transform_indices = @transform_2, window_bounds = array<i64: 1, 128>}, {pipeline_mode = #tpu.pipeline_mode<synchronous>, transform_indices = @transform_3, window_bounds = array<i64: 128, 128>}, {pipeline_mode = #tpu.pipeline_mode<synchronous>, transform_indices = @transform_4, window_bounds = array<i64: 1, 128>}, {transform_indices = @transform_5, window_bounds = array<i64: 512, 128>}]} {
    %c0 = arith.constant 0 : index
    %c0_0 = arith.constant 0 : index
    %0 = vector.load %arg1[%c0, %c0_0] : memref<512x32xbf16, #tpu.memory_space<vmem>>, vector<512x32xbf16>
    %c0_1 = arith.constant 0 : index
    %c0_2 = arith.constant 0 : index
    %1 = vector.load %arg2[%c0_1, %c0_2] : memref<32x128xbf16, #tpu.memory_space<vmem>>, vector<32x128xbf16>
    %cst = arith.constant dense<0.000000e+00> : vector<512x128xf32>
    %2 = tpu.matmul %0, %1, %cst {dimension_numbers = #tpu.dot_dimension_numbers<[1], [0], [0], [1], [0, 0, 1, 1], [], []>} : vector<512x32xbf16>, vector<32x128xbf16>, vector<512x128xf32> -> vector<512x128xf32>
    %c0_3 = arith.constant 0 : index
    %c0_4 = arith.constant 0 : index
    %3 = vector.load %arg3[%c0_3, %c0_4] : memref<1x128xf32, #tpu.memory_space<vmem>>, vector<1x128xf32>
    %4 = vector.broadcast %3 : vector<1x128xf32> to vector<512x128xf32>
    %5 = arith.addf %2, %4 : vector<512x128xf32>
    %cst_5 = arith.constant 0.000000e+00 : f32
    %6 = vector.broadcast %cst_5 : f32 to vector<512x128xf32>
    %7 = arith.maximumf %5, %6 : vector<512x128xf32>
    %8 = arith.truncf %7 : vector<512x128xf32> to vector<512x128xbf16>
    %c0_6 = arith.constant 0 : index
    %c0_7 = arith.constant 0 : index
    %9 = vector.load %arg4[%c0_6, %c0_7] : memref<128x128xbf16, #tpu.memory_space<vmem>>, vector<128x128xbf16>
    %cst_8 = arith.constant dense<0.000000e+00> : vector<512x128xf32>
    %10 = tpu.matmul %8, %9, %cst_8 {dimension_numbers = #tpu.dot_dimension_numbers<[1], [0], [0], [1], [0, 0, 1, 1], [], []>} : vector<512x128xbf16>, vector<128x128xbf16>, vector<512x128xf32> -> vector<512x128xf32>
    %c0_9 = arith.constant 0 : index
    %c0_10 = arith.constant 0 : index
    %11 = vector.load %arg5[%c0_9, %c0_10] : memref<1x128xf32, #tpu.memory_space<vmem>>, vector<1x128xf32>
    %12 = vector.broadcast %11 : vector<1x128xf32> to vector<512x128xf32>
    %13 = arith.addf %10, %12 : vector<512x128xf32>
    %c0_11 = arith.constant 0 : index
    %c0_12 = arith.constant 0 : index
    %14 = vector.load %arg6[%c0_11, %c0_12] : memref<512x128xf32, #tpu.memory_space<vmem>>, vector<512x128xf32>
    tpu.vector_store %arg6[%c0_11, %c0_12], %13 {strides = array<i32>} : memref<512x128xf32, #tpu.memory_space<vmem>>, vector<512x128xf32>,
    return
  }
  func.func @transform_0(%arg0: i32) -> (i32, i32) {
    %c0_i32 = arith.constant 0 : i32
    %c0_i32_0 = arith.constant 0 : i32
    return %arg0, %c0_i32 : i32, i32
  }
  func.func @transform_1(%arg0: i32) -> (i32, i32) {
    %c0_i32 = arith.constant 0 : i32
    %c0_i32_0 = arith.constant 0 : i32
    %c0_i32_1 = arith.constant 0 : i32
    return %c0_i32, %c0_i32_0 : i32, i32
  }
  func.func @transform_2(%arg0: i32) -> (i32, i32) {
    %c0_i32 = arith.constant 0 : i32
    %c0_i32_0 = arith.constant 0 : i32
    %c0_i32_1 = arith.constant 0 : i32
    return %c0_i32, %c0_i32_0 : i32, i32
  }
  func.func @transform_3(%arg0: i32) -> (i32, i32) {
    %c0_i32 = arith.constant 0 : i32
    %c0_i32_0 = arith.constant 0 : i32
    %c0_i32_1 = arith.constant 0 : i32
    return %c0_i32, %c0_i32_0 : i32, i32
  }
  func.func @transform_4(%arg0: i32) -> (i32, i32) {
    %c0_i32 = arith.constant 0 : i32
    %c0_i32_0 = arith.constant 0 : i32
    %c0_i32_1 = arith.constant 0 : i32
    return %c0_i32, %c0_i32_0 : i32, i32
  }
  func.func @transform_5(%arg0: i32) -> (i32, i32) {
    %c0_i32 = arith.constant 0 : i32
    %c0_i32_0 = arith.constant 0 : i32
    return %arg0, %c0_i32 : i32, i32
  }
}

</mosaic_0001>

<bundles_post_ra>
// kernel: reverse
= control target key start
LH: loop header
LB: loop body
LE: loop exit
PB: predicated region body
PF: predicated region fallthrough
CT: control target
= control target key end

     0   :  { %v2_v0 = vlaneseq  ;;  %s3106_s0 = inlined_call_operand.vmem [shape: f32[64,64,3], index: 0, kind: input, shape index: {}]   ;;  %s3107_s1 = inlined_call_operand.vmem [shape: f32[64,64,3], index: 1, kind: output, shape index: {}]  }
   0x2   :  { %v2540_v1 = vsub.s32 2, %v2_v0 }
   0x4   :  { %4 = vset.pattern.permute.xlu0 %v2540_v1 }
   0x5   :  { %s2543_s6 = smov 0   ;;  %s2545_s7 = smov 0  }
   0x6   :  { %s2547_s8 = smov 0  }
   0x7 LB: > { %s2207_s9 = sadd.s32 4294967295, %s2528_s8   ;;  %s29_s10 = sadd.s32 1, %s2524_s7  ;;  %s2528_s8 = sphi %s2547_s8, %s10_s8   ;;  %s2524_s7 = sphi %s2545_s7, %s3109_s7   ;;  %s2520_s6 = sphi %s2543_s6, %s3108_s6  }
   0x8   : > { %p31_p0 = scmp.ge.s32.totalorder %s29_s10, 4  ;;  %p2209_p1 = scmp.ge.s32.totalorder %s2528_s8, 4 }
   0x9   : > { %s45_s11 = sand.u32 (!%p2209_p1), 1, %s2528_s8   ;;  %s2478_s12 = sshll.u32 (!%p2209_p1), %s2524_s7, 10 }
   0xa   : > { %s3111_s10 = smov (%p31_p0, %s29_s10), 0  ;;  %43 = sbr.rel (%p2209_p1) target bundleno = 80 (0x50), region = 16 }
   0xb   : > { %s2210_s13 = sshll.u32 (!%p2209_p1), %s45_s11, 10  ;;  %s2568_s16 = scalar_lea.vmem (!%p2209_p1), %s3106_s0, %s2478_s12 }
   0xc   : > { %s2573_s17 = scalar_lea.vmem (!%p2209_p1), [#allocation0], %s2210_s13 }
   0xf   : > { %v338_v2 = vld [vmem:[%s2568_s16] sm:$0xff]  ;;  %v340_v3 = vld [vmem:[%s2568_s16 + $0x8] sm:$0xff]  ;;  %v342_v4 = vld [vmem:[%s2568_s16 + $0x10] sm:$0xff] }
  0x10   : > { %339 = vst [vmem:[%s2573_s17] sm:$0xff] %v338_v2  ;;  %341 = vst [vmem:[%s2573_s17 + $0x8] sm:$0xff] %v340_v3  ;;  %v344_v5 = vld [vmem:[%s2568_s16 + $0x18] sm:$0xff]  ;;  %v346_v6 = vld [vmem:[%s2568_s16 + $0x20] sm:$0xff] }
  0x11   : > { %343 = vst [vmem:[%s2573_s17 + $0x10] sm:$0xff] %v342_v4  ;;  %v348_v7 = vld [vmem:[%s2568_s16 + $0x28] sm:$0xff]  ;;  %345 = vst [vmem:[%s2573_s17 + $0x18] sm:$0xff] %v344_v5  ;;  %v350_v8 = vld [vmem:[%s2568_s16 + $0x30] sm:$0xff] }
  0x12   : > { %347 = vst [vmem:[%s2573_s17 + $0x20] sm:$0xff] %v346_v6  ;;  %349 = vst [vmem:[%s2573_s17 + $0x28] sm:$0xff] %v348_v7  ;;  %v352_v9 = vld [vmem:[%s2568_s16 + $0x38] sm:$0xff]  ;;  %v354_v10 = vld [vmem:[%s2568_s16 + $0x40] sm:$0xff] }
  0x13   : > { %351 = vst [vmem:[%s2573_s17 + $0x30] sm:$0xff] %v350_v8  ;;  %353 = vst [vmem:[%s2573_s17 + $0x38] sm:$0xff] %v352_v9  ;;  %v356_v11 = vld [vmem:[%s2568_s16 + $0x48] sm:$0xff]  ;;  %v358_v12 = vld [vmem:[%s2568_s16 + $0x50] sm:$0xff] }
  0x14   : > { %355 = vst [vmem:[%s2573_s17 + $0x40] sm:$0xff] %v354_v10  ;;  %v360_v13 = vld [vmem:[%s2568_s16 + $0x58] sm:$0xff]  ;;  %357 = vst [vmem:[%s2573_s17 + $0x48] sm:$0xff] %v356_v11  ;;  %v362_v14 = vld [vmem:[%s2568_s16 + $0x60] sm:$0xff] }
  0x15   : > { %359 = vst [vmem:[%s2573_s17 + $0x50] sm:$0xff] %v358_v12  ;;  %361 = vst [vmem:[%s2573_s17 + $0x58] sm:$0xff] %v360_v13  ;;  %v364_v15 = vld [vmem:[%s2568_s16 + $0x68] sm:$0xff]  ;;  %v366_v16 = vld [vmem:[%s2568_s16 + $0x70] sm:$0xff] }
  0x16   : > { %363 = vst [vmem:[%s2573_s17 + $0x60] sm:$0xff] %v362_v14  ;;  %365 = vst [vmem:[%s2573_s17 + $0x68] sm:$0xff] %v364_v15  ;;  %v368_v17 = vld [vmem:[%s2568_s16 + $0x78] sm:$0xff]  ;;  %v370_v18 = vld [vmem:[%s2568_s16 + $0x80] sm:$0xff] }
  0x17   : > { %367 = vst [vmem:[%s2573_s17 + $0x70] sm:$0xff] %v366_v16  ;;  %v372_v19 = vld [vmem:[%s2568_s16 + $0x88] sm:$0xff]  ;;  %369 = vst [vmem:[%s2573_s17 + $0x78] sm:$0xff] %v368_v17  ;;  %v374_v20 = vld [vmem:[%s2568_s16 + $0x90] sm:$0xff] }
  0x18   : > { %371 = vst [vmem:[%s2573_s17 + $0x80] sm:$0xff] %v370_v18  ;;  %373 = vst [vmem:[%s2573_s17 + $0x88] sm:$0xff] %v372_v19  ;;  %v376_v21 = vld [vmem:[%s2568_s16 + $0x98] sm:$0xff]  ;;  %v378_v22 = vld [vmem:[%s2568_s16 + $0xa0] sm:$0xff] }
  0x19   : > { %375 = vst [vmem:[%s2573_s17 + $0x90] sm:$0xff] %v374_v20  ;;  %377 = vst [vmem:[%s2573_s17 + $0x98] sm:$0xff] %v376_v21  ;;  %v380_v23 = vld [vmem:[%s2568_s16 + $0xa8] sm:$0xff]  ;;  %v382_v24 = vld [vmem:[%s2568_s16 + $0xb0] sm:$0xff] }
  0x1a   : > { %379 = vst [vmem:[%s2573_s17 + $0xa0] sm:$0xff] %v378_v22  ;;  %v384_v25 = vld [vmem:[%s2568_s16 + $0xb8] sm:$0xff]  ;;  %381 = vst [vmem:[%s2573_s17 + $0xa8] sm:$0xff] %v380_v23  ;;  %v386_v26 = vld [vmem:[%s2568_s16 + $0xc0] sm:$0xff] }
  0x1b   : > { %383 = vst [vmem:[%s2573_s17 + $0xb0] sm:$0xff] %v382_v24  ;;  %385 = vst [vmem:[%s2573_s17 + $0xb8] sm:$0xff] %v384_v25  ;;  %v388_v27 = vld [vmem:[%s2568_s16 + $0xc8] sm:$0xff]  ;;  %v390_v28 = vld [vmem:[%s2568_s16 + $0xd0] sm:$0xff] }
  0x1c   : > { %387 = vst [vmem:[%s2573_s17 + $0xc0] sm:$0xff] %v386_v26  ;;  %389 = vst [vmem:[%s2573_s17 + $0xc8] sm:$0xff] %v388_v27  ;;  %v392_v29 = vld [vmem:[%s2568_s16 + $0xd8] sm:$0xff]  ;;  %v394_v30 = vld [vmem:[%s2568_s16 + $0xe0] sm:$0xff] }
  0x1d   : > { %391 = vst [vmem:[%s2573_s17 + $0xd0] sm:$0xff] %v390_v28  ;;  %v396_v31 = vld [vmem:[%s2568_s16 + $0xe8] sm:$0xff]  ;;  %393 = vst [vmem:[%s2573_s17 + $0xd8] sm:$0xff] %v392_v29  ;;  %v398_v32 = vld [vmem:[%s2568_s16 + $0xf0] sm:$0xff] }
  0x1e   : > { %395 = vst [vmem:[%s2573_s17 + $0xe0] sm:$0xff] %v394_v30  ;;  %397 = vst [vmem:[%s2573_s17 + $0xe8] sm:$0xff] %v396_v31  ;;  %v400_v33 = vld [vmem:[%s2568_s16 + $0xf8] sm:$0xff]  ;;  %v402_v34 = vld [vmem:[%s2568_s16 + $0x100] sm:$0xff] }
  0x1f   : > { %399 = vst [vmem:[%s2573_s17 + $0xf0] sm:$0xff] %v398_v32  ;;  %401 = vst [vmem:[%s2573_s17 + $0xf8] sm:$0xff] %v400_v33  ;;  %v404_v35 = vld [vmem:[%s2568_s16 + $0x108] sm:$0xff]  ;;  %v406_v36 = vld [vmem:[%s2568_s16 + $0x110] sm:$0xff] }
  0x20   : > { %403 = vst [vmem:[%s2573_s17 + $0x100] sm:$0xff] %v402_v34  ;;  %v408_v37 = vld [vmem:[%s2568_s16 + $0x118] sm:$0xff]  ;;  %405 = vst [vmem:[%s2573_s17 + $0x108] sm:$0xff] %v404_v35  ;;  %v410_v38 = vld [vmem:[%s2568_s16 + $0x120] sm:$0xff] }
  0x21   : > { %407 = vst [vmem:[%s2573_s17 + $0x110] sm:$0xff] %v406_v36  ;;  %409 = vst [vmem:[%s2573_s17 + $0x118] sm:$0xff] %v408_v37  ;;  %v412_v39 = vld [vmem:[%s2568_s16 + $0x128] sm:$0xff]  ;;  %v414_v40 = vld [vmem:[%s2568_s16 + $0x130] sm:$0xff] }
  0x22   : > { %411 = vst [vmem:[%s2573_s17 + $0x120] sm:$0xff] %v410_v38  ;;  %413 = vst [vmem:[%s2573_s17 + $0x128] sm:$0xff] %v412_v39  ;;  %v416_v41 = vld [vmem:[%s2568_s16 + $0x138] sm:$0xff]  ;;  %v418_v42 = vld [vmem:[%s2568_s16 + $0x140] sm:$0xff] }
  0x23   : > { %415 = vst [vmem:[%s2573_s17 + $0x130] sm:$0xff] %v414_v40  ;;  %v420_v43 = vld [vmem:[%s2568_s16 + $0x148] sm:$0xff]  ;;  %417 = vst [vmem:[%s2573_s17 + $0x138] sm:$0xff] %v416_v41  ;;  %v422_v44 = vld [vmem:[%s2568_s16 + $0x150] sm:$0xff] }
  0x24   : > { %419 = vst [vmem:[%s2573_s17 + $0x140] sm:$0xff] %v418_v42  ;;  %421 = vst [vmem:[%s2573_s17 + $0x148] sm:$0xff] %v420_v43  ;;  %v424_v45 = vld [vmem:[%s2568_s16 + $0x158] sm:$0xff]  ;;  %v426_v46 = vld [vmem:[%s2568_s16 + $0x160] sm:$0xff] }
  0x25   : > { %423 = vst [vmem:[%s2573_s17 + $0x150] sm:$0xff] %v422_v44  ;;  %425 = vst [vmem:[%s2573_s17 + $0x158] sm:$0xff] %v424_v45  ;;  %v428_v47 = vld [vmem:[%s2568_s16 + $0x168] sm:$0xff]  ;;  %v430_v48 = vld [vmem:[%s2568_s16 + $0x170] sm:$0xff] }
  0x26   : > { %427 = vst [vmem:[%s2573_s17 + $0x160] sm:$0xff] %v426_v46  ;;  %v432_v49 = vld [vmem:[%s2568_s16 + $0x178] sm:$0xff]  ;;  %429 = vst [vmem:[%s2573_s17 + $0x168] sm:$0xff] %v428_v47  ;;  %v434_v50 = vld [vmem:[%s2568_s16 + $0x180] sm:$0xff] }
  0x27   : > { %431 = vst [vmem:[%s2573_s17 + $0x170] sm:$0xff] %v430_v48  ;;  %433 = vst [vmem:[%s2573_s17 + $0x178] sm:$0xff] %v432_v49  ;;  %v436_v51 = vld [vmem:[%s2568_s16 + $0x188] sm:$0xff]  ;;  %v438_v52 = vld [vmem:[%s2568_s16 + $0x190] sm:$0xff] }
  0x28   : > { %435 = vst [vmem:[%s2573_s17 + $0x180] sm:$0xff] %v434_v50  ;;  %437 = vst [vmem:[%s2573_s17 + $0x188] sm:$0xff] %v436_v51  ;;  %v440_v53 = vld [vmem:[%s2568_s16 + $0x198] sm:$0xff]  ;;  %v442_v54 = vld [vmem:[%s2568_s16 + $0x1a0] sm:$0xff] }
  0x29   : > { %439 = vst [vmem:[%s2573_s17 + $0x190] sm:$0xff] %v438_v52  ;;  %v444_v55 = vld [vmem:[%s2568_s16 + $0x1a8] sm:$0xff]  ;;  %441 = vst [vmem:[%s2573_s17 + $0x198] sm:$0xff] %v440_v53  ;;  %v446_v56 = vld [vmem:[%s2568_s16 + $0x1b0] sm:$0xff] }
  0x2a   : > { %443 = vst [vmem:[%s2573_s17 + $0x1a0] sm:$0xff] %v442_v54  ;;  %445 = vst [vmem:[%s2573_s17 + $0x1a8] sm:$0xff] %v444_v55  ;;  %v448_v57 = vld [vmem:[%s2568_s16 + $0x1b8] sm:$0xff]  ;;  %v450_v58 = vld [vmem:[%s2568_s16 + $0x1c0] sm:$0xff] }
  0x2b   : > { %447 = vst [vmem:[%s2573_s17 + $0x1b0] sm:$0xff] %v446_v56  ;;  %449 = vst [vmem:[%s2573_s17 + $0x1b8] sm:$0xff] %v448_v57  ;;  %v452_v59 = vld [vmem:[%s2568_s16 + $0x1c8] sm:$0xff]  ;;  %v454_v60 = vld [vmem:[%s2568_s16 + $0x1d0] sm:$0xff] }
  0x2c   : > { %451 = vst [vmem:[%s2573_s17 + $0x1c0] sm:$0xff] %v450_v58  ;;  %v456_v61 = vld [vmem:[%s2568_s16 + $0x1d8] sm:$0xff]  ;;  %453 = vst [vmem:[%s2573_s17 + $0x1c8] sm:$0xff] %v452_v59  ;;  %v458_v62 = vld [vmem:[%s2568_s16 + $0x1e0] sm:$0xff] }
  0x2d   : > { %455 = vst [vmem:[%s2573_s17 + $0x1d0] sm:$0xff] %v454_v60  ;;  %457 = vst [vmem:[%s2573_s17 + $0x1d8] sm:$0xff] %v456_v61  ;;  %v460_v63 = vld [vmem:[%s2568_s16 + $0x1e8] sm:$0xff]  ;;  %v462_v0 = vld [vmem:[%s2568_s16 + $0x1f0] sm:$0xff] }
  0x2e   : > { %459 = vst [vmem:[%s2573_s17 + $0x1e0] sm:$0xff] %v458_v62  ;;  %461 = vst [vmem:[%s2573_s17 + $0x1e8] sm:$0xff] %v460_v63  ;;  %v464_v2 = vld [vmem:[%s2568_s16 + $0x1f8] sm:$0xff]  ;;  %v466_v3 = vld [vmem:[%s2568_s16 + $0x200] sm:$0xff] }
  0x2f   : > { %463 = vst [vmem:[%s2573_s17 + $0x1f0] sm:$0xff] %v462_v0  ;;  %v468_v4 = vld [vmem:[%s2568_s16 + $0x208] sm:$0xff]  ;;  %465 = vst [vmem:[%s2573_s17 + $0x1f8] sm:$0xff] %v464_v2  ;;  %v470_v5 = vld [vmem:[%s2568_s16 + $0x210] sm:$0xff] }
  0x30   : > { %467 = vst [vmem:[%s2573_s17 + $0x200] sm:$0xff] %v466_v3  ;;  %469 = vst [vmem:[%s2573_s17 + $0x208] sm:$0xff] %v468_v4  ;;  %v472_v6 = vld [vmem:[%s2568_s16 + $0x218] sm:$0xff]  ;;  %v474_v7 = vld [vmem:[%s2568_s16 + $0x220] sm:$0xff] }
  0x31   : > { %471 = vst [vmem:[%s2573_s17 + $0x210] sm:$0xff] %v470_v5  ;;  %473 = vst [vmem:[%s2573_s17 + $0x218] sm:$0xff] %v472_v6  ;;  %v476_v8 = vld [vmem:[%s2568_s16 + $0x228] sm:$0xff]  ;;  %v478_v9 = vld [vmem:[%s2568_s16 + $0x230] sm:$0xff] }
  0x32   : > { %475 = vst [vmem:[%s2573_s17 + $0x220] sm:$0xff] %v474_v7  ;;  %v480_v10 = vld [vmem:[%s2568_s16 + $0x238] sm:$0xff]  ;;  %477 = vst [vmem:[%s2573_s17 + $0x228] sm:$0xff] %v476_v8  ;;  %v482_v11 = vld [vmem:[%s2568_s16 + $0x240] sm:$0xff] }
  0x33   : > { %479 = vst [vmem:[%s2573_s17 + $0x230] sm:$0xff] %v478_v9  ;;  %481 = vst [vmem:[%s2573_s17 + $0x238] sm:$0xff] %v480_v10  ;;  %v484_v12 = vld [vmem:[%s2568_s16 + $0x248] sm:$0xff]  ;;  %v486_v13 = vld [vmem:[%s2568_s16 + $0x250] sm:$0xff] }
  0x34   : > { %483 = vst [vmem:[%s2573_s17 + $0x240] sm:$0xff] %v482_v11  ;;  %485 = vst [vmem:[%s2573_s17 + $0x248] sm:$0xff] %v484_v12  ;;  %v488_v14 = vld [vmem:[%s2568_s16 + $0x258] sm:$0xff]  ;;  %v490_v15 = vld [vmem:[%s2568_s16 + $0x260] sm:$0xff] }
  0x35   : > { %487 = vst [vmem:[%s2573_s17 + $0x250] sm:$0xff] %v486_v13  ;;  %v492_v16 = vld [vmem:[%s2568_s16 + $0x268] sm:$0xff]  ;;  %489 = vst [vmem:[%s2573_s17 + $0x258] sm:$0xff] %v488_v14  ;;  %v494_v17 = vld [vmem:[%s2568_s16 + $0x270] sm:$0xff] }
  0x36   : > { %491 = vst [vmem:[%s2573_s17 + $0x260] sm:$0xff] %v490_v15  ;;  %493 = vst [vmem:[%s2573_s17 + $0x268] sm:$0xff] %v492_v16  ;;  %v496_v18 = vld [vmem:[%s2568_s16 + $0x278] sm:$0xff]  ;;  %v498_v19 = vld [vmem:[%s2568_s16 + $0x280] sm:$0xff] }
  0x37   : > { %495 = vst [vmem:[%s2573_s17 + $0x270] sm:$0xff] %v494_v17  ;;  %497 = vst [vmem:[%s2573_s17 + $0x278] sm:$0xff] %v496_v18  ;;  %v500_v20 = vld [vmem:[%s2568_s16 + $0x288] sm:$0xff]  ;;  %v502_v21 = vld [vmem:[%s2568_s16 + $0x290] sm:$0xff] }
  0x38   : > { %499 = vst [vmem:[%s2573_s17 + $0x280] sm:$0xff] %v498_v19  ;;  %v504_v22 = vld [vmem:[%s2568_s16 + $0x298] sm:$0xff]  ;;  %501 = vst [vmem:[%s2573_s17 + $0x288] sm:$0xff] %v500_v20  ;;  %v506_v23 = vld [vmem:[%s2568_s16 + $0x2a0] sm:$0xff] }
  0x39   : > { %503 = vst [vmem:[%s2573_s17 + $0x290] sm:$0xff] %v502_v21  ;;  %505 = vst [vmem:[%s2573_s17 + $0x298] sm:$0xff] %v504_v22  ;;  %v508_v24 = vld [vmem:[%s2568_s16 + $0x2a8] sm:$0xff]  ;;  %v510_v25 = vld [vmem:[%s2568_s16 + $0x2b0] sm:$0xff] }
  0x3a   : > { %507 = vst [vmem:[%s2573_s17 + $0x2a0] sm:$0xff] %v506_v23  ;;  %509 = vst [vmem:[%s2573_s17 + $0x2a8] sm:$0xff] %v508_v24  ;;  %v512_v26 = vld [vmem:[%s2568_s16 + $0x2b8] sm:$0xff]  ;;  %v514_v27 = vld [vmem:[%s2568_s16 + $0x2c0] sm:$0xff] }
  0x3b   : > { %511 = vst [vmem:[%s2573_s17 + $0x2b0] sm:$0xff] %v510_v25  ;;  %v516_v28 = vld [vmem:[%s2568_s16 + $0x2c8] sm:$0xff]  ;;  %513 = vst [vmem:[%s2573_s17 + $0x2b8] sm:$0xff] %v512_v26  ;;  %v518_v29 = vld [vmem:[%s2568_s16 + $0x2d0] sm:$0xff] }
  0x3c   : > { %515 = vst [vmem:[%s2573_s17 + $0x2c0] sm:$0xff] %v514_v27  ;;  %517 = vst [vmem:[%s2573_s17 + $0x2c8] sm:$0xff] %v516_v28  ;;  %v520_v30 = vld [vmem:[%s2568_s16 + $0x2d8] sm:$0xff]  ;;  %v522_v31 = vld [vmem:[%s2568_s16 + $0x2e0] sm:$0xff] }
  0x3d   : > { %519 = vst [vmem:[%s2573_s17 + $0x2d0] sm:$0xff] %v518_v29  ;;  %521 = vst [vmem:[%s2573_s17 + $0x2d8] sm:$0xff] %v520_v30  ;;  %v524_v32 = vld [vmem:[%s2568_s16 + $0x2e8] sm:$0xff]  ;;  %v526_v33 = vld [vmem:[%s2568_s16 + $0x2f0] sm:$0xff] }
  0x3e   : > { %523 = vst [vmem:[%s2573_s17 + $0x2e0] sm:$0xff] %v522_v31  ;;  %v528_v34 = vld [vmem:[%s2568_s16 + $0x2f8] sm:$0xff]  ;;  %525 = vst [vmem:[%s2573_s17 + $0x2e8] sm:$0xff] %v524_v32  ;;  %v530_v35 = vld [vmem:[%s2568_s16 + $0x300] sm:$0xff] }
  0x3f   : > { %527 = vst [vmem:[%s2573_s17 + $0x2f0] sm:$0xff] %v526_v33  ;;  %529 = vst [vmem:[%s2573_s17 + $0x2f8] sm:$0xff] %v528_v34  ;;  %v532_v36 = vld [vmem:[%s2568_s16 + $0x308] sm:$0xff]  ;;  %v534_v37 = vld [vmem:[%s2568_s16 + $0x310] sm:$0xff] }
  0x40   : > { %531 = vst [vmem:[%s2573_s17 + $0x300] sm:$0xff] %v530_v35  ;;  %533 = vst [vmem:[%s2573_s17 + $0x308] sm:$0xff] %v532_v36  ;;  %v536_v38 = vld [vmem:[%s2568_s16 + $0x318] sm:$0xff]  ;;  %v538_v39 = vld [vmem:[%s2568_s16 + $0x320] sm:$0xff] }
  0x41   : > { %535 = vst [vmem:[%s2573_s17 + $0x310] sm:$0xff] %v534_v37  ;;  %v540_v40 = vld [vmem:[%s2568_s16 + $0x328] sm:$0xff]  ;;  %537 = vst [vmem:[%s2573_s17 + $0x318] sm:$0xff] %v536_v38  ;;  %v542_v41 = vld [vmem:[%s2568_s16 + $0x330] sm:$0xff] }
  0x42   : > { %539 = vst [vmem:[%s2573_s17 + $0x320] sm:$0xff] %v538_v39  ;;  %541 = vst [vmem:[%s2573_s17 + $0x328] sm:$0xff] %v540_v40  ;;  %v544_v42 = vld [vmem:[%s2568_s16 + $0x338] sm:$0xff]  ;;  %v546_v43 = vld [vmem:[%s2568_s16 + $0x340] sm:$0xff] }
  0x43   : > { %543 = vst [vmem:[%s2573_s17 + $0x330] sm:$0xff] %v542_v41  ;;  %545 = vst [vmem:[%s2573_s17 + $0x338] sm:$0xff] %v544_v42  ;;  %v548_v44 = vld [vmem:[%s2568_s16 + $0x348] sm:$0xff]  ;;  %v550_v45 = vld [vmem:[%s2568_s16 + $0x350] sm:$0xff] }
  0x44   : > { %547 = vst [vmem:[%s2573_s17 + $0x340] sm:$0xff] %v546_v43  ;;  %v552_v46 = vld [vmem:[%s2568_s16 + $0x358] sm:$0xff]  ;;  %549 = vst [vmem:[%s2573_s17 + $0x348] sm:$0xff] %v548_v44  ;;  %v554_v47 = vld [vmem:[%s2568_s16 + $0x360] sm:$0xff] }
  0x45   : > { %551 = vst [vmem:[%s2573_s17 + $0x350] sm:$0xff] %v550_v45  ;;  %553 = vst [vmem:[%s2573_s17 + $0x358] sm:$0xff] %v552_v46  ;;  %v556_v48 = vld [vmem:[%s2568_s16 + $0x368] sm:$0xff]  ;;  %v558_v49 = vld [vmem:[%s2568_s16 + $0x370] sm:$0xff] }
  0x46   : > { %555 = vst [vmem:[%s2573_s17 + $0x360] sm:$0xff] %v554_v47  ;;  %557 = vst [vmem:[%s2573_s17 + $0x368] sm:$0xff] %v556_v48  ;;  %v560_v50 = vld [vmem:[%s2568_s16 + $0x378] sm:$0xff]  ;;  %v562_v51 = vld [vmem:[%s2568_s16 + $0x380] sm:$0xff] }
  0x47   : > { %559 = vst [vmem:[%s2573_s17 + $0x370] sm:$0xff] %v558_v49  ;;  %v564_v52 = vld [vmem:[%s2568_s16 + $0x388] sm:$0xff]  ;;  %561 = vst [vmem:[%s2573_s17 + $0x378] sm:$0xff] %v560_v50  ;;  %v566_v53 = vld [vmem:[%s2568_s16 + $0x390] sm:$0xff] }
  0x48   : > { %563 = vst [vmem:[%s2573_s17 + $0x380] sm:$0xff] %v562_v51  ;;  %565 = vst [vmem:[%s2573_s17 + $0x388] sm:$0xff] %v564_v52  ;;  %v568_v54 = vld [vmem:[%s2568_s16 + $0x398] sm:$0xff]  ;;  %v570_v55 = vld [vmem:[%s2568_s16 + $0x3a0] sm:$0xff] }
  0x49   : > { %567 = vst [vmem:[%s2573_s17 + $0x390] sm:$0xff] %v566_v53  ;;  %569 = vst [vmem:[%s2573_s17 + $0x398] sm:$0xff] %v568_v54  ;;  %v572_v56 = vld [vmem:[%s2568_s16 + $0x3a8] sm:$0xff]  ;;  %v574_v57 = vld [vmem:[%s2568_s16 + $0x3b0] sm:$0xff] }
  0x4a   : > { %571 = vst [vmem:[%s2573_s17 + $0x3a0] sm:$0xff] %v570_v55  ;;  %v576_v58 = vld [vmem:[%s2568_s16 + $0x3b8] sm:$0xff]  ;;  %573 = vst [vmem:[%s2573_s17 + $0x3a8] sm:$0xff] %v572_v56  ;;  %v578_v59 = vld [vmem:[%s2568_s16 + $0x3c0] sm:$0xff] }
  0x4b   : > { %575 = vst [vmem:[%s2573_s17 + $0x3b0] sm:$0xff] %v574_v57  ;;  %577 = vst [vmem:[%s2573_s17 + $0x3b8] sm:$0xff] %v576_v58  ;;  %v580_v60 = vld [vmem:[%s2568_s16 + $0x3c8] sm:$0xff]  ;;  %v582_v61 = vld [vmem:[%s2568_s16 + $0x3d0] sm:$0xff] }
  0x4c   : > { %579 = vst [vmem:[%s2573_s17 + $0x3c0] sm:$0xff] %v578_v59  ;;  %581 = vst [vmem:[%s2573_s17 + $0x3c8] sm:$0xff] %v580_v60  ;;  %v584_v62 = vld [vmem:[%s2568_s16 + $0x3d8] sm:$0xff]  ;;  %v586_v63 = vld [vmem:[%s2568_s16 + $0x3e0] sm:$0xff] }
  0x4d   : > { %583 = vst [vmem:[%s2573_s17 + $0x3d0] sm:$0xff] %v582_v61  ;;  %v588_v0 = vld [vmem:[%s2568_s16 + $0x3e8] sm:$0xff]  ;;  %585 = vst [vmem:[%s2573_s17 + $0x3d8] sm:$0xff] %v584_v62  ;;  %v590_v2 = vld [vmem:[%s2568_s16 + $0x3f0] sm:$0xff] }
  0x4e   : > { %587 = vst [vmem:[%s2573_s17 + $0x3e0] sm:$0xff] %v586_v63  ;;  %589 = vst [vmem:[%s2573_s17 + $0x3e8] sm:$0xff] %v588_v0  ;;  %v592_v3 = vld [vmem:[%s2568_s16 + $0x3f8] sm:$0xff] }
  0x4f   : > { %591 = vst [vmem:[%s2573_s17 + $0x3f0] sm:$0xff] %v590_v2  ;;  %593 = vst [vmem:[%s2573_s17 + $0x3f8] sm:$0xff] %v592_v3 }
  0x50 PF: > { %p2214_p2 = scmp.ge.s32.totalorder %s2528_s8, 1  ;;  %p598_p3 = scmp.lt.s32.totalorder %s2528_s8, 5 }
  0x52   : > { %p599_p4 = pnand %p2214_p2, %p598_p3 }
  0x53   : > { %s605_s18 = sand.u32 (!%p599_p4), 1, %s2207_s9   ;;  %s2480_s21 = sshll.u32 (!%p599_p4), %s2520_s6, 10 }
  0x54   : > { %602 = sbr.rel (%p599_p4) target bundleno = 467 (0x1d3), region = 54  ;;  %s2215_s19 = sshll.u32 (!%p599_p4), %s605_s18, 10 }
  0x55   : > { %s2833_s20 = scalar_lea.vmem (!%p599_p4), [#allocation0], %s2215_s19  ;;  %s2901_s24 = scalar_lea.vmem (!%p599_p4), %s3107_s1, %s2480_s21 }
  0x59   : > { %2505 = vset.pattern.permute.xlu1 %v2540_v1  ;;  %v2219_v4 = vld [vmem:[%s2833_s20 + $0x10] sm:$0xff]  ;;  %v621_v5 = vld [vmem:[%s2833_s20] sm:$0xff]  ;;  %v2221_v6 = vld [vmem:[%s2833_s20 + $0x18] sm:$0xff] }
  0x5a   : > { %634 = vperm.xlu1 %2505, %v2219_v4   ;;  %622 = vperm.xlu0 %4, %v621_v5   ;;  %v2217_v7 = vld [vmem:[%s2833_s20 + $0x8] sm:$0xff]  ;;  %v2223_v9 = vld [vmem:[%s2833_s20 + $0x20] sm:$0xff]  ;;  %v2229_v10 = vld [vmem:[%s2833_s20 + $0x38] sm:$0xff] }
  0x5b   : > { %v2225_v8 = vld [vmem:[%s2833_s20 + $0x28] sm:$0xff]  ;;  %v2227_v11 = vld [vmem:[%s2833_s20 + $0x30] sm:$0xff]  ;;  %v2231_v13 = vld [vmem:[%s2833_s20 + $0x40] sm:$0xff] }
  0x5c   : > { %v2233_v12 = vld [vmem:[%s2833_s20 + $0x48] sm:$0xff]  ;;  %v2237_v14 = vld [vmem:[%s2833_s20 + $0x58] sm:$0xff]  ;;  %v2235_v15 = vld [vmem:[%s2833_s20 + $0x50] sm:$0xff] }
  0x5d   : > { %v2241_v16 = vld [vmem:[%s2833_s20 + $0x68] sm:$0xff]  ;;  %v2239_v17 = vld [vmem:[%s2833_s20 + $0x60] sm:$0xff]  ;;  %v2245_v18 = vld [vmem:[%s2833_s20 + $0x78] sm:$0xff] }
  0x5e   : > { %640 = vperm.xlu1 %2505, %v2221_v6   ;;  %628 = vperm.xlu0 %4, %v2217_v7   ;;  %v2243_v19 = vld [vmem:[%s2833_s20 + $0x70] sm:$0xff]  ;;  %v2249_v20 = vld [vmem:[%s2833_s20 + $0x88] sm:$0xff]  ;;  %v2247_v21 = vld [vmem:[%s2833_s20 + $0x80] sm:$0xff] }
  0x5f   : > { %v2253_v22 = vld [vmem:[%s2833_s20 + $0x98] sm:$0xff]  ;;  %v2251_v23 = vld [vmem:[%s2833_s20 + $0x90] sm:$0xff]  ;;  %v2257_v24 = vld [vmem:[%s2833_s20 + $0xa8] sm:$0xff] }
  0x60   : > { %v2255_v25 = vld [vmem:[%s2833_s20 + $0xa0] sm:$0xff]  ;;  %v2261_v26 = vld [vmem:[%s2833_s20 + $0xb8] sm:$0xff]  ;;  %v2259_v27 = vld [vmem:[%s2833_s20 + $0xb0] sm:$0xff] }
  0x61   : > { %v2265_v28 = vld [vmem:[%s2833_s20 + $0xc8] sm:$0xff]  ;;  %v2263_v29 = vld [vmem:[%s2833_s20 + $0xc0] sm:$0xff]  ;;  %v2269_v30 = vld [vmem:[%s2833_s20 + $0xd8] sm:$0xff] }
  0x62   : > { %652 = vperm.xlu1 %2505, %v2225_v8   ;;  %646 = vperm.xlu0 %4, %v2223_v9   ;;  %v2267_v31 = vld [vmem:[%s2833_s20 + $0xd0] sm:$0xff]  ;;  %v2273_v32 = vld [vmem:[%s2833_s20 + $0xe8] sm:$0xff]  ;;  %v2271_v33 = vld [vmem:[%s2833_s20 + $0xe0] sm:$0xff] }
  0x63   : > { %v2277_v34 = vld [vmem:[%s2833_s20 + $0xf8] sm:$0xff]  ;;  %v2275_v35 = vld [vmem:[%s2833_s20 + $0xf0] sm:$0xff]  ;;  %v2281_v36 = vld [vmem:[%s2833_s20 + $0x108] sm:$0xff] }
  0x64   : > { %v2279_v37 = vld [vmem:[%s2833_s20 + $0x100] sm:$0xff]  ;;  %v2285_v38 = vld [vmem:[%s2833_s20 + $0x118] sm:$0xff]  ;;  %v2283_v39 = vld [vmem:[%s2833_s20 + $0x110] sm:$0xff] }
  0x65   : > { %v2289_v40 = vld [vmem:[%s2833_s20 + $0x128] sm:$0xff]  ;;  %v2287_v41 = vld [vmem:[%s2833_s20 + $0x120] sm:$0xff]  ;;  %v2293_v42 = vld [vmem:[%s2833_s20 + $0x138] sm:$0xff] }
  0x66   : > { %664 = vperm.xlu1 %2505, %v2229_v10   ;;  %658 = vperm.xlu0 %4, %v2227_v11   ;;  %v2291_v43 = vld [vmem:[%s2833_s20 + $0x130] sm:$0xff]  ;;  %v2297_v44 = vld [vmem:[%s2833_s20 + $0x148] sm:$0xff]  ;;  %v2295_v45 = vld [vmem:[%s2833_s20 + $0x140] sm:$0xff] }
  0x67   : > { %v2301_v46 = vld [vmem:[%s2833_s20 + $0x158] sm:$0xff]  ;;  %v2299_v47 = vld [vmem:[%s2833_s20 + $0x150] sm:$0xff]  ;;  %v2305_v48 = vld [vmem:[%s2833_s20 + $0x168] sm:$0xff] }
  0x68   : > { %v2303_v49 = vld [vmem:[%s2833_s20 + $0x160] sm:$0xff]  ;;  %v2309_v50 = vld [vmem:[%s2833_s20 + $0x178] sm:$0xff]  ;;  %v2307_v51 = vld [vmem:[%s2833_s20 + $0x170] sm:$0xff] }
  0x69   : > { %v2313_v52 = vld [vmem:[%s2833_s20 + $0x188] sm:$0xff]  ;;  %v2311_v53 = vld [vmem:[%s2833_s20 + $0x180] sm:$0xff]  ;;  %v2317_v54 = vld [vmem:[%s2833_s20 + $0x198] sm:$0xff] }
  0x6a   : > { %676 = vperm.xlu1 %2505, %v2233_v12   ;;  %670 = vperm.xlu0 %4, %v2231_v13   ;;  %v2315_v55 = vld [vmem:[%s2833_s20 + $0x190] sm:$0xff]  ;;  %v2321_v56 = vld [vmem:[%s2833_s20 + $0x1a8] sm:$0xff]  ;;  %v2319_v57 = vld [vmem:[%s2833_s20 + $0x1a0] sm:$0xff] }
  0x6b   : > { %v2325_v58 = vld [vmem:[%s2833_s20 + $0x1b8] sm:$0xff]  ;;  %v2323_v59 = vld [vmem:[%s2833_s20 + $0x1b0] sm:$0xff]  ;;  %v2329_v60 = vld [vmem:[%s2833_s20 + $0x1c8] sm:$0xff] }
  0x6c   : > { %v2327_v61 = vld [vmem:[%s2833_s20 + $0x1c0] sm:$0xff]  ;;  %v2333_v62 = vld [vmem:[%s2833_s20 + $0x1d8] sm:$0xff]  ;;  %v2331_v63 = vld [vmem:[%s2833_s20 + $0x1d0] sm:$0xff] }
  0x6d   : > { %v2337_v0 = vld [vmem:[%s2833_s20 + $0x1e8] sm:$0xff]  ;;  %v2335_v2 = vld [vmem:[%s2833_s20 + $0x1e0] sm:$0xff]  ;;  %v2341_v3 = vld [vmem:[%s2833_s20 + $0x1f8] sm:$0xff] }
  0x6e   : > { %688 = vperm.xlu1 %2505, %v2237_v14   ;;  %682 = vperm.xlu0 %4, %v2235_v15   ;;  %v2339_v4 = vld [vmem:[%s2833_s20 + $0x1f0] sm:$0xff]  ;;  %v2345_v7 = vld [vmem:[%s2833_s20 + $0x208] sm:$0xff]  ;;  %v2343_v8 = vld [vmem:[%s2833_s20 + $0x200] sm:$0xff] }
  0x6f   : > { %v2349_v11 = vld [vmem:[%s2833_s20 + $0x218] sm:$0xff]  ;;  %v2347_v12 = vld [vmem:[%s2833_s20 + $0x210] sm:$0xff]  ;;  %v2353_v15 = vld [vmem:[%s2833_s20 + $0x228] sm:$0xff] }
  0x72   : > { %700 = vperm.xlu1 %2505, %v2241_v16   ;;  %694 = vperm.xlu0 %4, %v2239_v17   ;;  %v2351_v16 = vld [vmem:[%s2833_s20 + $0x220] sm:$0xff] }
  0x76   : > { %712 = vperm.xlu1 %2505, %v2245_v18   ;;  %706 = vperm.xlu0 %4, %v2243_v19   ;;  %v2357_v19 = vld [vmem:[%s2833_s20 + $0x238] sm:$0xff] }
  0x7a   : > { %724 = vperm.xlu1 %2505, %v2249_v20   ;;  %718 = vperm.xlu0 %4, %v2247_v21   ;;  %v2355_v20 = vld [vmem:[%s2833_s20 + $0x230] sm:$0xff] }
  0x7e   : > { %736 = vperm.xlu1 %2505, %v2253_v22   ;;  %730 = vperm.xlu0 %4, %v2251_v23   ;;  %v2361_v23 = vld [vmem:[%s2833_s20 + $0x248] sm:$0xff] }
  0x82   : > { %748 = vperm.xlu1 %2505, %v2257_v24   ;;  %742 = vperm.xlu0 %4, %v2255_v25   ;;  %v2359_v24 = vld [vmem:[%s2833_s20 + $0x240] sm:$0xff] }
  0x86   : > { %760 = vperm.xlu1 %2505, %v2261_v26   ;;  %754 = vperm.xlu0 %4, %v2259_v27   ;;  %v2365_v27 = vld [vmem:[%s2833_s20 + $0x258] sm:$0xff] }
  0x8a   : > { %772 = vperm.xlu1 %2505, %v2265_v28   ;;  %766 = vperm.xlu0 %4, %v2263_v29   ;;  %v2363_v28 = vld [vmem:[%s2833_s20 + $0x250] sm:$0xff] }
  0x8e   : > { %784 = vperm.xlu1 %2505, %v2269_v30   ;;  %778 = vperm.xlu0 %4, %v2267_v31   ;;  %v2369_v31 = vld [vmem:[%s2833_s20 + $0x268] sm:$0xff] }
  0x92   : > { %796 = vperm.xlu1 %2505, %v2273_v32   ;;  %790 = vperm.xlu0 %4, %v2271_v33   ;;  %v2367_v32 = vld [vmem:[%s2833_s20 + $0x260] sm:$0xff] }
  0x96   : > { %808 = vperm.xlu1 %2505, %v2277_v34   ;;  %802 = vperm.xlu0 %4, %v2275_v35   ;;  %v2373_v35 = vld [vmem:[%s2833_s20 + $0x278] sm:$0xff] }
  0x9a   : > { %820 = vperm.xlu1 %2505, %v2281_v36   ;;  %814 = vperm.xlu0 %4, %v2279_v37   ;;  %v2371_v36 = vld [vmem:[%s2833_s20 + $0x270] sm:$0xff] }
  0x9e   : > { %832 = vperm.xlu1 %2505, %v2285_v38   ;;  %826 = vperm.xlu0 %4, %v2283_v39   ;;  %v2377_v39 = vld [vmem:[%s2833_s20 + $0x288] sm:$0xff] }
  0xa2   : > { %844 = vperm.xlu1 %2505, %v2289_v40   ;;  %838 = vperm.xlu0 %4, %v2287_v41   ;;  %v2375_v40 = vld [vmem:[%s2833_s20 + $0x280] sm:$0xff] }
  0xa6   : > { %856 = vperm.xlu1 %2505, %v2293_v42   ;;  %850 = vperm.xlu0 %4, %v2291_v43   ;;  %v2381_v43 = vld [vmem:[%s2833_s20 + $0x298] sm:$0xff] }
  0xaa   : > { %868 = vperm.xlu1 %2505, %v2297_v44   ;;  %862 = vperm.xlu0 %4, %v2295_v45   ;;  %v2379_v44 = vld [vmem:[%s2833_s20 + $0x290] sm:$0xff] }
  0xae   : > { %880 = vperm.xlu1 %2505, %v2301_v46   ;;  %874 = vperm.xlu0 %4, %v2299_v47   ;;  %v2385_v47 = vld [vmem:[%s2833_s20 + $0x2a8] sm:$0xff] }
  0xb2   : > { %892 = vperm.xlu1 %2505, %v2305_v48   ;;  %886 = vperm.xlu0 %4, %v2303_v49   ;;  %v2383_v48 = vld [vmem:[%s2833_s20 + $0x2a0] sm:$0xff] }
  0xb6   : > { %904 = vperm.xlu1 %2505, %v2309_v50   ;;  %898 = vperm.xlu0 %4, %v2307_v51   ;;  %v2389_v51 = vld [vmem:[%s2833_s20 + $0x2b8] sm:$0xff] }
  0xba   : > { %916 = vperm.xlu1 %2505, %v2313_v52   ;;  %910 = vperm.xlu0 %4, %v2311_v53   ;;  %v2387_v52 = vld [vmem:[%s2833_s20 + $0x2b0] sm:$0xff] }
  0xbe   : > { %928 = vperm.xlu1 %2505, %v2317_v54   ;;  %922 = vperm.xlu0 %4, %v2315_v55   ;;  %v2393_v55 = vld [vmem:[%s2833_s20 + $0x2c8] sm:$0xff] }
  0xc2   : > { %940 = vperm.xlu1 %2505, %v2321_v56   ;;  %934 = vperm.xlu0 %4, %v2319_v57   ;;  %v2391_v56 = vld [vmem:[%s2833_s20 + $0x2c0] sm:$0xff] }
  0xc6   : > { %952 = vperm.xlu1 %2505, %v2325_v58   ;;  %946 = vperm.xlu0 %4, %v2323_v59   ;;  %v2397_v59 = vld [vmem:[%s2833_s20 + $0x2d8] sm:$0xff] }
  0xca   : > { %964 = vperm.xlu1 %2505, %v2329_v60   ;;  %958 = vperm.xlu0 %4, %v2327_v61   ;;  %v2395_v60 = vld [vmem:[%s2833_s20 + $0x2d0] sm:$0xff] }
  0xce   : > { %976 = vperm.xlu1 %2505, %v2333_v62   ;;  %970 = vperm.xlu0 %4, %v2331_v63   ;;  %v2401_v63 = vld [vmem:[%s2833_s20 + $0x2e8] sm:$0xff] }
  0xd2   : > { %988 = vperm.xlu1 %2505, %v2337_v0   ;;  %982 = vperm.xlu0 %4, %v2335_v2   ;;  %v2399_v0 = vld [vmem:[%s2833_s20 + $0x2e0] sm:$0xff] }
  0xd5   : > { %v635_v5 = vpop.permute.xlu1 %634  ;;  %v623_v6 = vpop.permute.xlu0 %622 }
  0xd6   : > { %1685 = vst [vmem:[%s2901_s24 + $0x10] sm:$0xff] %v635_v5  ;;  %1681 = vst [vmem:[%s2901_s24] sm:$0xff] %v623_v6  ;;  %1000 = vperm.xlu1 %2505, %v2341_v3   ;;  %994 = vperm.xlu0 %4, %v2339_v4   ;;  %v2405_v4 = vld [vmem:[%s2833_s20 + $0x2f8] sm:$0xff]  ;;  %v2403_v5 = vld [vmem:[%s2833_s20 + $0x2f0] sm:$0xff] }
  0xd9   : > { %v641_v9 = vpop.permute.xlu1 %640  ;;  %v629_v10 = vpop.permute.xlu0 %628 }
  0xda   : > { %1687 = vst [vmem:[%s2901_s24 + $0x18] sm:$0xff] %v641_v9  ;;  %1683 = vst [vmem:[%s2901_s24 + $0x8] sm:$0xff] %v629_v10  ;;  %1012 = vperm.xlu1 %2505, %v2345_v7   ;;  %1006 = vperm.xlu0 %4, %v2343_v8   ;;  %v2409_v8 = vld [vmem:[%s2833_s20 + $0x308] sm:$0xff]  ;;  %v2407_v9 = vld [vmem:[%s2833_s20 + $0x300] sm:$0xff] }
  0xdd   : > { %v653_v13 = vpop.permute.xlu1 %652  ;;  %v647_v14 = vpop.permute.xlu0 %646 }
  0xde   : > { %1691 = vst [vmem:[%s2901_s24 + $0x28] sm:$0xff] %v653_v13  ;;  %1689 = vst [vmem:[%s2901_s24 + $0x20] sm:$0xff] %v647_v14  ;;  %1024 = vperm.xlu1 %2505, %v2349_v11   ;;  %1018 = vperm.xlu0 %4, %v2347_v12   ;;  %v2413_v12 = vld [vmem:[%s2833_s20 + $0x318] sm:$0xff]  ;;  %v2411_v13 = vld [vmem:[%s2833_s20 + $0x310] sm:$0xff] }
  0xe1   : > { %v665_v17 = vpop.permute.xlu1 %664  ;;  %v659_v18 = vpop.permute.xlu0 %658 }
  0xe2   : > { %1695 = vst [vmem:[%s2901_s24 + $0x38] sm:$0xff] %v665_v17  ;;  %1693 = vst [vmem:[%s2901_s24 + $0x30] sm:$0xff] %v659_v18  ;;  %1036 = vperm.xlu1 %2505, %v2353_v15   ;;  %1030 = vperm.xlu0 %4, %v2351_v16   ;;  %v2417_v16 = vld [vmem:[%s2833_s20 + $0x328] sm:$0xff]  ;;  %v2415_v17 = vld [vmem:[%s2833_s20 + $0x320] sm:$0xff] }
  0xe5   : > { %v677_v21 = vpop.permute.xlu1 %676  ;;  %v671_v22 = vpop.permute.xlu0 %670 }
  0xe6   : > { %1699 = vst [vmem:[%s2901_s24 + $0x48] sm:$0xff] %v677_v21  ;;  %1697 = vst [vmem:[%s2901_s24 + $0x40] sm:$0xff] %v671_v22  ;;  %1048 = vperm.xlu1 %2505, %v2357_v19   ;;  %1042 = vperm.xlu0 %4, %v2355_v20   ;;  %v2421_v20 = vld [vmem:[%s2833_s20 + $0x338] sm:$0xff]  ;;  %v2419_v21 = vld [vmem:[%s2833_s20 + $0x330] sm:$0xff] }
  0xe9   : > { %v689_v25 = vpop.permute.xlu1 %688  ;;  %v683_v26 = vpop.permute.xlu0 %682 }
  0xea   : > { %1703 = vst [vmem:[%s2901_s24 + $0x58] sm:$0xff] %v689_v25  ;;  %1701 = vst [vmem:[%s2901_s24 + $0x50] sm:$0xff] %v683_v26  ;;  %1060 = vperm.xlu1 %2505, %v2361_v23   ;;  %1054 = vperm.xlu0 %4, %v2359_v24   ;;  %v2425_v24 = vld [vmem:[%s2833_s20 + $0x348] sm:$0xff]  ;;  %v2423_v25 = vld [vmem:[%s2833_s20 + $0x340] sm:$0xff] }
  0xed   : > { %v701_v29 = vpop.permute.xlu1 %700  ;;  %v695_v30 = vpop.permute.xlu0 %694 }
  0xee   : > { %1707 = vst [vmem:[%s2901_s24 + $0x68] sm:$0xff] %v701_v29  ;;  %1705 = vst [vmem:[%s2901_s24 + $0x60] sm:$0xff] %v695_v30  ;;  %1072 = vperm.xlu1 %2505, %v2365_v27   ;;  %1066 = vperm.xlu0 %4, %v2363_v28   ;;  %v2429_v28 = vld [vmem:[%s2833_s20 + $0x358] sm:$0xff]  ;;  %v2427_v29 = vld [vmem:[%s2833_s20 + $0x350] sm:$0xff] }
  0xf1   : > { %v713_v33 = vpop.permute.xlu1 %712  ;;  %v707_v34 = vpop.permute.xlu0 %706 }
  0xf2   : > { %1711 = vst [vmem:[%s2901_s24 + $0x78] sm:$0xff] %v713_v33  ;;  %1709 = vst [vmem:[%s2901_s24 + $0x70] sm:$0xff] %v707_v34  ;;  %1084 = vperm.xlu1 %2505, %v2369_v31   ;;  %1078 = vperm.xlu0 %4, %v2367_v32   ;;  %v2433_v32 = vld [vmem:[%s2833_s20 + $0x368] sm:$0xff]  ;;  %v2431_v33 = vld [vmem:[%s2833_s20 + $0x360] sm:$0xff] }
  0xf5   : > { %v725_v37 = vpop.permute.xlu1 %724  ;;  %v719_v38 = vpop.permute.xlu0 %718 }
  0xf6   : > { %1715 = vst [vmem:[%s2901_s24 + $0x88] sm:$0xff] %v725_v37  ;;  %1713 = vst [vmem:[%s2901_s24 + $0x80] sm:$0xff] %v719_v38  ;;  %1096 = vperm.xlu1 %2505, %v2373_v35   ;;  %1090 = vperm.xlu0 %4, %v2371_v36   ;;  %v2437_v36 = vld [vmem:[%s2833_s20 + $0x378] sm:$0xff]  ;;  %v2435_v37 = vld [vmem:[%s2833_s20 + $0x370] sm:$0xff] }
  0xf9   : > { %v737_v41 = vpop.permute.xlu1 %736  ;;  %v731_v42 = vpop.permute.xlu0 %730 }
  0xfa   : > { %1719 = vst [vmem:[%s2901_s24 + $0x98] sm:$0xff] %v737_v41  ;;  %1717 = vst [vmem:[%s2901_s24 + $0x90] sm:$0xff] %v731_v42  ;;  %1108 = vperm.xlu1 %2505, %v2377_v39   ;;  %1102 = vperm.xlu0 %4, %v2375_v40   ;;  %v2441_v40 = vld [vmem:[%s2833_s20 + $0x388] sm:$0xff]  ;;  %v2439_v41 = vld [vmem:[%s2833_s20 + $0x380] sm:$0xff] }
  0xfd   : > { %v749_v45 = vpop.permute.xlu1 %748  ;;  %v743_v46 = vpop.permute.xlu0 %742 }
  0xfe   : > { %1723 = vst [vmem:[%s2901_s24 + $0xa8] sm:$0xff] %v749_v45  ;;  %1721 = vst [vmem:[%s2901_s24 + $0xa0] sm:$0xff] %v743_v46  ;;  %1120 = vperm.xlu1 %2505, %v2381_v43   ;;  %1114 = vperm.xlu0 %4, %v2379_v44   ;;  %v2445_v44 = vld [vmem:[%s2833_s20 + $0x398] sm:$0xff]  ;;  %v2443_v45 = vld [vmem:[%s2833_s20 + $0x390] sm:$0xff] }
 0x101   : > { %v761_v49 = vpop.permute.xlu1 %760  ;;  %v755_v50 = vpop.permute.xlu0 %754 }
 0x102   : > { %1727 = vst [vmem:[%s2901_s24 + $0xb8] sm:$0xff] %v761_v49  ;;  %1725 = vst [vmem:[%s2901_s24 + $0xb0] sm:$0xff] %v755_v50  ;;  %1132 = vperm.xlu1 %2505, %v2385_v47   ;;  %1126 = vperm.xlu0 %4, %v2383_v48   ;;  %v2449_v48 = vld [vmem:[%s2833_s20 + $0x3a8] sm:$0xff]  ;;  %v2447_v49 = vld [vmem:[%s2833_s20 + $0x3a0] sm:$0xff] }
 0x105   : > { %v773_v53 = vpop.permute.xlu1 %772  ;;  %v767_v54 = vpop.permute.xlu0 %766 }
 0x106   : > { %1731 = vst [vmem:[%s2901_s24 + $0xc8] sm:$0xff] %v773_v53  ;;  %1729 = vst [vmem:[%s2901_s24 + $0xc0] sm:$0xff] %v767_v54  ;;  %1144 = vperm.xlu1 %2505, %v2389_v51   ;;  %1138 = vperm.xlu0 %4, %v2387_v52   ;;  %v2453_v52 = vld [vmem:[%s2833_s20 + $0x3b8] sm:$0xff]  ;;  %v2451_v53 = vld [vmem:[%s2833_s20 + $0x3b0] sm:$0xff] }
 0x109   : > { %v785_v57 = vpop.permute.xlu1 %784  ;;  %v779_v58 = vpop.permute.xlu0 %778 }
 0x10a   : > { %1735 = vst [vmem:[%s2901_s24 + $0xd8] sm:$0xff] %v785_v57  ;;  %1733 = vst [vmem:[%s2901_s24 + $0xd0] sm:$0xff] %v779_v58  ;;  %1156 = vperm.xlu1 %2505, %v2393_v55   ;;  %1150 = vperm.xlu0 %4, %v2391_v56   ;;  %v2457_v56 = vld [vmem:[%s2833_s20 + $0x3c8] sm:$0xff]  ;;  %v2455_v57 = vld [vmem:[%s2833_s20 + $0x3c0] sm:$0xff] }
 0x10d   : > { %v797_v61 = vpop.permute.xlu1 %796  ;;  %v791_v62 = vpop.permute.xlu0 %790 }
 0x10e   : > { %1739 = vst [vmem:[%s2901_s24 + $0xe8] sm:$0xff] %v797_v61  ;;  %1737 = vst [vmem:[%s2901_s24 + $0xe0] sm:$0xff] %v791_v62  ;;  %1168 = vperm.xlu1 %2505, %v2397_v59   ;;  %1162 = vperm.xlu0 %4, %v2395_v60   ;;  %v2461_v60 = vld [vmem:[%s2833_s20 + $0x3d8] sm:$0xff]  ;;  %v2459_v61 = vld [vmem:[%s2833_s20 + $0x3d0] sm:$0xff] }
 0x111   : > { %v809_v2 = vpop.permute.xlu1 %808  ;;  %v803_v3 = vpop.permute.xlu0 %802 }
 0x112   : > { %1743 = vst [vmem:[%s2901_s24 + $0xf8] sm:$0xff] %v809_v2  ;;  %1741 = vst [vmem:[%s2901_s24 + $0xf0] sm:$0xff] %v803_v3  ;;  %1180 = vperm.xlu1 %2505, %v2401_v63   ;;  %1174 = vperm.xlu0 %4, %v2399_v0   ;;  %v2465_v0 = vld [vmem:[%s2833_s20 + $0x3e8] sm:$0xff]  ;;  %v2463_v2 = vld [vmem:[%s2833_s20 + $0x3e0] sm:$0xff] }
 0x115   : > { %v821_v6 = vpop.permute.xlu1 %820  ;;  %v815_v7 = vpop.permute.xlu0 %814 }
 0x116   : > { %1747 = vst [vmem:[%s2901_s24 + $0x108] sm:$0xff] %v821_v6  ;;  %1745 = vst [vmem:[%s2901_s24 + $0x100] sm:$0xff] %v815_v7  ;;  %1192 = vperm.xlu1 %2505, %v2405_v4   ;;  %1186 = vperm.xlu0 %4, %v2403_v5   ;;  %v2469_v5 = vld [vmem:[%s2833_s20 + $0x3f8] sm:$0xff]  ;;  %v2467_v6 = vld [vmem:[%s2833_s20 + $0x3f0] sm:$0xff] }
 0x119   : > { %v833_v10 = vpop.permute.xlu1 %832  ;;  %v827_v11 = vpop.permute.xlu0 %826 }
 0x11a   : > { %1751 = vst [vmem:[%s2901_s24 + $0x118] sm:$0xff] %v833_v10  ;;  %1749 = vst [vmem:[%s2901_s24 + $0x110] sm:$0xff] %v827_v11  ;;  %1204 = vperm.xlu1 %2505, %v2409_v8   ;;  %1198 = vperm.xlu0 %4, %v2407_v9  }
 0x11d   : > { %v845_v14 = vpop.permute.xlu1 %844  ;;  %v839_v15 = vpop.permute.xlu0 %838 }
 0x11e   : > { %1755 = vst [vmem:[%s2901_s24 + $0x128] sm:$0xff] %v845_v14  ;;  %1753 = vst [vmem:[%s2901_s24 + $0x120] sm:$0xff] %v839_v15  ;;  %1216 = vperm.xlu1 %2505, %v2413_v12   ;;  %1210 = vperm.xlu0 %4, %v2411_v13  }
 0x121   : > { %v857_v18 = vpop.permute.xlu1 %856  ;;  %v851_v19 = vpop.permute.xlu0 %850 }
 0x122   : > { %1759 = vst [vmem:[%s2901_s24 + $0x138] sm:$0xff] %v857_v18  ;;  %1757 = vst [vmem:[%s2901_s24 + $0x130] sm:$0xff] %v851_v19  ;;  %1228 = vperm.xlu1 %2505, %v2417_v16   ;;  %1222 = vperm.xlu0 %4, %v2415_v17  }
 0x125   : > { %v869_v22 = vpop.permute.xlu1 %868  ;;  %v863_v23 = vpop.permute.xlu0 %862 }
 0x126   : > { %1763 = vst [vmem:[%s2901_s24 + $0x148] sm:$0xff] %v869_v22  ;;  %1761 = vst [vmem:[%s2901_s24 + $0x140] sm:$0xff] %v863_v23  ;;  %1240 = vperm.xlu1 %2505, %v2421_v20   ;;  %1234 = vperm.xlu0 %4, %v2419_v21  }
 0x129   : > { %v881_v26 = vpop.permute.xlu1 %880  ;;  %v875_v27 = vpop.permute.xlu0 %874 }
 0x12a   : > { %1767 = vst [vmem:[%s2901_s24 + $0x158] sm:$0xff] %v881_v26  ;;  %1765 = vst [vmem:[%s2901_s24 + $0x150] sm:$0xff] %v875_v27  ;;  %1252 = vperm.xlu1 %2505, %v2425_v24   ;;  %1246 = vperm.xlu0 %4, %v2423_v25  }
 0x12d   : > { %v893_v30 = vpop.permute.xlu1 %892  ;;  %v887_v31 = vpop.permute.xlu0 %886 }
 0x12e   : > { %1771 = vst [vmem:[%s2901_s24 + $0x168] sm:$0xff] %v893_v30  ;;  %1769 = vst [vmem:[%s2901_s24 + $0x160] sm:$0xff] %v887_v31  ;;  %1264 = vperm.xlu1 %2505, %v2429_v28   ;;  %1258 = vperm.xlu0 %4, %v2427_v29  }
 0x131   : > { %v905_v34 = vpop.permute.xlu1 %904  ;;  %v899_v35 = vpop.permute.xlu0 %898 }
 0x132   : > { %1775 = vst [vmem:[%s2901_s24 + $0x178] sm:$0xff] %v905_v34  ;;  %1773 = vst [vmem:[%s2901_s24 + $0x170] sm:$0xff] %v899_v35  ;;  %1276 = vperm.xlu1 %2505, %v2433_v32   ;;  %1270 = vperm.xlu0 %4, %v2431_v33  }
 0x135   : > { %v917_v38 = vpop.permute.xlu1 %916  ;;  %v911_v39 = vpop.permute.xlu0 %910 }
 0x136   : > { %1779 = vst [vmem:[%s2901_s24 + $0x188] sm:$0xff] %v917_v38  ;;  %1777 = vst [vmem:[%s2901_s24 + $0x180] sm:$0xff] %v911_v39  ;;  %1288 = vperm.xlu1 %2505, %v2437_v36   ;;  %1282 = vperm.xlu0 %4, %v2435_v37  }
 0x139   : > { %v929_v42 = vpop.permute.xlu1 %928  ;;  %v923_v43 = vpop.permute.xlu0 %922 }
 0x13a   : > { %1783 = vst [vmem:[%s2901_s24 + $0x198] sm:$0xff] %v929_v42  ;;  %1781 = vst [vmem:[%s2901_s24 + $0x190] sm:$0xff] %v923_v43  ;;  %1300 = vperm.xlu1 %2505, %v2441_v40   ;;  %1294 = vperm.xlu0 %4, %v2439_v41  }
 0x13d   : > { %v941_v46 = vpop.permute.xlu1 %940  ;;  %v935_v47 = vpop.permute.xlu0 %934 }
 0x13e   : > { %1787 = vst [vmem:[%s2901_s24 + $0x1a8] sm:$0xff] %v941_v46  ;;  %1785 = vst [vmem:[%s2901_s24 + $0x1a0] sm:$0xff] %v935_v47  ;;  %1312 = vperm.xlu1 %2505, %v2445_v44   ;;  %1306 = vperm.xlu0 %4, %v2443_v45  }
 0x141   : > { %v953_v50 = vpop.permute.xlu1 %952  ;;  %v947_v51 = vpop.permute.xlu0 %946 }
 0x142   : > { %1791 = vst [vmem:[%s2901_s24 + $0x1b8] sm:$0xff] %v953_v50  ;;  %1789 = vst [vmem:[%s2901_s24 + $0x1b0] sm:$0xff] %v947_v51  ;;  %1324 = vperm.xlu1 %2505, %v2449_v48   ;;  %1318 = vperm.xlu0 %4, %v2447_v49  }
 0x145   : > { %v965_v54 = vpop.permute.xlu1 %964  ;;  %v959_v55 = vpop.permute.xlu0 %958 }
 0x146   : > { %1795 = vst [vmem:[%s2901_s24 + $0x1c8] sm:$0xff] %v965_v54  ;;  %1793 = vst [vmem:[%s2901_s24 + $0x1c0] sm:$0xff] %v959_v55  ;;  %1336 = vperm.xlu1 %2505, %v2453_v52   ;;  %1330 = vperm.xlu0 %4, %v2451_v53  }
 0x149   : > { %v977_v58 = vpop.permute.xlu1 %976  ;;  %v971_v59 = vpop.permute.xlu0 %970 }
 0x14a   : > { %1799 = vst [vmem:[%s2901_s24 + $0x1d8] sm:$0xff] %v977_v58  ;;  %1797 = vst [vmem:[%s2901_s24 + $0x1d0] sm:$0xff] %v971_v59  ;;  %1348 = vperm.xlu1 %2505, %v2457_v56   ;;  %1342 = vperm.xlu0 %4, %v2455_v57  }
 0x14d   : > { %v989_v62 = vpop.permute.xlu1 %988  ;;  %v983_v63 = vpop.permute.xlu0 %982 }
 0x14e   : > { %1803 = vst [vmem:[%s2901_s24 + $0x1e8] sm:$0xff] %v989_v62  ;;  %1801 = vst [vmem:[%s2901_s24 + $0x1e0] sm:$0xff] %v983_v63  ;;  %1360 = vperm.xlu1 %2505, %v2461_v60   ;;  %1354 = vperm.xlu0 %4, %v2459_v61  }
 0x151   : > { %v1001_v3 = vpop.permute.xlu1 %1000  ;;  %v995_v4 = vpop.permute.xlu0 %994 }
 0x152   : > { %1807 = vst [vmem:[%s2901_s24 + $0x1f8] sm:$0xff] %v1001_v3  ;;  %1805 = vst [vmem:[%s2901_s24 + $0x1f0] sm:$0xff] %v995_v4  ;;  %1372 = vperm.xlu1 %2505, %v2465_v0   ;;  %1366 = vperm.xlu0 %4, %v2463_v2  }
 0x155   : > { %v1013_v7 = vpop.permute.xlu1 %1012  ;;  %v1007_v8 = vpop.permute.xlu0 %1006 }
 0x156   : > { %1811 = vst [vmem:[%s2901_s24 + $0x208] sm:$0xff] %v1013_v7  ;;  %1809 = vst [vmem:[%s2901_s24 + $0x200] sm:$0xff] %v1007_v8  ;;  %1384 = vperm.xlu1 %2505, %v2469_v5   ;;  %1378 = vperm.xlu0 %4, %v2467_v6  }
 0x159   : > { %v1025_v9 = vpop.permute.xlu1 %1024  ;;  %v1019_v10 = vpop.permute.xlu0 %1018 }
 0x15a   : > { %1815 = vst [vmem:[%s2901_s24 + $0x218] sm:$0xff] %v1025_v9  ;;  %1813 = vst [vmem:[%s2901_s24 + $0x210] sm:$0xff] %v1019_v10 }
 0x15d   : > { %v1037_v11 = vpop.permute.xlu1 %1036  ;;  %v1031_v12 = vpop.permute.xlu0 %1030 }
 0x15e   : > { %1819 = vst [vmem:[%s2901_s24 + $0x228] sm:$0xff] %v1037_v11  ;;  %1817 = vst [vmem:[%s2901_s24 + $0x220] sm:$0xff] %v1031_v12 }
 0x161   : > { %v1049_v13 = vpop.permute.xlu1 %1048  ;;  %v1043_v14 = vpop.permute.xlu0 %1042 }
 0x162   : > { %1823 = vst [vmem:[%s2901_s24 + $0x238] sm:$0xff] %v1049_v13  ;;  %1821 = vst [vmem:[%s2901_s24 + $0x230] sm:$0xff] %v1043_v14 }
 0x165   : > { %v1061_v15 = vpop.permute.xlu1 %1060  ;;  %v1055_v16 = vpop.permute.xlu0 %1054 }
 0x166   : > { %1827 = vst [vmem:[%s2901_s24 + $0x248] sm:$0xff] %v1061_v15  ;;  %1825 = vst [vmem:[%s2901_s24 + $0x240] sm:$0xff] %v1055_v16 }
 0x169   : > { %v1073_v17 = vpop.permute.xlu1 %1072  ;;  %v1067_v18 = vpop.permute.xlu0 %1066 }
 0x16a   : > { %1831 = vst [vmem:[%s2901_s24 + $0x258] sm:$0xff] %v1073_v17  ;;  %1829 = vst [vmem:[%s2901_s24 + $0x250] sm:$0xff] %v1067_v18 }
 0x16d   : > { %v1085_v19 = vpop.permute.xlu1 %1084  ;;  %v1079_v20 = vpop.permute.xlu0 %1078 }
 0x16e   : > { %1835 = vst [vmem:[%s2901_s24 + $0x268] sm:$0xff] %v1085_v19  ;;  %1833 = vst [vmem:[%s2901_s24 + $0x260] sm:$0xff] %v1079_v20 }
 0x171   : > { %v1097_v21 = vpop.permute.xlu1 %1096  ;;  %v1091_v22 = vpop.permute.xlu0 %1090 }
 0x172   : > { %1839 = vst [vmem:[%s2901_s24 + $0x278] sm:$0xff] %v1097_v21  ;;  %1837 = vst [vmem:[%s2901_s24 + $0x270] sm:$0xff] %v1091_v22 }
 0x175   : > { %v1109_v23 = vpop.permute.xlu1 %1108  ;;  %v1103_v24 = vpop.permute.xlu0 %1102 }
 0x176   : > { %1843 = vst [vmem:[%s2901_s24 + $0x288] sm:$0xff] %v1109_v23  ;;  %1841 = vst [vmem:[%s2901_s24 + $0x280] sm:$0xff] %v1103_v24 }
 0x179   : > { %v1121_v25 = vpop.permute.xlu1 %1120  ;;  %v1115_v26 = vpop.permute.xlu0 %1114 }
 0x17a   : > { %1847 = vst [vmem:[%s2901_s24 + $0x298] sm:$0xff] %v1121_v25  ;;  %1845 = vst [vmem:[%s2901_s24 + $0x290] sm:$0xff] %v1115_v26 }
 0x17d   : > { %v1133_v27 = vpop.permute.xlu1 %1132  ;;  %v1127_v28 = vpop.permute.xlu0 %1126 }
 0x17e   : > { %1851 = vst [vmem:[%s2901_s24 + $0x2a8] sm:$0xff] %v1133_v27  ;;  %1849 = vst [vmem:[%s2901_s24 + $0x2a0] sm:$0xff] %v1127_v28 }
 0x181   : > { %v1145_v29 = vpop.permute.xlu1 %1144  ;;  %v1139_v30 = vpop.permute.xlu0 %1138 }
 0x182   : > { %1855 = vst [vmem:[%s2901_s24 + $0x2b8] sm:$0xff] %v1145_v29  ;;  %1853 = vst [vmem:[%s2901_s24 + $0x2b0] sm:$0xff] %v1139_v30 }
 0x185   : > { %v1157_v31 = vpop.permute.xlu1 %1156  ;;  %v1151_v32 = vpop.permute.xlu0 %1150 }
 0x186   : > { %1859 = vst [vmem:[%s2901_s24 + $0x2c8] sm:$0xff] %v1157_v31  ;;  %1857 = vst [vmem:[%s2901_s24 + $0x2c0] sm:$0xff] %v1151_v32 }
 0x189   : > { %v1169_v33 = vpop.permute.xlu1 %1168  ;;  %v1163_v34 = vpop.permute.xlu0 %1162 }
 0x18a   : > { %1863 = vst [vmem:[%s2901_s24 + $0x2d8] sm:$0xff] %v1169_v33  ;;  %1861 = vst [vmem:[%s2901_s24 + $0x2d0] sm:$0xff] %v1163_v34 }
 0x18d   : > { %v1181_v35 = vpop.permute.xlu1 %1180  ;;  %v1175_v36 = vpop.permute.xlu0 %1174 }
 0x18e   : > { %1867 = vst [vmem:[%s2901_s24 + $0x2e8] sm:$0xff] %v1181_v35  ;;  %1865 = vst [vmem:[%s2901_s24 + $0x2e0] sm:$0xff] %v1175_v36 }
 0x191   : > { %v1193_v37 = vpop.permute.xlu1 %1192  ;;  %v1187_v38 = vpop.permute.xlu0 %1186 }
 0x192   : > { %1871 = vst [vmem:[%s2901_s24 + $0x2f8] sm:$0xff] %v1193_v37  ;;  %1869 = vst [vmem:[%s2901_s24 + $0x2f0] sm:$0xff] %v1187_v38 }
 0x195   : > { %v1205_v39 = vpop.permute.xlu1 %1204  ;;  %v1199_v40 = vpop.permute.xlu0 %1198 }
 0x196   : > { %1875 = vst [vmem:[%s2901_s24 + $0x308] sm:$0xff] %v1205_v39  ;;  %1873 = vst [vmem:[%s2901_s24 + $0x300] sm:$0xff] %v1199_v40 }
 0x199   : > { %v1217_v41 = vpop.permute.xlu1 %1216  ;;  %v1211_v42 = vpop.permute.xlu0 %1210 }
 0x19a   : > { %1879 = vst [vmem:[%s2901_s24 + $0x318] sm:$0xff] %v1217_v41  ;;  %1877 = vst [vmem:[%s2901_s24 + $0x310] sm:$0xff] %v1211_v42 }
 0x19d   : > { %v1229_v43 = vpop.permute.xlu1 %1228  ;;  %v1223_v44 = vpop.permute.xlu0 %1222 }
 0x19e   : > { %1883 = vst [vmem:[%s2901_s24 + $0x328] sm:$0xff] %v1229_v43  ;;  %1881 = vst [vmem:[%s2901_s24 + $0x320] sm:$0xff] %v1223_v44 }
 0x1a1   : > { %v1241_v45 = vpop.permute.xlu1 %1240  ;;  %v1235_v46 = vpop.permute.xlu0 %1234 }
 0x1a2   : > { %1887 = vst [vmem:[%s2901_s24 + $0x338] sm:$0xff] %v1241_v45  ;;  %1885 = vst [vmem:[%s2901_s24 + $0x330] sm:$0xff] %v1235_v46 }
 0x1a5   : > { %v1253_v47 = vpop.permute.xlu1 %1252  ;;  %v1247_v48 = vpop.permute.xlu0 %1246 }
 0x1a6   : > { %1891 = vst [vmem:[%s2901_s24 + $0x348] sm:$0xff] %v1253_v47  ;;  %1889 = vst [vmem:[%s2901_s24 + $0x340] sm:$0xff] %v1247_v48 }
 0x1a9   : > { %v1265_v49 = vpop.permute.xlu1 %1264  ;;  %v1259_v50 = vpop.permute.xlu0 %1258 }
 0x1aa   : > { %1895 = vst [vmem:[%s2901_s24 + $0x358] sm:$0xff] %v1265_v49  ;;  %1893 = vst [vmem:[%s2901_s24 + $0x350] sm:$0xff] %v1259_v50 }
 0x1ad   : > { %v1277_v51 = vpop.permute.xlu1 %1276  ;;  %v1271_v52 = vpop.permute.xlu0 %1270 }
 0x1ae   : > { %1899 = vst [vmem:[%s2901_s24 + $0x368] sm:$0xff] %v1277_v51  ;;  %1897 = vst [vmem:[%s2901_s24 + $0x360] sm:$0xff] %v1271_v52 }
 0x1b1   : > { %v1289_v53 = vpop.permute.xlu1 %1288  ;;  %v1283_v54 = vpop.permute.xlu0 %1282 }
 0x1b2   : > { %1903 = vst [vmem:[%s2901_s24 + $0x378] sm:$0xff] %v1289_v53  ;;  %1901 = vst [vmem:[%s2901_s24 + $0x370] sm:$0xff] %v1283_v54 }
 0x1b5   : > { %v1301_v55 = vpop.permute.xlu1 %1300  ;;  %v1295_v56 = vpop.permute.xlu0 %1294 }
 0x1b6   : > { %1907 = vst [vmem:[%s2901_s24 + $0x388] sm:$0xff] %v1301_v55  ;;  %1905 = vst [vmem:[%s2901_s24 + $0x380] sm:$0xff] %v1295_v56 }
 0x1b9   : > { %v1313_v57 = vpop.permute.xlu1 %1312  ;;  %v1307_v58 = vpop.permute.xlu0 %1306 }
 0x1ba   : > { %1911 = vst [vmem:[%s2901_s24 + $0x398] sm:$0xff] %v1313_v57  ;;  %1909 = vst [vmem:[%s2901_s24 + $0x390] sm:$0xff] %v1307_v58 }
 0x1bd   : > { %v1325_v59 = vpop.permute.xlu1 %1324  ;;  %v1319_v60 = vpop.permute.xlu0 %1318 }
 0x1be   : > { %1915 = vst [vmem:[%s2901_s24 + $0x3a8] sm:$0xff] %v1325_v59  ;;  %1913 = vst [vmem:[%s2901_s24 + $0x3a0] sm:$0xff] %v1319_v60 }
 0x1c1   : > { %v1337_v61 = vpop.permute.xlu1 %1336  ;;  %v1331_v62 = vpop.permute.xlu0 %1330 }
 0x1c2   : > { %1919 = vst [vmem:[%s2901_s24 + $0x3b8] sm:$0xff] %v1337_v61  ;;  %1917 = vst [vmem:[%s2901_s24 + $0x3b0] sm:$0xff] %v1331_v62 }
 0x1c5   : > { %v1349_v63 = vpop.permute.xlu1 %1348  ;;  %v1343_v0 = vpop.permute.xlu0 %1342 }
 0x1c6   : > { %1923 = vst [vmem:[%s2901_s24 + $0x3c8] sm:$0xff] %v1349_v63  ;;  %1921 = vst [vmem:[%s2901_s24 + $0x3c0] sm:$0xff] %v1343_v0 }
 0x1c9   : > { %v1361_v2 = vpop.permute.xlu1 %1360  ;;  %v1355_v3 = vpop.permute.xlu0 %1354 }
 0x1ca   : > { %1927 = vst [vmem:[%s2901_s24 + $0x3d8] sm:$0xff] %v1361_v2  ;;  %1925 = vst [vmem:[%s2901_s24 + $0x3d0] sm:$0xff] %v1355_v3 }
 0x1cd   : > { %v1373_v4 = vpop.permute.xlu1 %1372  ;;  %v1367_v5 = vpop.permute.xlu0 %1366 }
 0x1ce   : > { %1931 = vst [vmem:[%s2901_s24 + $0x3e8] sm:$0xff] %v1373_v4  ;;  %1929 = vst [vmem:[%s2901_s24 + $0x3e0] sm:$0xff] %v1367_v5 }
 0x1d1   : > { %v1385_v6 = vpop.permute.xlu1 %1384  ;;  %v1379_v7 = vpop.permute.xlu0 %1378 }
 0x1d2   : > { %1935 = vst [vmem:[%s2901_s24 + $0x3f8] sm:$0xff] %v1385_v6  ;;  %1933 = vst [vmem:[%s2901_s24 + $0x3f0] sm:$0xff] %v1379_v7 }
 0x1d3 PF: > { %s10_s8 = sadd.s32 1, %s2528_s8   ;;  %s3108_s6 = smov %s2524_s7 }
 0x1d4   : > { %p7_p5 = scmp.ge.s32.totalorder %s10_s8, 6   ;;  %s3109_s7 = smov %s3111_s10 }
 0x1d6   :  { %9 = sbr.rel (!%p7_p5) target bundleno = 7 (0x7), region = 372 }

// kernel: reverse.1
= control target key start
LH: loop header
LB: loop body
LE: loop exit
PB: predicated region body
PF: predicated region fallthrough
CT: control target
= control target key end

     0   :  { %v2_v0 = vlaneseq  ;;  %s7350_s0 = inlined_call_operand.vmem [shape: bf16[64,64,3], index: 0, kind: input, shape index: {}]   ;;  %s7351_s1 = inlined_call_operand.vmem [shape: bf16[64,64,3], index: 1, kind: output, shape index: {}]  }
   0x2   :  { %v6903_v1 = vsub.s32 2, %v2_v0 }
   0x4   :  { %4 = vset.pattern.permute.xlu0 %v6903_v1 }
   0x5   :  { %s6906_s6 = smov 0   ;;  %s6908_s7 = smov 0  }
   0x6   :  { %s6910_s8 = smov 0  }
   0x7 LB: > { %s5548_s9 = sadd.s32 4294967295, %s6891_s8   ;;  %s29_s10 = sadd.s32 1, %s6887_s7  ;;  %s6891_s8 = sphi %s6910_s8, %s10_s8   ;;  %s6887_s7 = sphi %s6908_s7, %s7353_s7   ;;  %s6883_s6 = sphi %s6906_s6, %s7352_s6  }
   0x8   : > { %p31_p0 = scmp.ge.s32.totalorder %s29_s10, 4  ;;  %p5550_p1 = scmp.ge.s32.totalorder %s6891_s8, 4 }
   0x9   : > { %s45_s11 = sand.u32 (!%p5550_p1), 1, %s6891_s8   ;;  %s5819_s12 = sshll.u32 (!%p5550_p1), %s6887_s7, 9 }
   0xa   : > { %s7355_s10 = smov (%p31_p0, %s29_s10), 0  ;;  %43 = sbr.rel (%p5550_p1) target bundleno = 48 (0x30), region = 16 }
   0xb   : > { %s5551_s13 = sshll.u32 (!%p5550_p1), %s45_s11, 9  ;;  %s6931_s16 = scalar_lea.vmem (!%p5550_p1), %s7350_s0, %s5819_s12 }
   0xc   : > { %s6936_s17 = scalar_lea.vmem (!%p5550_p1), [#allocation1], %s5551_s13 }
   0xf   : > { %v72_v2 = vld [vmem:[%s6931_s16] sm:$0xff]   ;;  %v76_v3 = vld [vmem:[%s6931_s16 + $0x8] sm:$0xff]   ;;  %v80_v4 = vld [vmem:[%s6931_s16 + $0x10] sm:$0xff]  }
  0x10   : > { %73 = vst [vmem:[%s6936_s17] sm:$0xff] %v72_v2   ;;  %77 = vst [vmem:[%s6936_s17 + $0x8] sm:$0xff] %v76_v3   ;;  %v84_v5 = vld [vmem:[%s6931_s16 + $0x18] sm:$0xff]   ;;  %v88_v6 = vld [vmem:[%s6931_s16 + $0x20] sm:$0xff]  }
  0x11   : > { %81 = vst [vmem:[%s6936_s17 + $0x10] sm:$0xff] %v80_v4   ;;  %v92_v7 = vld [vmem:[%s6931_s16 + $0x28] sm:$0xff]   ;;  %85 = vst [vmem:[%s6936_s17 + $0x18] sm:$0xff] %v84_v5   ;;  %v96_v8 = vld [vmem:[%s6931_s16 + $0x30] sm:$0xff]  }
  0x12   : > { %89 = vst [vmem:[%s6936_s17 + $0x20] sm:$0xff] %v88_v6   ;;  %93 = vst [vmem:[%s6936_s17 + $0x28] sm:$0xff] %v92_v7   ;;  %v100_v9 = vld [vmem:[%s6931_s16 + $0x38] sm:$0xff]   ;;  %v104_v10 = vld [vmem:[%s6931_s16 + $0x40] sm:$0xff]  }
  0x13   : > { %97 = vst [vmem:[%s6936_s17 + $0x30] sm:$0xff] %v96_v8   ;;  %101 = vst [vmem:[%s6936_s17 + $0x38] sm:$0xff] %v100_v9   ;;  %v108_v11 = vld [vmem:[%s6931_s16 + $0x48] sm:$0xff]   ;;  %v112_v12 = vld [vmem:[%s6931_s16 + $0x50] sm:$0xff]  }
  0x14   : > { %105 = vst [vmem:[%s6936_s17 + $0x40] sm:$0xff] %v104_v10   ;;  %v116_v13 = vld [vmem:[%s6931_s16 + $0x58] sm:$0xff]   ;;  %109 = vst [vmem:[%s6936_s17 + $0x48] sm:$0xff] %v108_v11   ;;  %v120_v14 = vld [vmem:[%s6931_s16 + $0x60] sm:$0xff]  }
  0x15   : > { %113 = vst [vmem:[%s6936_s17 + $0x50] sm:$0xff] %v112_v12   ;;  %117 = vst [vmem:[%s6936_s17 + $0x58] sm:$0xff] %v116_v13   ;;  %v124_v15 = vld [vmem:[%s6931_s16 + $0x68] sm:$0xff]   ;;  %v128_v16 = vld [vmem:[%s6931_s16 + $0x70] sm:$0xff]  }
  0x16   : > { %121 = vst [vmem:[%s6936_s17 + $0x60] sm:$0xff] %v120_v14   ;;  %125 = vst [vmem:[%s6936_s17 + $0x68] sm:$0xff] %v124_v15   ;;  %v132_v17 = vld [vmem:[%s6931_s16 + $0x78] sm:$0xff]   ;;  %v136_v18 = vld [vmem:[%s6931_s16 + $0x80] sm:$0xff]  }
  0x17   : > { %129 = vst [vmem:[%s6936_s17 + $0x70] sm:$0xff] %v128_v16   ;;  %v140_v19 = vld [vmem:[%s6931_s16 + $0x88] sm:$0xff]   ;;  %133 = vst [vmem:[%s6936_s17 + $0x78] sm:$0xff] %v132_v17   ;;  %v144_v20 = vld [vmem:[%s6931_s16 + $0x90] sm:$0xff]  }
  0x18   : > { %137 = vst [vmem:[%s6936_s17 + $0x80] sm:$0xff] %v136_v18   ;;  %141 = vst [vmem:[%s6936_s17 + $0x88] sm:$0xff] %v140_v19   ;;  %v148_v21 = vld [vmem:[%s6931_s16 + $0x98] sm:$0xff]   ;;  %v152_v22 = vld [vmem:[%s6931_s16 + $0xa0] sm:$0xff]  }
  0x19   : > { %145 = vst [vmem:[%s6936_s17 + $0x90] sm:$0xff] %v144_v20   ;;  %149 = vst [vmem:[%s6936_s17 + $0x98] sm:$0xff] %v148_v21   ;;  %v156_v23 = vld [vmem:[%s6931_s16 + $0xa8] sm:$0xff]   ;;  %v160_v24 = vld [vmem:[%s6931_s16 + $0xb0] sm:$0xff]  }
  0x1a   : > { %153 = vst [vmem:[%s6936_s17 + $0xa0] sm:$0xff] %v152_v22   ;;  %v164_v25 = vld [vmem:[%s6931_s16 + $0xb8] sm:$0xff]   ;;  %157 = vst [vmem:[%s6936_s17 + $0xa8] sm:$0xff] %v156_v23   ;;  %v168_v26 = vld [vmem:[%s6931_s16 + $0xc0] sm:$0xff]  }
  0x1b   : > { %161 = vst [vmem:[%s6936_s17 + $0xb0] sm:$0xff] %v160_v24   ;;  %165 = vst [vmem:[%s6936_s17 + $0xb8] sm:$0xff] %v164_v25   ;;  %v172_v27 = vld [vmem:[%s6931_s16 + $0xc8] sm:$0xff]   ;;  %v176_v28 = vld [vmem:[%s6931_s16 + $0xd0] sm:$0xff]  }
  0x1c   : > { %169 = vst [vmem:[%s6936_s17 + $0xc0] sm:$0xff] %v168_v26   ;;  %173 = vst [vmem:[%s6936_s17 + $0xc8] sm:$0xff] %v172_v27   ;;  %v180_v29 = vld [vmem:[%s6931_s16 + $0xd8] sm:$0xff]   ;;  %v184_v30 = vld [vmem:[%s6931_s16 + $0xe0] sm:$0xff]  }
  0x1d   : > { %177 = vst [vmem:[%s6936_s17 + $0xd0] sm:$0xff] %v176_v28   ;;  %v188_v31 = vld [vmem:[%s6931_s16 + $0xe8] sm:$0xff]   ;;  %181 = vst [vmem:[%s6936_s17 + $0xd8] sm:$0xff] %v180_v29   ;;  %v192_v32 = vld [vmem:[%s6931_s16 + $0xf0] sm:$0xff]  }
  0x1e   : > { %185 = vst [vmem:[%s6936_s17 + $0xe0] sm:$0xff] %v184_v30   ;;  %189 = vst [vmem:[%s6936_s17 + $0xe8] sm:$0xff] %v188_v31   ;;  %v196_v33 = vld [vmem:[%s6931_s16 + $0xf8] sm:$0xff]   ;;  %v200_v34 = vld [vmem:[%s6931_s16 + $0x100] sm:$0xff]  }
  0x1f   : > { %193 = vst [vmem:[%s6936_s17 + $0xf0] sm:$0xff] %v192_v32   ;;  %197 = vst [vmem:[%s6936_s17 + $0xf8] sm:$0xff] %v196_v33   ;;  %v204_v35 = vld [vmem:[%s6931_s16 + $0x108] sm:$0xff]   ;;  %v208_v36 = vld [vmem:[%s6931_s16 + $0x110] sm:$0xff]  }
  0x20   : > { %201 = vst [vmem:[%s6936_s17 + $0x100] sm:$0xff] %v200_v34   ;;  %v212_v37 = vld [vmem:[%s6931_s16 + $0x118] sm:$0xff]   ;;  %205 = vst [vmem:[%s6936_s17 + $0x108] sm:$0xff] %v204_v35   ;;  %v216_v38 = vld [vmem:[%s6931_s16 + $0x120] sm:$0xff]  }
  0x21   : > { %209 = vst [vmem:[%s6936_s17 + $0x110] sm:$0xff] %v208_v36   ;;  %213 = vst [vmem:[%s6936_s17 + $0x118] sm:$0xff] %v212_v37   ;;  %v220_v39 = vld [vmem:[%s6931_s16 + $0x128] sm:$0xff]   ;;  %v224_v40 = vld [vmem:[%s6931_s16 + $0x130] sm:$0xff]  }
  0x22   : > { %217 = vst [vmem:[%s6936_s17 + $0x120] sm:$0xff] %v216_v38   ;;  %221 = vst [vmem:[%s6936_s17 + $0x128] sm:$0xff] %v220_v39   ;;  %v228_v41 = vld [vmem:[%s6931_s16 + $0x138] sm:$0xff]   ;;  %v232_v42 = vld [vmem:[%s6931_s16 + $0x140] sm:$0xff]  }
  0x23   : > { %225 = vst [vmem:[%s6936_s17 + $0x130] sm:$0xff] %v224_v40   ;;  %v236_v43 = vld [vmem:[%s6931_s16 + $0x148] sm:$0xff]   ;;  %229 = vst [vmem:[%s6936_s17 + $0x138] sm:$0xff] %v228_v41   ;;  %v240_v44 = vld [vmem:[%s6931_s16 + $0x150] sm:$0xff]  }
  0x24   : > { %233 = vst [vmem:[%s6936_s17 + $0x140] sm:$0xff] %v232_v42   ;;  %237 = vst [vmem:[%s6936_s17 + $0x148] sm:$0xff] %v236_v43   ;;  %v244_v45 = vld [vmem:[%s6931_s16 + $0x158] sm:$0xff]   ;;  %v248_v46 = vld [vmem:[%s6931_s16 + $0x160] sm:$0xff]  }
  0x25   : > { %241 = vst [vmem:[%s6936_s17 + $0x150] sm:$0xff] %v240_v44   ;;  %245 = vst [vmem:[%s6936_s17 + $0x158] sm:$0xff] %v244_v45   ;;  %v252_v47 = vld [vmem:[%s6931_s16 + $0x168] sm:$0xff]   ;;  %v256_v48 = vld [vmem:[%s6931_s16 + $0x170] sm:$0xff]  }
  0x26   : > { %249 = vst [vmem:[%s6936_s17 + $0x160] sm:$0xff] %v248_v46   ;;  %v260_v49 = vld [vmem:[%s6931_s16 + $0x178] sm:$0xff]   ;;  %253 = vst [vmem:[%s6936_s17 + $0x168] sm:$0xff] %v252_v47   ;;  %v264_v50 = vld [vmem:[%s6931_s16 + $0x180] sm:$0xff]  }
  0x27   : > { %257 = vst [vmem:[%s6936_s17 + $0x170] sm:$0xff] %v256_v48   ;;  %261 = vst [vmem:[%s6936_s17 + $0x178] sm:$0xff] %v260_v49   ;;  %v268_v51 = vld [vmem:[%s6931_s16 + $0x188] sm:$0xff]   ;;  %v272_v52 = vld [vmem:[%s6931_s16 + $0x190] sm:$0xff]  }
  0x28   : > { %265 = vst [vmem:[%s6936_s17 + $0x180] sm:$0xff] %v264_v50   ;;  %269 = vst [vmem:[%s6936_s17 + $0x188] sm:$0xff] %v268_v51   ;;  %v276_v53 = vld [vmem:[%s6931_s16 + $0x198] sm:$0xff]   ;;  %v280_v54 = vld [vmem:[%s6931_s16 + $0x1a0] sm:$0xff]  }
  0x29   : > { %273 = vst [vmem:[%s6936_s17 + $0x190] sm:$0xff] %v272_v52   ;;  %v284_v55 = vld [vmem:[%s6931_s16 + $0x1a8] sm:$0xff]   ;;  %277 = vst [vmem:[%s6936_s17 + $0x198] sm:$0xff] %v276_v53   ;;  %v288_v56 = vld [vmem:[%s6931_s16 + $0x1b0] sm:$0xff]  }
  0x2a   : > { %281 = vst [vmem:[%s6936_s17 + $0x1a0] sm:$0xff] %v280_v54   ;;  %285 = vst [vmem:[%s6936_s17 + $0x1a8] sm:$0xff] %v284_v55   ;;  %v292_v57 = vld [vmem:[%s6931_s16 + $0x1b8] sm:$0xff]   ;;  %v296_v58 = vld [vmem:[%s6931_s16 + $0x1c0] sm:$0xff]  }
  0x2b   : > { %289 = vst [vmem:[%s6936_s17 + $0x1b0] sm:$0xff] %v288_v56   ;;  %293 = vst [vmem:[%s6936_s17 + $0x1b8] sm:$0xff] %v292_v57   ;;  %v300_v59 = vld [vmem:[%s6931_s16 + $0x1c8] sm:$0xff]   ;;  %v304_v60 = vld [vmem:[%s6931_s16 + $0x1d0] sm:$0xff]  }
  0x2c   : > { %297 = vst [vmem:[%s6936_s17 + $0x1c0] sm:$0xff] %v296_v58   ;;  %v308_v61 = vld [vmem:[%s6931_s16 + $0x1d8] sm:$0xff]   ;;  %301 = vst [vmem:[%s6936_s17 + $0x1c8] sm:$0xff] %v300_v59   ;;  %v312_v62 = vld [vmem:[%s6931_s16 + $0x1e0] sm:$0xff]  }
  0x2d   : > { %305 = vst [vmem:[%s6936_s17 + $0x1d0] sm:$0xff] %v304_v60   ;;  %309 = vst [vmem:[%s6936_s17 + $0x1d8] sm:$0xff] %v308_v61   ;;  %v316_v63 = vld [vmem:[%s6931_s16 + $0x1e8] sm:$0xff]   ;;  %v320_v0 = vld [vmem:[%s6931_s16 + $0x1f0] sm:$0xff]  }
  0x2e   : > { %313 = vst [vmem:[%s6936_s17 + $0x1e0] sm:$0xff] %v312_v62   ;;  %317 = vst [vmem:[%s6936_s17 + $0x1e8] sm:$0xff] %v316_v63   ;;  %v324_v2 = vld [vmem:[%s6931_s16 + $0x1f8] sm:$0xff]  }
  0x2f   : > { %321 = vst [vmem:[%s6936_s17 + $0x1f0] sm:$0xff] %v320_v0   ;;  %325 = vst [vmem:[%s6936_s17 + $0x1f8] sm:$0xff] %v324_v2  }
  0x30 PF: > { %p5555_p2 = scmp.ge.s32.totalorder %s6891_s8, 1  ;;  %p606_p3 = scmp.lt.s32.totalorder %s6891_s8, 5 }
  0x32   : > { %p607_p4 = pnand %p5555_p2, %p606_p3 }
  0x33   : > { %s7068_s18 = sand.u32 (!%p607_p4), 1, %s5548_s9   ;;  %s5821_s22 = sshll.u32 (!%p607_p4), %s6883_s6, 9 }
  0x34   : > { %610 = sbr.rel (%p607_p4) target bundleno = 324 (0x144), region = 57  ;;  %s5556_s19 = sshll.u32 (!%p607_p4), %s7068_s18, 9 }
  0x35   : > { %s7073_s20 = scalar_lea.vmem (!%p607_p4), [#allocation1], %s5556_s19  ;;  %s7141_s21 = scalar_lea.vmem (!%p607_p4), [#allocation3], %s5556_s19 }
  0x36   : > { %s7151_s25 = scalar_lea.vmem (!%p607_p4), %s7351_s1, %s5821_s22 }
  0x39   : > { %6558 = vset.pattern.permute.xlu1 %v6903_v1  ;;  %v6075_v3 = vld [vmem:[%s7073_s20] sm:$0xff]   ;;  %v6459_v4 = vld [vmem:[%s7073_s20 + $0x10] sm:$0xff]   ;;  %v6460_v5 = vld [vmem:[%s7073_s20 + $0x8] sm:$0xff]  }
  0x3a   : > { %v6076_v6 = vunpack.c.l.bf16 %v6075_v3  ;;  %v6077_v7 = vunpack.c.h.bf16 %v6075_v3  ;;  %v6068_v8 = vunpack.c.l.bf16 %v6459_v4  ;;  %v6069_v9 = vunpack.c.h.bf16 %v6459_v4  ;;  %v6458_v10 = vld [vmem:[%s7073_s20 + $0x18] sm:$0xff]   ;;  %v6457_v11 = vld [vmem:[%s7073_s20 + $0x20] sm:$0xff]   ;;  %v6456_v16 = vld [vmem:[%s7073_s20 + $0x28] sm:$0xff]  }
  0x3b   : > { %v6072_v12 = vunpack.c.l.bf16 %v6460_v5  ;;  %v6073_v13 = vunpack.c.h.bf16 %v6460_v5  ;;  %v6064_v14 = vunpack.c.l.bf16 %v6458_v10  ;;  %v6065_v15 = vunpack.c.h.bf16 %v6458_v10  ;;  %v6455_v25 = vld [vmem:[%s7073_s20 + $0x30] sm:$0xff]   ;;  %v6454_v26 = vld [vmem:[%s7073_s20 + $0x38] sm:$0xff]   ;;  %v6453_v33 = vld [vmem:[%s7073_s20 + $0x40] sm:$0xff]  }
  0x3c   : > { %v6548_v17 = vpack.i.bf16 %v6077_v7, %v6076_v6  ;;  %v6559_v18 = vpack.i.bf16 %v6069_v9, %v6068_v8  ;;  %v6060_v19 = vunpack.c.l.bf16 %v6457_v11  ;;  %v6061_v20 = vunpack.c.h.bf16 %v6457_v11  ;;  %v6452_v34 = vld [vmem:[%s7073_s20 + $0x48] sm:$0xff]   ;;  %v6451_v41 = vld [vmem:[%s7073_s20 + $0x50] sm:$0xff]   ;;  %v6450_v42 = vld [vmem:[%s7073_s20 + $0x58] sm:$0xff]  }
  0x3d   : > { %v6553_v21 = vpack.i.bf16 %v6073_v13, %v6072_v12  ;;  %v6564_v22 = vpack.i.bf16 %v6065_v15, %v6064_v14  ;;  %v6056_v23 = vunpack.c.l.bf16 %v6456_v16  ;;  %v6057_v24 = vunpack.c.h.bf16 %v6456_v16  ;;  %v6449_v49 = vld [vmem:[%s7073_s20 + $0x60] sm:$0xff]   ;;  %v6448_v50 = vld [vmem:[%s7073_s20 + $0x68] sm:$0xff]   ;;  %v6447_v57 = vld [vmem:[%s7073_s20 + $0x70] sm:$0xff]  }
  0x3e   : > { %6549 = vperm.xlu0 %4, %v6548_v17   ;;  %6560 = vperm.xlu1 %6558, %v6559_v18   ;;  %v6569_v27 = vpack.i.bf16 %v6061_v20, %v6060_v19  ;;  %v6052_v28 = vunpack.c.l.bf16 %v6455_v25  ;;  %v6053_v30 = vunpack.c.h.bf16 %v6455_v25  ;;  %v6048_v31 = vunpack.c.l.bf16 %v6454_v26  ;;  %v6446_v58 = vld [vmem:[%s7073_s20 + $0x78] sm:$0xff]   ;;  %v6445_v2 = vld [vmem:[%s7073_s20 + $0x80] sm:$0xff]   ;;  %v6444_v3 = vld [vmem:[%s7073_s20 + $0x88] sm:$0xff]  }
  0x3f   : > { %v6574_v29 = vpack.i.bf16 %v6057_v24, %v6056_v23  ;;  %v6049_v32 = vunpack.c.h.bf16 %v6454_v26  ;;  %v6044_v35 = vunpack.c.l.bf16 %v6453_v33  ;;  %v6045_v36 = vunpack.c.h.bf16 %v6453_v33  ;;  %v6443_v10 = vld [vmem:[%s7073_s20 + $0x90] sm:$0xff]   ;;  %v6442_v11 = vld [vmem:[%s7073_s20 + $0x98] sm:$0xff]   ;;  %v6441_v18 = vld [vmem:[%s7073_s20 + $0xa0] sm:$0xff]  }
  0x40   : > { %v6579_v37 = vpack.i.bf16 %v6053_v30, %v6052_v28  ;;  %v6040_v39 = vunpack.c.l.bf16 %v6452_v34  ;;  %v6041_v40 = vunpack.c.h.bf16 %v6452_v34  ;;  %v6036_v44 = vunpack.c.l.bf16 %v6451_v41  ;;  %v6440_v19 = vld [vmem:[%s7073_s20 + $0xa8] sm:$0xff]   ;;  %v6439_v26 = vld [vmem:[%s7073_s20 + $0xb0] sm:$0xff]   ;;  %v6437_v34 = vld [vmem:[%s7073_s20 + $0xc0] sm:$0xff]  }
  0x41   : > { %v6584_v38 = vpack.i.bf16 %v6049_v32, %v6048_v31  ;;  %v6589_v43 = vpack.i.bf16 %v6045_v36, %v6044_v35  ;;  %v6037_v46 = vunpack.c.h.bf16 %v6451_v41  ;;  %v6032_v47 = vunpack.c.l.bf16 %v6450_v42  ;;  %v6436_v35 = vld [vmem:[%s7073_s20 + $0xc8] sm:$0xff]  }
  0x42   : > { %6554 = vperm.xlu0 %4, %v6553_v21   ;;  %6565 = vperm.xlu1 %6558, %v6564_v22   ;;  %v6594_v45 = vpack.i.bf16 %v6041_v40, %v6040_v39  ;;  %v6033_v48 = vunpack.c.h.bf16 %v6450_v42  ;;  %v6028_v51 = vunpack.c.l.bf16 %v6449_v49  ;;  %v6029_v52 = vunpack.c.h.bf16 %v6449_v49  ;;  %v6435_v42 = vld [vmem:[%s7073_s20 + $0xd0] sm:$0xff]  }
  0x43   : > { %v6599_v53 = vpack.i.bf16 %v6037_v46, %v6036_v44  ;;  %v6024_v55 = vunpack.c.l.bf16 %v6448_v50  ;;  %v6025_v56 = vunpack.c.h.bf16 %v6448_v50  ;;  %v6020_v60 = vunpack.c.l.bf16 %v6447_v57  ;;  %v6433_v50 = vld [vmem:[%s7073_s20 + $0xe0] sm:$0xff]  }
  0x44   : > { %v6604_v54 = vpack.i.bf16 %v6033_v48, %v6032_v47  ;;  %v6609_v59 = vpack.i.bf16 %v6029_v52, %v6028_v51  ;;  %v6021_v62 = vunpack.c.h.bf16 %v6447_v57  ;;  %v6016_v63 = vunpack.c.l.bf16 %v6446_v58  ;;  %v6432_v51 = vld [vmem:[%s7073_s20 + $0xe8] sm:$0xff]  }
  0x45   : > { %v6614_v61 = vpack.i.bf16 %v6025_v56, %v6024_v55  ;;  %v6017_v0 = vunpack.c.h.bf16 %v6446_v58  ;;  %v6012_v4 = vunpack.c.l.bf16 %v6445_v2  ;;  %v6013_v5 = vunpack.c.h.bf16 %v6445_v2  ;;  %v6431_v58 = vld [vmem:[%s7073_s20 + $0xf0] sm:$0xff]  }
  0x46   : > { %6570 = vperm.xlu0 %4, %v6569_v27   ;;  %6575 = vperm.xlu1 %6558, %v6574_v29   ;;  %v6619_v6 = vpack.i.bf16 %v6021_v62, %v6020_v60  ;;  %v6008_v8 = vunpack.c.l.bf16 %v6444_v3  ;;  %v6009_v9 = vunpack.c.h.bf16 %v6444_v3  ;;  %v6004_v13 = vunpack.c.l.bf16 %v6443_v10  ;;  %v6438_v27 = vld [vmem:[%s7073_s20 + $0xb8] sm:$0xff]   ;;  %v6429_v3 = vld [vmem:[%s7073_s20 + $0x100] sm:$0xff]  }
  0x47   : > { %v6624_v7 = vpack.i.bf16 %v6017_v0, %v6016_v63  ;;  %v6629_v12 = vpack.i.bf16 %v6013_v5, %v6012_v4  ;;  %v6005_v15 = vunpack.c.h.bf16 %v6443_v10  ;;  %v6000_v16 = vunpack.c.l.bf16 %v6442_v11  ;;  %v6428_v4 = vld [vmem:[%s7073_s20 + $0x108] sm:$0xff]  }
  0x48   : > { %v6634_v14 = vpack.i.bf16 %v6009_v9, %v6008_v8  ;;  %v6001_v17 = vunpack.c.h.bf16 %v6442_v11  ;;  %v5996_v20 = vunpack.c.l.bf16 %v6441_v18  ;;  %v5997_v21 = vunpack.c.h.bf16 %v6441_v18  ;;  %v6427_v11 = vld [vmem:[%s7073_s20 + $0x110] sm:$0xff]  }
  0x49   : > { %v6639_v22 = vpack.i.bf16 %v6005_v15, %v6004_v13  ;;  %v5992_v24 = vunpack.c.l.bf16 %v6440_v19  ;;  %v5993_v25 = vunpack.c.h.bf16 %v6440_v19  ;;  %v5988_v29 = vunpack.c.l.bf16 %v6439_v26  ;;  %v6425_v19 = vld [vmem:[%s7073_s20 + $0x120] sm:$0xff]  }
  0x4a   : > { %6580 = vperm.xlu0 %4, %v6579_v37   ;;  %6585 = vperm.xlu1 %6558, %v6584_v38   ;;  %v6644_v23 = vpack.i.bf16 %v6001_v17, %v6000_v16  ;;  %v6649_v28 = vpack.i.bf16 %v5997_v21, %v5996_v20  ;;  %v5989_v31 = vunpack.c.h.bf16 %v6439_v26  ;;  %v5984_v32 = vunpack.c.l.bf16 %v6438_v27  ;;  %v6424_v20 = vld [vmem:[%s7073_s20 + $0x128] sm:$0xff]  }
  0x4b   : > { %v6654_v30 = vpack.i.bf16 %v5993_v25, %v5992_v24  ;;  %v5985_v33 = vunpack.c.h.bf16 %v6438_v27  ;;  %v5980_v36 = vunpack.c.l.bf16 %v6437_v34  ;;  %v5981_v37 = vunpack.c.h.bf16 %v6437_v34  ;;  %v6423_v27 = vld [vmem:[%s7073_s20 + $0x130] sm:$0xff]  }
  0x4c   : > { %v6659_v38 = vpack.i.bf16 %v5989_v31, %v5988_v29  ;;  %v5976_v40 = vunpack.c.l.bf16 %v6436_v35  ;;  %v5977_v41 = vunpack.c.h.bf16 %v6436_v35  ;;  %v5973_v47 = vunpack.c.h.bf16 %v6435_v42  ;;  %v6421_v35 = vld [vmem:[%s7073_s20 + $0x140] sm:$0xff]  }
  0x4d   : > { %v6664_v39 = vpack.i.bf16 %v5985_v33, %v5984_v32  ;;  %v6669_v44 = vpack.i.bf16 %v5981_v37, %v5980_v36  ;;  %v5964_v52 = vunpack.c.l.bf16 %v6433_v50  ;;  %v5960_v56 = vunpack.c.l.bf16 %v6432_v51  ;;  %v6420_v36 = vld [vmem:[%s7073_s20 + $0x148] sm:$0xff]  }
  0x4e   : > { %6590 = vperm.xlu0 %4, %v6589_v43   ;;  %6595 = vperm.xlu1 %6558, %v6594_v45   ;;  %v6434_v43 = vld [vmem:[%s7073_s20 + $0xd8] sm:$0xff]   ;;  %v5972_v45 = vunpack.c.l.bf16 %v6435_v42  ;;  %v6674_v46 = vpack.i.bf16 %v5977_v41, %v5976_v40  ;;  %v5961_v57 = vunpack.c.h.bf16 %v6432_v51  ;;  %v5957_v63 = vunpack.c.h.bf16 %v6431_v58  ;;  %v6417_v51 = vld [vmem:[%s7073_s20 + $0x160] sm:$0xff]  }
  0x4f   : > { %v5968_v48 = vunpack.c.l.bf16 %v6434_v43  ;;  %v5969_v49 = vunpack.c.h.bf16 %v6434_v43  ;;  %v5948_v5 = vunpack.c.l.bf16 %v6429_v3  ;;  %v5944_v9 = vunpack.c.l.bf16 %v6428_v4  ;;  %v6419_v43 = vld [vmem:[%s7073_s20 + $0x150] sm:$0xff]  }
  0x50   : > { %v6694_v62 = vpack.i.bf16 %v5961_v57, %v5960_v56  ;;  %v5945_v10 = vunpack.c.h.bf16 %v6428_v4  ;;  %v5941_v16 = vunpack.c.h.bf16 %v6427_v11  ;;  %v5932_v21 = vunpack.c.l.bf16 %v6425_v19  ;;  %v6413_v4 = vld [vmem:[%s7073_s20 + $0x180] sm:$0xff]  }
  0x51   : > { %v6684_v55 = vpack.i.bf16 %v5969_v49, %v5968_v48  ;;  %v5928_v25 = vunpack.c.l.bf16 %v6424_v20  ;;  %v5929_v26 = vunpack.c.h.bf16 %v6424_v20  ;;  %v5925_v32 = vunpack.c.h.bf16 %v6423_v27  ;;  %v6409_v20 = vld [vmem:[%s7073_s20 + $0x1a0] sm:$0xff]  }
  0x52   : > { %6600 = vperm.xlu0 %4, %v6599_v53   ;;  %6605 = vperm.xlu1 %6558, %v6604_v54   ;;  %v5965_v53 = vunpack.c.h.bf16 %v6433_v50  ;;  %v6679_v54 = vpack.i.bf16 %v5973_v47, %v5972_v45  ;;  %v6714_v15 = vpack.i.bf16 %v5945_v10, %v5944_v9  ;;  %v5916_v37 = vunpack.c.l.bf16 %v6421_v35 }
  0x53   : > { %v6734_v31 = vpack.i.bf16 %v5929_v26, %v5928_v25  ;;  %v5912_v41 = vunpack.c.l.bf16 %v6420_v36  ;;  %v5913_v42 = vunpack.c.h.bf16 %v6420_v36  ;;  %v5909_v48 = vunpack.c.h.bf16 %v6419_v43  ;;  %v6405_v36 = vld [vmem:[%s7073_s20 + $0x1c0] sm:$0xff]  }
  0x54   : > { %v6689_v60 = vpack.i.bf16 %v5965_v53, %v5964_v52  ;;  %v6416_v52 = vld [vmem:[%s7073_s20 + $0x168] sm:$0xff]   ;;  %v5900_v53 = vunpack.c.l.bf16 %v6417_v51 }
  0x55   : > { %v6754_v47 = vpack.i.bf16 %v5913_v42, %v5912_v41  ;;  %v5896_v57 = vunpack.c.l.bf16 %v6416_v52 }
  0x56   : > { %6610 = vperm.xlu0 %4, %v6609_v59   ;;  %6615 = vperm.xlu1 %6558, %v6614_v61   ;;  %v6430_v59 = vld [vmem:[%s7073_s20 + $0xf8] sm:$0xff]   ;;  %v5956_v61 = vunpack.c.l.bf16 %v6431_v58  ;;  %v5897_v58 = vunpack.c.h.bf16 %v6416_v52  ;;  %v6401_v52 = vld [vmem:[%s7073_s20 + $0x1e0] sm:$0xff]  }
  0x57   : > { %v5952_v0 = vunpack.c.l.bf16 %v6430_v59  ;;  %v5953_v2 = vunpack.c.h.bf16 %v6430_v59  ;;  %v6415_v59 = vld [vmem:[%s7073_s20 + $0x170] sm:$0xff]  }
  0x59   : > { %v6704_v8 = vpack.i.bf16 %v5953_v2, %v5952_v0  ;;  %v5893_v0 = vunpack.c.h.bf16 %v6415_v59 }
  0x5a   : > { %6620 = vperm.xlu0 %4, %v6619_v6   ;;  %6625 = vperm.xlu1 %6558, %v6624_v7   ;;  %v5949_v6 = vunpack.c.h.bf16 %v6429_v3  ;;  %v6699_v7 = vpack.i.bf16 %v5957_v63, %v5956_v61  ;;  %v6774_v63 = vpack.i.bf16 %v5897_v58, %v5896_v57 }
  0x5c   : > { %v6709_v13 = vpack.i.bf16 %v5949_v6, %v5948_v5  ;;  %v6412_v5 = vld [vmem:[%s7073_s20 + $0x188] sm:$0xff]   ;;  %v5884_v6 = vunpack.c.l.bf16 %v6413_v4 }
  0x5d   : > { %v5880_v10 = vunpack.c.l.bf16 %v6412_v5 }
  0x5e   : > { %6630 = vperm.xlu0 %4, %v6629_v12   ;;  %6635 = vperm.xlu1 %6558, %v6634_v14   ;;  %v6426_v12 = vld [vmem:[%s7073_s20 + $0x118] sm:$0xff]   ;;  %v5940_v14 = vunpack.c.l.bf16 %v6427_v11  ;;  %v5881_v11 = vunpack.c.h.bf16 %v6412_v5 }
  0x5f   : > { %v5936_v17 = vunpack.c.l.bf16 %v6426_v12  ;;  %v5937_v18 = vunpack.c.h.bf16 %v6426_v12  ;;  %v6411_v12 = vld [vmem:[%s7073_s20 + $0x190] sm:$0xff]  }
  0x61   : > { %v6724_v24 = vpack.i.bf16 %v5937_v18, %v5936_v17  ;;  %v5877_v17 = vunpack.c.h.bf16 %v6411_v12 }
  0x62   : > { %6640 = vperm.xlu0 %4, %v6639_v22   ;;  %6645 = vperm.xlu1 %6558, %v6644_v23   ;;  %v5933_v22 = vunpack.c.h.bf16 %v6425_v19  ;;  %v6719_v23 = vpack.i.bf16 %v5941_v16, %v5940_v14  ;;  %v6794_v16 = vpack.i.bf16 %v5881_v11, %v5880_v10 }
  0x64   : > { %v6729_v29 = vpack.i.bf16 %v5933_v22, %v5932_v21  ;;  %v6408_v21 = vld [vmem:[%s7073_s20 + $0x1a8] sm:$0xff]   ;;  %v5868_v22 = vunpack.c.l.bf16 %v6409_v20 }
  0x65   : > { %v5864_v26 = vunpack.c.l.bf16 %v6408_v21 }
  0x66   : > { %6650 = vperm.xlu0 %4, %v6649_v28   ;;  %6655 = vperm.xlu1 %6558, %v6654_v30   ;;  %v6422_v28 = vld [vmem:[%s7073_s20 + $0x138] sm:$0xff]   ;;  %v5924_v30 = vunpack.c.l.bf16 %v6423_v27  ;;  %v5865_v27 = vunpack.c.h.bf16 %v6408_v21 }
  0x67   : > { %v5920_v33 = vunpack.c.l.bf16 %v6422_v28  ;;  %v5921_v34 = vunpack.c.h.bf16 %v6422_v28  ;;  %v6407_v28 = vld [vmem:[%s7073_s20 + $0x1b0] sm:$0xff]  }
  0x69   : > { %v6744_v40 = vpack.i.bf16 %v5921_v34, %v5920_v33  ;;  %v5861_v33 = vunpack.c.h.bf16 %v6407_v28 }
  0x6a   : > { %6660 = vperm.xlu0 %4, %v6659_v38   ;;  %6665 = vperm.xlu1 %6558, %v6664_v39   ;;  %v5917_v38 = vunpack.c.h.bf16 %v6421_v35  ;;  %v6739_v39 = vpack.i.bf16 %v5925_v32, %v5924_v30  ;;  %v6814_v32 = vpack.i.bf16 %v5865_v27, %v5864_v26 }
  0x6c   : > { %v6749_v45 = vpack.i.bf16 %v5917_v38, %v5916_v37  ;;  %v6404_v37 = vld [vmem:[%s7073_s20 + $0x1c8] sm:$0xff]   ;;  %v5852_v38 = vunpack.c.l.bf16 %v6405_v36 }
  0x6d   : > { %v5848_v42 = vunpack.c.l.bf16 %v6404_v37 }
  0x6e   : > { %6670 = vperm.xlu0 %4, %v6669_v44   ;;  %6675 = vperm.xlu1 %6558, %v6674_v46   ;;  %v6418_v44 = vld [vmem:[%s7073_s20 + $0x158] sm:$0xff]   ;;  %v5908_v46 = vunpack.c.l.bf16 %v6419_v43  ;;  %v5849_v43 = vunpack.c.h.bf16 %v6404_v37 }
  0x6f   : > { %v5904_v49 = vunpack.c.l.bf16 %v6418_v44  ;;  %v5905_v50 = vunpack.c.h.bf16 %v6418_v44  ;;  %v6403_v44 = vld [vmem:[%s7073_s20 + $0x1d0] sm:$0xff]  }
  0x71   : > { %v6764_v56 = vpack.i.bf16 %v5905_v50, %v5904_v49  ;;  %v5845_v49 = vunpack.c.h.bf16 %v6403_v44 }
  0x72   : > { %6680 = vperm.xlu0 %4, %v6679_v54   ;;  %6685 = vperm.xlu1 %6558, %v6684_v55   ;;  %v5901_v54 = vunpack.c.h.bf16 %v6417_v51  ;;  %v6759_v55 = vpack.i.bf16 %v5909_v48, %v5908_v46  ;;  %v6834_v48 = vpack.i.bf16 %v5849_v43, %v5848_v42 }
  0x74   : > { %v6769_v61 = vpack.i.bf16 %v5901_v54, %v5900_v53  ;;  %v6400_v53 = vld [vmem:[%s7073_s20 + $0x1e8] sm:$0xff]   ;;  %v5836_v54 = vunpack.c.l.bf16 %v6401_v52 }
  0x75   : > { %v5832_v58 = vunpack.c.l.bf16 %v6400_v53 }
  0x76   : > { %6690 = vperm.xlu0 %4, %v6689_v60   ;;  %6695 = vperm.xlu1 %6558, %v6694_v62   ;;  %v6414_v60 = vld [vmem:[%s7073_s20 + $0x178] sm:$0xff]   ;;  %v5892_v62 = vunpack.c.l.bf16 %v6415_v59  ;;  %v5833_v59 = vunpack.c.h.bf16 %v6400_v53 }
  0x77   : > { %v5888_v2 = vunpack.c.l.bf16 %v6414_v60  ;;  %v5889_v3 = vunpack.c.h.bf16 %v6414_v60  ;;  %v6399_v60 = vld [vmem:[%s7073_s20 + $0x1f0] sm:$0xff]  }
  0x79   : > { %v6784_v9 = vpack.i.bf16 %v5889_v3, %v5888_v2  ;;  %v5829_v2 = vunpack.c.h.bf16 %v6399_v60 }
  0x7a   : > { %6700 = vperm.xlu0 %4, %v6699_v7   ;;  %6705 = vperm.xlu1 %6558, %v6704_v8   ;;  %v5885_v7 = vunpack.c.h.bf16 %v6413_v4  ;;  %v6779_v8 = vpack.i.bf16 %v5893_v0, %v5892_v62  ;;  %v6854_v0 = vpack.i.bf16 %v5833_v59, %v5832_v58 }
  0x7c   : > { %v6789_v14 = vpack.i.bf16 %v5885_v7, %v5884_v6 }
  0x7e   : > { %6710 = vperm.xlu0 %4, %v6709_v13   ;;  %6715 = vperm.xlu1 %6558, %v6714_v15   ;;  %v6410_v13 = vld [vmem:[%s7073_s20 + $0x198] sm:$0xff]   ;;  %v5876_v15 = vunpack.c.l.bf16 %v6411_v12 }
  0x7f   : > { %v5872_v18 = vunpack.c.l.bf16 %v6410_v13  ;;  %v5873_v19 = vunpack.c.h.bf16 %v6410_v13 }
  0x81   : > { %v6804_v25 = vpack.i.bf16 %v5873_v19, %v5872_v18 }
  0x82   : > { %6720 = vperm.xlu0 %4, %v6719_v23   ;;  %6725 = vperm.xlu1 %6558, %v6724_v24   ;;  %v5869_v23 = vunpack.c.h.bf16 %v6409_v20  ;;  %v6799_v24 = vpack.i.bf16 %v5877_v17, %v5876_v15 }
  0x84   : > { %v6809_v30 = vpack.i.bf16 %v5869_v23, %v5868_v22 }
  0x86   : > { %6730 = vperm.xlu0 %4, %v6729_v29   ;;  %6735 = vperm.xlu1 %6558, %v6734_v31   ;;  %v6406_v29 = vld [vmem:[%s7073_s20 + $0x1b8] sm:$0xff]   ;;  %v5860_v31 = vunpack.c.l.bf16 %v6407_v28 }
  0x87   : > { %v5856_v34 = vunpack.c.l.bf16 %v6406_v29  ;;  %v5857_v35 = vunpack.c.h.bf16 %v6406_v29 }
  0x89   : > { %v6824_v41 = vpack.i.bf16 %v5857_v35, %v5856_v34 }
  0x8a   : > { %6740 = vperm.xlu0 %4, %v6739_v39   ;;  %6745 = vperm.xlu1 %6558, %v6744_v40   ;;  %v5853_v39 = vunpack.c.h.bf16 %v6405_v36  ;;  %v6819_v40 = vpack.i.bf16 %v5861_v33, %v5860_v31 }
  0x8c   : > { %v6829_v46 = vpack.i.bf16 %v5853_v39, %v5852_v38 }
  0x8e   : > { %6750 = vperm.xlu0 %4, %v6749_v45   ;;  %6755 = vperm.xlu1 %6558, %v6754_v47   ;;  %v6402_v45 = vld [vmem:[%s7073_s20 + $0x1d8] sm:$0xff]   ;;  %v5844_v47 = vunpack.c.l.bf16 %v6403_v44 }
  0x8f   : > { %v5840_v50 = vunpack.c.l.bf16 %v6402_v45  ;;  %v5841_v51 = vunpack.c.h.bf16 %v6402_v45 }
  0x91   : > { %v6844_v57 = vpack.i.bf16 %v5841_v51, %v5840_v50 }
  0x92   : > { %6760 = vperm.xlu0 %4, %v6759_v55   ;;  %6765 = vperm.xlu1 %6558, %v6764_v56   ;;  %v5837_v55 = vunpack.c.h.bf16 %v6401_v52  ;;  %v6839_v56 = vpack.i.bf16 %v5845_v49, %v5844_v47 }
  0x94   : > { %v6849_v62 = vpack.i.bf16 %v5837_v55, %v5836_v54 }
  0x96   : > { %6770 = vperm.xlu0 %4, %v6769_v61   ;;  %6775 = vperm.xlu1 %6558, %v6774_v63   ;;  %v6398_v61 = vld [vmem:[%s7073_s20 + $0x1f8] sm:$0xff]   ;;  %v5828_v63 = vunpack.c.l.bf16 %v6399_v60 }
  0x97   : > { %v5824_v3 = vunpack.c.l.bf16 %v6398_v61  ;;  %v5825_v4 = vunpack.c.h.bf16 %v6398_v61 }
  0x98   : > { %v6859_v5 = vpack.i.bf16 %v5829_v2, %v5828_v63 }
  0x99   : > { %v6864_v6 = vpack.i.bf16 %v5825_v4, %v5824_v3 }
  0x9a   : > { %6780 = vperm.xlu0 %4, %v6779_v8   ;;  %6785 = vperm.xlu1 %6558, %v6784_v9  }
  0x9e   : > { %6790 = vperm.xlu0 %4, %v6789_v14   ;;  %6795 = vperm.xlu1 %6558, %v6794_v16  }
  0xa2   : > { %6800 = vperm.xlu0 %4, %v6799_v24   ;;  %6805 = vperm.xlu1 %6558, %v6804_v25  }
  0xa6   : > { %6810 = vperm.xlu0 %4, %v6809_v30   ;;  %6815 = vperm.xlu1 %6558, %v6814_v32  }
  0xaa   : > { %6820 = vperm.xlu0 %4, %v6819_v40   ;;  %6825 = vperm.xlu1 %6558, %v6824_v41  }
  0xae   : > { %6830 = vperm.xlu0 %4, %v6829_v46   ;;  %6835 = vperm.xlu1 %6558, %v6834_v48  }
  0xb2   : > { %6840 = vperm.xlu0 %4, %v6839_v56   ;;  %6845 = vperm.xlu1 %6558, %v6844_v57  }
  0xb6   : > { %6850 = vperm.xlu0 %4, %v6849_v62   ;;  %6855 = vperm.xlu1 %6558, %v6854_v0  }
  0xb9   : > { %v6550_v7 = vpop.permute.xlu0 %6549  ;;  %v6561_v8 = vpop.permute.xlu1 %6560 }
  0xba   : > { %v6552_v9 = vunpack.i.h.bf16 %v6550_v7  ;;  %v6551_v10 = vunpack.i.l.bf16 %v6550_v7  ;;  %v6563_v11 = vunpack.i.h.bf16 %v6561_v8  ;;  %v6562_v12 = vunpack.i.l.bf16 %v6561_v8  ;;  %6860 = vperm.xlu0 %4, %v6859_v5   ;;  %6865 = vperm.xlu1 %6558, %v6864_v6  }
  0xbc   : > { %v6081_v13 = vpack.c.bf16 %v6552_v9, %v6551_v10  ;;  %v6091_v14 = vpack.c.bf16 %v6563_v11, %v6562_v12 }
  0xbd   : > { %v6555_v15 = vpop.permute.xlu0 %6554  ;;  %v6566_v16 = vpop.permute.xlu1 %6565 }
  0xbe   : > { %6082 = vst [vmem:[%s7141_s21] sm:$0xff] %v6081_v13   ;;  %6462 = vst [vmem:[%s7141_s21 + $0x10] sm:$0xff] %v6091_v14   ;;  %v6557_v17 = vunpack.i.h.bf16 %v6555_v15  ;;  %v6556_v18 = vunpack.i.l.bf16 %v6555_v15  ;;  %v6568_v19 = vunpack.i.h.bf16 %v6566_v16  ;;  %v6567_v20 = vunpack.i.l.bf16 %v6566_v16 }
  0xc0   : > { %v6086_v21 = vpack.c.bf16 %v6557_v17, %v6556_v18  ;;  %v6096_v22 = vpack.c.bf16 %v6568_v19, %v6567_v20 }
  0xc1   : > { %v6571_v23 = vpop.permute.xlu0 %6570  ;;  %v6576_v24 = vpop.permute.xlu1 %6575 }
  0xc2   : > { %6461 = vst [vmem:[%s7141_s21 + $0x8] sm:$0xff] %v6086_v21   ;;  %6463 = vst [vmem:[%s7141_s21 + $0x18] sm:$0xff] %v6096_v22   ;;  %v6573_v25 = vunpack.i.h.bf16 %v6571_v23  ;;  %v6572_v26 = vunpack.i.l.bf16 %v6571_v23  ;;  %v6578_v27 = vunpack.i.h.bf16 %v6576_v24  ;;  %v6577_v28 = vunpack.i.l.bf16 %v6576_v24 }
  0xc4   : > { %v6101_v29 = vpack.c.bf16 %v6573_v25, %v6572_v26  ;;  %v6106_v30 = vpack.c.bf16 %v6578_v27, %v6577_v28 }
  0xc5   : > { %v4495_v31 = vld [vmem:[%s7141_s21] sm:$0xff]   ;;  %v4503_v32 = vld [vmem:[%s7141_s21 + $0x10] sm:$0xff]   ;;  %v6581_v33 = vpop.permute.xlu0 %6580  ;;  %v6586_v34 = vpop.permute.xlu1 %6585 }
  0xc6   : > { %4496 = vst [vmem:[%s7151_s25] sm:$0xff] %v4495_v31   ;;  %4504 = vst [vmem:[%s7151_s25 + $0x10] sm:$0xff] %v4503_v32   ;;  %v6583_v35 = vunpack.i.h.bf16 %v6581_v33  ;;  %v6582_v36 = vunpack.i.l.bf16 %v6581_v33  ;;  %v6588_v37 = vunpack.i.h.bf16 %v6586_v34  ;;  %v6587_v38 = vunpack.i.l.bf16 %v6586_v34 }
  0xc7   : > { %6464 = vst [vmem:[%s7141_s21 + $0x20] sm:$0xff] %v6101_v29   ;;  %6465 = vst [vmem:[%s7141_s21 + $0x28] sm:$0xff] %v6106_v30  }
  0xc8   : > { %v6111_v39 = vpack.c.bf16 %v6583_v35, %v6582_v36  ;;  %v6116_v40 = vpack.c.bf16 %v6588_v37, %v6587_v38 }
  0xc9   : > { %v4499_v41 = vld [vmem:[%s7141_s21 + $0x8] sm:$0xff]   ;;  %v4507_v42 = vld [vmem:[%s7141_s21 + $0x18] sm:$0xff]   ;;  %v6591_v43 = vpop.permute.xlu0 %6590  ;;  %v6596_v44 = vpop.permute.xlu1 %6595 }
  0xca   : > { %4500 = vst [vmem:[%s7151_s25 + $0x8] sm:$0xff] %v4499_v41   ;;  %4508 = vst [vmem:[%s7151_s25 + $0x18] sm:$0xff] %v4507_v42   ;;  %v6593_v45 = vunpack.i.h.bf16 %v6591_v43  ;;  %v6592_v46 = vunpack.i.l.bf16 %v6591_v43  ;;  %v6598_v47 = vunpack.i.h.bf16 %v6596_v44  ;;  %v6597_v48 = vunpack.i.l.bf16 %v6596_v44 }
  0xcb   : > { %6466 = vst [vmem:[%s7141_s21 + $0x30] sm:$0xff] %v6111_v39   ;;  %6467 = vst [vmem:[%s7141_s21 + $0x38] sm:$0xff] %v6116_v40  }
  0xcc   : > { %v6121_v49 = vpack.c.bf16 %v6593_v45, %v6592_v46  ;;  %v6126_v50 = vpack.c.bf16 %v6598_v47, %v6597_v48 }
  0xcd   : > { %v6601_v53 = vpop.permute.xlu0 %6600  ;;  %v6606_v54 = vpop.permute.xlu1 %6605 }
  0xce   : > { %v4511_v51 = vld [vmem:[%s7141_s21 + $0x20] sm:$0xff]   ;;  %v4515_v52 = vld [vmem:[%s7141_s21 + $0x28] sm:$0xff]   ;;  %6468 = vst [vmem:[%s7141_s21 + $0x40] sm:$0xff] %v6121_v49   ;;  %6469 = vst [vmem:[%s7141_s21 + $0x48] sm:$0xff] %v6126_v50   ;;  %v6603_v55 = vunpack.i.h.bf16 %v6601_v53  ;;  %v6602_v56 = vunpack.i.l.bf16 %v6601_v53  ;;  %v6608_v57 = vunpack.i.h.bf16 %v6606_v54  ;;  %v6607_v58 = vunpack.i.l.bf16 %v6606_v54 }
  0xcf   : > { %4512 = vst [vmem:[%s7151_s25 + $0x20] sm:$0xff] %v4511_v51   ;;  %4516 = vst [vmem:[%s7151_s25 + $0x28] sm:$0xff] %v4515_v52  }
  0xd0   : > { %v6131_v59 = vpack.c.bf16 %v6603_v55, %v6602_v56  ;;  %v6136_v60 = vpack.c.bf16 %v6608_v57, %v6607_v58 }
  0xd1   : > { %v6611_v63 = vpop.permute.xlu0 %6610  ;;  %v6616_v0 = vpop.permute.xlu1 %6615 }
  0xd2   : > { %v4519_v61 = vld [vmem:[%s7141_s21 + $0x30] sm:$0xff]   ;;  %v4523_v62 = vld [vmem:[%s7141_s21 + $0x38] sm:$0xff]   ;;  %6470 = vst [vmem:[%s7141_s21 + $0x50] sm:$0xff] %v6131_v59   ;;  %6471 = vst [vmem:[%s7141_s21 + $0x58] sm:$0xff] %v6136_v60   ;;  %v6613_v2 = vunpack.i.h.bf16 %v6611_v63  ;;  %v6612_v3 = vunpack.i.l.bf16 %v6611_v63  ;;  %v6618_v4 = vunpack.i.h.bf16 %v6616_v0  ;;  %v6617_v5 = vunpack.i.l.bf16 %v6616_v0 }
  0xd3   : > { %4520 = vst [vmem:[%s7151_s25 + $0x30] sm:$0xff] %v4519_v61   ;;  %4524 = vst [vmem:[%s7151_s25 + $0x38] sm:$0xff] %v4523_v62  }
  0xd4   : > { %v6141_v6 = vpack.c.bf16 %v6613_v2, %v6612_v3  ;;  %v6146_v7 = vpack.c.bf16 %v6618_v4, %v6617_v5 }
  0xd5   : > { %v4527_v8 = vld [vmem:[%s7141_s21 + $0x40] sm:$0xff]   ;;  %v4531_v9 = vld [vmem:[%s7141_s21 + $0x48] sm:$0xff]   ;;  %v6621_v10 = vpop.permute.xlu0 %6620  ;;  %v6626_v11 = vpop.permute.xlu1 %6625 }
  0xd6   : > { %4528 = vst [vmem:[%s7151_s25 + $0x40] sm:$0xff] %v4527_v8   ;;  %4532 = vst [vmem:[%s7151_s25 + $0x48] sm:$0xff] %v4531_v9   ;;  %v6623_v12 = vunpack.i.h.bf16 %v6621_v10  ;;  %v6622_v13 = vunpack.i.l.bf16 %v6621_v10  ;;  %v6628_v14 = vunpack.i.h.bf16 %v6626_v11  ;;  %v6627_v15 = vunpack.i.l.bf16 %v6626_v11 }
  0xd7   : > { %6472 = vst [vmem:[%s7141_s21 + $0x60] sm:$0xff] %v6141_v6   ;;  %6473 = vst [vmem:[%s7141_s21 + $0x68] sm:$0xff] %v6146_v7  }
  0xd8   : > { %v6151_v16 = vpack.c.bf16 %v6623_v12, %v6622_v13  ;;  %v6156_v17 = vpack.c.bf16 %v6628_v14, %v6627_v15 }
  0xd9   : > { %v4535_v18 = vld [vmem:[%s7141_s21 + $0x50] sm:$0xff]   ;;  %v4539_v19 = vld [vmem:[%s7141_s21 + $0x58] sm:$0xff]   ;;  %v6631_v20 = vpop.permute.xlu0 %6630  ;;  %v6636_v21 = vpop.permute.xlu1 %6635 }
  0xda   : > { %4536 = vst [vmem:[%s7151_s25 + $0x50] sm:$0xff] %v4535_v18   ;;  %4540 = vst [vmem:[%s7151_s25 + $0x58] sm:$0xff] %v4539_v19   ;;  %v6633_v22 = vunpack.i.h.bf16 %v6631_v20  ;;  %v6632_v23 = vunpack.i.l.bf16 %v6631_v20  ;;  %v6638_v24 = vunpack.i.h.bf16 %v6636_v21  ;;  %v6637_v25 = vunpack.i.l.bf16 %v6636_v21 }
  0xdb   : > { %6474 = vst [vmem:[%s7141_s21 + $0x70] sm:$0xff] %v6151_v16   ;;  %6475 = vst [vmem:[%s7141_s21 + $0x78] sm:$0xff] %v6156_v17  }
  0xdc   : > { %v6161_v26 = vpack.c.bf16 %v6633_v22, %v6632_v23  ;;  %v6166_v27 = vpack.c.bf16 %v6638_v24, %v6637_v25 }
  0xdd   : > { %v6641_v30 = vpop.permute.xlu0 %6640  ;;  %v6646_v31 = vpop.permute.xlu1 %6645 }
  0xde   : > { %v4543_v28 = vld [vmem:[%s7141_s21 + $0x60] sm:$0xff]   ;;  %v4547_v29 = vld [vmem:[%s7141_s21 + $0x68] sm:$0xff]   ;;  %6476 = vst [vmem:[%s7141_s21 + $0x80] sm:$0xff] %v6161_v26   ;;  %6477 = vst [vmem:[%s7141_s21 + $0x88] sm:$0xff] %v6166_v27   ;;  %v6643_v32 = vunpack.i.h.bf16 %v6641_v30  ;;  %v6642_v33 = vunpack.i.l.bf16 %v6641_v30  ;;  %v6648_v34 = vunpack.i.h.bf16 %v6646_v31  ;;  %v6647_v35 = vunpack.i.l.bf16 %v6646_v31 }
  0xdf   : > { %4544 = vst [vmem:[%s7151_s25 + $0x60] sm:$0xff] %v4543_v28   ;;  %4548 = vst [vmem:[%s7151_s25 + $0x68] sm:$0xff] %v4547_v29  }
  0xe0   : > { %v6171_v36 = vpack.c.bf16 %v6643_v32, %v6642_v33  ;;  %v6176_v37 = vpack.c.bf16 %v6648_v34, %v6647_v35 }
  0xe1   : > { %v6651_v40 = vpop.permute.xlu0 %6650  ;;  %v6656_v41 = vpop.permute.xlu1 %6655 }
  0xe2   : > { %v4551_v38 = vld [vmem:[%s7141_s21 + $0x70] sm:$0xff]   ;;  %v4555_v39 = vld [vmem:[%s7141_s21 + $0x78] sm:$0xff]   ;;  %6478 = vst [vmem:[%s7141_s21 + $0x90] sm:$0xff] %v6171_v36   ;;  %6479 = vst [vmem:[%s7141_s21 + $0x98] sm:$0xff] %v6176_v37   ;;  %v6653_v42 = vunpack.i.h.bf16 %v6651_v40  ;;  %v6652_v43 = vunpack.i.l.bf16 %v6651_v40  ;;  %v6658_v44 = vunpack.i.h.bf16 %v6656_v41  ;;  %v6657_v45 = vunpack.i.l.bf16 %v6656_v41 }
  0xe3   : > { %4552 = vst [vmem:[%s7151_s25 + $0x70] sm:$0xff] %v4551_v38   ;;  %4556 = vst [vmem:[%s7151_s25 + $0x78] sm:$0xff] %v4555_v39  }
  0xe4   : > { %v6181_v46 = vpack.c.bf16 %v6653_v42, %v6652_v43  ;;  %v6186_v47 = vpack.c.bf16 %v6658_v44, %v6657_v45 }
  0xe5   : > { %v4559_v48 = vld [vmem:[%s7141_s21 + $0x80] sm:$0xff]   ;;  %v4563_v49 = vld [vmem:[%s7141_s21 + $0x88] sm:$0xff]   ;;  %v6661_v50 = vpop.permute.xlu0 %6660  ;;  %v6666_v51 = vpop.permute.xlu1 %6665 }
  0xe6   : > { %4560 = vst [vmem:[%s7151_s25 + $0x80] sm:$0xff] %v4559_v48   ;;  %4564 = vst [vmem:[%s7151_s25 + $0x88] sm:$0xff] %v4563_v49   ;;  %v6663_v52 = vunpack.i.h.bf16 %v6661_v50  ;;  %v6662_v53 = vunpack.i.l.bf16 %v6661_v50  ;;  %v6668_v54 = vunpack.i.h.bf16 %v6666_v51  ;;  %v6667_v55 = vunpack.i.l.bf16 %v6666_v51 }
  0xe7   : > { %6480 = vst [vmem:[%s7141_s21 + $0xa0] sm:$0xff] %v6181_v46   ;;  %6481 = vst [vmem:[%s7141_s21 + $0xa8] sm:$0xff] %v6186_v47  }
  0xe8   : > { %v6191_v56 = vpack.c.bf16 %v6663_v52, %v6662_v53  ;;  %v6196_v57 = vpack.c.bf16 %v6668_v54, %v6667_v55 }
  0xe9   : > { %v4567_v58 = vld [vmem:[%s7141_s21 + $0x90] sm:$0xff]   ;;  %v4571_v59 = vld [vmem:[%s7141_s21 + $0x98] sm:$0xff]   ;;  %v6671_v60 = vpop.permute.xlu0 %6670  ;;  %v6676_v61 = vpop.permute.xlu1 %6675 }
  0xea   : > { %4568 = vst [vmem:[%s7151_s25 + $0x90] sm:$0xff] %v4567_v58   ;;  %4572 = vst [vmem:[%s7151_s25 + $0x98] sm:$0xff] %v4571_v59   ;;  %v6673_v62 = vunpack.i.h.bf16 %v6671_v60  ;;  %v6672_v63 = vunpack.i.l.bf16 %v6671_v60  ;;  %v6678_v0 = vunpack.i.h.bf16 %v6676_v61  ;;  %v6677_v2 = vunpack.i.l.bf16 %v6676_v61 }
  0xeb   : > { %6482 = vst [vmem:[%s7141_s21 + $0xb0] sm:$0xff] %v6191_v56   ;;  %6483 = vst [vmem:[%s7141_s21 + $0xb8] sm:$0xff] %v6196_v57  }
  0xec   : > { %v6201_v3 = vpack.c.bf16 %v6673_v62, %v6672_v63  ;;  %v6206_v4 = vpack.c.bf16 %v6678_v0, %v6677_v2 }
  0xed   : > { %v6681_v7 = vpop.permute.xlu0 %6680  ;;  %v6686_v8 = vpop.permute.xlu1 %6685 }
  0xee   : > { %v4575_v5 = vld [vmem:[%s7141_s21 + $0xa0] sm:$0xff]   ;;  %v4579_v6 = vld [vmem:[%s7141_s21 + $0xa8] sm:$0xff]   ;;  %6484 = vst [vmem:[%s7141_s21 + $0xc0] sm:$0xff] %v6201_v3   ;;  %6485 = vst [vmem:[%s7141_s21 + $0xc8] sm:$0xff] %v6206_v4   ;;  %v6683_v9 = vunpack.i.h.bf16 %v6681_v7  ;;  %v6682_v10 = vunpack.i.l.bf16 %v6681_v7  ;;  %v6688_v11 = vunpack.i.h.bf16 %v6686_v8  ;;  %v6687_v12 = vunpack.i.l.bf16 %v6686_v8 }
  0xef   : > { %4576 = vst [vmem:[%s7151_s25 + $0xa0] sm:$0xff] %v4575_v5   ;;  %4580 = vst [vmem:[%s7151_s25 + $0xa8] sm:$0xff] %v4579_v6  }
  0xf0   : > { %v6211_v13 = vpack.c.bf16 %v6683_v9, %v6682_v10  ;;  %v6216_v14 = vpack.c.bf16 %v6688_v11, %v6687_v12 }
  0xf1   : > { %v6691_v17 = vpop.permute.xlu0 %6690  ;;  %v6696_v18 = vpop.permute.xlu1 %6695 }
  0xf2   : > { %v4583_v15 = vld [vmem:[%s7141_s21 + $0xb0] sm:$0xff]   ;;  %v4587_v16 = vld [vmem:[%s7141_s21 + $0xb8] sm:$0xff]   ;;  %6486 = vst [vmem:[%s7141_s21 + $0xd0] sm:$0xff] %v6211_v13   ;;  %6487 = vst [vmem:[%s7141_s21 + $0xd8] sm:$0xff] %v6216_v14   ;;  %v6693_v19 = vunpack.i.h.bf16 %v6691_v17  ;;  %v6692_v20 = vunpack.i.l.bf16 %v6691_v17  ;;  %v6698_v21 = vunpack.i.h.bf16 %v6696_v18  ;;  %v6697_v22 = vunpack.i.l.bf16 %v6696_v18 }
  0xf3   : > { %4584 = vst [vmem:[%s7151_s25 + $0xb0] sm:$0xff] %v4583_v15   ;;  %4588 = vst [vmem:[%s7151_s25 + $0xb8] sm:$0xff] %v4587_v16  }
  0xf4   : > { %v6221_v23 = vpack.c.bf16 %v6693_v19, %v6692_v20  ;;  %v6226_v24 = vpack.c.bf16 %v6698_v21, %v6697_v22 }
  0xf5   : > { %v4591_v25 = vld [vmem:[%s7141_s21 + $0xc0] sm:$0xff]   ;;  %v4595_v26 = vld [vmem:[%s7141_s21 + $0xc8] sm:$0xff]   ;;  %v6701_v27 = vpop.permute.xlu0 %6700  ;;  %v6706_v28 = vpop.permute.xlu1 %6705 }
  0xf6   : > { %4592 = vst [vmem:[%s7151_s25 + $0xc0] sm:$0xff] %v4591_v25   ;;  %4596 = vst [vmem:[%s7151_s25 + $0xc8] sm:$0xff] %v4595_v26   ;;  %v6703_v29 = vunpack.i.h.bf16 %v6701_v27  ;;  %v6702_v30 = vunpack.i.l.bf16 %v6701_v27  ;;  %v6708_v31 = vunpack.i.h.bf16 %v6706_v28  ;;  %v6707_v32 = vunpack.i.l.bf16 %v6706_v28 }
  0xf7   : > { %6488 = vst [vmem:[%s7141_s21 + $0xe0] sm:$0xff] %v6221_v23   ;;  %6489 = vst [vmem:[%s7141_s21 + $0xe8] sm:$0xff] %v6226_v24  }
  0xf8   : > { %v6231_v33 = vpack.c.bf16 %v6703_v29, %v6702_v30  ;;  %v6236_v34 = vpack.c.bf16 %v6708_v31, %v6707_v32 }
  0xf9   : > { %v4599_v35 = vld [vmem:[%s7141_s21 + $0xd0] sm:$0xff]   ;;  %v4603_v36 = vld [vmem:[%s7141_s21 + $0xd8] sm:$0xff]   ;;  %v6711_v37 = vpop.permute.xlu0 %6710  ;;  %v6716_v38 = vpop.permute.xlu1 %6715 }
  0xfa   : > { %4600 = vst [vmem:[%s7151_s25 + $0xd0] sm:$0xff] %v4599_v35   ;;  %4604 = vst [vmem:[%s7151_s25 + $0xd8] sm:$0xff] %v4603_v36   ;;  %v6713_v39 = vunpack.i.h.bf16 %v6711_v37  ;;  %v6712_v40 = vunpack.i.l.bf16 %v6711_v37  ;;  %v6718_v41 = vunpack.i.h.bf16 %v6716_v38  ;;  %v6717_v42 = vunpack.i.l.bf16 %v6716_v38 }
  0xfb   : > { %6490 = vst [vmem:[%s7141_s21 + $0xf0] sm:$0xff] %v6231_v33   ;;  %6491 = vst [vmem:[%s7141_s21 + $0xf8] sm:$0xff] %v6236_v34  }
  0xfc   : > { %v6241_v43 = vpack.c.bf16 %v6713_v39, %v6712_v40  ;;  %v6246_v44 = vpack.c.bf16 %v6718_v41, %v6717_v42 }
  0xfd   : > { %v6721_v47 = vpop.permute.xlu0 %6720  ;;  %v6726_v48 = vpop.permute.xlu1 %6725 }
  0xfe   : > { %v4607_v45 = vld [vmem:[%s7141_s21 + $0xe0] sm:$0xff]   ;;  %v4611_v46 = vld [vmem:[%s7141_s21 + $0xe8] sm:$0xff]   ;;  %6492 = vst [vmem:[%s7141_s21 + $0x100] sm:$0xff] %v6241_v43   ;;  %6493 = vst [vmem:[%s7141_s21 + $0x108] sm:$0xff] %v6246_v44   ;;  %v6723_v49 = vunpack.i.h.bf16 %v6721_v47  ;;  %v6722_v50 = vunpack.i.l.bf16 %v6721_v47  ;;  %v6728_v51 = vunpack.i.h.bf16 %v6726_v48  ;;  %v6727_v52 = vunpack.i.l.bf16 %v6726_v48 }
  0xff   : > { %4608 = vst [vmem:[%s7151_s25 + $0xe0] sm:$0xff] %v4607_v45   ;;  %4612 = vst [vmem:[%s7151_s25 + $0xe8] sm:$0xff] %v4611_v46  }
 0x100   : > { %v6251_v53 = vpack.c.bf16 %v6723_v49, %v6722_v50  ;;  %v6256_v54 = vpack.c.bf16 %v6728_v51, %v6727_v52 }
 0x101   : > { %v6731_v57 = vpop.permute.xlu0 %6730  ;;  %v6736_v58 = vpop.permute.xlu1 %6735 }
 0x102   : > { %v4615_v55 = vld [vmem:[%s7141_s21 + $0xf0] sm:$0xff]   ;;  %v4619_v56 = vld [vmem:[%s7141_s21 + $0xf8] sm:$0xff]   ;;  %6494 = vst [vmem:[%s7141_s21 + $0x110] sm:$0xff] %v6251_v53   ;;  %6495 = vst [vmem:[%s7141_s21 + $0x118] sm:$0xff] %v6256_v54   ;;  %v6733_v59 = vunpack.i.h.bf16 %v6731_v57  ;;  %v6732_v60 = vunpack.i.l.bf16 %v6731_v57  ;;  %v6738_v61 = vunpack.i.h.bf16 %v6736_v58  ;;  %v6737_v62 = vunpack.i.l.bf16 %v6736_v58 }
 0x103   : > { %4616 = vst [vmem:[%s7151_s25 + $0xf0] sm:$0xff] %v4615_v55   ;;  %4620 = vst [vmem:[%s7151_s25 + $0xf8] sm:$0xff] %v4619_v56  }
 0x104   : > { %v6261_v63 = vpack.c.bf16 %v6733_v59, %v6732_v60  ;;  %v6266_v0 = vpack.c.bf16 %v6738_v61, %v6737_v62 }
 0x105   : > { %v4623_v2 = vld [vmem:[%s7141_s21 + $0x100] sm:$0xff]   ;;  %v4627_v3 = vld [vmem:[%s7141_s21 + $0x108] sm:$0xff]   ;;  %v6741_v4 = vpop.permute.xlu0 %6740  ;;  %v6746_v5 = vpop.permute.xlu1 %6745 }
 0x106   : > { %4624 = vst [vmem:[%s7151_s25 + $0x100] sm:$0xff] %v4623_v2   ;;  %4628 = vst [vmem:[%s7151_s25 + $0x108] sm:$0xff] %v4627_v3   ;;  %v6743_v6 = vunpack.i.h.bf16 %v6741_v4  ;;  %v6742_v7 = vunpack.i.l.bf16 %v6741_v4  ;;  %v6748_v8 = vunpack.i.h.bf16 %v6746_v5  ;;  %v6747_v9 = vunpack.i.l.bf16 %v6746_v5 }
 0x107   : > { %6496 = vst [vmem:[%s7141_s21 + $0x120] sm:$0xff] %v6261_v63   ;;  %6497 = vst [vmem:[%s7141_s21 + $0x128] sm:$0xff] %v6266_v0  }
 0x108   : > { %v6271_v10 = vpack.c.bf16 %v6743_v6, %v6742_v7  ;;  %v6276_v11 = vpack.c.bf16 %v6748_v8, %v6747_v9 }
 0x109   : > { %v4631_v12 = vld [vmem:[%s7141_s21 + $0x110] sm:$0xff]   ;;  %v4635_v13 = vld [vmem:[%s7141_s21 + $0x118] sm:$0xff]   ;;  %v6751_v14 = vpop.permute.xlu0 %6750  ;;  %v6756_v15 = vpop.permute.xlu1 %6755 }
 0x10a   : > { %4632 = vst [vmem:[%s7151_s25 + $0x110] sm:$0xff] %v4631_v12   ;;  %4636 = vst [vmem:[%s7151_s25 + $0x118] sm:$0xff] %v4635_v13   ;;  %v6753_v16 = vunpack.i.h.bf16 %v6751_v14  ;;  %v6752_v17 = vunpack.i.l.bf16 %v6751_v14  ;;  %v6758_v18 = vunpack.i.h.bf16 %v6756_v15  ;;  %v6757_v19 = vunpack.i.l.bf16 %v6756_v15 }
 0x10b   : > { %6498 = vst [vmem:[%s7141_s21 + $0x130] sm:$0xff] %v6271_v10   ;;  %6499 = vst [vmem:[%s7141_s21 + $0x138] sm:$0xff] %v6276_v11  }
 0x10c   : > { %v6281_v20 = vpack.c.bf16 %v6753_v16, %v6752_v17  ;;  %v6286_v21 = vpack.c.bf16 %v6758_v18, %v6757_v19 }
 0x10d   : > { %v6761_v24 = vpop.permute.xlu0 %6760  ;;  %v6766_v25 = vpop.permute.xlu1 %6765 }
 0x10e   : > { %v4639_v22 = vld [vmem:[%s7141_s21 + $0x120] sm:$0xff]   ;;  %v4643_v23 = vld [vmem:[%s7141_s21 + $0x128] sm:$0xff]   ;;  %6500 = vst [vmem:[%s7141_s21 + $0x140] sm:$0xff] %v6281_v20   ;;  %6501 = vst [vmem:[%s7141_s21 + $0x148] sm:$0xff] %v6286_v21   ;;  %v6763_v26 = vunpack.i.h.bf16 %v6761_v24  ;;  %v6762_v27 = vunpack.i.l.bf16 %v6761_v24  ;;  %v6768_v28 = vunpack.i.h.bf16 %v6766_v25  ;;  %v6767_v29 = vunpack.i.l.bf16 %v6766_v25 }
 0x10f   : > { %4640 = vst [vmem:[%s7151_s25 + $0x120] sm:$0xff] %v4639_v22   ;;  %4644 = vst [vmem:[%s7151_s25 + $0x128] sm:$0xff] %v4643_v23  }
 0x110   : > { %v6291_v30 = vpack.c.bf16 %v6763_v26, %v6762_v27  ;;  %v6296_v31 = vpack.c.bf16 %v6768_v28, %v6767_v29 }
 0x111   : > { %v6771_v34 = vpop.permute.xlu0 %6770  ;;  %v6776_v35 = vpop.permute.xlu1 %6775 }
 0x112   : > { %v4647_v32 = vld [vmem:[%s7141_s21 + $0x130] sm:$0xff]   ;;  %v4651_v33 = vld [vmem:[%s7141_s21 + $0x138] sm:$0xff]   ;;  %6502 = vst [vmem:[%s7141_s21 + $0x150] sm:$0xff] %v6291_v30   ;;  %6503 = vst [vmem:[%s7141_s21 + $0x158] sm:$0xff] %v6296_v31   ;;  %v6773_v36 = vunpack.i.h.bf16 %v6771_v34  ;;  %v6772_v37 = vunpack.i.l.bf16 %v6771_v34  ;;  %v6778_v38 = vunpack.i.h.bf16 %v6776_v35  ;;  %v6777_v39 = vunpack.i.l.bf16 %v6776_v35 }
 0x113   : > { %4648 = vst [vmem:[%s7151_s25 + $0x130] sm:$0xff] %v4647_v32   ;;  %4652 = vst [vmem:[%s7151_s25 + $0x138] sm:$0xff] %v4651_v33  }
 0x114   : > { %v6301_v40 = vpack.c.bf16 %v6773_v36, %v6772_v37  ;;  %v6306_v41 = vpack.c.bf16 %v6778_v38, %v6777_v39 }
 0x115   : > { %v4655_v42 = vld [vmem:[%s7141_s21 + $0x140] sm:$0xff]   ;;  %v4659_v43 = vld [vmem:[%s7141_s21 + $0x148] sm:$0xff]   ;;  %v6781_v44 = vpop.permute.xlu0 %6780  ;;  %v6786_v45 = vpop.permute.xlu1 %6785 }
 0x116   : > { %4656 = vst [vmem:[%s7151_s25 + $0x140] sm:$0xff] %v4655_v42   ;;  %4660 = vst [vmem:[%s7151_s25 + $0x148] sm:$0xff] %v4659_v43   ;;  %v6783_v46 = vunpack.i.h.bf16 %v6781_v44  ;;  %v6782_v47 = vunpack.i.l.bf16 %v6781_v44  ;;  %v6788_v48 = vunpack.i.h.bf16 %v6786_v45  ;;  %v6787_v49 = vunpack.i.l.bf16 %v6786_v45 }
 0x117   : > { %6504 = vst [vmem:[%s7141_s21 + $0x160] sm:$0xff] %v6301_v40   ;;  %6505 = vst [vmem:[%s7141_s21 + $0x168] sm:$0xff] %v6306_v41  }
 0x118   : > { %v6311_v50 = vpack.c.bf16 %v6783_v46, %v6782_v47  ;;  %v6316_v51 = vpack.c.bf16 %v6788_v48, %v6787_v49 }
 0x119   : > { %v4663_v52 = vld [vmem:[%s7141_s21 + $0x150] sm:$0xff]   ;;  %v4667_v53 = vld [vmem:[%s7141_s21 + $0x158] sm:$0xff]   ;;  %v6791_v54 = vpop.permute.xlu0 %6790  ;;  %v6796_v55 = vpop.permute.xlu1 %6795 }
 0x11a   : > { %4664 = vst [vmem:[%s7151_s25 + $0x150] sm:$0xff] %v4663_v52   ;;  %4668 = vst [vmem:[%s7151_s25 + $0x158] sm:$0xff] %v4667_v53   ;;  %v6793_v56 = vunpack.i.h.bf16 %v6791_v54  ;;  %v6792_v57 = vunpack.i.l.bf16 %v6791_v54  ;;  %v6798_v58 = vunpack.i.h.bf16 %v6796_v55  ;;  %v6797_v59 = vunpack.i.l.bf16 %v6796_v55 }
 0x11b   : > { %6506 = vst [vmem:[%s7141_s21 + $0x170] sm:$0xff] %v6311_v50   ;;  %6507 = vst [vmem:[%s7141_s21 + $0x178] sm:$0xff] %v6316_v51  }
 0x11c   : > { %v6321_v60 = vpack.c.bf16 %v6793_v56, %v6792_v57  ;;  %v6326_v61 = vpack.c.bf16 %v6798_v58, %v6797_v59 }
 0x11d   : > { %v6801_v0 = vpop.permute.xlu0 %6800  ;;  %v6806_v2 = vpop.permute.xlu1 %6805 }
 0x11e   : > { %v4671_v62 = vld [vmem:[%s7141_s21 + $0x160] sm:$0xff]   ;;  %v4675_v63 = vld [vmem:[%s7141_s21 + $0x168] sm:$0xff]   ;;  %6508 = vst [vmem:[%s7141_s21 + $0x180] sm:$0xff] %v6321_v60   ;;  %6509 = vst [vmem:[%s7141_s21 + $0x188] sm:$0xff] %v6326_v61   ;;  %v6803_v3 = vunpack.i.h.bf16 %v6801_v0  ;;  %v6802_v4 = vunpack.i.l.bf16 %v6801_v0  ;;  %v6808_v5 = vunpack.i.h.bf16 %v6806_v2  ;;  %v6807_v6 = vunpack.i.l.bf16 %v6806_v2 }
 0x11f   : > { %4672 = vst [vmem:[%s7151_s25 + $0x160] sm:$0xff] %v4671_v62   ;;  %4676 = vst [vmem:[%s7151_s25 + $0x168] sm:$0xff] %v4675_v63  }
 0x120   : > { %v6331_v7 = vpack.c.bf16 %v6803_v3, %v6802_v4  ;;  %v6336_v8 = vpack.c.bf16 %v6808_v5, %v6807_v6 }
 0x121   : > { %v6811_v11 = vpop.permute.xlu0 %6810  ;;  %v6816_v12 = vpop.permute.xlu1 %6815 }
 0x122   : > { %v4679_v9 = vld [vmem:[%s7141_s21 + $0x170] sm:$0xff]   ;;  %v4683_v10 = vld [vmem:[%s7141_s21 + $0x178] sm:$0xff]   ;;  %6510 = vst [vmem:[%s7141_s21 + $0x190] sm:$0xff] %v6331_v7   ;;  %6511 = vst [vmem:[%s7141_s21 + $0x198] sm:$0xff] %v6336_v8   ;;  %v6813_v13 = vunpack.i.h.bf16 %v6811_v11  ;;  %v6812_v14 = vunpack.i.l.bf16 %v6811_v11  ;;  %v6818_v15 = vunpack.i.h.bf16 %v6816_v12  ;;  %v6817_v16 = vunpack.i.l.bf16 %v6816_v12 }
 0x123   : > { %4680 = vst [vmem:[%s7151_s25 + $0x170] sm:$0xff] %v4679_v9   ;;  %4684 = vst [vmem:[%s7151_s25 + $0x178] sm:$0xff] %v4683_v10  }
 0x124   : > { %v6341_v17 = vpack.c.bf16 %v6813_v13, %v6812_v14  ;;  %v6346_v18 = vpack.c.bf16 %v6818_v15, %v6817_v16 }
 0x125   : > { %v4687_v19 = vld [vmem:[%s7141_s21 + $0x180] sm:$0xff]   ;;  %v4691_v20 = vld [vmem:[%s7141_s21 + $0x188] sm:$0xff]   ;;  %v6821_v21 = vpop.permute.xlu0 %6820  ;;  %v6826_v22 = vpop.permute.xlu1 %6825 }
 0x126   : > { %4688 = vst [vmem:[%s7151_s25 + $0x180] sm:$0xff] %v4687_v19   ;;  %4692 = vst [vmem:[%s7151_s25 + $0x188] sm:$0xff] %v4691_v20   ;;  %v6823_v23 = vunpack.i.h.bf16 %v6821_v21  ;;  %v6822_v24 = vunpack.i.l.bf16 %v6821_v21  ;;  %v6828_v25 = vunpack.i.h.bf16 %v6826_v22  ;;  %v6827_v26 = vunpack.i.l.bf16 %v6826_v22 }
 0x127   : > { %6512 = vst [vmem:[%s7141_s21 + $0x1a0] sm:$0xff] %v6341_v17   ;;  %6513 = vst [vmem:[%s7141_s21 + $0x1a8] sm:$0xff] %v6346_v18  }
 0x128   : > { %v6351_v27 = vpack.c.bf16 %v6823_v23, %v6822_v24  ;;  %v6356_v28 = vpack.c.bf16 %v6828_v25, %v6827_v26 }
 0x129   : > { %v4695_v29 = vld [vmem:[%s7141_s21 + $0x190] sm:$0xff]   ;;  %v4699_v30 = vld [vmem:[%s7141_s21 + $0x198] sm:$0xff]   ;;  %v6831_v31 = vpop.permute.xlu0 %6830  ;;  %v6836_v32 = vpop.permute.xlu1 %6835 }
 0x12a   : > { %4696 = vst [vmem:[%s7151_s25 + $0x190] sm:$0xff] %v4695_v29   ;;  %4700 = vst [vmem:[%s7151_s25 + $0x198] sm:$0xff] %v4699_v30   ;;  %v6833_v33 = vunpack.i.h.bf16 %v6831_v31  ;;  %v6832_v34 = vunpack.i.l.bf16 %v6831_v31  ;;  %v6838_v35 = vunpack.i.h.bf16 %v6836_v32  ;;  %v6837_v36 = vunpack.i.l.bf16 %v6836_v32 }
 0x12b   : > { %6514 = vst [vmem:[%s7141_s21 + $0x1b0] sm:$0xff] %v6351_v27   ;;  %6515 = vst [vmem:[%s7141_s21 + $0x1b8] sm:$0xff] %v6356_v28  }
 0x12c   : > { %v6361_v37 = vpack.c.bf16 %v6833_v33, %v6832_v34  ;;  %v6366_v38 = vpack.c.bf16 %v6838_v35, %v6837_v36 }
 0x12d   : > { %v6841_v41 = vpop.permute.xlu0 %6840  ;;  %v6846_v42 = vpop.permute.xlu1 %6845 }
 0x12e   : > { %v4703_v39 = vld [vmem:[%s7141_s21 + $0x1a0] sm:$0xff]   ;;  %v4707_v40 = vld [vmem:[%s7141_s21 + $0x1a8] sm:$0xff]   ;;  %6516 = vst [vmem:[%s7141_s21 + $0x1c0] sm:$0xff] %v6361_v37   ;;  %6517 = vst [vmem:[%s7141_s21 + $0x1c8] sm:$0xff] %v6366_v38   ;;  %v6843_v43 = vunpack.i.h.bf16 %v6841_v41  ;;  %v6842_v44 = vunpack.i.l.bf16 %v6841_v41  ;;  %v6848_v45 = vunpack.i.h.bf16 %v6846_v42  ;;  %v6847_v46 = vunpack.i.l.bf16 %v6846_v42 }
 0x12f   : > { %4704 = vst [vmem:[%s7151_s25 + $0x1a0] sm:$0xff] %v4703_v39   ;;  %4708 = vst [vmem:[%s7151_s25 + $0x1a8] sm:$0xff] %v4707_v40  }
 0x130   : > { %v6371_v47 = vpack.c.bf16 %v6843_v43, %v6842_v44  ;;  %v6376_v48 = vpack.c.bf16 %v6848_v45, %v6847_v46 }
 0x131   : > { %v6851_v51 = vpop.permute.xlu0 %6850  ;;  %v6856_v52 = vpop.permute.xlu1 %6855 }
 0x132   : > { %v4711_v49 = vld [vmem:[%s7141_s21 + $0x1b0] sm:$0xff]   ;;  %v4715_v50 = vld [vmem:[%s7141_s21 + $0x1b8] sm:$0xff]   ;;  %6518 = vst [vmem:[%s7141_s21 + $0x1d0] sm:$0xff] %v6371_v47   ;;  %6519 = vst [vmem:[%s7141_s21 + $0x1d8] sm:$0xff] %v6376_v48   ;;  %v6853_v53 = vunpack.i.h.bf16 %v6851_v51  ;;  %v6852_v54 = vunpack.i.l.bf16 %v6851_v51  ;;  %v6858_v55 = vunpack.i.h.bf16 %v6856_v52  ;;  %v6857_v56 = vunpack.i.l.bf16 %v6856_v52 }
 0x133   : > { %4712 = vst [vmem:[%s7151_s25 + $0x1b0] sm:$0xff] %v4711_v49   ;;  %4716 = vst [vmem:[%s7151_s25 + $0x1b8] sm:$0xff] %v4715_v50  }
 0x134   : > { %v6381_v57 = vpack.c.bf16 %v6853_v53, %v6852_v54  ;;  %v6386_v58 = vpack.c.bf16 %v6858_v55, %v6857_v56 }
 0x135   : > { %v4719_v59 = vld [vmem:[%s7141_s21 + $0x1c0] sm:$0xff]   ;;  %v4723_v60 = vld [vmem:[%s7141_s21 + $0x1c8] sm:$0xff]   ;;  %v6861_v61 = vpop.permute.xlu0 %6860  ;;  %v6866_v62 = vpop.permute.xlu1 %6865 }
 0x136   : > { %4720 = vst [vmem:[%s7151_s25 + $0x1c0] sm:$0xff] %v4719_v59   ;;  %4724 = vst [vmem:[%s7151_s25 + $0x1c8] sm:$0xff] %v4723_v60   ;;  %v6863_v63 = vunpack.i.h.bf16 %v6861_v61  ;;  %v6862_v0 = vunpack.i.l.bf16 %v6861_v61  ;;  %v6868_v2 = vunpack.i.h.bf16 %v6866_v62  ;;  %v6867_v3 = vunpack.i.l.bf16 %v6866_v62 }
 0x137   : > { %6520 = vst [vmem:[%s7141_s21 + $0x1e0] sm:$0xff] %v6381_v57   ;;  %6521 = vst [vmem:[%s7141_s21 + $0x1e8] sm:$0xff] %v6386_v58  }
 0x138   : > { %v6391_v4 = vpack.c.bf16 %v6863_v63, %v6862_v0  ;;  %v6396_v5 = vpack.c.bf16 %v6868_v2, %v6867_v3 }
 0x139   : > { %v4727_v6 = vld [vmem:[%s7141_s21 + $0x1d0] sm:$0xff]   ;;  %v4731_v7 = vld [vmem:[%s7141_s21 + $0x1d8] sm:$0xff]  }
 0x13a   : > { %4728 = vst [vmem:[%s7151_s25 + $0x1d0] sm:$0xff] %v4727_v6   ;;  %4732 = vst [vmem:[%s7151_s25 + $0x1d8] sm:$0xff] %v4731_v7  }
 0x13b   : > { %6522 = vst [vmem:[%s7141_s21 + $0x1f0] sm:$0xff] %v6391_v4   ;;  %6523 = vst [vmem:[%s7141_s21 + $0x1f8] sm:$0xff] %v6396_v5  }
 0x13e   : > { %v4735_v8 = vld [vmem:[%s7141_s21 + $0x1e0] sm:$0xff]   ;;  %v4739_v9 = vld [vmem:[%s7141_s21 + $0x1e8] sm:$0xff]  }
 0x13f   : > { %4736 = vst [vmem:[%s7151_s25 + $0x1e0] sm:$0xff] %v4735_v8   ;;  %4740 = vst [vmem:[%s7151_s25 + $0x1e8] sm:$0xff] %v4739_v9  }
 0x142   : > { %v4743_v10 = vld [vmem:[%s7141_s21 + $0x1f0] sm:$0xff]   ;;  %v4747_v11 = vld [vmem:[%s7141_s21 + $0x1f8] sm:$0xff]  }
 0x143   : > { %4744 = vst [vmem:[%s7151_s25 + $0x1f0] sm:$0xff] %v4743_v10   ;;  %4748 = vst [vmem:[%s7151_s25 + $0x1f8] sm:$0xff] %v4747_v11  }
 0x144 PF: > { %s10_s8 = sadd.s32 1, %s6891_s8   ;;  %s7352_s6 = smov %s6887_s7 }
 0x145   : > { %p7_p5 = scmp.ge.s32.totalorder %s10_s8, 6   ;;  %s7353_s7 = smov %s7355_s10 }
 0x147   :  { %9 = sbr.rel (!%p7_p5) target bundleno = 7 (0x7), region = 886 }

// kernel: _lambda_.19
= control target key start
LH: loop header
LB: loop body
LE: loop exit
PB: predicated region body
PF: predicated region fallthrough
CT: control target
= control target key end

     0   :  { %s1861_s12 = smov 0   ;;  %s2209_s0 = inlined_call_operand.vmem [shape: bf16[1024,147], index: 0, kind: input, shape index: {}]   ;;  %s2210_s1 = inlined_call_operand.vmem [shape: bf16[147,8], index: 1, kind: input, shape index: {}]   ;;  %s2211_s2 = inlined_call_operand.vmem [shape: f32[1,8], index: 2, kind: input, shape index: {}]   ;;  %s2212_s3 = inlined_call_operand.vmem [shape: bf16[1024,8], index: 3, kind: output, shape index: {}]  }
   0x1 LB: > { %s1447_s13 = sadd.s32 4294967295, %s1837_s12   ;;  %p1451_p0 = scmp.ge.s32.totalorder %s1837_s12, 1  ;;  %s1837_s12 = sphi %s1861_s12, %s13_s12  }
   0x2   : > { %p139_p1 = scmp.lt.s32.totalorder %s1837_s12, 3 }
   0x4   : > { %p140_p2 = pnand %p1451_p0, %p139_p1 }
   0x5   : > { %s1452_s20 = sshll.u32 (!%p140_p2), %s1447_s13, 6 }
   0x6   : > { %143 = sbr.rel (%p140_p2) target bundleno = 376 (0x178), region = 32  ;;  %p165_p3 = scmp.lt.s32.totalorder (!%p140_p2), %s1452_s20, 127 }
   0xb   : > { %v1725_v0 = vld [vmem:[%s2210_s1 + $0x38] sm:$0xff]   ;;  %v1839_v1 = vmov 0   ;;  %v1726_v2 = vld [vmem:[%s2210_s1 + $0x30] sm:$0xff]   ;;  %v1727_v3 = vld [vmem:[%s2210_s1 + $0x28] sm:$0xff]   ;;  %s2214_s20 = smov (!%p165_p3, %s1452_s20), 127  ;;  %vm613_vm0 = vcmask 154624  }
   0xc   : > { %717 = vmatprep.subr.bf16.mxu0 %v1839_v1  ;;  %1695 = vmatprep.subr.bf16.mxu1 %v1839_v1  ;;  %v1728_v4 = vld [vmem:[%s2210_s1 + $0x20] sm:$0xff]   ;;  %s1630_s23 = sshll.u32 %s2214_s20, 3  ;;  %v1729_v5 = vld [vmem:[%s2210_s1 + $0x18] sm:$0xff]   ;;  %v1730_v8 = vld [vmem:[%s2210_s1 + $0x10] sm:$0xff]   ;;  %vm710_vm1 = vcmask 1040384   ;;  %vm711_vm2 = vcmask 1041408  }
   0xd   : > { %718 = vmatpush1.bf16.msra.mxu0 %v1725_v0  ;;  %1705 = vmatpush1.bf16.msra.mxu1 %v1725_v0  ;;  %s1887_s26 = scalar_lea.vmem %s2209_s0, %s1630_s23  ;;  %v1731_v9 = vld [vmem:[%s2210_s1 + $0x8] sm:$0xff]   ;;  %v1840_v10 = vmov 65535   ;;  %v1732_v12 = vld [vmem:[%s2210_s1] sm:$0xff]   ;;  %s1456_s15 = sshll.u32 %s2214_s20, 2  ;;  %vm1326_vm3 = vcmask 60416  }
   0xe   : > { %719 = vmatprep.subr.bf16.mxu0 %v1839_v1  ;;  %1696 = vmatprep.subr.bf16.mxu1 %v1839_v1  ;;  %v1737_v6 = vld [vmem:[%s1887_s26 + $0x4] ss:$8 sps:$4 sm:$0xff]   ;;  %v712_v11 = vsel %vm710_vm1, 4294967295, %v1840_v10  ;;  %v1733_v13 = vld [vmem:[%s2210_s1 + $0x48] ss:$0 sps:$4 sm:$0x33]   ;;  %s2014_s18 = scalar_lea.vmem %s2212_s3, %s1456_s15 }
   0xf   : > { %v1740_v7 = vld [vmem:[%s1887_s26 + $0x104] ss:$8 sps:$4 sm:$0xff]   ;;  %1532 = vmatprep.mubr.msk.bf16.mxu0 %vm613_vm0, %v1737_v6  ;;  %v713_v14 = vsel %vm711_vm2, %v712_v11, 0  ;;  %v1735_v17 = vld [vmem:[%s1887_s26] ss:$8 sps:$4 sm:$0xff]  }
  0x10   : > { %1548 = vmatprep.mubr.msk.bf16.mxu1 %vm613_vm0, %v1740_v7  ;;  %v715_v15 = vand.u32 %v1733_v13, %v713_v14  ;;  %v1734_v16 = vld [vmem:[%s2210_s1 + $0x40] sm:$0xff]   ;;  %v1741_v19 = vld [vmem:[%s1887_s26 + $0x14] ss:$8 sps:$4 sm:$0xff]   ;;  %v1745_v21 = vld [vmem:[%s1887_s26 + $0x10] ss:$8 sps:$4 sm:$0xff]  }
  0x11   : > { %720 = vmatpush1.bf16.msra.mxu0 %v1726_v2  ;;  %1706 = vmatpush1.bf16.msra.mxu1 %v1726_v2  ;;  %v1738_v18 = vld [vmem:[%s1887_s26 + $0x100] ss:$8 sps:$4 sm:$0xff]   ;;  %v1743_v20 = vld [vmem:[%s1887_s26 + $0x114] ss:$8 sps:$4 sm:$0xff]   ;;  %v1746_v22 = vld [vmem:[%s1887_s26 + $0x110] ss:$8 sps:$4 sm:$0xff]  }
  0x12   : > { %721 = vmatprep.subr.bf16.mxu0 %v1839_v1  ;;  %1697 = vmatprep.subr.bf16.mxu1 %v1839_v1  ;;  %v1747_v23 = vld [vmem:[%s1887_s26 + $0x24] ss:$8 sps:$4 sm:$0xff]   ;;  %v1751_v25 = vld [vmem:[%s1887_s26 + $0x20] ss:$8 sps:$4 sm:$0xff]   ;;  %v1753_v27 = vld [vmem:[%s1887_s26 + $0x34] ss:$8 sps:$4 sm:$0xff]  }
  0x13   : > { %v1749_v24 = vld [vmem:[%s1887_s26 + $0x124] ss:$8 sps:$4 sm:$0xff]   ;;  %v1752_v26 = vld [vmem:[%s1887_s26 + $0x120] ss:$8 sps:$4 sm:$0xff]   ;;  %v1755_v28 = vld [vmem:[%s1887_s26 + $0x134] ss:$8 sps:$4 sm:$0xff]  }
  0x14   : > { %v1757_v29 = vld [vmem:[%s1887_s26 + $0x30] ss:$8 sps:$4 sm:$0xff]   ;;  %v1759_v31 = vld [vmem:[%s1887_s26 + $0x44] ss:$8 sps:$4 sm:$0xff]   ;;  %v1763_v33 = vld [vmem:[%s1887_s26 + $0x40] ss:$8 sps:$4 sm:$0xff]  }
  0x15   : > { %722 = vmatpush1.bf16.msra.mxu0 %v1727_v3  ;;  %1707 = vmatpush1.bf16.msra.mxu1 %v1727_v3  ;;  %v1758_v30 = vld [vmem:[%s1887_s26 + $0x130] ss:$8 sps:$4 sm:$0xff]   ;;  %v1761_v32 = vld [vmem:[%s1887_s26 + $0x144] ss:$8 sps:$4 sm:$0xff]   ;;  %v1764_v34 = vld [vmem:[%s1887_s26 + $0x140] ss:$8 sps:$4 sm:$0xff]  }
  0x16   : > { %723 = vmatprep.subr.bf16.mxu0 %v1839_v1  ;;  %1698 = vmatprep.subr.bf16.mxu1 %v1839_v1  ;;  %v1765_v35 = vld [vmem:[%s1887_s26 + $0x54] ss:$8 sps:$4 sm:$0xff]   ;;  %v1769_v37 = vld [vmem:[%s1887_s26 + $0x50] ss:$8 sps:$4 sm:$0xff]   ;;  %v1771_v39 = vld [vmem:[%s1887_s26 + $0x64] ss:$8 sps:$4 sm:$0xff]  }
  0x17   : > { %v1767_v36 = vld [vmem:[%s1887_s26 + $0x154] ss:$8 sps:$4 sm:$0xff]   ;;  %v1770_v38 = vld [vmem:[%s1887_s26 + $0x150] ss:$8 sps:$4 sm:$0xff]   ;;  %v1773_v40 = vld [vmem:[%s1887_s26 + $0x164] ss:$8 sps:$4 sm:$0xff]  }
  0x18   : > { %v1775_v41 = vld [vmem:[%s1887_s26 + $0x60] ss:$8 sps:$4 sm:$0xff]   ;;  %v1777_v43 = vld [vmem:[%s1887_s26 + $0x74] ss:$8 sps:$4 sm:$0xff]   ;;  %v1781_v45 = vld [vmem:[%s1887_s26 + $0x70] ss:$8 sps:$4 sm:$0xff]  }
  0x19   : > { %724 = vmatpush1.bf16.msra.mxu0 %v1728_v4  ;;  %1708 = vmatpush1.bf16.msra.mxu1 %v1728_v4  ;;  %v1776_v42 = vld [vmem:[%s1887_s26 + $0x160] ss:$8 sps:$4 sm:$0xff]   ;;  %v1779_v44 = vld [vmem:[%s1887_s26 + $0x174] ss:$8 sps:$4 sm:$0xff]   ;;  %v1782_v46 = vld [vmem:[%s1887_s26 + $0x170] ss:$8 sps:$4 sm:$0xff]  }
  0x1a   : > { %725 = vmatprep.subr.bf16.mxu0 %v1839_v1  ;;  %1699 = vmatprep.subr.bf16.mxu1 %v1839_v1  ;;  %v1783_v47 = vld [vmem:[%s1887_s26 + $0x84] ss:$8 sps:$4 sm:$0xff]   ;;  %v1787_v49 = vld [vmem:[%s1887_s26 + $0x80] ss:$8 sps:$4 sm:$0xff]   ;;  %v1789_v51 = vld [vmem:[%s1887_s26 + $0x94] ss:$8 sps:$4 sm:$0xff]  }
  0x1b   : > { %v1785_v48 = vld [vmem:[%s1887_s26 + $0x184] ss:$8 sps:$4 sm:$0xff]   ;;  %v1788_v50 = vld [vmem:[%s1887_s26 + $0x180] ss:$8 sps:$4 sm:$0xff]   ;;  %v1791_v52 = vld [vmem:[%s1887_s26 + $0x194] ss:$8 sps:$4 sm:$0xff]  }
  0x1c   : > { %v1793_v53 = vld [vmem:[%s1887_s26 + $0x90] ss:$8 sps:$4 sm:$0xff]   ;;  %v1795_v55 = vld [vmem:[%s1887_s26 + $0xa4] ss:$8 sps:$4 sm:$0xff]   ;;  %v1799_v57 = vld [vmem:[%s1887_s26 + $0xa0] ss:$8 sps:$4 sm:$0xff]  }
  0x1d   : > { %726 = vmatpush1.bf16.msra.mxu0 %v1729_v5  ;;  %1709 = vmatpush1.bf16.msra.mxu1 %v1729_v5  ;;  %v1794_v54 = vld [vmem:[%s1887_s26 + $0x190] ss:$8 sps:$4 sm:$0xff]   ;;  %v1797_v56 = vld [vmem:[%s1887_s26 + $0x1a4] ss:$8 sps:$4 sm:$0xff]   ;;  %v1800_v58 = vld [vmem:[%s1887_s26 + $0x1a0] ss:$8 sps:$4 sm:$0xff]  }
  0x1e   : > { %727 = vmatprep.subr.bf16.mxu0 %v1839_v1  ;;  %1700 = vmatprep.subr.bf16.mxu1 %v1839_v1  ;;  %v1801_v59 = vld [vmem:[%s1887_s26 + $0xb4] ss:$8 sps:$4 sm:$0xff]   ;;  %v1805_v61 = vld [vmem:[%s1887_s26 + $0xb0] ss:$8 sps:$4 sm:$0xff]   ;;  %v1807_v63 = vld [vmem:[%s1887_s26 + $0xc4] ss:$8 sps:$4 sm:$0xff]  }
  0x1f   : > { %v1803_v60 = vld [vmem:[%s1887_s26 + $0x1b4] ss:$8 sps:$4 sm:$0xff]   ;;  %v1806_v62 = vld [vmem:[%s1887_s26 + $0x1b0] ss:$8 sps:$4 sm:$0xff]   ;;  %v1809_v0 = vld [vmem:[%s1887_s26 + $0x1c4] ss:$8 sps:$4 sm:$0xff]  }
  0x20   : > { %v1812_v2 = vld [vmem:[%s1887_s26 + $0x1c0] ss:$8 sps:$4 sm:$0xff]   ;;  %v1813_v3 = vld [vmem:[%s1887_s26 + $0xd4] ss:$8 sps:$4 sm:$0xff]   ;;  %v1817_v5 = vld [vmem:[%s1887_s26 + $0xd0] ss:$8 sps:$4 sm:$0xff]  }
  0x21   : > { %728 = vmatpush1.bf16.msra.mxu0 %v1730_v8  ;;  %1710 = vmatpush1.bf16.msra.mxu1 %v1730_v8  ;;  %v1815_v4 = vld [vmem:[%s1887_s26 + $0x1d4] ss:$8 sps:$4 sm:$0xff]   ;;  %v1818_v6 = vld [vmem:[%s1887_s26 + $0x1d0] ss:$8 sps:$4 sm:$0xff]   ;;  %v1819_v7 = vld [vmem:[%s1887_s26 + $0xe4] ss:$8 sps:$4 sm:$0xff]  }
  0x22   : > { %729 = vmatprep.subr.bf16.mxu0 %v1839_v1  ;;  %1701 = vmatprep.subr.bf16.mxu1 %v1839_v1  ;;  %v1821_v8 = vld [vmem:[%s1887_s26 + $0x1e4] ss:$8 sps:$4 sm:$0xff]   ;;  %v1824_v10 = vld [vmem:[%s1887_s26 + $0x1e0] ss:$8 sps:$4 sm:$0xff]   ;;  %v1825_v11 = vld [vmem:[%s1887_s26 + $0xf4] ss:$8 sps:$4 sm:$0xff]  }
  0x23   : > { %v1829_v13 = vld [vmem:[%s1887_s26 + $0xf0] ss:$8 sps:$4 sm:$0xff]  }
  0x24   : > { %v1830_v14 = vld [vmem:[%s1887_s26 + $0x1f0] ss:$8 sps:$4 sm:$0xff]  }
  0x25   : > { %730 = vmatpush1.bf16.msra.mxu0 %v1731_v9  ;;  %1711 = vmatpush1.bf16.msra.mxu1 %v1731_v9  ;;  %v1823_v9 = vld [vmem:[%s1887_s26 + $0xe0] ss:$8 sps:$4 sm:$0xff]  }
  0x26   : > { %731 = vmatprep.subr.bf16.mxu0 %v1839_v1  ;;  %1702 = vmatprep.subr.bf16.mxu1 %v1839_v1 }
  0x29   : > { %732 = vmatpush1.bf16.msra.mxu0 %v1732_v12  ;;  %1712 = vmatpush1.bf16.msra.mxu1 %v1732_v12  ;;  %v1827_v12 = vld [vmem:[%s1887_s26 + $0x1f4] ss:$8 sps:$4 sm:$0xff]  }
  0x2a   : > { %745 = vmatprep.subr.bf16.mxu0 %v1839_v1  ;;  %1703 = vmatprep.subr.bf16.mxu1 %v1839_v1 }
  0x2d   : > { %746 = vmatpush2.bf16.msra.mxu0 %v715_v15  ;;  %1713 = vmatpush2.bf16.msra.mxu1 %v715_v15  ;;  %v2006_v15 = vld [vmem:[%s2211_s2] ss:$0 sm:$0xff] }
  0x2e   : > { %747 = vmatprep.subr.bf16.mxu0 %v1839_v1  ;;  %1704 = vmatprep.subr.bf16.mxu1 %v1839_v1  ;;  %v1811_v1 = vld [vmem:[%s1887_s26 + $0xc0] ss:$8 sps:$4 sm:$0xff]  }
  0x31   : > { %748 = vmatpush2.bf16.msra.mxu0 %v1734_v16  ;;  %1714 = vmatpush2.bf16.msra.mxu1 %v1734_v16 }
  0x34   : > { %750 = vmatmul.mubr.bf16.vlgmr.msra.gmra.mxu0 %v1735_v17  ;;  %878 = vmatmul.mubr.bf16.vlgmr.msra.gmra.mxu1 %v1738_v18 }
  0x35   : > { %1533 = vmatprep.mubr.msk.bf16.mxu0 %vm613_vm0, %v1741_v19  ;;  %1549 = vmatprep.mubr.msk.bf16.mxu1 %vm613_vm0, %v1743_v20 }
  0x3c   : > { %758 = vmatmul.mubr.bf16.gmra.mxu0 %v1745_v21  ;;  %886 = vmatmul.mubr.bf16.gmra.mxu1 %v1746_v22 }
  0x3d   : > { %1534 = vmatprep.mubr.msk.bf16.mxu0 %vm613_vm0, %v1747_v23  ;;  %1550 = vmatprep.mubr.msk.bf16.mxu1 %vm613_vm0, %v1749_v24 }
  0x44   : > { %766 = vmatmul.mubr.bf16.gmra.mxu0 %v1751_v25  ;;  %894 = vmatmul.mubr.bf16.gmra.mxu1 %v1752_v26 }
  0x45   : > { %1535 = vmatprep.mubr.msk.bf16.mxu0 %vm613_vm0, %v1753_v27  ;;  %1551 = vmatprep.mubr.msk.bf16.mxu1 %vm613_vm0, %v1755_v28 }
  0x4c   : > { %774 = vmatmul.mubr.bf16.gmra.mxu0 %v1757_v29  ;;  %902 = vmatmul.mubr.bf16.gmra.mxu1 %v1758_v30 }
  0x4d   : > { %1536 = vmatprep.mubr.msk.bf16.mxu0 %vm613_vm0, %v1759_v31  ;;  %1552 = vmatprep.mubr.msk.bf16.mxu1 %vm613_vm0, %v1761_v32 }
  0x54   : > { %782 = vmatmul.mubr.bf16.gmra.mxu0 %v1763_v33  ;;  %910 = vmatmul.mubr.bf16.gmra.mxu1 %v1764_v34 }
  0x55   : > { %1537 = vmatprep.mubr.msk.bf16.mxu0 %vm613_vm0, %v1765_v35  ;;  %1553 = vmatprep.mubr.msk.bf16.mxu1 %vm613_vm0, %v1767_v36 }
  0x5c   : > { %790 = vmatmul.mubr.bf16.gmra.mxu0 %v1769_v37  ;;  %918 = vmatmul.mubr.bf16.gmra.mxu1 %v1770_v38 }
  0x5d   : > { %1538 = vmatprep.mubr.msk.bf16.mxu0 %vm613_vm0, %v1771_v39  ;;  %1554 = vmatprep.mubr.msk.bf16.mxu1 %vm613_vm0, %v1773_v40 }
  0x64   : > { %798 = vmatmul.mubr.bf16.gmra.mxu0 %v1775_v41  ;;  %926 = vmatmul.mubr.bf16.gmra.mxu1 %v1776_v42 }
  0x65   : > { %1539 = vmatprep.mubr.msk.bf16.mxu0 %vm613_vm0, %v1777_v43  ;;  %1555 = vmatprep.mubr.msk.bf16.mxu1 %vm613_vm0, %v1779_v44 }
  0x6c   : > { %806 = vmatmul.mubr.bf16.gmra.mxu0 %v1781_v45  ;;  %934 = vmatmul.mubr.bf16.gmra.mxu1 %v1782_v46 }
  0x6d   : > { %1540 = vmatprep.mubr.msk.bf16.mxu0 %vm613_vm0, %v1783_v47  ;;  %1556 = vmatprep.mubr.msk.bf16.mxu1 %vm613_vm0, %v1785_v48 }
  0x74   : > { %814 = vmatmul.mubr.bf16.gmra.mxu0 %v1787_v49  ;;  %942 = vmatmul.mubr.bf16.gmra.mxu1 %v1788_v50 }
  0x75   : > { %1541 = vmatprep.mubr.msk.bf16.mxu0 %vm613_vm0, %v1789_v51  ;;  %1557 = vmatprep.mubr.msk.bf16.mxu1 %vm613_vm0, %v1791_v52 }
  0x7c   : > { %822 = vmatmul.mubr.bf16.gmra.mxu0 %v1793_v53  ;;  %950 = vmatmul.mubr.bf16.gmra.mxu1 %v1794_v54 }
  0x7d   : > { %1542 = vmatprep.mubr.msk.bf16.mxu0 %vm613_vm0, %v1795_v55  ;;  %1558 = vmatprep.mubr.msk.bf16.mxu1 %vm613_vm0, %v1797_v56 }
  0x84   : > { %830 = vmatmul.mubr.bf16.gmra.mxu0 %v1799_v57  ;;  %958 = vmatmul.mubr.bf16.gmra.mxu1 %v1800_v58 }
  0x85   : > { %1543 = vmatprep.mubr.msk.bf16.mxu0 %vm613_vm0, %v1801_v59  ;;  %1559 = vmatprep.mubr.msk.bf16.mxu1 %vm613_vm0, %v1803_v60 }
  0x8c   : > { %838 = vmatmul.mubr.bf16.gmra.mxu0 %v1805_v61  ;;  %966 = vmatmul.mubr.bf16.gmra.mxu1 %v1806_v62 }
  0x8d   : > { %1544 = vmatprep.mubr.msk.bf16.mxu0 %vm613_vm0, %v1807_v63  ;;  %1560 = vmatprep.mubr.msk.bf16.mxu1 %vm613_vm0, %v1809_v0 }
  0x94   : > { %846 = vmatmul.mubr.bf16.gmra.mxu0 %v1811_v1  ;;  %974 = vmatmul.mubr.bf16.gmra.mxu1 %v1812_v2 }
  0x95   : > { %1545 = vmatprep.mubr.msk.bf16.mxu0 %vm613_vm0, %v1813_v3  ;;  %1561 = vmatprep.mubr.msk.bf16.mxu1 %vm613_vm0, %v1815_v4 }
  0x9c   : > { %854 = vmatmul.mubr.bf16.gmra.mxu0 %v1817_v5  ;;  %982 = vmatmul.mubr.bf16.gmra.mxu1 %v1818_v6 }
  0x9d   : > { %1546 = vmatprep.mubr.msk.bf16.mxu0 %vm613_vm0, %v1819_v7  ;;  %1562 = vmatprep.mubr.msk.bf16.mxu1 %vm613_vm0, %v1821_v8 }
  0xa4   : > { %862 = vmatmul.mubr.bf16.gmra.mxu0 %v1823_v9  ;;  %990 = vmatmul.mubr.bf16.gmra.mxu1 %v1824_v10 }
  0xa5   : > { %1547 = vmatprep.mubr.msk.bf16.mxu0 %vm613_vm0, %v1825_v11  ;;  %1563 = vmatprep.mubr.msk.bf16.mxu1 %vm613_vm0, %v1827_v12 }
  0xac   : > { %870 = vmatmul.mubr.bf16.gmra.mxu0 %v1829_v13  ;;  %998 = vmatmul.mubr.bf16.gmra.mxu1 %v1830_v14 }
  0xf4   : > { %v751_v16 = vpop.f32.mrf.mxu0  ;;  %v879_v17 = vpop.f32.mrf.mxu1 }
  0xf5   : > { %v752_v18 = vadd.f32 %v2006_v15, %v751_v16  ;;  %v880_v19 = vadd.f32 %v2006_v15, %v879_v17 }
  0xf6   : > { %v753_v20 = vpop.f32.mrf.mxu0  ;;  %v881_v21 = vpop.f32.mrf.mxu1 }
  0xf7   : > { %v1006_v22 = vmax.f32 %v752_v18, 0.0  ;;  %v1038_v23 = vmax.f32 %v880_v19, 0.0 }
  0xf8   : > { %v754_v24 = vpop.f32.mrf.mxu0  ;;  %v882_v25 = vpop.f32.mrf.mxu1 }
  0xf9   : > { %v1631_v26 = vpack.c.bf16 %v1006_v22, %v1006_v22  ;;  %v1663_v27 = vpack.c.bf16 %v1038_v23, %v1038_v23  ;;  %v755_v28 = vadd.f32 %v2006_v15, %v754_v24  ;;  %v883_v29 = vadd.f32 %v2006_v15, %v882_v25 }
  0xfa   : > { %v756_v30 = vpop.f32.mrf.mxu0  ;;  %v884_v31 = vpop.f32.mrf.mxu1 }
  0xfb   : > { %1327 = vst.msk [vmem:[%s2014_s18] sm:$0xf] %vm1326_vm3, %v1631_v26  ;;  %1359 = vst.msk [vmem:[%s2014_s18 + $0x80] sm:$0xf] %vm1326_vm3, %v1663_v27  ;;  %v1007_v32 = vmax.f32 %v755_v28, 0.0  ;;  %v1039_v33 = vmax.f32 %v883_v29, 0.0 }
  0xfc   : > { %v759_v34 = vpop.f32.mrf.mxu0  ;;  %v887_v35 = vpop.f32.mrf.mxu1 }
  0xfd   : > { %v1632_v36 = vpack.c.bf16 %v1007_v32, %v1007_v32  ;;  %v1664_v37 = vpack.c.bf16 %v1039_v33, %v1039_v33  ;;  %v760_v38 = vadd.f32 %v2006_v15, %v759_v34  ;;  %v888_v39 = vadd.f32 %v2006_v15, %v887_v35 }
  0xfe   : > { %v761_v40 = vpop.f32.mrf.mxu0  ;;  %v889_v41 = vpop.f32.mrf.mxu1 }
  0xff   : > { %1328 = vst.msk [vmem:[%s2014_s18 + $0x4] sm:$0xf] %vm1326_vm3, %v1632_v36  ;;  %1360 = vst.msk [vmem:[%s2014_s18 + $0x84] sm:$0xf] %vm1326_vm3, %v1664_v37  ;;  %v1008_v42 = vmax.f32 %v760_v38, 0.0  ;;  %v1040_v43 = vmax.f32 %v888_v39, 0.0 }
 0x100   : > { %v762_v44 = vpop.f32.mrf.mxu0  ;;  %v890_v45 = vpop.f32.mrf.mxu1 }
 0x101   : > { %v1633_v46 = vpack.c.bf16 %v1008_v42, %v1008_v42  ;;  %v1665_v47 = vpack.c.bf16 %v1040_v43, %v1040_v43  ;;  %v763_v48 = vadd.f32 %v2006_v15, %v762_v44  ;;  %v891_v49 = vadd.f32 %v2006_v15, %v890_v45 }
 0x102   : > { %v764_v50 = vpop.f32.mrf.mxu0  ;;  %v892_v51 = vpop.f32.mrf.mxu1 }
 0x103   : > { %1329 = vst.msk [vmem:[%s2014_s18 + $0x8] sm:$0xf] %vm1326_vm3, %v1633_v46  ;;  %1361 = vst.msk [vmem:[%s2014_s18 + $0x88] sm:$0xf] %vm1326_vm3, %v1665_v47  ;;  %v1009_v52 = vmax.f32 %v763_v48, 0.0  ;;  %v1041_v53 = vmax.f32 %v891_v49, 0.0 }
 0x104   : > { %v767_v54 = vpop.f32.mrf.mxu0  ;;  %v895_v55 = vpop.f32.mrf.mxu1 }
 0x105   : > { %v1634_v56 = vpack.c.bf16 %v1009_v52, %v1009_v52  ;;  %v1666_v57 = vpack.c.bf16 %v1041_v53, %v1041_v53  ;;  %v768_v58 = vadd.f32 %v2006_v15, %v767_v54  ;;  %v896_v59 = vadd.f32 %v2006_v15, %v895_v55 }
 0x106   : > { %v769_v60 = vpop.f32.mrf.mxu0  ;;  %v897_v61 = vpop.f32.mrf.mxu1 }
 0x107   : > { %1330 = vst.msk [vmem:[%s2014_s18 + $0xc] sm:$0xf] %vm1326_vm3, %v1634_v56  ;;  %1362 = vst.msk [vmem:[%s2014_s18 + $0x8c] sm:$0xf] %vm1326_vm3, %v1666_v57  ;;  %v1010_v62 = vmax.f32 %v768_v58, 0.0  ;;  %v1042_v63 = vmax.f32 %v896_v59, 0.0 }
 0x108   : > { %v770_v0 = vpop.f32.mrf.mxu0  ;;  %v898_v1 = vpop.f32.mrf.mxu1 }
 0x109   : > { %v1635_v2 = vpack.c.bf16 %v1010_v62, %v1010_v62  ;;  %v1667_v3 = vpack.c.bf16 %v1042_v63, %v1042_v63  ;;  %v771_v4 = vadd.f32 %v2006_v15, %v770_v0  ;;  %v899_v5 = vadd.f32 %v2006_v15, %v898_v1 }
 0x10a   : > { %v772_v6 = vpop.f32.mrf.mxu0  ;;  %v900_v7 = vpop.f32.mrf.mxu1 }
 0x10b   : > { %1331 = vst.msk [vmem:[%s2014_s18 + $0x10] sm:$0xf] %vm1326_vm3, %v1635_v2  ;;  %1363 = vst.msk [vmem:[%s2014_s18 + $0x90] sm:$0xf] %vm1326_vm3, %v1667_v3  ;;  %v1011_v8 = vmax.f32 %v771_v4, 0.0  ;;  %v1043_v9 = vmax.f32 %v899_v5, 0.0 }
 0x10c   : > { %v775_v10 = vpop.f32.mrf.mxu0  ;;  %v903_v11 = vpop.f32.mrf.mxu1 }
 0x10d   : > { %v1636_v12 = vpack.c.bf16 %v1011_v8, %v1011_v8  ;;  %v1668_v13 = vpack.c.bf16 %v1043_v9, %v1043_v9  ;;  %v776_v14 = vadd.f32 %v2006_v15, %v775_v10  ;;  %v904_v16 = vadd.f32 %v2006_v15, %v903_v11 }
 0x10e   : > { %v777_v17 = vpop.f32.mrf.mxu0  ;;  %v905_v18 = vpop.f32.mrf.mxu1 }
 0x10f   : > { %1332 = vst.msk [vmem:[%s2014_s18 + $0x14] sm:$0xf] %vm1326_vm3, %v1636_v12  ;;  %1364 = vst.msk [vmem:[%s2014_s18 + $0x94] sm:$0xf] %vm1326_vm3, %v1668_v13  ;;  %v1012_v19 = vmax.f32 %v776_v14, 0.0  ;;  %v1044_v20 = vmax.f32 %v904_v16, 0.0 }
 0x110   : > { %v778_v21 = vpop.f32.mrf.mxu0  ;;  %v906_v22 = vpop.f32.mrf.mxu1 }
 0x111   : > { %v1637_v23 = vpack.c.bf16 %v1012_v19, %v1012_v19  ;;  %v1669_v24 = vpack.c.bf16 %v1044_v20, %v1044_v20  ;;  %v779_v25 = vadd.f32 %v2006_v15, %v778_v21  ;;  %v907_v26 = vadd.f32 %v2006_v15, %v906_v22 }
 0x112   : > { %v780_v27 = vpop.f32.mrf.mxu0  ;;  %v908_v28 = vpop.f32.mrf.mxu1 }
 0x113   : > { %1333 = vst.msk [vmem:[%s2014_s18 + $0x18] sm:$0xf] %vm1326_vm3, %v1637_v23  ;;  %1365 = vst.msk [vmem:[%s2014_s18 + $0x98] sm:$0xf] %vm1326_vm3, %v1669_v24  ;;  %v1013_v29 = vmax.f32 %v779_v25, 0.0  ;;  %v1045_v30 = vmax.f32 %v907_v26, 0.0 }
 0x114   : > { %v783_v31 = vpop.f32.mrf.mxu0  ;;  %v911_v32 = vpop.f32.mrf.mxu1 }
 0x115   : > { %v1638_v33 = vpack.c.bf16 %v1013_v29, %v1013_v29  ;;  %v1670_v34 = vpack.c.bf16 %v1045_v30, %v1045_v30  ;;  %v784_v35 = vadd.f32 %v2006_v15, %v783_v31  ;;  %v912_v36 = vadd.f32 %v2006_v15, %v911_v32 }
 0x116   : > { %v785_v37 = vpop.f32.mrf.mxu0  ;;  %v913_v38 = vpop.f32.mrf.mxu1 }
 0x117   : > { %1334 = vst.msk [vmem:[%s2014_s18 + $0x1c] sm:$0xf] %vm1326_vm3, %v1638_v33  ;;  %1366 = vst.msk [vmem:[%s2014_s18 + $0x9c] sm:$0xf] %vm1326_vm3, %v1670_v34  ;;  %v1014_v39 = vmax.f32 %v784_v35, 0.0  ;;  %v1046_v40 = vmax.f32 %v912_v36, 0.0 }
 0x118   : > { %v786_v41 = vpop.f32.mrf.mxu0  ;;  %v914_v42 = vpop.f32.mrf.mxu1 }
 0x119   : > { %v1639_v43 = vpack.c.bf16 %v1014_v39, %v1014_v39  ;;  %v1671_v44 = vpack.c.bf16 %v1046_v40, %v1046_v40  ;;  %v787_v45 = vadd.f32 %v2006_v15, %v786_v41  ;;  %v915_v46 = vadd.f32 %v2006_v15, %v914_v42 }
 0x11a   : > { %v788_v47 = vpop.f32.mrf.mxu0  ;;  %v916_v48 = vpop.f32.mrf.mxu1 }
 0x11b   : > { %1335 = vst.msk [vmem:[%s2014_s18 + $0x20] sm:$0xf] %vm1326_vm3, %v1639_v43  ;;  %1367 = vst.msk [vmem:[%s2014_s18 + $0xa0] sm:$0xf] %vm1326_vm3, %v1671_v44  ;;  %v1015_v49 = vmax.f32 %v787_v45, 0.0  ;;  %v1047_v50 = vmax.f32 %v915_v46, 0.0 }
 0x11c   : > { %v791_v51 = vpop.f32.mrf.mxu0  ;;  %v919_v52 = vpop.f32.mrf.mxu1 }
 0x11d   : > { %v1640_v53 = vpack.c.bf16 %v1015_v49, %v1015_v49  ;;  %v1672_v54 = vpack.c.bf16 %v1047_v50, %v1047_v50  ;;  %v792_v55 = vadd.f32 %v2006_v15, %v791_v51  ;;  %v920_v56 = vadd.f32 %v2006_v15, %v919_v52 }
 0x11e   : > { %v793_v57 = vpop.f32.mrf.mxu0  ;;  %v921_v58 = vpop.f32.mrf.mxu1 }
 0x11f   : > { %1336 = vst.msk [vmem:[%s2014_s18 + $0x24] sm:$0xf] %vm1326_vm3, %v1640_v53  ;;  %1368 = vst.msk [vmem:[%s2014_s18 + $0xa4] sm:$0xf] %vm1326_vm3, %v1672_v54  ;;  %v1016_v59 = vmax.f32 %v792_v55, 0.0  ;;  %v1048_v60 = vmax.f32 %v920_v56, 0.0 }
 0x120   : > { %v794_v61 = vpop.f32.mrf.mxu0  ;;  %v922_v62 = vpop.f32.mrf.mxu1 }
 0x121   : > { %v1641_v63 = vpack.c.bf16 %v1016_v59, %v1016_v59  ;;  %v1673_v0 = vpack.c.bf16 %v1048_v60, %v1048_v60  ;;  %v795_v1 = vadd.f32 %v2006_v15, %v794_v61  ;;  %v923_v2 = vadd.f32 %v2006_v15, %v922_v62 }
 0x122   : > { %v796_v3 = vpop.f32.mrf.mxu0  ;;  %v924_v4 = vpop.f32.mrf.mxu1 }
 0x123   : > { %1337 = vst.msk [vmem:[%s2014_s18 + $0x28] sm:$0xf] %vm1326_vm3, %v1641_v63  ;;  %1369 = vst.msk [vmem:[%s2014_s18 + $0xa8] sm:$0xf] %vm1326_vm3, %v1673_v0  ;;  %v1017_v5 = vmax.f32 %v795_v1, 0.0  ;;  %v1049_v6 = vmax.f32 %v923_v2, 0.0 }
 0x124   : > { %v799_v7 = vpop.f32.mrf.mxu0  ;;  %v927_v8 = vpop.f32.mrf.mxu1 }
 0x125   : > { %v1642_v9 = vpack.c.bf16 %v1017_v5, %v1017_v5  ;;  %v1674_v10 = vpack.c.bf16 %v1049_v6, %v1049_v6  ;;  %v800_v11 = vadd.f32 %v2006_v15, %v799_v7  ;;  %v928_v12 = vadd.f32 %v2006_v15, %v927_v8 }
 0x126   : > { %v801_v13 = vpop.f32.mrf.mxu0  ;;  %v929_v14 = vpop.f32.mrf.mxu1 }
 0x127   : > { %1338 = vst.msk [vmem:[%s2014_s18 + $0x2c] sm:$0xf] %vm1326_vm3, %v1642_v9  ;;  %1370 = vst.msk [vmem:[%s2014_s18 + $0xac] sm:$0xf] %vm1326_vm3, %v1674_v10  ;;  %v1018_v16 = vmax.f32 %v800_v11, 0.0  ;;  %v1050_v17 = vmax.f32 %v928_v12, 0.0 }
 0x128   : > { %v802_v18 = vpop.f32.mrf.mxu0  ;;  %v930_v19 = vpop.f32.mrf.mxu1 }
 0x129   : > { %v1643_v20 = vpack.c.bf16 %v1018_v16, %v1018_v16  ;;  %v1675_v21 = vpack.c.bf16 %v1050_v17, %v1050_v17  ;;  %v803_v22 = vadd.f32 %v2006_v15, %v802_v18  ;;  %v931_v23 = vadd.f32 %v2006_v15, %v930_v19 }
 0x12a   : > { %v804_v24 = vpop.f32.mrf.mxu0  ;;  %v932_v25 = vpop.f32.mrf.mxu1 }
 0x12b   : > { %1339 = vst.msk [vmem:[%s2014_s18 + $0x30] sm:$0xf] %vm1326_vm3, %v1643_v20  ;;  %1371 = vst.msk [vmem:[%s2014_s18 + $0xb0] sm:$0xf] %vm1326_vm3, %v1675_v21  ;;  %v1019_v26 = vmax.f32 %v803_v22, 0.0  ;;  %v1051_v27 = vmax.f32 %v931_v23, 0.0 }
 0x12c   : > { %v807_v28 = vpop.f32.mrf.mxu0  ;;  %v935_v29 = vpop.f32.mrf.mxu1 }
 0x12d   : > { %v1644_v30 = vpack.c.bf16 %v1019_v26, %v1019_v26  ;;  %v1676_v31 = vpack.c.bf16 %v1051_v27, %v1051_v27  ;;  %v808_v32 = vadd.f32 %v2006_v15, %v807_v28  ;;  %v936_v33 = vadd.f32 %v2006_v15, %v935_v29 }
 0x12e   : > { %v809_v34 = vpop.f32.mrf.mxu0  ;;  %v937_v35 = vpop.f32.mrf.mxu1 }
 0x12f   : > { %1340 = vst.msk [vmem:[%s2014_s18 + $0x34] sm:$0xf] %vm1326_vm3, %v1644_v30  ;;  %1372 = vst.msk [vmem:[%s2014_s18 + $0xb4] sm:$0xf] %vm1326_vm3, %v1676_v31  ;;  %v1020_v36 = vmax.f32 %v808_v32, 0.0  ;;  %v1052_v37 = vmax.f32 %v936_v33, 0.0 }
 0x130   : > { %v810_v38 = vpop.f32.mrf.mxu0  ;;  %v938_v39 = vpop.f32.mrf.mxu1 }
 0x131   : > { %v1645_v40 = vpack.c.bf16 %v1020_v36, %v1020_v36  ;;  %v1677_v41 = vpack.c.bf16 %v1052_v37, %v1052_v37  ;;  %v811_v42 = vadd.f32 %v2006_v15, %v810_v38  ;;  %v939_v43 = vadd.f32 %v2006_v15, %v938_v39 }
 0x132   : > { %v812_v44 = vpop.f32.mrf.mxu0  ;;  %v940_v45 = vpop.f32.mrf.mxu1 }
 0x133   : > { %1341 = vst.msk [vmem:[%s2014_s18 + $0x38] sm:$0xf] %vm1326_vm3, %v1645_v40  ;;  %1373 = vst.msk [vmem:[%s2014_s18 + $0xb8] sm:$0xf] %vm1326_vm3, %v1677_v41  ;;  %v1021_v46 = vmax.f32 %v811_v42, 0.0  ;;  %v1053_v47 = vmax.f32 %v939_v43, 0.0 }
 0x134   : > { %v815_v48 = vpop.f32.mrf.mxu0  ;;  %v943_v49 = vpop.f32.mrf.mxu1 }
 0x135   : > { %v1646_v50 = vpack.c.bf16 %v1021_v46, %v1021_v46  ;;  %v1678_v51 = vpack.c.bf16 %v1053_v47, %v1053_v47  ;;  %v816_v52 = vadd.f32 %v2006_v15, %v815_v48  ;;  %v944_v53 = vadd.f32 %v2006_v15, %v943_v49 }
 0x136   : > { %v817_v54 = vpop.f32.mrf.mxu0  ;;  %v945_v55 = vpop.f32.mrf.mxu1 }
 0x137   : > { %1342 = vst.msk [vmem:[%s2014_s18 + $0x3c] sm:$0xf] %vm1326_vm3, %v1646_v50  ;;  %1374 = vst.msk [vmem:[%s2014_s18 + $0xbc] sm:$0xf] %vm1326_vm3, %v1678_v51  ;;  %v1022_v56 = vmax.f32 %v816_v52, 0.0  ;;  %v1054_v57 = vmax.f32 %v944_v53, 0.0 }
 0x138   : > { %v818_v58 = vpop.f32.mrf.mxu0  ;;  %v946_v59 = vpop.f32.mrf.mxu1 }
 0x139   : > { %v1647_v60 = vpack.c.bf16 %v1022_v56, %v1022_v56  ;;  %v1679_v61 = vpack.c.bf16 %v1054_v57, %v1054_v57  ;;  %v819_v62 = vadd.f32 %v2006_v15, %v818_v58  ;;  %v947_v63 = vadd.f32 %v2006_v15, %v946_v59 }
 0x13a   : > { %v820_v0 = vpop.f32.mrf.mxu0  ;;  %v948_v1 = vpop.f32.mrf.mxu1 }
 0x13b   : > { %1343 = vst.msk [vmem:[%s2014_s18 + $0x40] sm:$0xf] %vm1326_vm3, %v1647_v60  ;;  %1375 = vst.msk [vmem:[%s2014_s18 + $0xc0] sm:$0xf] %vm1326_vm3, %v1679_v61  ;;  %v1023_v2 = vmax.f32 %v819_v62, 0.0  ;;  %v1055_v3 = vmax.f32 %v947_v63, 0.0 }
 0x13c   : > { %v823_v4 = vpop.f32.mrf.mxu0  ;;  %v951_v5 = vpop.f32.mrf.mxu1 }
 0x13d   : > { %v1648_v6 = vpack.c.bf16 %v1023_v2, %v1023_v2  ;;  %v1680_v7 = vpack.c.bf16 %v1055_v3, %v1055_v3  ;;  %v824_v8 = vadd.f32 %v2006_v15, %v823_v4  ;;  %v952_v9 = vadd.f32 %v2006_v15, %v951_v5 }
 0x13e   : > { %v825_v10 = vpop.f32.mrf.mxu0  ;;  %v953_v11 = vpop.f32.mrf.mxu1 }
 0x13f   : > { %1344 = vst.msk [vmem:[%s2014_s18 + $0x44] sm:$0xf] %vm1326_vm3, %v1648_v6  ;;  %1376 = vst.msk [vmem:[%s2014_s18 + $0xc4] sm:$0xf] %vm1326_vm3, %v1680_v7  ;;  %v1024_v12 = vmax.f32 %v824_v8, 0.0  ;;  %v1056_v13 = vmax.f32 %v952_v9, 0.0 }
 0x140   : > { %v826_v14 = vpop.f32.mrf.mxu0  ;;  %v954_v16 = vpop.f32.mrf.mxu1 }
 0x141   : > { %v1649_v17 = vpack.c.bf16 %v1024_v12, %v1024_v12  ;;  %v1681_v18 = vpack.c.bf16 %v1056_v13, %v1056_v13  ;;  %v827_v19 = vadd.f32 %v2006_v15, %v826_v14  ;;  %v955_v20 = vadd.f32 %v2006_v15, %v954_v16 }
 0x142   : > { %v828_v21 = vpop.f32.mrf.mxu0  ;;  %v956_v22 = vpop.f32.mrf.mxu1 }
 0x143   : > { %1345 = vst.msk [vmem:[%s2014_s18 + $0x48] sm:$0xf] %vm1326_vm3, %v1649_v17  ;;  %1377 = vst.msk [vmem:[%s2014_s18 + $0xc8] sm:$0xf] %vm1326_vm3, %v1681_v18  ;;  %v1025_v23 = vmax.f32 %v827_v19, 0.0  ;;  %v1057_v24 = vmax.f32 %v955_v20, 0.0 }
 0x144   : > { %v831_v25 = vpop.f32.mrf.mxu0  ;;  %v959_v26 = vpop.f32.mrf.mxu1 }
 0x145   : > { %v1650_v27 = vpack.c.bf16 %v1025_v23, %v1025_v23  ;;  %v1682_v28 = vpack.c.bf16 %v1057_v24, %v1057_v24  ;;  %v832_v29 = vadd.f32 %v2006_v15, %v831_v25  ;;  %v960_v30 = vadd.f32 %v2006_v15, %v959_v26 }
 0x146   : > { %v833_v31 = vpop.f32.mrf.mxu0  ;;  %v961_v32 = vpop.f32.mrf.mxu1 }
 0x147   : > { %1346 = vst.msk [vmem:[%s2014_s18 + $0x4c] sm:$0xf] %vm1326_vm3, %v1650_v27  ;;  %1378 = vst.msk [vmem:[%s2014_s18 + $0xcc] sm:$0xf] %vm1326_vm3, %v1682_v28  ;;  %v1026_v33 = vmax.f32 %v832_v29, 0.0  ;;  %v1058_v34 = vmax.f32 %v960_v30, 0.0 }
 0x148   : > { %v834_v35 = vpop.f32.mrf.mxu0  ;;  %v962_v36 = vpop.f32.mrf.mxu1 }
 0x149   : > { %v1651_v37 = vpack.c.bf16 %v1026_v33, %v1026_v33  ;;  %v1683_v38 = vpack.c.bf16 %v1058_v34, %v1058_v34  ;;  %v835_v39 = vadd.f32 %v2006_v15, %v834_v35  ;;  %v963_v40 = vadd.f32 %v2006_v15, %v962_v36 }
 0x14a   : > { %v836_v41 = vpop.f32.mrf.mxu0  ;;  %v964_v42 = vpop.f32.mrf.mxu1 }
 0x14b   : > { %1347 = vst.msk [vmem:[%s2014_s18 + $0x50] sm:$0xf] %vm1326_vm3, %v1651_v37  ;;  %1379 = vst.msk [vmem:[%s2014_s18 + $0xd0] sm:$0xf] %vm1326_vm3, %v1683_v38  ;;  %v1027_v43 = vmax.f32 %v835_v39, 0.0  ;;  %v1059_v44 = vmax.f32 %v963_v40, 0.0 }
 0x14c   : > { %v839_v45 = vpop.f32.mrf.mxu0  ;;  %v967_v46 = vpop.f32.mrf.mxu1 }
 0x14d   : > { %v1652_v47 = vpack.c.bf16 %v1027_v43, %v1027_v43  ;;  %v1684_v48 = vpack.c.bf16 %v1059_v44, %v1059_v44  ;;  %v840_v49 = vadd.f32 %v2006_v15, %v839_v45  ;;  %v968_v50 = vadd.f32 %v2006_v15, %v967_v46 }
 0x14e   : > { %v841_v51 = vpop.f32.mrf.mxu0  ;;  %v969_v52 = vpop.f32.mrf.mxu1 }
 0x14f   : > { %1348 = vst.msk [vmem:[%s2014_s18 + $0x54] sm:$0xf] %vm1326_vm3, %v1652_v47  ;;  %1380 = vst.msk [vmem:[%s2014_s18 + $0xd4] sm:$0xf] %vm1326_vm3, %v1684_v48  ;;  %v1028_v53 = vmax.f32 %v840_v49, 0.0  ;;  %v1060_v54 = vmax.f32 %v968_v50, 0.0 }
 0x150   : > { %v842_v55 = vpop.f32.mrf.mxu0  ;;  %v970_v56 = vpop.f32.mrf.mxu1 }
 0x151   : > { %v1653_v57 = vpack.c.bf16 %v1028_v53, %v1028_v53  ;;  %v1685_v58 = vpack.c.bf16 %v1060_v54, %v1060_v54  ;;  %v843_v59 = vadd.f32 %v2006_v15, %v842_v55  ;;  %v971_v60 = vadd.f32 %v2006_v15, %v970_v56 }
 0x152   : > { %v844_v61 = vpop.f32.mrf.mxu0  ;;  %v972_v62 = vpop.f32.mrf.mxu1 }
 0x153   : > { %1349 = vst.msk [vmem:[%s2014_s18 + $0x58] sm:$0xf] %vm1326_vm3, %v1653_v57  ;;  %1381 = vst.msk [vmem:[%s2014_s18 + $0xd8] sm:$0xf] %vm1326_vm3, %v1685_v58  ;;  %v1029_v63 = vmax.f32 %v843_v59, 0.0  ;;  %v1061_v0 = vmax.f32 %v971_v60, 0.0 }
 0x154   : > { %v847_v1 = vpop.f32.mrf.mxu0  ;;  %v975_v2 = vpop.f32.mrf.mxu1 }
 0x155   : > { %v1654_v3 = vpack.c.bf16 %v1029_v63, %v1029_v63  ;;  %v1686_v4 = vpack.c.bf16 %v1061_v0, %v1061_v0  ;;  %v848_v5 = vadd.f32 %v2006_v15, %v847_v1  ;;  %v976_v6 = vadd.f32 %v2006_v15, %v975_v2 }
 0x156   : > { %v849_v7 = vpop.f32.mrf.mxu0  ;;  %v977_v8 = vpop.f32.mrf.mxu1 }
 0x157   : > { %1350 = vst.msk [vmem:[%s2014_s18 + $0x5c] sm:$0xf] %vm1326_vm3, %v1654_v3  ;;  %1382 = vst.msk [vmem:[%s2014_s18 + $0xdc] sm:$0xf] %vm1326_vm3, %v1686_v4  ;;  %v1030_v9 = vmax.f32 %v848_v5, 0.0  ;;  %v1062_v10 = vmax.f32 %v976_v6, 0.0 }
 0x158   : > { %v850_v11 = vpop.f32.mrf.mxu0  ;;  %v978_v12 = vpop.f32.mrf.mxu1 }
 0x159   : > { %v1655_v13 = vpack.c.bf16 %v1030_v9, %v1030_v9  ;;  %v1687_v14 = vpack.c.bf16 %v1062_v10, %v1062_v10  ;;  %v851_v16 = vadd.f32 %v2006_v15, %v850_v11  ;;  %v979_v17 = vadd.f32 %v2006_v15, %v978_v12 }
 0x15a   : > { %v852_v18 = vpop.f32.mrf.mxu0  ;;  %v980_v19 = vpop.f32.mrf.mxu1 }
 0x15b   : > { %1351 = vst.msk [vmem:[%s2014_s18 + $0x60] sm:$0xf] %vm1326_vm3, %v1655_v13  ;;  %1383 = vst.msk [vmem:[%s2014_s18 + $0xe0] sm:$0xf] %vm1326_vm3, %v1687_v14  ;;  %v1031_v20 = vmax.f32 %v851_v16, 0.0  ;;  %v1063_v21 = vmax.f32 %v979_v17, 0.0 }
 0x15c   : > { %v855_v22 = vpop.f32.mrf.mxu0  ;;  %v983_v23 = vpop.f32.mrf.mxu1 }
 0x15d   : > { %v1656_v24 = vpack.c.bf16 %v1031_v20, %v1031_v20  ;;  %v1688_v25 = vpack.c.bf16 %v1063_v21, %v1063_v21  ;;  %v856_v26 = vadd.f32 %v2006_v15, %v855_v22  ;;  %v984_v27 = vadd.f32 %v2006_v15, %v983_v23 }
 0x15e   : > { %v857_v28 = vpop.f32.mrf.mxu0  ;;  %v985_v29 = vpop.f32.mrf.mxu1 }
 0x15f   : > { %1352 = vst.msk [vmem:[%s2014_s18 + $0x64] sm:$0xf] %vm1326_vm3, %v1656_v24  ;;  %1384 = vst.msk [vmem:[%s2014_s18 + $0xe4] sm:$0xf] %vm1326_vm3, %v1688_v25  ;;  %v1032_v30 = vmax.f32 %v856_v26, 0.0  ;;  %v1064_v31 = vmax.f32 %v984_v27, 0.0 }
 0x160   : > { %v858_v32 = vpop.f32.mrf.mxu0  ;;  %v986_v33 = vpop.f32.mrf.mxu1 }
 0x161   : > { %v1657_v34 = vpack.c.bf16 %v1032_v30, %v1032_v30  ;;  %v1689_v35 = vpack.c.bf16 %v1064_v31, %v1064_v31  ;;  %v859_v36 = vadd.f32 %v2006_v15, %v858_v32  ;;  %v987_v37 = vadd.f32 %v2006_v15, %v986_v33 }
 0x162   : > { %v860_v38 = vpop.f32.mrf.mxu0  ;;  %v988_v39 = vpop.f32.mrf.mxu1 }
 0x163   : > { %1353 = vst.msk [vmem:[%s2014_s18 + $0x68] sm:$0xf] %vm1326_vm3, %v1657_v34  ;;  %1385 = vst.msk [vmem:[%s2014_s18 + $0xe8] sm:$0xf] %vm1326_vm3, %v1689_v35  ;;  %v1033_v40 = vmax.f32 %v859_v36, 0.0  ;;  %v1065_v41 = vmax.f32 %v987_v37, 0.0 }
 0x164   : > { %v863_v42 = vpop.f32.mrf.mxu0  ;;  %v991_v43 = vpop.f32.mrf.mxu1 }
 0x165   : > { %v1658_v44 = vpack.c.bf16 %v1033_v40, %v1033_v40  ;;  %v1690_v45 = vpack.c.bf16 %v1065_v41, %v1065_v41  ;;  %v864_v46 = vadd.f32 %v2006_v15, %v863_v42  ;;  %v992_v47 = vadd.f32 %v2006_v15, %v991_v43 }
 0x166   : > { %v865_v48 = vpop.f32.mrf.mxu0  ;;  %v993_v49 = vpop.f32.mrf.mxu1 }
 0x167   : > { %1354 = vst.msk [vmem:[%s2014_s18 + $0x6c] sm:$0xf] %vm1326_vm3, %v1658_v44  ;;  %1386 = vst.msk [vmem:[%s2014_s18 + $0xec] sm:$0xf] %vm1326_vm3, %v1690_v45  ;;  %v1034_v50 = vmax.f32 %v864_v46, 0.0  ;;  %v1066_v51 = vmax.f32 %v992_v47, 0.0 }
 0x168   : > { %v866_v52 = vpop.f32.mrf.mxu0  ;;  %v994_v53 = vpop.f32.mrf.mxu1 }
 0x169   : > { %v1659_v54 = vpack.c.bf16 %v1034_v50, %v1034_v50  ;;  %v1691_v55 = vpack.c.bf16 %v1066_v51, %v1066_v51  ;;  %v867_v56 = vadd.f32 %v2006_v15, %v866_v52  ;;  %v995_v57 = vadd.f32 %v2006_v15, %v994_v53 }
 0x16a   : > { %v868_v58 = vpop.f32.mrf.mxu0  ;;  %v996_v59 = vpop.f32.mrf.mxu1 }
 0x16b   : > { %1355 = vst.msk [vmem:[%s2014_s18 + $0x70] sm:$0xf] %vm1326_vm3, %v1659_v54  ;;  %1387 = vst.msk [vmem:[%s2014_s18 + $0xf0] sm:$0xf] %vm1326_vm3, %v1691_v55  ;;  %v1035_v60 = vmax.f32 %v867_v56, 0.0  ;;  %v1067_v61 = vmax.f32 %v995_v57, 0.0 }
 0x16c   : > { %v871_v62 = vpop.f32.mrf.mxu0  ;;  %v999_v63 = vpop.f32.mrf.mxu1 }
 0x16d   : > { %v1660_v0 = vpack.c.bf16 %v1035_v60, %v1035_v60  ;;  %v1692_v1 = vpack.c.bf16 %v1067_v61, %v1067_v61  ;;  %v872_v2 = vadd.f32 %v2006_v15, %v871_v62  ;;  %v1000_v3 = vadd.f32 %v2006_v15, %v999_v63 }
 0x16e   : > { %v873_v4 = vpop.f32.mrf.mxu0  ;;  %v1001_v5 = vpop.f32.mrf.mxu1 }
 0x16f   : > { %1356 = vst.msk [vmem:[%s2014_s18 + $0x74] sm:$0xf] %vm1326_vm3, %v1660_v0  ;;  %1388 = vst.msk [vmem:[%s2014_s18 + $0xf4] sm:$0xf] %vm1326_vm3, %v1692_v1  ;;  %v1036_v6 = vmax.f32 %v872_v2, 0.0  ;;  %v1068_v7 = vmax.f32 %v1000_v3, 0.0 }
 0x170   : > { %v874_v8 = vpop.f32.mrf.mxu0  ;;  %v1002_v9 = vpop.f32.mrf.mxu1 }
 0x171   : > { %v1661_v10 = vpack.c.bf16 %v1036_v6, %v1036_v6  ;;  %v1693_v11 = vpack.c.bf16 %v1068_v7, %v1068_v7  ;;  %v875_v12 = vadd.f32 %v2006_v15, %v874_v8  ;;  %v1003_v13 = vadd.f32 %v2006_v15, %v1002_v9 }
 0x172   : > { %v876_v14 = vpop.f32.mrf.mxu0  ;;  %v1004_v16 = vpop.f32.mrf.mxu1 }
 0x173   : > { %1357 = vst.msk [vmem:[%s2014_s18 + $0x78] sm:$0xf] %vm1326_vm3, %v1661_v10  ;;  %1389 = vst.msk [vmem:[%s2014_s18 + $0xf8] sm:$0xf] %vm1326_vm3, %v1693_v11  ;;  %v1037_v17 = vmax.f32 %v875_v12, 0.0  ;;  %v1069_v18 = vmax.f32 %v1003_v13, 0.0 }
 0x175   : > { %v1662_v19 = vpack.c.bf16 %v1037_v17, %v1037_v17  ;;  %v1694_v20 = vpack.c.bf16 %v1069_v18, %v1069_v18 }
 0x177   : > { %1358 = vst.msk [vmem:[%s2014_s18 + $0x7c] sm:$0xf] %vm1326_vm3, %v1662_v19  ;;  %1390 = vst.msk [vmem:[%s2014_s18 + $0xfc] sm:$0xf] %vm1326_vm3, %v1694_v20 }
 0x178 PF: > { %s13_s12 = sadd.s32 1, %s1837_s12  }
 0x179   : > { %p10_p4 = scmp.ge.s32.totalorder %s13_s12, 4  }
 0x17b   :  { %12 = sbr.rel (!%p10_p4) target bundleno = 1 (0x1), region = 62 }

// kernel: _lambda_.20
= control target key start
LH: loop header
LB: loop body
LE: loop exit
PB: predicated region body
PF: predicated region fallthrough
CT: control target
= control target key end

     0   :  { %vm219_vm0 = vcmask 1043456   ;;  %vm170_vm1 = vcmask 588800   ;;  %vm544_vm2 = vcmask 125952   ;;  %s1043_s1 = inlined_call_operand.vmem [shape: bf16[72,16], index: 1, kind: input, shape index: {}]   ;;  %s1044_s0 = inlined_call_operand.vmem [shape: bf16[256,72], index: 0, kind: input, shape index: {}]   ;;  %s1045_s2 = inlined_call_operand.vmem [shape: f32[1,16], index: 2, kind: input, shape index: {}]   ;;  %s1046_s3 = inlined_call_operand.vmem [shape: bf16[256,16], index: 3, kind: output, shape index: {}]  }
   0x1   :  { %v758_v0 = vld [vmem:[%s1043_s1 + $0x20] ss:$0 sps:$4 sm:$0xff]   ;;  %v759_v1 = vld [vmem:[%s1043_s1 + $0x18] sm:$0xff]   ;;  %v760_v3 = vld [vmem:[%s1043_s1 + $0x10] sm:$0xff]  }
   0x2   :  { %756 = vmatprep.subr.msk.bf16.mxu0 %vm219_vm0, %v758_v0  ;;  %757 = vmatprep.subr.msk.bf16.mxu1 %vm219_vm0, %v758_v0  ;;  %v221_v2 = vsel %vm219_vm0, %v758_v0, 0  ;;  %v763_v4 = vld [vmem:[%s1044_s0] sm:$0xff]   ;;  %v761_v6 = vld [vmem:[%s1043_s1 + $0x8] sm:$0xff]   ;;  %v767_v10 = vld [vmem:[%s1044_s0 + $0x10] sm:$0xff]  }
   0x3   :  { %705 = vmatpush3.bf16.msra.mxu0 %v221_v2  ;;  %751 = vmatpush3.bf16.msra.mxu1 %v221_v2  ;;  %v764_v5 = vld [vmem:[%s1044_s0 + $0x40] sm:$0xff]   ;;  %v765_v8 = vld [vmem:[%s1044_s0 + $0x8] sm:$0xff]   ;;  %v768_v11 = vld [vmem:[%s1044_s0 + $0x50] sm:$0xff]  }
   0x4   :  { %706 = vmatprep.subr.bf16.mxu0 %v759_v1  ;;  %747 = vmatprep.subr.bf16.mxu1 %v759_v1  ;;  %v762_v7 = vld [vmem:[%s1043_s1] sm:$0xff]   ;;  %v766_v9 = vld [vmem:[%s1044_s0 + $0x48] sm:$0xff]   ;;  %v769_v12 = vld [vmem:[%s1044_s0 + $0x18] sm:$0xff]  }
   0x5   :  { %714 = vmatprep.mubr.msk.bf16.mxu0 %vm170_vm1, %v763_v4  ;;  %730 = vmatprep.mubr.msk.bf16.mxu1 %vm170_vm1, %v764_v5  ;;  %v770_v13 = vld [vmem:[%s1044_s0 + $0x58] sm:$0xff]   ;;  %v771_v14 = vld [vmem:[%s1044_s0 + $0x20] sm:$0xff]   ;;  %v773_v16 = vld [vmem:[%s1044_s0 + $0x28] sm:$0xff]  }
   0x6   :  { %v772_v15 = vld [vmem:[%s1044_s0 + $0x60] sm:$0xff]   ;;  %v774_v17 = vld [vmem:[%s1044_s0 + $0x68] sm:$0xff]   ;;  %v775_v18 = vld [vmem:[%s1044_s0 + $0x30] sm:$0xff]  }
   0x7   :  { %707 = vmatpush3.bf16.msra.mxu0 %v759_v1  ;;  %752 = vmatpush3.bf16.msra.mxu1 %v759_v1  ;;  %v776_v19 = vld [vmem:[%s1044_s0 + $0x70] sm:$0xff]   ;;  %v777_v20 = vld [vmem:[%s1044_s0 + $0x38] sm:$0xff]   ;;  %v881_v22 = vld [vmem:[%s1045_s2] ss:$0 sm:$0xff] }
   0x8   :  { %708 = vmatprep.subr.bf16.mxu0 %v760_v3  ;;  %748 = vmatprep.subr.bf16.mxu1 %v760_v3  ;;  %v778_v21 = vld [vmem:[%s1044_s0 + $0x78] sm:$0xff]  }
   0xb   :  { %709 = vmatpush3.bf16.msra.mxu0 %v760_v3  ;;  %753 = vmatpush3.bf16.msra.mxu1 %v760_v3 }
   0xc   :  { %710 = vmatprep.subr.bf16.mxu0 %v761_v6  ;;  %749 = vmatprep.subr.bf16.mxu1 %v761_v6 }
   0xf   :  { %711 = vmatpush3.bf16.msra.mxu0 %v761_v6  ;;  %754 = vmatpush3.bf16.msra.mxu1 %v761_v6 }
  0x10   :  { %712 = vmatprep.subr.bf16.mxu0 %v762_v7  ;;  %750 = vmatprep.subr.bf16.mxu1 %v762_v7 }
  0x13   :  { %713 = vmatpush3.bf16.msra.mxu0 %v762_v7  ;;  %755 = vmatpush3.bf16.msra.mxu1 %v762_v7 }
  0x16   :  { %715 = vmatmul.mubr.msk.bf16.vlgmr.msra.gmra.mxu0 %vm170_vm1, %v765_v8  ;;  %731 = vmatmul.mubr.msk.bf16.vlgmr.msra.gmra.mxu1 %vm170_vm1, %v766_v9 }
  0x17   :  { %718 = vmatprep.mubr.msk.bf16.mxu0 %vm170_vm1, %v767_v10  ;;  %734 = vmatprep.mubr.msk.bf16.mxu1 %vm170_vm1, %v768_v11 }
  0x1e   :  { %719 = vmatmul.mubr.msk.bf16.gmra.mxu0 %vm170_vm1, %v769_v12  ;;  %735 = vmatmul.mubr.msk.bf16.gmra.mxu1 %vm170_vm1, %v770_v13 }
  0x1f   :  { %722 = vmatprep.mubr.msk.bf16.mxu0 %vm170_vm1, %v771_v14  ;;  %738 = vmatprep.mubr.msk.bf16.mxu1 %vm170_vm1, %v772_v15 }
  0x26   :  { %723 = vmatmul.mubr.msk.bf16.gmra.mxu0 %vm170_vm1, %v773_v16  ;;  %739 = vmatmul.mubr.msk.bf16.gmra.mxu1 %vm170_vm1, %v774_v17 }
  0x27   :  { %726 = vmatprep.mubr.msk.bf16.mxu0 %vm170_vm1, %v775_v18  ;;  %742 = vmatprep.mubr.msk.bf16.mxu1 %vm170_vm1, %v776_v19 }
  0x2e   :  { %727 = vmatmul.mubr.msk.bf16.gmra.mxu0 %vm170_vm1, %v777_v20  ;;  %743 = vmatmul.mubr.msk.bf16.gmra.mxu1 %vm170_vm1, %v778_v21 }
  0xd6   :  { %v716_v23 = vpop.f32.mrf.mxu0  ;;  %v732_v24 = vpop.f32.mrf.mxu1 }
  0xd7   :  { %v266_v25 = vadd.f32 %v716_v23, %v881_v22  ;;  %v330_v26 = vadd.f32 %v732_v24, %v881_v22 }
  0xd8   :  { %v257_v27 = vpop.f32.mrf.mxu0  ;;  %v321_v28 = vpop.f32.mrf.mxu1 }
  0xd9   :  { %v386_v29 = vmax.f32 %v266_v25, 0.0  ;;  %v402_v30 = vmax.f32 %v330_v26, 0.0  ;;  %v258_v31 = vadd.f32 %v881_v22, %v257_v27  ;;  %v322_v32 = vadd.f32 %v881_v22, %v321_v28 }
  0xda   :  { %v717_v33 = vpop.f32.mrf.mxu0  ;;  %v733_v34 = vpop.f32.mrf.mxu1 }
  0xdb   :  { %v653_v35 = vpack.c.bf16 %v386_v29, %v386_v29  ;;  %v669_v36 = vpack.c.bf16 %v402_v30, %v402_v30  ;;  %v384_v37 = vmax.f32 %v258_v31, 0.0  ;;  %v400_v38 = vmax.f32 %v322_v32, 0.0 }
  0xdc   :  { %v269_v39 = vadd.f32 %v717_v33, %v881_v22  ;;  %v333_v40 = vadd.f32 %v733_v34, %v881_v22  ;;  %v260_v41 = vpop.f32.mrf.mxu0  ;;  %v324_v42 = vpop.f32.mrf.mxu1 }
  0xdd   :  { %547 = vst.msk [vmem:[%s1046_s3 + $0x8] sm:$0xf] %vm544_vm2, %v653_v35  ;;  %563 = vst.msk [vmem:[%s1046_s3 + $0x48] sm:$0xf] %vm544_vm2, %v669_v36  ;;  %v651_v43 = vpack.c.bf16 %v384_v37, %v384_v37  ;;  %v667_v44 = vpack.c.bf16 %v400_v38, %v400_v38  ;;  %v261_v45 = vadd.f32 %v881_v22, %v260_v41 }
  0xde   :  { %v325_v46 = vadd.f32 %v881_v22, %v324_v42  ;;  %v387_v47 = vmax.f32 %v269_v39, 0.0  ;;  %v403_v48 = vmax.f32 %v333_v40, 0.0  ;;  %v720_v49 = vpop.f32.mrf.mxu0  ;;  %v736_v50 = vpop.f32.mrf.mxu1 }
  0xdf   :  { %545 = vst.msk [vmem:[%s1046_s3] sm:$0xf] %vm544_vm2, %v651_v43  ;;  %561 = vst.msk [vmem:[%s1046_s3 + $0x40] sm:$0xf] %vm544_vm2, %v667_v44  ;;  %v385_v51 = vmax.f32 %v261_v45, 0.0  ;;  %v282_v53 = vadd.f32 %v720_v49, %v881_v22  ;;  %v346_v54 = vadd.f32 %v736_v50, %v881_v22 }
  0xe0   :  { %v401_v52 = vmax.f32 %v325_v46, 0.0  ;;  %v654_v55 = vpack.c.bf16 %v387_v47, %v387_v47  ;;  %v670_v56 = vpack.c.bf16 %v403_v48, %v403_v48  ;;  %v273_v57 = vpop.f32.mrf.mxu0  ;;  %v337_v58 = vpop.f32.mrf.mxu1 }
  0xe1   :  { %v652_v59 = vpack.c.bf16 %v385_v51, %v385_v51  ;;  %v390_v61 = vmax.f32 %v282_v53, 0.0  ;;  %v406_v62 = vmax.f32 %v346_v54, 0.0  ;;  %v274_v63 = vadd.f32 %v881_v22, %v273_v57 }
  0xe2   :  { %v668_v60 = vpack.c.bf16 %v401_v52, %v401_v52  ;;  %548 = vst.msk [vmem:[%s1046_s3 + $0xc] sm:$0xf] %vm544_vm2, %v654_v55  ;;  %564 = vst.msk [vmem:[%s1046_s3 + $0x4c] sm:$0xf] %vm544_vm2, %v670_v56  ;;  %v338_v0 = vadd.f32 %v881_v22, %v337_v58  ;;  %v721_v1 = vpop.f32.mrf.mxu0  ;;  %v737_v2 = vpop.f32.mrf.mxu1 }
  0xe3   :  { %546 = vst.msk [vmem:[%s1046_s3 + $0x4] sm:$0xf] %vm544_vm2, %v652_v59  ;;  %v657_v3 = vpack.c.bf16 %v390_v61, %v390_v61  ;;  %v673_v4 = vpack.c.bf16 %v406_v62, %v406_v62  ;;  %v285_v5 = vadd.f32 %v721_v1, %v881_v22  ;;  %v349_v6 = vadd.f32 %v737_v2, %v881_v22 }
  0xe4   :  { %562 = vst.msk [vmem:[%s1046_s3 + $0x44] sm:$0xf] %vm544_vm2, %v668_v60  ;;  %v388_v7 = vmax.f32 %v274_v63, 0.0  ;;  %v404_v8 = vmax.f32 %v338_v0, 0.0  ;;  %v276_v9 = vpop.f32.mrf.mxu0  ;;  %v340_v10 = vpop.f32.mrf.mxu1 }
  0xe5   :  { %551 = vst.msk [vmem:[%s1046_s3 + $0x18] sm:$0xf] %vm544_vm2, %v657_v3  ;;  %567 = vst.msk [vmem:[%s1046_s3 + $0x58] sm:$0xf] %vm544_vm2, %v673_v4  ;;  %v391_v11 = vmax.f32 %v285_v5, 0.0  ;;  %v407_v12 = vmax.f32 %v349_v6, 0.0  ;;  %v277_v13 = vadd.f32 %v881_v22, %v276_v9  ;;  %v341_v14 = vadd.f32 %v881_v22, %v340_v10 }
  0xe6   :  { %v655_v15 = vpack.c.bf16 %v388_v7, %v388_v7  ;;  %v671_v16 = vpack.c.bf16 %v404_v8, %v404_v8  ;;  %v724_v17 = vpop.f32.mrf.mxu0  ;;  %v740_v18 = vpop.f32.mrf.mxu1 }
  0xe7   :  { %v658_v19 = vpack.c.bf16 %v391_v11, %v391_v11  ;;  %v674_v20 = vpack.c.bf16 %v407_v12, %v407_v12  ;;  %v389_v21 = vmax.f32 %v277_v13, 0.0  ;;  %v405_v23 = vmax.f32 %v341_v14, 0.0 }
  0xe8   :  { %549 = vst.msk [vmem:[%s1046_s3 + $0x10] sm:$0xf] %vm544_vm2, %v655_v15  ;;  %565 = vst.msk [vmem:[%s1046_s3 + $0x50] sm:$0xf] %vm544_vm2, %v671_v16  ;;  %v298_v24 = vadd.f32 %v724_v17, %v881_v22  ;;  %v362_v25 = vadd.f32 %v740_v18, %v881_v22  ;;  %v289_v26 = vpop.f32.mrf.mxu0  ;;  %v353_v27 = vpop.f32.mrf.mxu1 }
  0xe9   :  { %552 = vst.msk [vmem:[%s1046_s3 + $0x1c] sm:$0xf] %vm544_vm2, %v658_v19  ;;  %568 = vst.msk [vmem:[%s1046_s3 + $0x5c] sm:$0xf] %vm544_vm2, %v674_v20  ;;  %v656_v28 = vpack.c.bf16 %v389_v21, %v389_v21  ;;  %v672_v29 = vpack.c.bf16 %v405_v23, %v405_v23  ;;  %v290_v30 = vadd.f32 %v881_v22, %v289_v26 }
  0xea   :  { %v354_v31 = vadd.f32 %v881_v22, %v353_v27  ;;  %v394_v32 = vmax.f32 %v298_v24, 0.0  ;;  %v410_v33 = vmax.f32 %v362_v25, 0.0  ;;  %v725_v34 = vpop.f32.mrf.mxu0  ;;  %v741_v35 = vpop.f32.mrf.mxu1 }
  0xeb   :  { %550 = vst.msk [vmem:[%s1046_s3 + $0x14] sm:$0xf] %vm544_vm2, %v656_v28  ;;  %566 = vst.msk [vmem:[%s1046_s3 + $0x54] sm:$0xf] %vm544_vm2, %v672_v29  ;;  %v392_v36 = vmax.f32 %v290_v30, 0.0  ;;  %v301_v38 = vadd.f32 %v725_v34, %v881_v22  ;;  %v365_v39 = vadd.f32 %v741_v35, %v881_v22 }
  0xec   :  { %v408_v37 = vmax.f32 %v354_v31, 0.0  ;;  %v661_v40 = vpack.c.bf16 %v394_v32, %v394_v32  ;;  %v677_v41 = vpack.c.bf16 %v410_v33, %v410_v33  ;;  %v292_v42 = vpop.f32.mrf.mxu0  ;;  %v356_v43 = vpop.f32.mrf.mxu1 }
  0xed   :  { %v659_v44 = vpack.c.bf16 %v392_v36, %v392_v36  ;;  %v395_v46 = vmax.f32 %v301_v38, 0.0  ;;  %v411_v47 = vmax.f32 %v365_v39, 0.0  ;;  %v293_v48 = vadd.f32 %v881_v22, %v292_v42 }
  0xee   :  { %v675_v45 = vpack.c.bf16 %v408_v37, %v408_v37  ;;  %555 = vst.msk [vmem:[%s1046_s3 + $0x28] sm:$0xf] %vm544_vm2, %v661_v40  ;;  %571 = vst.msk [vmem:[%s1046_s3 + $0x68] sm:$0xf] %vm544_vm2, %v677_v41  ;;  %v357_v49 = vadd.f32 %v881_v22, %v356_v43  ;;  %v728_v50 = vpop.f32.mrf.mxu0  ;;  %v744_v51 = vpop.f32.mrf.mxu1 }
  0xef   :  { %553 = vst.msk [vmem:[%s1046_s3 + $0x20] sm:$0xf] %vm544_vm2, %v659_v44  ;;  %v662_v52 = vpack.c.bf16 %v395_v46, %v395_v46  ;;  %v678_v53 = vpack.c.bf16 %v411_v47, %v411_v47  ;;  %v314_v54 = vadd.f32 %v728_v50, %v881_v22  ;;  %v378_v55 = vadd.f32 %v744_v51, %v881_v22 }
  0xf0   :  { %569 = vst.msk [vmem:[%s1046_s3 + $0x60] sm:$0xf] %vm544_vm2, %v675_v45  ;;  %v393_v56 = vmax.f32 %v293_v48, 0.0  ;;  %v409_v57 = vmax.f32 %v357_v49, 0.0  ;;  %v305_v58 = vpop.f32.mrf.mxu0  ;;  %v369_v59 = vpop.f32.mrf.mxu1 }
  0xf1   :  { %556 = vst.msk [vmem:[%s1046_s3 + $0x2c] sm:$0xf] %vm544_vm2, %v662_v52  ;;  %572 = vst.msk [vmem:[%s1046_s3 + $0x6c] sm:$0xf] %vm544_vm2, %v678_v53  ;;  %v398_v60 = vmax.f32 %v314_v54, 0.0  ;;  %v414_v61 = vmax.f32 %v378_v55, 0.0  ;;  %v306_v62 = vadd.f32 %v881_v22, %v305_v58  ;;  %v370_v63 = vadd.f32 %v881_v22, %v369_v59 }
  0xf2   :  { %v660_v0 = vpack.c.bf16 %v393_v56, %v393_v56  ;;  %v676_v1 = vpack.c.bf16 %v409_v57, %v409_v57  ;;  %v729_v2 = vpop.f32.mrf.mxu0  ;;  %v745_v3 = vpop.f32.mrf.mxu1 }
  0xf3   :  { %v665_v4 = vpack.c.bf16 %v398_v60, %v398_v60  ;;  %v681_v5 = vpack.c.bf16 %v414_v61, %v414_v61  ;;  %v396_v6 = vmax.f32 %v306_v62, 0.0  ;;  %v412_v7 = vmax.f32 %v370_v63, 0.0 }
  0xf4   :  { %554 = vst.msk [vmem:[%s1046_s3 + $0x24] sm:$0xf] %vm544_vm2, %v660_v0  ;;  %570 = vst.msk [vmem:[%s1046_s3 + $0x64] sm:$0xf] %vm544_vm2, %v676_v1  ;;  %v317_v8 = vadd.f32 %v729_v2, %v881_v22  ;;  %v381_v9 = vadd.f32 %v745_v3, %v881_v22  ;;  %v308_v10 = vpop.f32.mrf.mxu0  ;;  %v372_v11 = vpop.f32.mrf.mxu1 }
  0xf5   :  { %559 = vst.msk [vmem:[%s1046_s3 + $0x38] sm:$0xf] %vm544_vm2, %v665_v4  ;;  %575 = vst.msk [vmem:[%s1046_s3 + $0x78] sm:$0xf] %vm544_vm2, %v681_v5  ;;  %v663_v12 = vpack.c.bf16 %v396_v6, %v396_v6  ;;  %v679_v13 = vpack.c.bf16 %v412_v7, %v412_v7  ;;  %v309_v14 = vadd.f32 %v881_v22, %v308_v10 }
  0xf6   :  { %v373_v15 = vadd.f32 %v881_v22, %v372_v11  ;;  %v399_v16 = vmax.f32 %v317_v8, 0.0  ;;  %v415_v17 = vmax.f32 %v381_v9, 0.0 }
  0xf7   :  { %557 = vst.msk [vmem:[%s1046_s3 + $0x30] sm:$0xf] %vm544_vm2, %v663_v12  ;;  %573 = vst.msk [vmem:[%s1046_s3 + $0x70] sm:$0xf] %vm544_vm2, %v679_v13  ;;  %v397_v18 = vmax.f32 %v309_v14, 0.0 }
  0xf8   :  { %v413_v19 = vmax.f32 %v373_v15, 0.0  ;;  %v666_v20 = vpack.c.bf16 %v399_v16, %v399_v16  ;;  %v682_v21 = vpack.c.bf16 %v415_v17, %v415_v17 }
  0xf9   :  { %v664_v23 = vpack.c.bf16 %v397_v18, %v397_v18 }
  0xfa   :  { %v680_v24 = vpack.c.bf16 %v413_v19, %v413_v19  ;;  %560 = vst.msk [vmem:[%s1046_s3 + $0x3c] sm:$0xf] %vm544_vm2, %v666_v20  ;;  %576 = vst.msk [vmem:[%s1046_s3 + $0x7c] sm:$0xf] %vm544_vm2, %v682_v21 }
  0xfb   :  { %558 = vst.msk [vmem:[%s1046_s3 + $0x34] sm:$0xf] %vm544_vm2, %v664_v23 }
  0xfc   :  { %574 = vst.msk [vmem:[%s1046_s3 + $0x74] sm:$0xf] %vm544_vm2, %v680_v24 }

// kernel: _lambda_.21
= control target key start
LH: loop header
LB: loop body
LE: loop exit
PB: predicated region body
PF: predicated region fallthrough
CT: control target
= control target key end

     0   :  { %v347_v0 = vmov 0   ;;  %vm138_vm0 = vcmask 130048   ;;  %vm256_vm1 = vcmask 257024   ;;  %s458_s1 = inlined_call_operand.vmem [shape: bf16[144,32], index: 1, kind: input, shape index: {}]   ;;  %s459_s0 = inlined_call_operand.vmem [shape: bf16[64,144], index: 0, kind: input, shape index: {}]   ;;  %s460_s2 = inlined_call_operand.vmem [shape: f32[1,32], index: 2, kind: input, shape index: {}]   ;;  %s461_s3 = inlined_call_operand.vmem [shape: bf16[64,32], index: 3, kind: output, shape index: {}]  }
   0x1   :  { %151 = vmatprep.subr.bf16.mxu0 %v347_v0  ;;  %307 = vmatprep.subr.bf16.mxu1 %v347_v0  ;;  %v326_v1 = vld [vmem:[%s458_s1 + $0x38] sm:$0xff]   ;;  %v327_v2 = vld [vmem:[%s458_s1 + $0x30] sm:$0xff]   ;;  %v328_v3 = vld [vmem:[%s458_s1 + $0x28] sm:$0xff]  }
   0x2   :  { %152 = vmatpush1.bf16.msra.mxu0 %v326_v1  ;;  %316 = vmatpush1.bf16.msra.mxu1 %v326_v1  ;;  %v329_v4 = vld [vmem:[%s458_s1 + $0x20] sm:$0xff]   ;;  %v330_v7 = vld [vmem:[%s458_s1 + $0x18] sm:$0xff]   ;;  %v331_v8 = vld [vmem:[%s458_s1 + $0x10] sm:$0xff]  }
   0x3   :  { %153 = vmatprep.subr.bf16.mxu0 %v347_v0  ;;  %308 = vmatprep.subr.bf16.mxu1 %v347_v0  ;;  %v337_v5 = vld [vmem:[%s459_s0 + $0x4] ss:$8 sps:$4 sm:$0xff]   ;;  %v335_v12 = vld [vmem:[%s459_s0] ss:$8 sps:$4 sm:$0xff]   ;;  %v341_v14 = vld [vmem:[%s459_s0 + $0x14] ss:$8 sps:$4 sm:$0xff]  }
   0x4   :  { %v340_v6 = vld [vmem:[%s459_s0 + $0x24] ss:$8 sps:$4 sm:$0xff]   ;;  %287 = vmatprep.mubr.msk.bf16.mxu0 %vm138_vm0, %v337_v5  ;;  %v338_v13 = vld [vmem:[%s459_s0 + $0x20] ss:$8 sps:$4 sm:$0xff]   ;;  %v343_v15 = vld [vmem:[%s459_s0 + $0x34] ss:$8 sps:$4 sm:$0xff]  }
   0x5   :  { %289 = vmatprep.mubr.msk.bf16.mxu1 %vm138_vm0, %v340_v6  ;;  %v332_v9 = vld [vmem:[%s458_s1 + $0x8] sm:$0xff]   ;;  %v333_v10 = vld [vmem:[%s458_s1] sm:$0xff]   ;;  %v345_v16 = vld [vmem:[%s459_s0 + $0x10] ss:$8 sps:$4 sm:$0xff]  }
   0x6   :  { %154 = vmatpush1.bf16.msra.mxu0 %v327_v2  ;;  %317 = vmatpush1.bf16.msra.mxu1 %v327_v2  ;;  %v334_v11 = vld [vmem:[%s458_s1 + $0x40] sm:$0xff]   ;;  %v346_v17 = vld [vmem:[%s459_s0 + $0x30] ss:$8 sps:$4 sm:$0xff]  }
   0x7   :  { %155 = vmatprep.subr.bf16.mxu0 %v347_v0  ;;  %309 = vmatprep.subr.bf16.mxu1 %v347_v0  ;;  %v269_v18 = vld [vmem:[%s460_s2] ss:$0 sm:$0xff] }
   0xa   :  { %156 = vmatpush1.bf16.msra.mxu0 %v328_v3  ;;  %318 = vmatpush1.bf16.msra.mxu1 %v328_v3 }
   0xb   :  { %157 = vmatprep.subr.bf16.mxu0 %v347_v0  ;;  %310 = vmatprep.subr.bf16.mxu1 %v347_v0 }
   0xe   :  { %158 = vmatpush1.bf16.msra.mxu0 %v329_v4  ;;  %319 = vmatpush1.bf16.msra.mxu1 %v329_v4 }
   0xf   :  { %159 = vmatprep.subr.bf16.mxu0 %v347_v0  ;;  %311 = vmatprep.subr.bf16.mxu1 %v347_v0 }
  0x12   :  { %160 = vmatpush1.bf16.msra.mxu0 %v330_v7  ;;  %320 = vmatpush1.bf16.msra.mxu1 %v330_v7 }
  0x13   :  { %161 = vmatprep.subr.bf16.mxu0 %v347_v0  ;;  %312 = vmatprep.subr.bf16.mxu1 %v347_v0 }
  0x16   :  { %162 = vmatpush1.bf16.msra.mxu0 %v331_v8  ;;  %321 = vmatpush1.bf16.msra.mxu1 %v331_v8 }
  0x17   :  { %163 = vmatprep.subr.bf16.mxu0 %v347_v0  ;;  %313 = vmatprep.subr.bf16.mxu1 %v347_v0 }
  0x1a   :  { %164 = vmatpush1.bf16.msra.mxu0 %v332_v9  ;;  %322 = vmatpush1.bf16.msra.mxu1 %v332_v9 }
  0x1b   :  { %165 = vmatprep.subr.bf16.mxu0 %v347_v0  ;;  %314 = vmatprep.subr.bf16.mxu1 %v347_v0 }
  0x1e   :  { %166 = vmatpush1.bf16.msra.mxu0 %v333_v10  ;;  %323 = vmatpush1.bf16.msra.mxu1 %v333_v10 }
  0x1f   :  { %181 = vmatprep.subr.bf16.mxu0 %v347_v0  ;;  %315 = vmatprep.subr.bf16.mxu1 %v347_v0 }
  0x22   :  { %182 = vmatpush2.bf16.msra.mxu0 %v334_v11  ;;  %324 = vmatpush2.bf16.msra.mxu1 %v334_v11 }
  0x25   :  { %184 = vmatmul.mubr.bf16.vlgmr.msra.gmra.mxu0 %v335_v12  ;;  %200 = vmatmul.mubr.bf16.vlgmr.msra.gmra.mxu1 %v338_v13 }
  0x26   :  { %288 = vmatprep.mubr.msk.bf16.mxu0 %vm138_vm0, %v341_v14  ;;  %290 = vmatprep.mubr.msk.bf16.mxu1 %vm138_vm0, %v343_v15 }
  0x2d   :  { %192 = vmatmul.mubr.bf16.gmra.mxu0 %v345_v16  ;;  %208 = vmatmul.mubr.bf16.gmra.mxu1 %v346_v17 }
  0xe5   :  { %v185_v19 = vpop.f32.mrf.mxu0  ;;  %v201_v20 = vpop.f32.mrf.mxu1 }
  0xe6   :  { %v186_v21 = vadd.f32 %v269_v18, %v185_v19  ;;  %v202_v22 = vadd.f32 %v269_v18, %v201_v20 }
  0xe7   :  { %v187_v23 = vpop.f32.mrf.mxu0  ;;  %v203_v24 = vpop.f32.mrf.mxu1 }
  0xe8   :  { %v216_v25 = vmax.f32 %v186_v21, 0.0  ;;  %v220_v26 = vmax.f32 %v202_v22, 0.0 }
  0xe9   :  { %v188_v27 = vpop.f32.mrf.mxu0  ;;  %v204_v28 = vpop.f32.mrf.mxu1 }
  0xea   :  { %v299_v29 = vpack.c.bf16 %v216_v25, %v216_v25  ;;  %v303_v30 = vpack.c.bf16 %v220_v26, %v220_v26  ;;  %v189_v31 = vadd.f32 %v269_v18, %v188_v27  ;;  %v205_v32 = vadd.f32 %v269_v18, %v204_v28 }
  0xeb   :  { %v190_v33 = vpop.f32.mrf.mxu0  ;;  %v206_v34 = vpop.f32.mrf.mxu1 }
  0xec   :  { %257 = vst.msk [vmem:[%s461_s3] sm:$0xf] %vm256_vm1, %v299_v29  ;;  %261 = vst.msk [vmem:[%s461_s3 + $0x10] sm:$0xf] %vm256_vm1, %v303_v30  ;;  %v217_v35 = vmax.f32 %v189_v31, 0.0  ;;  %v221_v36 = vmax.f32 %v205_v32, 0.0 }
  0xed   :  { %v193_v37 = vpop.f32.mrf.mxu0  ;;  %v209_v38 = vpop.f32.mrf.mxu1 }
  0xee   :  { %v300_v39 = vpack.c.bf16 %v217_v35, %v217_v35  ;;  %v304_v40 = vpack.c.bf16 %v221_v36, %v221_v36  ;;  %v194_v41 = vadd.f32 %v269_v18, %v193_v37  ;;  %v210_v42 = vadd.f32 %v269_v18, %v209_v38 }
  0xef   :  { %v195_v43 = vpop.f32.mrf.mxu0  ;;  %v211_v44 = vpop.f32.mrf.mxu1 }
  0xf0   :  { %258 = vst.msk [vmem:[%s461_s3 + $0x4] sm:$0xf] %vm256_vm1, %v300_v39  ;;  %262 = vst.msk [vmem:[%s461_s3 + $0x14] sm:$0xf] %vm256_vm1, %v304_v40  ;;  %v218_v45 = vmax.f32 %v194_v41, 0.0  ;;  %v222_v46 = vmax.f32 %v210_v42, 0.0 }
  0xf1   :  { %v196_v47 = vpop.f32.mrf.mxu0  ;;  %v212_v48 = vpop.f32.mrf.mxu1 }
  0xf2   :  { %v301_v49 = vpack.c.bf16 %v218_v45, %v218_v45  ;;  %v305_v50 = vpack.c.bf16 %v222_v46, %v222_v46  ;;  %v197_v51 = vadd.f32 %v269_v18, %v196_v47  ;;  %v213_v52 = vadd.f32 %v269_v18, %v212_v48 }
  0xf3   :  { %v198_v53 = vpop.f32.mrf.mxu0  ;;  %v214_v54 = vpop.f32.mrf.mxu1 }
  0xf4   :  { %259 = vst.msk [vmem:[%s461_s3 + $0x8] sm:$0xf] %vm256_vm1, %v301_v49  ;;  %263 = vst.msk [vmem:[%s461_s3 + $0x18] sm:$0xf] %vm256_vm1, %v305_v50  ;;  %v219_v55 = vmax.f32 %v197_v51, 0.0  ;;  %v223_v56 = vmax.f32 %v213_v52, 0.0 }
  0xf6   :  { %v302_v57 = vpack.c.bf16 %v219_v55, %v219_v55  ;;  %v306_v58 = vpack.c.bf16 %v223_v56, %v223_v56 }
  0xf8   :  { %260 = vst.msk [vmem:[%s461_s3 + $0xc] sm:$0xf] %vm256_vm1, %v302_v57  ;;  %264 = vst.msk [vmem:[%s461_s3 + $0x1c] sm:$0xf] %vm256_vm1, %v306_v58 }

// kernel: _lambda_.22
= control target key start
LH: loop header
LB: loop body
LE: loop exit
PB: predicated region body
PF: predicated region fallthrough
CT: control target
= control target key end

     0   :  { %v372_v1 = vmov 0.0   ;;  %vm373_vm0 = vmmov 0   ;;  %vm185_vm1 = vcmask 261120   ;;  %vm281_vm2 = vcmask 519168   ;;  %s466_s1 = inlined_call_operand.vmem [shape: bf16[288,64], index: 1, kind: input, shape index: {}]   ;;  %s467_s0 = inlined_call_operand.vmem [shape: bf16[16,288], index: 0, kind: input, shape index: {}]   ;;  %s468_s2 = inlined_call_operand.vmem [shape: f32[1,64], index: 2, kind: input, shape index: {}]   ;;  %s469_s3 = inlined_call_operand.vmem [shape: bf16[16,64], index: 3, kind: output, shape index: {}]  }
   0x1   :  { %v350_v0 = vld [vmem:[%s466_s1 + $0x78] sm:$0xff]   ;;  %340 = vmatprep.subr.bf16.mxu1 %v372_v1  ;;  %344 = vmatprep.mubr.msk.bf16.mxu1 %vm373_vm0, %v372_v1  ;;  %v352_v3 = vld [vmem:[%s466_s1 + $0x70] sm:$0xff]   ;;  %v354_v5 = vld [vmem:[%s466_s1 + $0x68] sm:$0xff]  }
   0x2   :  { %v351_v2 = vld [vmem:[%s466_s1 + $0x38] sm:$0xff]   ;;  %315 = vmatprep.subr.bf16.mxu0 %v350_v0  ;;  %v353_v4 = vld [vmem:[%s466_s1 + $0x30] sm:$0xff]   ;;  %v355_v6 = vld [vmem:[%s466_s1 + $0x28] sm:$0xff]  }
   0x3   :  { %316 = vmatpush3.bf16.msra.mxu0 %v351_v2  ;;  %v356_v7 = vld [vmem:[%s466_s1 + $0x60] sm:$0xff]   ;;  %v358_v9 = vld [vmem:[%s466_s1 + $0x58] sm:$0xff]   ;;  %v364_v10 = vld [vmem:[%s466_s1 + $0x88] sm:$0xff]  }
   0x4   :  { %317 = vmatprep.subr.bf16.mxu0 %v352_v3  ;;  %v357_v8 = vld [vmem:[%s466_s1 + $0x20] sm:$0xff]   ;;  %v359_v11 = vld [vmem:[%s466_s1 + $0x18] sm:$0xff]   ;;  %v360_v12 = vld [vmem:[%s466_s1 + $0x50] sm:$0xff]   ;;  %341 = vmatpush3.bf16.msra.mxu1 %v364_v10 }
   0x5   :  { %342 = vmatprep.subr.bf16.mxu1 %v372_v1  ;;  %v367_v13 = vld [vmem:[%s466_s1 + $0x80] sm:$0xff]   ;;  %v361_v14 = vld [vmem:[%s466_s1 + $0x10] sm:$0xff]   ;;  %v362_v16 = vld [vmem:[%s466_s1 + $0x48] sm:$0xff]  }
   0x6   :  { %v370_v15 = vld [vmem:[%s467_s0 + $0x4] ss:$12 sps:$4 sm:$0xff]   ;;  %v371_v17 = vld [vmem:[%s467_s0 + $0x8] ss:$12 sps:$4 sm:$0xff]   ;;  %v368_v21 = vld [vmem:[%s467_s0] ss:$12 sps:$4 sm:$0xff]  }
   0x7   :  { %318 = vmatpush3.bf16.msra.mxu0 %v353_v4  ;;  %221 = vmatprep.mubr.bf16.mxu0 %v370_v15  ;;  %v363_v18 = vld [vmem:[%s466_s1 + $0x8] sm:$0xff]   ;;  %v365_v19 = vld [vmem:[%s466_s1 + $0x40] sm:$0xff]  }
   0x8   :  { %319 = vmatprep.subr.bf16.mxu0 %v354_v5  ;;  %343 = vmatpush3.bf16.msra.mxu1 %v367_v13  ;;  %v366_v20 = vld [vmem:[%s466_s1] sm:$0xff]  }
   0x9   :  { %v288_v27 = vld [vmem:[%s468_s2] ss:$0 sm:$0xff] }
   0xb   :  { %320 = vmatpush3.bf16.msra.mxu0 %v355_v6  ;;  %345 = vmatmul.mubr.msk.bf16.vlgmr.msra.gmra.mxu1 %vm185_vm1, %v371_v17 }
   0xc   :  { %321 = vmatprep.subr.bf16.mxu0 %v356_v7 }
   0xf   :  { %322 = vmatpush3.bf16.msra.mxu0 %v357_v8 }
  0x10   :  { %323 = vmatprep.subr.bf16.mxu0 %v358_v9 }
  0x13   :  { %324 = vmatpush3.bf16.msra.mxu0 %v359_v11 }
  0x14   :  { %325 = vmatprep.subr.bf16.mxu0 %v360_v12 }
  0x17   :  { %326 = vmatpush3.bf16.msra.mxu0 %v361_v14 }
  0x18   :  { %327 = vmatprep.subr.bf16.mxu0 %v362_v16 }
  0x1b   :  { %328 = vmatpush3.bf16.msra.mxu0 %v363_v18 }
  0x1c   :  { %329 = vmatprep.subr.bf16.mxu0 %v365_v19 }
  0x1f   :  { %330 = vmatpush3.bf16.msra.mxu0 %v366_v20 }
  0x22   :  { %222 = vmatmul.mubr.bf16.vlgmr.msra.gmra.mxu0 %v368_v21 }
  0xcb   :  { %v264_v22 = vpop.f32.mrf.mxu1 }
  0xcd   :  { %v346_v23 = vpop.f32.mrf.mxu1 }
  0xcf   :  { %v267_v24 = vpop.f32.mrf.mxu1 }
  0xd1   :  { %v347_v25 = vpop.f32.mrf.mxu1 }
  0xe2   :  { %v331_v26 = vpop.f32.mrf.mxu0 }
  0xe4   :  { %v332_v28 = vpop.f32.mrf.mxu0 }
  0xe5   :  { %v333_v29 = vadd.f32 %v332_v28, %v331_v26 }
  0xe6   :  { %v334_v30 = vpop.f32.mrf.mxu0 }
  0xe7   :  { %v224_v31 = vadd.f32 %v333_v29, %v288_v27 }
  0xe8   :  { %v335_v32 = vpop.f32.mrf.mxu0 }
  0xe9   :  { %v265_v33 = vadd.f32 %v264_v22, %v224_v31  ;;  %v336_v34 = vadd.f32 %v335_v32, %v334_v30 }
  0xeb   :  { %v271_v35 = vmax.f32 %v265_v33, 0.0  ;;  %v227_v36 = vadd.f32 %v336_v34, %v288_v27 }
  0xed   :  { %v313_v37 = vpack.c.bf16 %v271_v35, %v271_v35  ;;  %v268_v38 = vadd.f32 %v267_v24, %v227_v36 }
  0xef   :  { %282 = vst.msk [vmem:[%s469_s3] sm:$0xf] %vm281_vm2, %v313_v37  ;;  %v272_v39 = vmax.f32 %v268_v38, 0.0 }
  0xf1   :  { %v314_v40 = vpack.c.bf16 %v272_v39, %v272_v39 }
  0xf3   :  { %283 = vst.msk [vmem:[%s469_s3 + $0x4] sm:$0xf] %vm281_vm2, %v314_v40 }

// kernel: _lambda_.27
= control target key start
LH: loop header
LB: loop body
LE: loop exit
PB: predicated region body
PF: predicated region fallthrough
CT: control target
= control target key end

     0   :  { %v182_v0 = vmov 0.0   ;;  %vm183_vm0 = vmmov 0   ;;  %vm128_vm1 = vcmask 254976   ;;  %s237_s1 = inlined_call_operand.vmem [shape: bf16[128,32], index: 1, kind: input, shape index: {}]   ;;  %s238_s0 = inlined_call_operand.vmem [shape: bf16[4,128], index: 0, kind: input, shape index: {}]   ;;  %s239_s2 = inlined_call_operand.vmem [shape: f32[1,32], index: 2, kind: input, shape index: {}]   ;;  %s240_s3 = inlined_call_operand.vmem [shape: bf16[4,32], index: 3, kind: output, shape index: {}]  }
   0x1   :  { %152 = vmatprep.subr.bf16.mxu0 %v182_v0  ;;  %v174_v1 = vld [vmem:[%s237_s1 + $0x38] sm:$0xff]   ;;  %168 = vmatprep.mubr.msk.bf16.mxu0 %vm183_vm0, %v182_v0  ;;  %v175_v2 = vld [vmem:[%s237_s1 + $0x30] sm:$0xff]   ;;  %v176_v3 = vld [vmem:[%s237_s1 + $0x28] sm:$0xff]  }
   0x2   :  { %153 = vmatpush3.bf16.msra.mxu0 %v174_v1  ;;  %v177_v4 = vld [vmem:[%s237_s1 + $0x20] sm:$0xff]   ;;  %v178_v5 = vld [vmem:[%s237_s1 + $0x18] sm:$0xff]   ;;  %v179_v6 = vld [vmem:[%s237_s1 + $0x10] sm:$0xff]  }
   0x3   :  { %154 = vmatprep.subr.bf16.mxu0 %v182_v0  ;;  %v180_v7 = vld [vmem:[%s237_s1 + $0x8] sm:$0xff]   ;;  %v181_v8 = vld [vmem:[%s237_s1] sm:$0xff]  }
   0x4   :  { %v15_v9 = vld [vmem:[%s238_s0] sm:$0x3] }
   0x5   :  { %v134_v10 = vld [vmem:[%s239_s2] ss:$0 sm:$0xff] }
   0x6   :  { %155 = vmatpush3.bf16.msra.mxu0 %v175_v2 }
   0x7   :  { %156 = vmatprep.subr.bf16.mxu0 %v182_v0 }
   0xa   :  { %157 = vmatpush3.bf16.msra.mxu0 %v176_v3 }
   0xb   :  { %158 = vmatprep.subr.bf16.mxu0 %v182_v0 }
   0xe   :  { %159 = vmatpush3.bf16.msra.mxu0 %v177_v4 }
   0xf   :  { %160 = vmatprep.subr.bf16.mxu0 %v182_v0 }
  0x12   :  { %161 = vmatpush3.bf16.msra.mxu0 %v178_v5 }
  0x13   :  { %162 = vmatprep.subr.bf16.mxu0 %v182_v0 }
  0x16   :  { %163 = vmatpush3.bf16.msra.mxu0 %v179_v6 }
  0x17   :  { %164 = vmatprep.subr.bf16.mxu0 %v182_v0 }
  0x1a   :  { %165 = vmatpush3.bf16.msra.mxu0 %v180_v7 }
  0x1b   :  { %166 = vmatprep.subr.bf16.mxu0 %v182_v0 }
  0x1e   :  { %167 = vmatpush3.bf16.msra.mxu0 %v181_v8 }
  0x21   :  { %169 = vmatmul.mubr.bf16.vlgmr.msra.gmra.mxu0 %v15_v9 }
  0xe1   :  { %v121_v11 = vpop.f32.mrf.mxu0 }
  0xe2   :  { %v122_v12 = vadd.f32 %v134_v10, %v121_v11 }
  0xe3   :  { %v170_v13 = vpop.f32.mrf.mxu0 }
  0xe4   :  { %v127_v14 = vpack.c.bf16 %v122_v12, %v122_v12 }
  0xe5   :  { %v124_v15 = vpop.f32.mrf.mxu0 }
  0xe6   :  { %129 = vst.msk [vmem:[%s240_s3] sm:$0x3] %vm128_vm1, %v127_v14 }
  0xe7   :  { %v171_v16 = vpop.f32.mrf.mxu0 }

// kernel: _lambda_.23
= control target key start
LH: loop header
LB: loop body
LE: loop exit
PB: predicated region body
PF: predicated region fallthrough
CT: control target
= control target key end

     0   :  { %v613_v21 = vmov 1983009808   ;;  %v102_v23 = vlaneseq  ;;  %v614_v40 = vmov 0.0   ;;  %vm615_vm0 = vmmov 0   ;;  %s756_s1 = inlined_call_operand.vmem [shape: bf16[576,128], index: 1, kind: input, shape index: {}]   ;;  %s757_s0 = inlined_call_operand.vmem [shape: bf16[4,576], index: 0, kind: input, shape index: {}]   ;;  %s758_s2 = inlined_call_operand.vmem [shape: f32[1,128], index: 2, kind: input, shape index: {}]   ;;  %s759_s3 = inlined_call_operand.vmem [shape: bf16[4,128], index: 3, kind: output, shape index: {}]  }
   0x1   :  { %v576_v0 = vld [vmem:[%s756_s1 + $0x78] sm:$0xff]   ;;  %v580_v4 = vld [vmem:[%s756_s1 + $0x70] sm:$0xff]   ;;  %v584_v8 = vld [vmem:[%s756_s1 + $0x68] sm:$0xff]   ;;  %v100_v22 = vunpack.c.l.s4 %v613_v21  ;;  %vm342_vm1 = vcmask 523264  }
   0x2   :  { %v577_v1 = vld [vmem:[%s756_s1 + $0x38] sm:$0xff]   ;;  %512 = vmatprep.subr.bf16.mxu0 %v576_v0  ;;  %v581_v5 = vld [vmem:[%s756_s1 + $0x30] sm:$0xff]   ;;  %v585_v9 = vld [vmem:[%s756_s1 + $0x28] sm:$0xff]   ;;  %v103_v29 = vshrl.u32 %v102_v23, 7 }
   0x3   :  { %v578_v2 = vld [vmem:[%s756_s1 + $0xf8] sm:$0xff]   ;;  %513 = vmatpush3.bf16.msra.mxu0 %v577_v1  ;;  %v582_v6 = vld [vmem:[%s756_s1 + $0xf0] sm:$0xff]   ;;  %v586_v10 = vld [vmem:[%s756_s1 + $0xe8] sm:$0xff]   ;;  %v101_v28 = vunpack.c.0.s8 %v100_v22 }
   0x4   :  { %v579_v3 = vld [vmem:[%s756_s1 + $0xb8] sm:$0xff]   ;;  %534 = vmatprep.subr.bf16.mxu1 %v578_v2  ;;  %514 = vmatprep.subr.bf16.mxu0 %v580_v4  ;;  %v583_v7 = vld [vmem:[%s756_s1 + $0xb0] sm:$0xff]   ;;  %v587_v11 = vld [vmem:[%s756_s1 + $0xa8] sm:$0xff]  }
   0x5   :  { %535 = vmatpush3.bf16.msra.mxu1 %v579_v3  ;;  %v588_v12 = vld [vmem:[%s756_s1 + $0x60] sm:$0xff]   ;;  %v592_v16 = vld [vmem:[%s756_s1 + $0x58] sm:$0xff]   ;;  %v596_v20 = vld [vmem:[%s756_s1 + $0x50] sm:$0xff]   ;;  %v104_v34 = vsub.s32 %v101_v28, %v103_v29 }
   0x6   :  { %536 = vmatprep.subr.bf16.mxu1 %v582_v6  ;;  %v589_v13 = vld [vmem:[%s756_s1 + $0x20] sm:$0xff]   ;;  %v593_v17 = vld [vmem:[%s756_s1 + $0x18] sm:$0xff]   ;;  %v597_v24 = vld [vmem:[%s756_s1 + $0x10] sm:$0xff]  }
   0x7   :  { %515 = vmatpush3.bf16.msra.mxu0 %v581_v5  ;;  %v590_v14 = vld [vmem:[%s756_s1 + $0xe0] sm:$0xff]   ;;  %v594_v18 = vld [vmem:[%s756_s1 + $0xd8] sm:$0xff]   ;;  %v598_v25 = vld [vmem:[%s756_s1 + $0xd0] sm:$0xff]  }
   0x8   :  { %516 = vmatprep.subr.bf16.mxu0 %v584_v8  ;;  %v591_v15 = vld [vmem:[%s756_s1 + $0xa0] sm:$0xff]   ;;  %v595_v19 = vld [vmem:[%s756_s1 + $0x98] sm:$0xff]   ;;  %v599_v26 = vld [vmem:[%s756_s1 + $0x90] sm:$0xff]  }
   0x9   :  { %537 = vmatpush3.bf16.msra.mxu1 %v583_v7  ;;  %v600_v27 = vld [vmem:[%s756_s1 + $0x48] sm:$0xff]   ;;  %v604_v33 = vld [vmem:[%s756_s1 + $0x40] sm:$0xff]   ;;  %v609_v44 = vld [vmem:[%s756_s1 + $0x118] sm:$0xff]  }
   0xa   :  { %538 = vmatprep.subr.bf16.mxu1 %v586_v10  ;;  %v601_v30 = vld [vmem:[%s756_s1 + $0x8] sm:$0xff]   ;;  %v605_v35 = vld [vmem:[%s756_s1] sm:$0xff]   ;;  %v610_v46 = vld [vmem:[%s756_s1 + $0x110] sm:$0xff]  }
   0xb   :  { %517 = vmatpush3.bf16.msra.mxu0 %v585_v9  ;;  %v602_v31 = vld [vmem:[%s756_s1 + $0xc8] sm:$0xff]   ;;  %v606_v36 = vld [vmem:[%s756_s1 + $0xc0] sm:$0xff]  }
   0xc   :  { %518 = vmatprep.subr.bf16.mxu0 %v588_v12  ;;  %v603_v32 = vld [vmem:[%s756_s1 + $0x88] sm:$0xff]   ;;  %v15_v37 = vld [vmem:[%s757_s0] sm:$0xff] }
   0xd   :  { %539 = vmatpush3.bf16.msra.mxu1 %v587_v11  ;;  %v607_v38 = vld [vmem:[%s756_s1 + $0x80] sm:$0xff]   ;;  %v105_v39 = vrot.slane %v15_v37, %v104_v34  ;;  %v98_v41 = vcombine.high %v15_v37, %v15_v37  ;;  %v611_v47 = vld [vmem:[%s756_s1 + $0x108] sm:$0xff]  }
   0xe   :  { %540 = vmatprep.subr.bf16.mxu1 %v590_v14  ;;  %v612_v48 = vld [vmem:[%s756_s1 + $0x100] sm:$0xff]   ;;  %v474_v49 = vld.sshfl [vmem:[%s757_s0 + $0x8] sm:$0x3 pattern:$0x76325410] }
   0xf   :  { %519 = vmatpush3.bf16.msra.mxu0 %v589_v13  ;;  %v113_v42 = vcombine.high %v105_v39, %v105_v39  ;;  %v112_v43 = vrot.slane %v98_v41, %v104_v34  ;;  %v473_v58 = vld [vmem:[%s758_s2] ss:$0 sm:$0xff] }
  0x10   :  { %520 = vmatprep.subr.bf16.mxu0 %v592_v16 }
  0x11   :  { %541 = vmatpush3.bf16.msra.mxu1 %v591_v15  ;;  %378 = vmatprep.mubr.bf16.mxu0 %v113_v42  ;;  %v114_v45 = vcombine.high %v112_v43, %v112_v43 }
  0x12   :  { %542 = vmatprep.subr.bf16.mxu1 %v594_v18 }
  0x13   :  { %521 = vmatpush3.bf16.msra.mxu0 %v593_v17  ;;  %418 = vmatprep.mubr.bf16.mxu1 %v114_v45 }
  0x14   :  { %522 = vmatprep.subr.bf16.mxu0 %v596_v20 }
  0x15   :  { %543 = vmatpush3.bf16.msra.mxu1 %v595_v19 }
  0x16   :  { %544 = vmatprep.subr.bf16.mxu1 %v598_v25 }
  0x17   :  { %523 = vmatpush3.bf16.msra.mxu0 %v597_v24 }
  0x18   :  { %524 = vmatprep.subr.bf16.mxu0 %v600_v27 }
  0x19   :  { %545 = vmatpush3.bf16.msra.mxu1 %v599_v26 }
  0x1a   :  { %546 = vmatprep.subr.bf16.mxu1 %v602_v31 }
  0x1b   :  { %525 = vmatpush3.bf16.msra.mxu0 %v601_v30 }
  0x1c   :  { %526 = vmatprep.subr.bf16.mxu0 %v604_v33 }
  0x1d   :  { %547 = vmatpush3.bf16.msra.mxu1 %v603_v32 }
  0x1e   :  { %548 = vmatprep.subr.bf16.mxu1 %v606_v36 }
  0x1f   :  { %527 = vmatpush3.bf16.msra.mxu0 %v605_v35 }
  0x20   :  { %561 = vmatprep.subr.bf16.mxu0 %v614_v40 }
  0x21   :  { %549 = vmatpush3.bf16.msra.mxu1 %v607_v38 }
  0x22   :  { %379 = vmatmul.mubr.bf16.vlgmr.msra.gmra.mxu0 %v105_v39 }
  0x23   :  { %562 = vmatpush3.bf16.msra.mxu0 %v609_v44  ;;  %569 = vmatprep.mubr.msk.bf16.mxu0 %vm615_vm0, %v614_v40 }
  0x24   :  { %419 = vmatmul.mubr.bf16.vlgmr.msra.gmra.mxu1 %v112_v43  ;;  %563 = vmatprep.subr.bf16.mxu0 %v614_v40 }
  0x27   :  { %564 = vmatpush3.bf16.msra.mxu0 %v610_v46 }
  0x28   :  { %565 = vmatprep.subr.bf16.mxu0 %v614_v40 }
  0x2b   :  { %566 = vmatpush3.bf16.msra.mxu0 %v611_v47 }
  0x2c   :  { %567 = vmatprep.subr.bf16.mxu0 %v614_v40 }
  0x2f   :  { %568 = vmatpush3.bf16.msra.mxu0 %v612_v48 }
  0x32   :  { %570 = vmatmul.mubr.msk.bf16.vlgmr.msra.gmra.mxu0 %vm342_vm1, %v474_v49 }
  0xe2   :  { %v528_v50 = vpop.f32.mrf.mxu0 }
  0xe4   :  { %v529_v51 = vpop.f32.mrf.mxu0  ;;  %v550_v52 = vpop.f32.mrf.mxu1 }
  0xe5   :  { %v530_v57 = vadd.f32 %v529_v51, %v528_v50 }
  0xe6   :  { %v531_v53 = vpop.f32.mrf.mxu0  ;;  %v551_v54 = vpop.f32.mrf.mxu1 }
  0xe7   :  { %v381_v60 = vadd.f32 %v530_v57, %v473_v58  ;;  %v552_v61 = vadd.f32 %v551_v54, %v550_v52 }
  0xe8   :  { %v532_v55 = vpop.f32.mrf.mxu0  ;;  %v553_v56 = vpop.f32.mrf.mxu1 }
  0xe9   :  { %v421_v62 = vadd.f32 %v552_v61, %v381_v60 }
  0xea   :  { %v554_v59 = vpop.f32.mrf.mxu1 }
  0xf2   :  { %v460_v63 = vpop.f32.mrf.mxu0 }
  0xf3   :  { %v461_v0 = vadd.f32 %v460_v63, %v421_v62 }
  0xf4   :  { %v571_v1 = vpop.f32.mrf.mxu0 }
  0xf5   :  { %v466_v2 = vmax.f32 %v461_v0, 0.0 }
  0xf6   :  { %v463_v3 = vpop.f32.mrf.mxu0 }
  0xf7   :  { %v467_v4 = vpack.c.bf16 %v466_v2, %v466_v2 }
  0xf8   :  { %v572_v5 = vpop.f32.mrf.mxu0 }
  0xf9   :  { %468 = vst [vmem:[%s759_s3] sm:$0x3] %v467_v4 }

// kernel: _lambda_.26
= control target key start
LH: loop header
LB: loop body
LE: loop exit
PB: predicated region body
PF: predicated region fallthrough
CT: control target
= control target key end

     0   :  { %v156_v0 = vmov 0.0   ;;  %vm157_vm0 = vmmov 0   ;;  %vm61_vm1 = vcmask 523264   ;;  %vm114_vm2 = vcmask 257024   ;;  %s202_s1 = inlined_call_operand.vmem [shape: bf16[64,32], index: 1, kind: input, shape index: {}]   ;;  %s203_s0 = inlined_call_operand.vmem [shape: bf16[16,64], index: 0, kind: input, shape index: {}]   ;;  %s204_s2 = inlined_call_operand.vmem [shape: f32[1,32], index: 2, kind: input, shape index: {}]   ;;  %s205_s3 = inlined_call_operand.vmem [shape: bf16[16,32], index: 3, kind: output, shape index: {}]  }
   0x1   :  { %137 = vmatprep.subr.bf16.mxu0 %v156_v0  ;;  %v151_v1 = vld [vmem:[%s202_s1 + $0x18] sm:$0xff]   ;;  %145 = vmatprep.mubr.msk.bf16.mxu0 %vm157_vm0, %v156_v0  ;;  %v152_v2 = vld [vmem:[%s202_s1 + $0x10] sm:$0xff]   ;;  %v153_v3 = vld [vmem:[%s202_s1 + $0x8] sm:$0xff]  }
   0x2   :  { %138 = vmatpush3.bf16.msra.mxu0 %v151_v1  ;;  %v154_v4 = vld [vmem:[%s202_s1] sm:$0xff]  }
   0x3   :  { %139 = vmatprep.subr.bf16.mxu0 %v156_v0  ;;  %v155_v5 = vld [vmem:[%s203_s0] sm:$0xff]  }
   0x4   :  { %v121_v6 = vld [vmem:[%s204_s2] ss:$0 sm:$0xff] }
   0x6   :  { %140 = vmatpush3.bf16.msra.mxu0 %v152_v2 }
   0x7   :  { %141 = vmatprep.subr.bf16.mxu0 %v156_v0 }
   0xa   :  { %142 = vmatpush3.bf16.msra.mxu0 %v153_v3 }
   0xb   :  { %143 = vmatprep.subr.bf16.mxu0 %v156_v0 }
   0xe   :  { %144 = vmatpush3.bf16.msra.mxu0 %v154_v4 }
  0x11   :  { %146 = vmatmul.mubr.msk.bf16.vlgmr.msra.gmra.mxu0 %vm61_vm1, %v155_v5 }
  0xd1   :  { %v99_v7 = vpop.f32.mrf.mxu0 }
  0xd2   :  { %v100_v8 = vadd.f32 %v121_v6, %v99_v7 }
  0xd3   :  { %v147_v9 = vpop.f32.mrf.mxu0 }
  0xd4   :  { %v130_v10 = vpack.c.bf16 %v100_v8, %v100_v8 }
  0xd5   :  { %v102_v11 = vpop.f32.mrf.mxu0 }
  0xd6   :  { %115 = vst.msk [vmem:[%s205_s3] sm:$0xf] %vm114_vm2, %v130_v10  ;;  %v103_v12 = vadd.f32 %v121_v6, %v102_v11 }
  0xd7   :  { %v148_v13 = vpop.f32.mrf.mxu0 }
  0xd8   :  { %v131_v14 = vpack.c.bf16 %v103_v12, %v103_v12 }
  0xda   :  { %116 = vst.msk [vmem:[%s205_s3 + $0x4] sm:$0xf] %vm114_vm2, %v131_v14 }

// kernel: _lambda_.25
= control target key start
LH: loop header
LB: loop body
LE: loop exit
PB: predicated region body
PF: predicated region fallthrough
CT: control target
= control target key end

     0   :  { %vm66_vm0 = vcmask 261120   ;;  %vm176_vm1 = vcmask 257024   ;;  %s317_s1 = inlined_call_operand.vmem [shape: bf16[32,32], index: 1, kind: input, shape index: {}]   ;;  %s318_s0 = inlined_call_operand.vmem [shape: bf16[64,32], index: 0, kind: input, shape index: {}]   ;;  %s319_s2 = inlined_call_operand.vmem [shape: f32[1,32], index: 2, kind: input, shape index: {}]   ;;  %s320_s3 = inlined_call_operand.vmem [shape: bf16[64,32], index: 3, kind: output, shape index: {}]  }
   0x1   :  { %v238_v0 = vld [vmem:[%s317_s1 + $0x8] sm:$0xff]   ;;  %v239_v1 = vld [vmem:[%s317_s1] sm:$0xff]   ;;  %v241_v3 = vld [vmem:[%s318_s0 + $0x10] sm:$0xff]  }
   0x2   :  { %222 = vmatprep.subr.bf16.mxu0 %v238_v0  ;;  %234 = vmatprep.subr.bf16.mxu1 %v238_v0  ;;  %v240_v2 = vld [vmem:[%s318_s0] sm:$0xff]   ;;  %v242_v4 = vld [vmem:[%s318_s0 + $0x8] sm:$0xff]   ;;  %v243_v5 = vld [vmem:[%s318_s0 + $0x18] sm:$0xff]  }
   0x3   :  { %223 = vmatpush3.bf16.msra.mxu0 %v238_v0  ;;  %236 = vmatpush3.bf16.msra.mxu1 %v238_v0  ;;  %v189_v6 = vld [vmem:[%s319_s2] ss:$0 sm:$0xff] }
   0x4   :  { %224 = vmatprep.subr.bf16.mxu0 %v239_v1  ;;  %235 = vmatprep.subr.bf16.mxu1 %v239_v1 }
   0x5   :  { %226 = vmatprep.mubr.msk.bf16.mxu0 %vm66_vm0, %v240_v2  ;;  %230 = vmatprep.mubr.msk.bf16.mxu1 %vm66_vm0, %v241_v3 }
   0x7   :  { %225 = vmatpush3.bf16.msra.mxu0 %v239_v1  ;;  %237 = vmatpush3.bf16.msra.mxu1 %v239_v1 }
   0xa   :  { %227 = vmatmul.mubr.msk.bf16.vlgmr.msra.gmra.mxu0 %vm66_vm0, %v242_v4  ;;  %231 = vmatmul.mubr.msk.bf16.vlgmr.msra.gmra.mxu1 %vm66_vm0, %v243_v5 }
  0xca   :  { %v228_v7 = vpop.f32.mrf.mxu0  ;;  %v232_v8 = vpop.f32.mrf.mxu1 }
  0xcb   :  { %v122_v9 = vadd.f32 %v228_v7, %v189_v6  ;;  %v138_v10 = vadd.f32 %v232_v8, %v189_v6 }
  0xcc   :  { %v113_v11 = vpop.f32.mrf.mxu0  ;;  %v129_v12 = vpop.f32.mrf.mxu1 }
  0xcd   :  { %v210_v13 = vpack.c.bf16 %v122_v9, %v122_v9  ;;  %v214_v14 = vpack.c.bf16 %v138_v10, %v138_v10  ;;  %v114_v15 = vadd.f32 %v189_v6, %v113_v11  ;;  %v130_v16 = vadd.f32 %v189_v6, %v129_v12 }
  0xce   :  { %v229_v17 = vpop.f32.mrf.mxu0  ;;  %v233_v18 = vpop.f32.mrf.mxu1 }
  0xcf   :  { %179 = vst.msk [vmem:[%s320_s3 + $0x8] sm:$0xf] %vm176_vm1, %v210_v13  ;;  %183 = vst.msk [vmem:[%s320_s3 + $0x18] sm:$0xf] %vm176_vm1, %v214_v14  ;;  %v208_v19 = vpack.c.bf16 %v114_v15, %v114_v15  ;;  %v212_v20 = vpack.c.bf16 %v130_v16, %v130_v16  ;;  %v125_v21 = vadd.f32 %v229_v17, %v189_v6 }
  0xd0   :  { %v141_v22 = vadd.f32 %v233_v18, %v189_v6  ;;  %v116_v23 = vpop.f32.mrf.mxu0  ;;  %v132_v24 = vpop.f32.mrf.mxu1 }
  0xd1   :  { %177 = vst.msk [vmem:[%s320_s3] sm:$0xf] %vm176_vm1, %v208_v19  ;;  %181 = vst.msk [vmem:[%s320_s3 + $0x10] sm:$0xf] %vm176_vm1, %v212_v20  ;;  %v211_v25 = vpack.c.bf16 %v125_v21, %v125_v21  ;;  %v117_v27 = vadd.f32 %v189_v6, %v116_v23  ;;  %v133_v28 = vadd.f32 %v189_v6, %v132_v24 }
  0xd2   :  { %v215_v26 = vpack.c.bf16 %v141_v22, %v141_v22 }
  0xd3   :  { %180 = vst.msk [vmem:[%s320_s3 + $0xc] sm:$0xf] %vm176_vm1, %v211_v25  ;;  %v209_v29 = vpack.c.bf16 %v117_v27, %v117_v27  ;;  %v213_v30 = vpack.c.bf16 %v133_v28, %v133_v28 }
  0xd4   :  { %184 = vst.msk [vmem:[%s320_s3 + $0x1c] sm:$0xf] %vm176_vm1, %v215_v26 }
  0xd5   :  { %178 = vst.msk [vmem:[%s320_s3 + $0x4] sm:$0xf] %vm176_vm1, %v209_v29  ;;  %182 = vst.msk [vmem:[%s320_s3 + $0x14] sm:$0xf] %vm176_vm1, %v213_v30 }

// kernel: _lambda_.24
= control target key start
LH: loop header
LB: loop body
LE: loop exit
PB: predicated region body
PF: predicated region fallthrough
CT: control target
= control target key end

     0   :  { %vm142_vm0 = vcmask 130048   ;;  %vm480_vm1 = vcmask 257024   ;;  %s937_s1 = inlined_call_operand.vmem [shape: bf16[16,32], index: 1, kind: input, shape index: {}]   ;;  %s938_s0 = inlined_call_operand.vmem [shape: bf16[256,16], index: 0, kind: input, shape index: {}]   ;;  %s939_s2 = inlined_call_operand.vmem [shape: f32[1,32], index: 2, kind: input, shape index: {}]   ;;  %s940_s3 = inlined_call_operand.vmem [shape: bf16[256,32], index: 3, kind: output, shape index: {}]  }
   0x1   :  { %v668_v0 = vld [vmem:[%s937_s1] sm:$0xff]   ;;  %v671_v3 = vld [vmem:[%s938_s0 + $0x8] sm:$0xff]   ;;  %v673_v5 = vld [vmem:[%s938_s0 + $0x10] sm:$0xff]  }
   0x2   :  { %v669_v1 = vld [vmem:[%s938_s0] sm:$0xff]   ;;  %632 = vmatprep.subr.bf16.mxu0 %v668_v0  ;;  %666 = vmatprep.subr.bf16.mxu1 %v668_v0  ;;  %v672_v4 = vld [vmem:[%s938_s0 + $0x48] sm:$0xff]   ;;  %v674_v6 = vld [vmem:[%s938_s0 + $0x50] sm:$0xff]  }
   0x3   :  { %v670_v2 = vld [vmem:[%s938_s0 + $0x40] sm:$0xff]   ;;  %633 = vmatpush3.bf16.msra.mxu0 %v668_v0  ;;  %667 = vmatpush3.bf16.msra.mxu1 %v668_v0  ;;  %v675_v7 = vld [vmem:[%s938_s0 + $0x18] sm:$0xff]   ;;  %v679_v11 = vld [vmem:[%s938_s0 + $0x28] sm:$0xff]  }
   0x4   :  { %634 = vmatprep.mubr.msk.bf16.mxu0 %vm142_vm0, %v669_v1  ;;  %650 = vmatprep.mubr.msk.bf16.mxu1 %vm142_vm0, %v670_v2  ;;  %v676_v8 = vld [vmem:[%s938_s0 + $0x58] sm:$0xff]   ;;  %v677_v9 = vld [vmem:[%s938_s0 + $0x20] sm:$0xff]   ;;  %v680_v12 = vld [vmem:[%s938_s0 + $0x68] sm:$0xff]  }
   0x5   :  { %v678_v10 = vld [vmem:[%s938_s0 + $0x60] sm:$0xff]   ;;  %v681_v13 = vld [vmem:[%s938_s0 + $0x30] sm:$0xff]   ;;  %v683_v15 = vld [vmem:[%s938_s0 + $0x38] sm:$0xff]  }
   0x6   :  { %635 = vmatmul.mubr.msk.bf16.vlgmr.msra.gmra.mxu0 %vm142_vm0, %v671_v3  ;;  %651 = vmatmul.mubr.msk.bf16.vlgmr.msra.gmra.mxu1 %vm142_vm0, %v672_v4  ;;  %v682_v14 = vld [vmem:[%s938_s0 + $0x70] sm:$0xff]   ;;  %v684_v16 = vld [vmem:[%s938_s0 + $0x78] sm:$0xff]   ;;  %v775_v17 = vld [vmem:[%s939_s2] ss:$0 sm:$0xff] }
   0x7   :  { %638 = vmatprep.mubr.msk.bf16.mxu0 %vm142_vm0, %v673_v5  ;;  %654 = vmatprep.mubr.msk.bf16.mxu1 %vm142_vm0, %v674_v6 }
   0xe   :  { %639 = vmatmul.mubr.msk.bf16.gmra.mxu0 %vm142_vm0, %v675_v7  ;;  %655 = vmatmul.mubr.msk.bf16.gmra.mxu1 %vm142_vm0, %v676_v8 }
   0xf   :  { %642 = vmatprep.mubr.msk.bf16.mxu0 %vm142_vm0, %v677_v9  ;;  %658 = vmatprep.mubr.msk.bf16.mxu1 %vm142_vm0, %v678_v10 }
  0x16   :  { %643 = vmatmul.mubr.msk.bf16.gmra.mxu0 %vm142_vm0, %v679_v11  ;;  %659 = vmatmul.mubr.msk.bf16.gmra.mxu1 %vm142_vm0, %v680_v12 }
  0x17   :  { %646 = vmatprep.mubr.msk.bf16.mxu0 %vm142_vm0, %v681_v13  ;;  %662 = vmatprep.mubr.msk.bf16.mxu1 %vm142_vm0, %v682_v14 }
  0x1e   :  { %647 = vmatmul.mubr.msk.bf16.gmra.mxu0 %vm142_vm0, %v683_v15  ;;  %663 = vmatmul.mubr.msk.bf16.gmra.mxu1 %vm142_vm0, %v684_v16 }
  0xc6   :  { %v636_v18 = vpop.f32.mrf.mxu0  ;;  %v652_v19 = vpop.f32.mrf.mxu1 }
  0xc7   :  { %v234_v20 = vadd.f32 %v636_v18, %v775_v17  ;;  %v298_v21 = vadd.f32 %v652_v19, %v775_v17 }
  0xc8   :  { %v225_v22 = vpop.f32.mrf.mxu0  ;;  %v289_v23 = vpop.f32.mrf.mxu1 }
  0xc9   :  { %v585_v24 = vpack.c.bf16 %v234_v20, %v234_v20  ;;  %v601_v25 = vpack.c.bf16 %v298_v21, %v298_v21  ;;  %v226_v26 = vadd.f32 %v775_v17, %v225_v22  ;;  %v290_v27 = vadd.f32 %v775_v17, %v289_v23 }
  0xca   :  { %v637_v28 = vpop.f32.mrf.mxu0  ;;  %v653_v29 = vpop.f32.mrf.mxu1 }
  0xcb   :  { %483 = vst.msk [vmem:[%s940_s3 + $0x8] sm:$0xf] %vm480_vm1, %v585_v24  ;;  %499 = vst.msk [vmem:[%s940_s3 + $0x48] sm:$0xf] %vm480_vm1, %v601_v25  ;;  %v583_v30 = vpack.c.bf16 %v226_v26, %v226_v26  ;;  %v599_v31 = vpack.c.bf16 %v290_v27, %v290_v27  ;;  %v237_v32 = vadd.f32 %v637_v28, %v775_v17 }
  0xcc   :  { %v301_v33 = vadd.f32 %v653_v29, %v775_v17  ;;  %v228_v34 = vpop.f32.mrf.mxu0  ;;  %v292_v35 = vpop.f32.mrf.mxu1 }
  0xcd   :  { %481 = vst.msk [vmem:[%s940_s3] sm:$0xf] %vm480_vm1, %v583_v30  ;;  %497 = vst.msk [vmem:[%s940_s3 + $0x40] sm:$0xf] %vm480_vm1, %v599_v31  ;;  %v586_v36 = vpack.c.bf16 %v237_v32, %v237_v32  ;;  %v229_v38 = vadd.f32 %v775_v17, %v228_v34  ;;  %v293_v39 = vadd.f32 %v775_v17, %v292_v35 }
  0xce   :  { %v602_v37 = vpack.c.bf16 %v301_v33, %v301_v33  ;;  %v640_v40 = vpop.f32.mrf.mxu0  ;;  %v656_v41 = vpop.f32.mrf.mxu1 }
  0xcf   :  { %484 = vst.msk [vmem:[%s940_s3 + $0xc] sm:$0xf] %vm480_vm1, %v586_v36  ;;  %v584_v42 = vpack.c.bf16 %v229_v38, %v229_v38  ;;  %v600_v43 = vpack.c.bf16 %v293_v39, %v293_v39  ;;  %v250_v44 = vadd.f32 %v640_v40, %v775_v17  ;;  %v314_v45 = vadd.f32 %v656_v41, %v775_v17 }
  0xd0   :  { %500 = vst.msk [vmem:[%s940_s3 + $0x4c] sm:$0xf] %vm480_vm1, %v602_v37  ;;  %v241_v46 = vpop.f32.mrf.mxu0  ;;  %v305_v47 = vpop.f32.mrf.mxu1 }
  0xd1   :  { %482 = vst.msk [vmem:[%s940_s3 + $0x4] sm:$0xf] %vm480_vm1, %v584_v42  ;;  %498 = vst.msk [vmem:[%s940_s3 + $0x44] sm:$0xf] %vm480_vm1, %v600_v43  ;;  %v589_v48 = vpack.c.bf16 %v250_v44, %v250_v44  ;;  %v605_v49 = vpack.c.bf16 %v314_v45, %v314_v45  ;;  %v242_v50 = vadd.f32 %v775_v17, %v241_v46 }
  0xd2   :  { %v306_v51 = vadd.f32 %v775_v17, %v305_v47  ;;  %v641_v52 = vpop.f32.mrf.mxu0  ;;  %v657_v53 = vpop.f32.mrf.mxu1 }
  0xd3   :  { %487 = vst.msk [vmem:[%s940_s3 + $0x18] sm:$0xf] %vm480_vm1, %v589_v48  ;;  %503 = vst.msk [vmem:[%s940_s3 + $0x58] sm:$0xf] %vm480_vm1, %v605_v49  ;;  %v587_v54 = vpack.c.bf16 %v242_v50, %v242_v50  ;;  %v253_v56 = vadd.f32 %v641_v52, %v775_v17  ;;  %v317_v57 = vadd.f32 %v657_v53, %v775_v17 }
  0xd4   :  { %v603_v55 = vpack.c.bf16 %v306_v51, %v306_v51  ;;  %v244_v58 = vpop.f32.mrf.mxu0  ;;  %v308_v59 = vpop.f32.mrf.mxu1 }
  0xd5   :  { %485 = vst.msk [vmem:[%s940_s3 + $0x10] sm:$0xf] %vm480_vm1, %v587_v54  ;;  %v590_v60 = vpack.c.bf16 %v253_v56, %v253_v56  ;;  %v606_v61 = vpack.c.bf16 %v317_v57, %v317_v57  ;;  %v245_v62 = vadd.f32 %v775_v17, %v244_v58  ;;  %v309_v63 = vadd.f32 %v775_v17, %v308_v59 }
  0xd6   :  { %501 = vst.msk [vmem:[%s940_s3 + $0x50] sm:$0xf] %vm480_vm1, %v603_v55  ;;  %v644_v0 = vpop.f32.mrf.mxu0  ;;  %v660_v1 = vpop.f32.mrf.mxu1 }
  0xd7   :  { %488 = vst.msk [vmem:[%s940_s3 + $0x1c] sm:$0xf] %vm480_vm1, %v590_v60  ;;  %504 = vst.msk [vmem:[%s940_s3 + $0x5c] sm:$0xf] %vm480_vm1, %v606_v61  ;;  %v588_v2 = vpack.c.bf16 %v245_v62, %v245_v62  ;;  %v604_v3 = vpack.c.bf16 %v309_v63, %v309_v63  ;;  %v266_v4 = vadd.f32 %v644_v0, %v775_v17 }
  0xd8   :  { %v330_v5 = vadd.f32 %v660_v1, %v775_v17  ;;  %v257_v6 = vpop.f32.mrf.mxu0  ;;  %v321_v7 = vpop.f32.mrf.mxu1 }
  0xd9   :  { %486 = vst.msk [vmem:[%s940_s3 + $0x14] sm:$0xf] %vm480_vm1, %v588_v2  ;;  %502 = vst.msk [vmem:[%s940_s3 + $0x54] sm:$0xf] %vm480_vm1, %v604_v3  ;;  %v593_v8 = vpack.c.bf16 %v266_v4, %v266_v4  ;;  %v258_v10 = vadd.f32 %v775_v17, %v257_v6  ;;  %v322_v11 = vadd.f32 %v775_v17, %v321_v7 }
  0xda   :  { %v609_v9 = vpack.c.bf16 %v330_v5, %v330_v5  ;;  %v645_v12 = vpop.f32.mrf.mxu0  ;;  %v661_v13 = vpop.f32.mrf.mxu1 }
  0xdb   :  { %491 = vst.msk [vmem:[%s940_s3 + $0x28] sm:$0xf] %vm480_vm1, %v593_v8  ;;  %v591_v14 = vpack.c.bf16 %v258_v10, %v258_v10  ;;  %v607_v15 = vpack.c.bf16 %v322_v11, %v322_v11  ;;  %v269_v16 = vadd.f32 %v645_v12, %v775_v17  ;;  %v333_v18 = vadd.f32 %v661_v13, %v775_v17 }
  0xdc   :  { %507 = vst.msk [vmem:[%s940_s3 + $0x68] sm:$0xf] %vm480_vm1, %v609_v9  ;;  %v260_v19 = vpop.f32.mrf.mxu0  ;;  %v324_v20 = vpop.f32.mrf.mxu1 }
  0xdd   :  { %489 = vst.msk [vmem:[%s940_s3 + $0x20] sm:$0xf] %vm480_vm1, %v591_v14  ;;  %505 = vst.msk [vmem:[%s940_s3 + $0x60] sm:$0xf] %vm480_vm1, %v607_v15  ;;  %v594_v21 = vpack.c.bf16 %v269_v16, %v269_v16  ;;  %v610_v22 = vpack.c.bf16 %v333_v18, %v333_v18  ;;  %v261_v23 = vadd.f32 %v775_v17, %v260_v19 }
  0xde   :  { %v325_v24 = vadd.f32 %v775_v17, %v324_v20  ;;  %v648_v25 = vpop.f32.mrf.mxu0  ;;  %v664_v26 = vpop.f32.mrf.mxu1 }
  0xdf   :  { %492 = vst.msk [vmem:[%s940_s3 + $0x2c] sm:$0xf] %vm480_vm1, %v594_v21  ;;  %508 = vst.msk [vmem:[%s940_s3 + $0x6c] sm:$0xf] %vm480_vm1, %v610_v22  ;;  %v592_v27 = vpack.c.bf16 %v261_v23, %v261_v23  ;;  %v282_v29 = vadd.f32 %v648_v25, %v775_v17  ;;  %v346_v30 = vadd.f32 %v664_v26, %v775_v17 }
  0xe0   :  { %v608_v28 = vpack.c.bf16 %v325_v24, %v325_v24  ;;  %v273_v31 = vpop.f32.mrf.mxu0  ;;  %v337_v32 = vpop.f32.mrf.mxu1 }
  0xe1   :  { %490 = vst.msk [vmem:[%s940_s3 + $0x24] sm:$0xf] %vm480_vm1, %v592_v27  ;;  %v597_v33 = vpack.c.bf16 %v282_v29, %v282_v29  ;;  %v613_v34 = vpack.c.bf16 %v346_v30, %v346_v30  ;;  %v274_v35 = vadd.f32 %v775_v17, %v273_v31  ;;  %v338_v36 = vadd.f32 %v775_v17, %v337_v32 }
  0xe2   :  { %506 = vst.msk [vmem:[%s940_s3 + $0x64] sm:$0xf] %vm480_vm1, %v608_v28  ;;  %v649_v37 = vpop.f32.mrf.mxu0  ;;  %v665_v38 = vpop.f32.mrf.mxu1 }
  0xe3   :  { %495 = vst.msk [vmem:[%s940_s3 + $0x38] sm:$0xf] %vm480_vm1, %v597_v33  ;;  %511 = vst.msk [vmem:[%s940_s3 + $0x78] sm:$0xf] %vm480_vm1, %v613_v34  ;;  %v595_v39 = vpack.c.bf16 %v274_v35, %v274_v35  ;;  %v611_v40 = vpack.c.bf16 %v338_v36, %v338_v36  ;;  %v285_v41 = vadd.f32 %v649_v37, %v775_v17 }
  0xe4   :  { %v349_v42 = vadd.f32 %v665_v38, %v775_v17  ;;  %v276_v43 = vpop.f32.mrf.mxu0  ;;  %v340_v44 = vpop.f32.mrf.mxu1 }
  0xe5   :  { %493 = vst.msk [vmem:[%s940_s3 + $0x30] sm:$0xf] %vm480_vm1, %v595_v39  ;;  %509 = vst.msk [vmem:[%s940_s3 + $0x70] sm:$0xf] %vm480_vm1, %v611_v40  ;;  %v598_v45 = vpack.c.bf16 %v285_v41, %v285_v41  ;;  %v277_v47 = vadd.f32 %v775_v17, %v276_v43  ;;  %v341_v48 = vadd.f32 %v775_v17, %v340_v44 }
  0xe6   :  { %v614_v46 = vpack.c.bf16 %v349_v42, %v349_v42 }
  0xe7   :  { %496 = vst.msk [vmem:[%s940_s3 + $0x3c] sm:$0xf] %vm480_vm1, %v598_v45  ;;  %v596_v49 = vpack.c.bf16 %v277_v47, %v277_v47  ;;  %v612_v50 = vpack.c.bf16 %v341_v48, %v341_v48 }
  0xe8   :  { %512 = vst.msk [vmem:[%s940_s3 + $0x7c] sm:$0xf] %vm480_vm1, %v614_v46 }
  0xe9   :  { %494 = vst.msk [vmem:[%s940_s3 + $0x34] sm:$0xf] %vm480_vm1, %v596_v49  ;;  %510 = vst.msk [vmem:[%s940_s3 + $0x74] sm:$0xf] %vm480_vm1, %v612_v50 }

// kernel: _lambda_.28
= control target key start
LH: loop header
LB: loop body
LE: loop exit
PB: predicated region body
PF: predicated region fallthrough
CT: control target
= control target key end

     0   :  { %v1808_v0 = vmov 0   ;;  %vm577_vm0 = vcmask 261120   ;;  %s2285_s1 = inlined_call_operand.vmem [shape: bf16[288,128], index: 1, kind: input, shape index: {}]   ;;  %s2286_s0 = inlined_call_operand.vmem [shape: bf16[340,288], index: 0, kind: input, shape index: {}]   ;;  %s2287_s2 = inlined_call_operand.vmem [shape: f32[1,128], index: 2, kind: input, shape index: {}]   ;;  %s2288_s3 = inlined_call_operand.vmem [shape: bf16[340,128], index: 3, kind: output, shape index: {}]  }
   0x1   :  { %644 = vmatprep.subr.bf16.mxu0 %v1808_v0  ;;  %1670 = vmatprep.subr.bf16.mxu1 %v1808_v0  ;;  %v1703_v1 = vld [vmem:[%s2285_s1 + $0x38] sm:$0xff]   ;;  %v1704_v2 = vld [vmem:[%s2285_s1 + $0x30] sm:$0xff]   ;;  %v1705_v3 = vld [vmem:[%s2285_s1 + $0x28] sm:$0xff]  }
   0x2   :  { %645 = vmatpush1.bf16.msra.mxu0 %v1703_v1  ;;  %1686 = vmatpush1.bf16.msra.mxu1 %v1703_v1  ;;  %v1706_v4 = vld [vmem:[%s2285_s1 + $0x20] sm:$0xff]   ;;  %v1707_v5 = vld [vmem:[%s2285_s1 + $0x18] sm:$0xff]   ;;  %v1708_v7 = vld [vmem:[%s2285_s1 + $0x10] sm:$0xff]  }
   0x3   :  { %646 = vmatprep.subr.bf16.mxu0 %v1808_v0  ;;  %1671 = vmatprep.subr.bf16.mxu1 %v1808_v0  ;;  %v1721_v6 = vld [vmem:[%s2286_s0 + $0x4] ss:$12 sps:$4 sm:$0xff]   ;;  %v1724_v8 = vld [vmem:[%s2286_s0 + $0x19c] ss:$12 sps:$4 sm:$0xff]   ;;  %v1719_v20 = vld [vmem:[%s2286_s0] ss:$12 sps:$4 sm:$0xff]  }
   0x4   :  { %676 = vmatprep.mubr.bf16.mxu0 %v1721_v6  ;;  %812 = vmatprep.mubr.bf16.mxu1 %v1724_v8  ;;  %v1709_v9 = vld [vmem:[%s2285_s1 + $0x8] sm:$0xff]   ;;  %v1710_v10 = vld [vmem:[%s2285_s1] sm:$0xff]   ;;  %v1711_v11 = vld [vmem:[%s2285_s1 + $0x78] sm:$0xff]  }
   0x5   :  { %v1712_v12 = vld [vmem:[%s2285_s1 + $0x70] sm:$0xff]   ;;  %v1713_v13 = vld [vmem:[%s2285_s1 + $0x68] sm:$0xff]   ;;  %v1714_v14 = vld [vmem:[%s2285_s1 + $0x60] sm:$0xff]  }
   0x6   :  { %647 = vmatpush1.bf16.msra.mxu0 %v1704_v2  ;;  %1687 = vmatpush1.bf16.msra.mxu1 %v1704_v2  ;;  %v1715_v15 = vld [vmem:[%s2285_s1 + $0x58] sm:$0xff]   ;;  %v1716_v16 = vld [vmem:[%s2285_s1 + $0x50] sm:$0xff]   ;;  %v1717_v17 = vld [vmem:[%s2285_s1 + $0x48] sm:$0xff]  }
   0x7   :  { %648 = vmatprep.subr.bf16.mxu0 %v1808_v0  ;;  %1672 = vmatprep.subr.bf16.mxu1 %v1808_v0  ;;  %v1718_v18 = vld [vmem:[%s2285_s1 + $0x40] sm:$0xff]   ;;  %v1729_v19 = vld [vmem:[%s2285_s1 + $0x88] sm:$0xff]   ;;  %v1731_v26 = vld [vmem:[%s2286_s0 + $0x1b0] ss:$12 sps:$4 sm:$0xff]  }
   0x8   :  { %v1722_v21 = vld [vmem:[%s2286_s0 + $0x198] ss:$12 sps:$4 sm:$0xff]   ;;  %v1725_v22 = vld [vmem:[%s2286_s0 + $0x1c] ss:$12 sps:$4 sm:$0xff]   ;;  %v1727_v23 = vld [vmem:[%s2286_s0 + $0x1b4] ss:$12 sps:$4 sm:$0xff]  }
   0x9   :  { %v1744_v24 = vld [vmem:[%s2285_s1 + $0x80] sm:$0xff]   ;;  %v1734_v28 = vld [vmem:[%s2286_s0 + $0x1cc] ss:$12 sps:$4 sm:$0xff]   ;;  %v1736_v29 = vld [vmem:[%s2286_s0 + $0x30] ss:$12 sps:$4 sm:$0xff]  }
   0xa   :  { %649 = vmatpush1.bf16.msra.mxu0 %v1705_v3  ;;  %1688 = vmatpush1.bf16.msra.mxu1 %v1705_v3  ;;  %v1730_v25 = vld [vmem:[%s2286_s0 + $0x18] ss:$12 sps:$4 sm:$0xff]   ;;  %v1732_v27 = vld [vmem:[%s2286_s0 + $0x34] ss:$12 sps:$4 sm:$0xff]   ;;  %v1750_v40 = vld [vmem:[%s2286_s0 + $0x7c] ss:$12 sps:$4 sm:$0xff]  }
   0xb   :  { %650 = vmatprep.subr.bf16.mxu0 %v1808_v0  ;;  %1673 = vmatprep.subr.bf16.mxu1 %v1808_v0  ;;  %v1737_v30 = vld [vmem:[%s2286_s0 + $0x1c8] ss:$12 sps:$4 sm:$0xff]   ;;  %v1738_v31 = vld [vmem:[%s2286_s0 + $0x4c] ss:$12 sps:$4 sm:$0xff]   ;;  %v1740_v32 = vld [vmem:[%s2286_s0 + $0x1e4] ss:$12 sps:$4 sm:$0xff]  }
   0xc   :  { %v99_v33 = vld [vmem:[%s2286_s0 + $0x1f8] sm:$0x33]  ;;  %v1742_v34 = vld [vmem:[%s2286_s0 + $0x48] ss:$12 sps:$4 sm:$0xff]   ;;  %v1743_v35 = vld [vmem:[%s2286_s0 + $0x1e0] ss:$12 sps:$4 sm:$0xff]  }
   0xd   :  { %v1745_v36 = vld [vmem:[%s2286_s0 + $0x64] ss:$12 sps:$4 sm:$0xff]   ;;  %v1345_v37 = vcombine.high %v99_v33, %v99_v33  ;;  %v1748_v38 = vld [vmem:[%s2286_s0 + $0x60] ss:$12 sps:$4 sm:$0xff]   ;;  %v1344_v39 = vcombine.low %v99_v33, %v99_v33  ;;  %v1752_v41 = vld [vmem:[%s2286_s0 + $0x8] ss:$12 sps:$4 sm:$0xff]  }
   0xe   :  { %651 = vmatpush1.bf16.msra.mxu0 %v1706_v4  ;;  %1689 = vmatpush1.bf16.msra.mxu1 %v1706_v4  ;;  %v1753_v42 = vld [vmem:[%s2286_s0 + $0x78] ss:$12 sps:$4 sm:$0xff]   ;;  %v1754_v43 = vld [vmem:[%s2286_s0 + $0x20] ss:$12 sps:$4 sm:$0xff]   ;;  %v1758_v46 = vld [vmem:[%s2286_s0 + $0x90] ss:$12 sps:$4 sm:$0xff]  }
   0xf   :  { %652 = vmatprep.subr.bf16.mxu0 %v1808_v0  ;;  %1674 = vmatprep.subr.bf16.mxu1 %v1808_v0  ;;  %v1755_v44 = vld [vmem:[%s2286_s0 + $0x94] ss:$12 sps:$4 sm:$0xff]   ;;  %v1757_v45 = vld [vmem:[%s2286_s0 + $0x38] ss:$12 sps:$4 sm:$0xff]   ;;  %v1759_v47 = vld [vmem:[%s2286_s0 + $0x50] ss:$12 sps:$4 sm:$0xff]  }
  0x10   :  { %v1760_v48 = vld [vmem:[%s2286_s0 + $0xac] ss:$12 sps:$4 sm:$0xff]   ;;  %v1762_v49 = vld [vmem:[%s2286_s0 + $0x68] ss:$12 sps:$4 sm:$0xff]   ;;  %v1765_v52 = vld [vmem:[%s2286_s0 + $0xc4] ss:$12 sps:$4 sm:$0xff]  }
  0x11   :  { %v1763_v50 = vld [vmem:[%s2286_s0 + $0xa8] ss:$12 sps:$4 sm:$0xff]   ;;  %v1764_v51 = vld [vmem:[%s2286_s0 + $0x80] ss:$12 sps:$4 sm:$0xff]   ;;  %v1767_v53 = vld [vmem:[%s2286_s0 + $0x98] ss:$12 sps:$4 sm:$0xff]  }
  0x12   :  { %653 = vmatpush1.bf16.msra.mxu0 %v1707_v5  ;;  %1690 = vmatpush1.bf16.msra.mxu1 %v1707_v5  ;;  %v1768_v54 = vld [vmem:[%s2286_s0 + $0xc0] ss:$12 sps:$4 sm:$0xff]   ;;  %v1769_v55 = vld [vmem:[%s2286_s0 + $0xb0] ss:$12 sps:$4 sm:$0xff]   ;;  %v1772_v57 = vld [vmem:[%s2286_s0 + $0xc8] ss:$12 sps:$4 sm:$0xff]  }
  0x13   :  { %654 = vmatprep.subr.bf16.mxu0 %v1808_v0  ;;  %1675 = vmatprep.subr.bf16.mxu1 %v1808_v0  ;;  %v1770_v56 = vld [vmem:[%s2286_s0 + $0xdc] ss:$12 sps:$4 sm:$0xff]   ;;  %v1773_v58 = vld [vmem:[%s2286_s0 + $0xd8] ss:$12 sps:$4 sm:$0xff]   ;;  %v1774_v59 = vld [vmem:[%s2286_s0 + $0xe0] ss:$12 sps:$4 sm:$0xff]  }
  0x14   :  { %v1775_v60 = vld [vmem:[%s2286_s0 + $0xf4] ss:$12 sps:$4 sm:$0xff]   ;;  %v1777_v61 = vld [vmem:[%s2286_s0 + $0xf8] ss:$12 sps:$4 sm:$0xff]   ;;  %v1778_v62 = vld [vmem:[%s2286_s0 + $0xf0] ss:$12 sps:$4 sm:$0xff]  }
  0x15   :  { %v1779_v63 = vld [vmem:[%s2286_s0 + $0x110] ss:$12 sps:$4 sm:$0xff]   ;;  %v1782_v1 = vld [vmem:[%s2286_s0 + $0x128] ss:$12 sps:$4 sm:$0xff]   ;;  %v1784_v3 = vld [vmem:[%s2286_s0 + $0x140] ss:$12 sps:$4 sm:$0xff]  }
  0x16   :  { %655 = vmatpush1.bf16.msra.mxu0 %v1708_v7  ;;  %1691 = vmatpush1.bf16.msra.mxu1 %v1708_v7  ;;  %v1783_v2 = vld [vmem:[%s2286_s0 + $0x108] ss:$12 sps:$4 sm:$0xff]   ;;  %v1785_v4 = vld [vmem:[%s2286_s0 + $0x124] ss:$12 sps:$4 sm:$0xff]   ;;  %v1788_v6 = vld [vmem:[%s2286_s0 + $0x120] ss:$12 sps:$4 sm:$0xff]  }
  0x17   :  { %656 = vmatprep.subr.bf16.mxu0 %v1808_v0  ;;  %1676 = vmatprep.subr.bf16.mxu1 %v1808_v0  ;;  %v1787_v5 = vld [vmem:[%s2286_s0 + $0x158] ss:$12 sps:$4 sm:$0xff]   ;;  %v1789_v7 = vld [vmem:[%s2286_s0 + $0x170] ss:$12 sps:$4 sm:$0xff]  }
  0x18   :  { %v1790_v8 = vld [vmem:[%s2286_s0 + $0x13c] ss:$12 sps:$4 sm:$0xff]  }
  0x1a   :  { %657 = vmatpush1.bf16.msra.mxu0 %v1709_v9  ;;  %1692 = vmatpush1.bf16.msra.mxu1 %v1709_v9  ;;  %v1792_v9 = vld [vmem:[%s2286_s0 + $0x188] ss:$12 sps:$4 sm:$0xff]  }
  0x1b   :  { %658 = vmatprep.subr.bf16.mxu0 %v1808_v0  ;;  %1677 = vmatprep.subr.bf16.mxu1 %v1808_v0 }
  0x1e   :  { %659 = vmatpush1.bf16.msra.mxu0 %v1710_v10  ;;  %1693 = vmatpush1.bf16.msra.mxu1 %v1710_v10  ;;  %v1793_v10 = vld [vmem:[%s2286_s0 + $0x138] ss:$12 sps:$4 sm:$0xff]  }
  0x1f   :  { %660 = vmatprep.subr.bf16.mxu0 %v1808_v0  ;;  %1678 = vmatprep.subr.bf16.mxu1 %v1808_v0 }
  0x22   :  { %661 = vmatpush2.bf16.msra.mxu0 %v1711_v11  ;;  %1694 = vmatpush2.bf16.msra.mxu1 %v1711_v11  ;;  %v1794_v11 = vld [vmem:[%s2286_s0 + $0x1a0] ss:$12 sps:$4 sm:$0xff]  }
  0x23   :  { %662 = vmatprep.subr.bf16.mxu0 %v1808_v0  ;;  %1679 = vmatprep.subr.bf16.mxu1 %v1808_v0 }
  0x26   :  { %663 = vmatpush2.bf16.msra.mxu0 %v1712_v12  ;;  %1695 = vmatpush2.bf16.msra.mxu1 %v1712_v12  ;;  %v1795_v12 = vld [vmem:[%s2286_s0 + $0x154] ss:$12 sps:$4 sm:$0xff]  }
  0x27   :  { %664 = vmatprep.subr.bf16.mxu0 %v1808_v0  ;;  %1680 = vmatprep.subr.bf16.mxu1 %v1808_v0 }
  0x2a   :  { %665 = vmatpush2.bf16.msra.mxu0 %v1713_v13  ;;  %1696 = vmatpush2.bf16.msra.mxu1 %v1713_v13  ;;  %v1797_v13 = vld [vmem:[%s2286_s0 + $0x1b8] ss:$12 sps:$4 sm:$0xff]  }
  0x2b   :  { %666 = vmatprep.subr.bf16.mxu0 %v1808_v0  ;;  %1681 = vmatprep.subr.bf16.mxu1 %v1808_v0 }
  0x2e   :  { %667 = vmatpush2.bf16.msra.mxu0 %v1714_v14  ;;  %1697 = vmatpush2.bf16.msra.mxu1 %v1714_v14  ;;  %v1798_v14 = vld [vmem:[%s2286_s0 + $0x150] ss:$12 sps:$4 sm:$0xff]  }
  0x2f   :  { %668 = vmatprep.subr.bf16.mxu0 %v1808_v0  ;;  %1682 = vmatprep.subr.bf16.mxu1 %v1808_v0 }
  0x32   :  { %669 = vmatpush2.bf16.msra.mxu0 %v1715_v15  ;;  %1698 = vmatpush2.bf16.msra.mxu1 %v1715_v15  ;;  %v1799_v15 = vld [vmem:[%s2286_s0 + $0x1d0] ss:$12 sps:$4 sm:$0xff]  }
  0x33   :  { %670 = vmatprep.subr.bf16.mxu0 %v1808_v0  ;;  %1683 = vmatprep.subr.bf16.mxu1 %v1808_v0 }
  0x36   :  { %671 = vmatpush2.bf16.msra.mxu0 %v1716_v16  ;;  %1699 = vmatpush2.bf16.msra.mxu1 %v1716_v16  ;;  %v1800_v16 = vld [vmem:[%s2286_s0 + $0x16c] ss:$12 sps:$4 sm:$0xff]  }
  0x37   :  { %672 = vmatprep.subr.bf16.mxu0 %v1808_v0  ;;  %1684 = vmatprep.subr.bf16.mxu1 %v1808_v0 }
  0x3a   :  { %673 = vmatpush2.bf16.msra.mxu0 %v1717_v17  ;;  %1700 = vmatpush2.bf16.msra.mxu1 %v1717_v17  ;;  %v1802_v17 = vld [vmem:[%s2286_s0 + $0x1e8] ss:$12 sps:$4 sm:$0xff]  }
  0x3b   :  { %674 = vmatprep.subr.bf16.mxu0 %v1808_v0  ;;  %1685 = vmatprep.subr.bf16.mxu1 %v1808_v0  ;;  %v1780_v0 = vld [vmem:[%s2286_s0 + $0x10c] ss:$12 sps:$4 sm:$0xff]  }
  0x3e   :  { %675 = vmatpush2.bf16.msra.mxu0 %v1718_v18  ;;  %1701 = vmatpush2.bf16.msra.mxu1 %v1718_v18  ;;  %v1803_v18 = vld [vmem:[%s2286_s0 + $0x168] ss:$12 sps:$4 sm:$0xff]  }
  0x3f   :  { %1622 = vmatprep.subr.bf16.mxu1 %v1729_v19 }
  0x41   :  { %677 = vmatmul.mubr.bf16.vlgmr.msra.gmra.mxu0 %v1719_v20  ;;  %813 = vmatmul.mubr.bf16.vlgmr.msra.gmra.mxu1 %v1722_v21  ;;  %v1805_v20 = vld [vmem:[%s2286_s0 + $0x184] ss:$12 sps:$4 sm:$0xff]   ;;  %v1807_v21 = vld [vmem:[%s2286_s0 + $0x180] ss:$12 sps:$4 sm:$0xff]  }
  0x42   :  { %684 = vmatprep.mubr.bf16.mxu0 %v1725_v22  ;;  %820 = vmatprep.mubr.bf16.mxu1 %v1727_v23 }
  0x43   :  { %1623 = vmatpush3.bf16.msra.mxu1 %v1729_v19  ;;  %v1804_v19 = vld [vmem:[%s2286_s0 + $0x200] ss:$0 sps:$4 sm:$0x33]  }
  0x44   :  { %1624 = vmatprep.subr.bf16.mxu1 %v1744_v24 }
  0x47   :  { %1625 = vmatpush3.bf16.msra.mxu1 %v1744_v24 }
  0x49   :  { %685 = vmatmul.mubr.bf16.gmra.mxu0 %v1730_v25  ;;  %821 = vmatmul.mubr.bf16.gmra.mxu1 %v1731_v26 }
  0x4a   :  { %692 = vmatprep.mubr.bf16.mxu0 %v1732_v27  ;;  %828 = vmatprep.mubr.bf16.mxu1 %v1734_v28 }
  0x51   :  { %693 = vmatmul.mubr.bf16.gmra.mxu0 %v1736_v29  ;;  %829 = vmatmul.mubr.bf16.gmra.mxu1 %v1737_v30 }
  0x52   :  { %700 = vmatprep.mubr.bf16.mxu0 %v1738_v31  ;;  %836 = vmatprep.mubr.bf16.mxu1 %v1740_v32 }
  0x59   :  { %701 = vmatmul.mubr.bf16.gmra.mxu0 %v1742_v34  ;;  %837 = vmatmul.mubr.bf16.gmra.mxu1 %v1743_v35 }
  0x5a   :  { %708 = vmatprep.mubr.bf16.mxu0 %v1745_v36  ;;  %844 = vmatprep.mubr.bf16.mxu1 %v1345_v37 }
  0x61   :  { %709 = vmatmul.mubr.bf16.gmra.mxu0 %v1748_v38  ;;  %845 = vmatmul.mubr.bf16.gmra.mxu1 %v1344_v39 }
  0x62   :  { %716 = vmatprep.mubr.bf16.mxu0 %v1750_v40  ;;  %1626 = vmatprep.mubr.msk.bf16.mxu1 %vm577_vm0, %v1752_v41 }
  0x69   :  { %717 = vmatmul.mubr.bf16.gmra.mxu0 %v1753_v42  ;;  %1627 = vmatmul.mubr.msk.bf16.vlgmr.msra.gmra.mxu1 %vm577_vm0, %v1754_v43 }
  0x6a   :  { %724 = vmatprep.mubr.bf16.mxu0 %v1755_v44  ;;  %1630 = vmatprep.mubr.msk.bf16.mxu1 %vm577_vm0, %v1757_v45 }
  0x71   :  { %725 = vmatmul.mubr.bf16.gmra.mxu0 %v1758_v46  ;;  %1631 = vmatmul.mubr.msk.bf16.gmra.mxu1 %vm577_vm0, %v1759_v47 }
  0x72   :  { %732 = vmatprep.mubr.bf16.mxu0 %v1760_v48  ;;  %1634 = vmatprep.mubr.msk.bf16.mxu1 %vm577_vm0, %v1762_v49 }
  0x79   :  { %733 = vmatmul.mubr.bf16.gmra.mxu0 %v1763_v50  ;;  %1635 = vmatmul.mubr.msk.bf16.gmra.mxu1 %vm577_vm0, %v1764_v51 }
  0x7a   :  { %740 = vmatprep.mubr.bf16.mxu0 %v1765_v52  ;;  %1638 = vmatprep.mubr.msk.bf16.mxu1 %vm577_vm0, %v1767_v53 }
  0x81   :  { %741 = vmatmul.mubr.bf16.gmra.mxu0 %v1768_v54  ;;  %1639 = vmatmul.mubr.msk.bf16.gmra.mxu1 %vm577_vm0, %v1769_v55 }
  0x82   :  { %748 = vmatprep.mubr.bf16.mxu0 %v1770_v56  ;;  %1642 = vmatprep.mubr.msk.bf16.mxu1 %vm577_vm0, %v1772_v57 }
  0x89   :  { %749 = vmatmul.mubr.bf16.gmra.mxu0 %v1773_v58  ;;  %1643 = vmatmul.mubr.msk.bf16.gmra.mxu1 %vm577_vm0, %v1774_v59 }
  0x8a   :  { %756 = vmatprep.mubr.bf16.mxu0 %v1775_v60  ;;  %1646 = vmatprep.mubr.msk.bf16.mxu1 %vm577_vm0, %v1777_v61 }
  0x91   :  { %757 = vmatmul.mubr.bf16.gmra.mxu0 %v1778_v62  ;;  %1647 = vmatmul.mubr.msk.bf16.gmra.mxu1 %vm577_vm0, %v1779_v63 }
  0x92   :  { %764 = vmatprep.mubr.bf16.mxu0 %v1780_v0  ;;  %1650 = vmatprep.mubr.msk.bf16.mxu1 %vm577_vm0, %v1782_v1  ;;  %v2153_v0 = vld [vmem:[%s2287_s2] ss:$0 sm:$0xff] }
  0x99   :  { %765 = vmatmul.mubr.bf16.gmra.mxu0 %v1783_v2  ;;  %1651 = vmatmul.mubr.msk.bf16.gmra.mxu1 %vm577_vm0, %v1784_v3 }
  0x9a   :  { %772 = vmatprep.mubr.bf16.mxu0 %v1785_v4  ;;  %1654 = vmatprep.mubr.msk.bf16.mxu1 %vm577_vm0, %v1787_v5 }
  0xa1   :  { %773 = vmatmul.mubr.bf16.gmra.mxu0 %v1788_v6  ;;  %1655 = vmatmul.mubr.msk.bf16.gmra.mxu1 %vm577_vm0, %v1789_v7 }
  0xa2   :  { %780 = vmatprep.mubr.bf16.mxu0 %v1790_v8  ;;  %1658 = vmatprep.mubr.msk.bf16.mxu1 %vm577_vm0, %v1792_v9 }
  0xa9   :  { %781 = vmatmul.mubr.bf16.gmra.mxu0 %v1793_v10  ;;  %1659 = vmatmul.mubr.msk.bf16.gmra.mxu1 %vm577_vm0, %v1794_v11 }
  0xaa   :  { %788 = vmatprep.mubr.bf16.mxu0 %v1795_v12  ;;  %1662 = vmatprep.mubr.msk.bf16.mxu1 %vm577_vm0, %v1797_v13 }
  0xb1   :  { %789 = vmatmul.mubr.bf16.gmra.mxu0 %v1798_v14  ;;  %1663 = vmatmul.mubr.msk.bf16.gmra.mxu1 %vm577_vm0, %v1799_v15 }
  0xb2   :  { %796 = vmatprep.mubr.bf16.mxu0 %v1800_v16  ;;  %1666 = vmatprep.mubr.msk.bf16.mxu1 %vm577_vm0, %v1802_v17 }
  0xb9   :  { %797 = vmatmul.mubr.bf16.gmra.mxu0 %v1803_v18  ;;  %1667 = vmatmul.mubr.msk.bf16.gmra.mxu1 %vm577_vm0, %v1804_v19 }
  0xba   :  { %804 = vmatprep.mubr.bf16.mxu0 %v1805_v20 }
  0xc1   :  { %805 = vmatmul.mubr.bf16.gmra.mxu0 %v1807_v21 }
 0x101   :  { %v678_v22 = vpop.f32.mrf.mxu0  ;;  %v2132_v23 = vpop.f32.mrf.mxu1 }
 0x102   :  { %v679_v7 = vadd.f32 %v2153_v0, %v678_v22 }
 0x103   :  { %v680_v24 = vpop.f32.mrf.mxu0  ;;  %v816_v25 = vpop.f32.mrf.mxu1 }
 0x105   :  { %v681_v26 = vpop.f32.mrf.mxu0  ;;  %v2134_v27 = vpop.f32.mrf.mxu1 }
 0x106   :  { %v682_v8 = vadd.f32 %v2153_v0, %v681_v26 }
 0x107   :  { %v683_v28 = vpop.f32.mrf.mxu0  ;;  %v819_v29 = vpop.f32.mrf.mxu1 }
 0x109   :  { %v686_v30 = vpop.f32.mrf.mxu0  ;;  %v2136_v31 = vpop.f32.mrf.mxu1 }
 0x10a   :  { %v687_v3 = vadd.f32 %v2153_v0, %v686_v30 }
 0x10b   :  { %v688_v32 = vpop.f32.mrf.mxu0  ;;  %v824_v33 = vpop.f32.mrf.mxu1 }
 0x10d   :  { %v689_v34 = vpop.f32.mrf.mxu0  ;;  %v2138_v35 = vpop.f32.mrf.mxu1 }
 0x10e   :  { %v690_v4 = vadd.f32 %v2153_v0, %v689_v34 }
 0x10f   :  { %v691_v36 = vpop.f32.mrf.mxu0  ;;  %v827_v37 = vpop.f32.mrf.mxu1 }
 0x111   :  { %v694_v38 = vpop.f32.mrf.mxu0  ;;  %v2140_v39 = vpop.f32.mrf.mxu1 }
 0x112   :  { %v695_v26 = vadd.f32 %v2153_v0, %v694_v38 }
 0x113   :  { %v696_v40 = vpop.f32.mrf.mxu0  ;;  %v832_v41 = vpop.f32.mrf.mxu1 }
 0x115   :  { %v697_v42 = vpop.f32.mrf.mxu0  ;;  %v2142_v43 = vpop.f32.mrf.mxu1 }
 0x116   :  { %v698_v28 = vadd.f32 %v2153_v0, %v697_v42 }
 0x117   :  { %v699_v44 = vpop.f32.mrf.mxu0  ;;  %v835_v45 = vpop.f32.mrf.mxu1 }
 0x119   :  { %v702_v46 = vpop.f32.mrf.mxu0  ;;  %v2144_v47 = vpop.f32.mrf.mxu1 }
 0x11a   :  { %v703_v21 = vadd.f32 %v2153_v0, %v702_v46 }
 0x11b   :  { %v704_v48 = vpop.f32.mrf.mxu0  ;;  %v840_v49 = vpop.f32.mrf.mxu1 }
 0x11d   :  { %v705_v50 = vpop.f32.mrf.mxu0  ;;  %v2146_v51 = vpop.f32.mrf.mxu1 }
 0x11e   :  { %v706_v22 = vadd.f32 %v2153_v0, %v705_v50 }
 0x11f   :  { %v707_v52 = vpop.f32.mrf.mxu0  ;;  %v843_v53 = vpop.f32.mrf.mxu1 }
 0x121   :  { %v710_v54 = vpop.f32.mrf.mxu0  ;;  %v2148_v55 = vpop.f32.mrf.mxu1 }
 0x122   :  { %v711_v50 = vadd.f32 %v2153_v0, %v710_v54 }
 0x123   :  { %v712_v56 = vpop.f32.mrf.mxu0  ;;  %v848_v57 = vpop.f32.mrf.mxu1 }
 0x125   :  { %v713_v58 = vpop.f32.mrf.mxu0  ;;  %v849_v59 = vpop.f32.mrf.mxu1 }
 0x126   :  { %v714_v52 = vadd.f32 %v2153_v0, %v713_v58 }
 0x127   :  { %v715_v60 = vpop.f32.mrf.mxu0  ;;  %v850_v61 = vpop.f32.mrf.mxu1 }
 0x129   :  { %v718_v62 = vpop.f32.mrf.mxu0  ;;  %v1628_v63 = vpop.f32.mrf.mxu1 }
 0x12a   :  { %v895_v9 = vadd.f32 %v1628_v63, %v687_v3  ;;  %v719_v38 = vadd.f32 %v2153_v0, %v718_v62 }
 0x12b   :  { %v720_v1 = vpop.f32.mrf.mxu0  ;;  %v886_v2 = vpop.f32.mrf.mxu1 }
 0x12c   :  { %v887_v13 = vadd.f32 %v886_v2, %v679_v7 }
 0x12d   :  { %v721_v5 = vpop.f32.mrf.mxu0  ;;  %v1629_v6 = vpop.f32.mrf.mxu1 }
 0x12e   :  { %v898_v10 = vadd.f32 %v1629_v6, %v690_v4  ;;  %v722_v42 = vadd.f32 %v2153_v0, %v721_v5 }
 0x12f   :  { %v723_v11 = vpop.f32.mrf.mxu0  ;;  %v889_v12 = vpop.f32.mrf.mxu1 }
 0x130   :  { %v1481_v14 = vpack.c.bf16 %v898_v10, %v895_v9  ;;  %v890_v15 = vadd.f32 %v889_v12, %v682_v8 }
 0x131   :  { %v726_v16 = vpop.f32.mrf.mxu0  ;;  %v1632_v17 = vpop.f32.mrf.mxu1 }
 0x132   :  { %1578 = vst [vmem:[%s2288_s3 + $0x8] sm:$0xff] %v1481_v14   ;;  %v1476_v18 = vpack.c.bf16 %v890_v15, %v887_v13  ;;  %v911_v29 = vadd.f32 %v1632_v17, %v703_v21  ;;  %v727_v7 = vadd.f32 %v2153_v0, %v726_v16 }
 0x133   :  { %v728_v19 = vpop.f32.mrf.mxu0  ;;  %v902_v20 = vpop.f32.mrf.mxu1 }
 0x134   :  { %1477 = vst [vmem:[%s2288_s3] sm:$0xff] %v1476_v18   ;;  %v903_v34 = vadd.f32 %v902_v20, %v695_v26 }
 0x135   :  { %v729_v24 = vpop.f32.mrf.mxu0  ;;  %v1633_v25 = vpop.f32.mrf.mxu1 }
 0x136   :  { %v914_v30 = vadd.f32 %v1633_v25, %v706_v22  ;;  %v730_v8 = vadd.f32 %v2153_v0, %v729_v24 }
 0x137   :  { %v731_v32 = vpop.f32.mrf.mxu0  ;;  %v905_v33 = vpop.f32.mrf.mxu1 }
 0x138   :  { %v1491_v36 = vpack.c.bf16 %v914_v30, %v911_v29  ;;  %v906_v37 = vadd.f32 %v905_v33, %v698_v28 }
 0x139   :  { %v734_v40 = vpop.f32.mrf.mxu0  ;;  %v1636_v41 = vpop.f32.mrf.mxu1 }
 0x13a   :  { %1580 = vst [vmem:[%s2288_s3 + $0x18] sm:$0xff] %v1491_v36   ;;  %v1486_v44 = vpack.c.bf16 %v906_v37, %v903_v34  ;;  %v927_v53 = vadd.f32 %v1636_v41, %v719_v38  ;;  %v735_v54 = vadd.f32 %v2153_v0, %v734_v40 }
 0x13b   :  { %v736_v45 = vpop.f32.mrf.mxu0  ;;  %v918_v46 = vpop.f32.mrf.mxu1 }
 0x13c   :  { %1579 = vst [vmem:[%s2288_s3 + $0x10] sm:$0xff] %v1486_v44   ;;  %v919_v60 = vadd.f32 %v918_v46, %v711_v50 }
 0x13d   :  { %v737_v48 = vpop.f32.mrf.mxu0  ;;  %v1637_v49 = vpop.f32.mrf.mxu1 }
 0x13e   :  { %v930_v56 = vadd.f32 %v1637_v49, %v722_v42  ;;  %v738_v58 = vadd.f32 %v2153_v0, %v737_v48 }
 0x13f   :  { %v739_v57 = vpop.f32.mrf.mxu0  ;;  %v921_v59 = vpop.f32.mrf.mxu1 }
 0x140   :  { %v1501_v61 = vpack.c.bf16 %v930_v56, %v927_v53  ;;  %v922_v63 = vadd.f32 %v921_v59, %v714_v52 }
 0x141   :  { %v742_v62 = vpop.f32.mrf.mxu0  ;;  %v1640_v1 = vpop.f32.mrf.mxu1 }
 0x142   :  { %1582 = vst [vmem:[%s2288_s3 + $0x28] sm:$0xff] %v1501_v61   ;;  %v1496_v2 = vpack.c.bf16 %v922_v63, %v919_v60  ;;  %v943_v9 = vadd.f32 %v1640_v1, %v735_v54  ;;  %v743_v25 = vadd.f32 %v2153_v0, %v742_v62 }
 0x143   :  { %v744_v3 = vpop.f32.mrf.mxu0  ;;  %v934_v4 = vpop.f32.mrf.mxu1 }
 0x144   :  { %1581 = vst [vmem:[%s2288_s3 + $0x20] sm:$0xff] %v1496_v2   ;;  %v935_v13 = vadd.f32 %v934_v4, %v727_v7 }
 0x145   :  { %v745_v5 = vpop.f32.mrf.mxu0  ;;  %v1641_v6 = vpop.f32.mrf.mxu1 }
 0x146   :  { %v946_v10 = vadd.f32 %v1641_v6, %v738_v58  ;;  %v746_v26 = vadd.f32 %v2153_v0, %v745_v5 }
 0x147   :  { %v747_v11 = vpop.f32.mrf.mxu0  ;;  %v937_v12 = vpop.f32.mrf.mxu1 }
 0x148   :  { %v1511_v14 = vpack.c.bf16 %v946_v10, %v943_v9  ;;  %v938_v15 = vadd.f32 %v937_v12, %v730_v8 }
 0x149   :  { %v750_v17 = vpop.f32.mrf.mxu0  ;;  %v1644_v18 = vpop.f32.mrf.mxu1 }
 0x14a   :  { %1584 = vst [vmem:[%s2288_s3 + $0x38] sm:$0xff] %v1511_v14   ;;  %v1506_v19 = vpack.c.bf16 %v938_v15, %v935_v13  ;;  %v751_v16 = vadd.f32 %v2153_v0, %v750_v17 }
 0x14b   :  { %v752_v20 = vpop.f32.mrf.mxu0  ;;  %v950_v21 = vpop.f32.mrf.mxu1 }
 0x14c   :  { %1583 = vst [vmem:[%s2288_s3 + $0x30] sm:$0xff] %v1506_v19   ;;  %v959_v32 = vadd.f32 %v1644_v18, %v751_v16  ;;  %v951_v33 = vadd.f32 %v950_v21, %v743_v25  ;;  %v815_v25 = vadd.f32 %v2153_v0, %v2132_v23 }
 0x14d   :  { %v753_v22 = vpop.f32.mrf.mxu0  ;;  %v1645_v24 = vpop.f32.mrf.mxu1 }
 0x14e   :  { %v754_v28 = vadd.f32 %v2153_v0, %v753_v22 }
 0x14f   :  { %v755_v29 = vpop.f32.mrf.mxu0  ;;  %v953_v30 = vpop.f32.mrf.mxu1 }
 0x150   :  { %v962_v34 = vadd.f32 %v1645_v24, %v754_v28  ;;  %v954_v36 = vadd.f32 %v953_v30, %v746_v26  ;;  %v818_v26 = vadd.f32 %v2153_v0, %v2134_v27 }
 0x151   :  { %v758_v37 = vpop.f32.mrf.mxu0  ;;  %v1648_v40 = vpop.f32.mrf.mxu1 }
 0x152   :  { %v1521_v41 = vpack.c.bf16 %v962_v34, %v959_v32  ;;  %v1516_v44 = vpack.c.bf16 %v954_v36, %v951_v33  ;;  %v759_v38 = vadd.f32 %v2153_v0, %v758_v37 }
 0x153   :  { %v760_v45 = vpop.f32.mrf.mxu0  ;;  %v966_v46 = vpop.f32.mrf.mxu1 }
 0x154   :  { %1586 = vst [vmem:[%s2288_s3 + $0x48] sm:$0xff] %v1521_v41   ;;  %1585 = vst [vmem:[%s2288_s3 + $0x40] sm:$0xff] %v1516_v44   ;;  %v967_v53 = vadd.f32 %v966_v46, %v759_v38 }
 0x155   :  { %v761_v42 = vpop.f32.mrf.mxu0  ;;  %v1649_v48 = vpop.f32.mrf.mxu1 }
 0x156   :  { %v762_v49 = vadd.f32 %v2153_v0, %v761_v42 }
 0x157   :  { %v763_v50 = vpop.f32.mrf.mxu0  ;;  %v969_v52 = vpop.f32.mrf.mxu1 }
 0x158   :  { %v970_v56 = vadd.f32 %v969_v52, %v762_v49  ;;  %v834_v49 = vadd.f32 %v2153_v0, %v2142_v43  ;;  %v823_v50 = vadd.f32 %v2153_v0, %v2136_v31 }
 0x159   :  { %v766_v57 = vpop.f32.mrf.mxu0  ;;  %v1652_v59 = vpop.f32.mrf.mxu1 }
 0x15a   :  { %v1526_v60 = vpack.c.bf16 %v970_v56, %v967_v53  ;;  %v767_v62 = vadd.f32 %v2153_v0, %v766_v57  ;;  %v826_v56 = vadd.f32 %v2153_v0, %v2138_v35 }
 0x15b   :  { %v768_v61 = vpop.f32.mrf.mxu0  ;;  %v982_v63 = vpop.f32.mrf.mxu1 }
 0x15c   :  { %1587 = vst [vmem:[%s2288_s3 + $0x50] sm:$0xff] %v1526_v60   ;;  %v975_v58 = vadd.f32 %v1648_v40, %v767_v62 }
 0x15d   :  { %v769_v1 = vpop.f32.mrf.mxu0  ;;  %v1653_v2 = vpop.f32.mrf.mxu1 }
 0x15e   :  { %v770_v3 = vadd.f32 %v2153_v0, %v769_v1 }
 0x15f   :  { %v771_v4 = vpop.f32.mrf.mxu0  ;;  %v985_v54 = vpop.f32.mrf.mxu1 }
 0x160   :  { %v978_v5 = vadd.f32 %v1649_v48, %v770_v3  ;;  %v831_v48 = vadd.f32 %v2153_v0, %v2140_v39  ;;  %v847_v39 = vadd.f32 %v2153_v0, %v2148_v55 }
 0x161   :  { %v774_v6 = vpop.f32.mrf.mxu0  ;;  %v2212_v7 = vpop.f32.mrf.mxu1 }
 0x162   :  { %v1531_v8 = vpack.c.bf16 %v978_v5, %v975_v58  ;;  %v775_v11 = vadd.f32 %v2153_v0, %v774_v6 }
 0x163   :  { %v776_v9 = vpop.f32.mrf.mxu0  ;;  %v998_v10 = vpop.f32.mrf.mxu1 }
 0x164   :  { %1588 = vst [vmem:[%s2288_s3 + $0x58] sm:$0xff] %v1531_v8   ;;  %v983_v18 = vadd.f32 %v982_v63, %v775_v11  ;;  %v839_v11 = vadd.f32 %v2153_v0, %v2144_v47 }
 0x165   :  { %v777_v12 = vpop.f32.mrf.mxu0  ;;  %v2218_v13 = vpop.f32.mrf.mxu1 }
 0x166   :  { %v778_v14 = vadd.f32 %v2153_v0, %v777_v12  ;;  %v842_v12 = vadd.f32 %v2153_v0, %v2146_v51 }
 0x167   :  { %v779_v15 = vpop.f32.mrf.mxu0  ;;  %v1001_v17 = vpop.f32.mrf.mxu1 }
 0x168   :  { %v986_v19 = vadd.f32 %v985_v54, %v778_v14 }
 0x169   :  { %v782_v20 = vpop.f32.mrf.mxu0  ;;  %v1660_v21 = vpop.f32.mrf.mxu1 }
 0x16a   :  { %v1536_v16 = vpack.c.bf16 %v986_v19, %v983_v18  ;;  %v783_v28 = vadd.f32 %v2153_v0, %v782_v20  ;;  %v1023_v32 = vadd.f32 %v1660_v21, %v815_v25 }
 0x16b   :  { %v784_v22 = vpop.f32.mrf.mxu0  ;;  %v2221_v24 = vpop.f32.mrf.mxu1 }
 0x16c   :  { %1589 = vst [vmem:[%s2288_s3 + $0x60] sm:$0xff] %v1536_v16   ;;  %v991_v40 = vadd.f32 %v1652_v59, %v783_v28 }
 0x16d   :  { %v785_v29 = vpop.f32.mrf.mxu0  ;;  %v1661_v30 = vpop.f32.mrf.mxu1 }
 0x16e   :  { %v786_v33 = vadd.f32 %v2153_v0, %v785_v29  ;;  %v1026_v34 = vadd.f32 %v1661_v30, %v818_v26 }
 0x16f   :  { %v787_v36 = vpop.f32.mrf.mxu0  ;;  %v2232_v37 = vpop.f32.mrf.mxu1 }
 0x170   :  { %v994_v23 = vadd.f32 %v1653_v2, %v786_v33  ;;  %v1561_v41 = vpack.c.bf16 %v1026_v34, %v1023_v32 }
 0x171   :  { %v790_v44 = vpop.f32.mrf.mxu0  ;;  %v1664_v27 = vpop.f32.mrf.mxu1 }
 0x172   :  { %v1541_v45 = vpack.c.bf16 %v994_v23, %v991_v40  ;;  %1594 = vst [vmem:[%s2288_s3 + $0x88] sm:$0xff] %v1561_v41   ;;  %v791_v46 = vadd.f32 %v2153_v0, %v790_v44  ;;  %v1039_v57 = vadd.f32 %v1664_v27, %v831_v48 }
 0x173   :  { %v792_v38 = vpop.f32.mrf.mxu0  ;;  %v1030_v42 = vpop.f32.mrf.mxu1 }
 0x174   :  { %1590 = vst [vmem:[%s2288_s3 + $0x68] sm:$0xff] %v1541_v45   ;;  %v999_v43 = vadd.f32 %v998_v10, %v791_v46  ;;  %v1031_v62 = vadd.f32 %v1030_v42, %v823_v50 }
 0x175   :  { %v793_v52 = vpop.f32.mrf.mxu0  ;;  %v1665_v53 = vpop.f32.mrf.mxu1 }
 0x176   :  { %v794_v59 = vadd.f32 %v2153_v0, %v793_v52  ;;  %v1042_v60 = vadd.f32 %v1665_v53, %v834_v49 }
 0x177   :  { %v795_v61 = vpop.f32.mrf.mxu0  ;;  %v1033_v63 = vpop.f32.mrf.mxu1 }
 0x178   :  { %v1002_v1 = vadd.f32 %v1001_v17, %v794_v59  ;;  %v1571_v2 = vpack.c.bf16 %v1042_v60, %v1039_v57  ;;  %v1034_v3 = vadd.f32 %v1033_v63, %v826_v56 }
 0x179   :  { %v798_v31 = vpop.f32.mrf.mxu0  ;;  %v1668_v4 = vpop.f32.mrf.mxu1 }
 0x17a   :  { %v1546_v54 = vpack.c.bf16 %v1002_v1, %v999_v43  ;;  %1596 = vst [vmem:[%s2288_s3 + $0x98] sm:$0xff] %v1571_v2   ;;  %v1566_v35 = vpack.c.bf16 %v1034_v3, %v1031_v62  ;;  %v1055_v58 = vadd.f32 %v1668_v4, %v847_v39  ;;  %v799_v55 = vadd.f32 %v2153_v0, %v798_v31 }
 0x17b   :  { %v800_v5 = vpop.f32.mrf.mxu0  ;;  %v1046_v6 = vpop.f32.mrf.mxu1 }
 0x17c   :  { %1591 = vst [vmem:[%s2288_s3 + $0x70] sm:$0xff] %v1546_v54   ;;  %1595 = vst [vmem:[%s2288_s3 + $0x90] sm:$0xff] %v1566_v35   ;;  %v1472_v8 = vpack.c.bf16 %v1055_v58, %v1055_v58  ;;  %v1007_v18 = vadd.f32 %v2212_v7, %v799_v55  ;;  %v1047_v19 = vadd.f32 %v1046_v6, %v839_v11 }
 0x17d   :  { %v801_v9 = vpop.f32.mrf.mxu0  ;;  %v1669_v10 = vpop.f32.mrf.mxu1 }
 0x17e   :  { %1275 = vst [vmem:[%s2288_s3 + $0xa8] sm:$0x3] %v1472_v8  ;;  %v802_v14 = vadd.f32 %v2153_v0, %v801_v9 }
 0x17f   :  { %v803_v15 = vpop.f32.mrf.mxu0  ;;  %v1049_v17 = vpop.f32.mrf.mxu1 }
 0x180   :  { %v1010_v20 = vadd.f32 %v2218_v13, %v802_v14  ;;  %v1050_v21 = vadd.f32 %v1049_v17, %v842_v12 }
 0x181   :  { %v806_v16 = vpop.f32.mrf.mxu0 }
 0x182   :  { %v1551_v22 = vpack.c.bf16 %v1010_v20, %v1007_v18  ;;  %v1576_v47 = vpack.c.bf16 %v1050_v21, %v1047_v19  ;;  %v807_v51 = vadd.f32 %v2153_v0, %v806_v16 }
 0x183   :  { %v808_v25 = vpop.f32.mrf.mxu0 }
 0x184   :  { %1592 = vst [vmem:[%s2288_s3 + $0x78] sm:$0xff] %v1551_v22   ;;  %1597 = vst [vmem:[%s2288_s3 + $0xa0] sm:$0xff] %v1576_v47   ;;  %v1015_v13 = vadd.f32 %v2221_v24, %v807_v51 }
 0x185   :  { %v809_v26 = vpop.f32.mrf.mxu0 }
 0x186   :  { %v810_v7 = vadd.f32 %v2153_v0, %v809_v26 }
 0x187   :  { %v811_v28 = vpop.f32.mrf.mxu0 }
 0x188   :  { %v1018_v29 = vadd.f32 %v2232_v37, %v810_v7 }
 0x18a   :  { %v1556_v30 = vpack.c.bf16 %v1018_v29, %v1015_v13 }
 0x18c   :  { %1593 = vst [vmem:[%s2288_s3 + $0x80] sm:$0xff] %v1556_v30  }

// kernel: _lambda_.29
= control target key start
LH: loop header
LB: loop body
LE: loop exit
PB: predicated region body
PF: predicated region fallthrough
CT: control target
= control target key end

     0   :  { %v1859_v0 = vmov 0   ;;  %vm583_vm0 = vcmask 261120   ;;  %s2538_s1 = inlined_call_operand.vmem [shape: bf16[288,32], index: 1, kind: input, shape index: {}]   ;;  %s2539_s0 = inlined_call_operand.vmem [shape: bf16[341,288], index: 0, kind: input, shape index: {}]   ;;  %s2540_s3 = inlined_call_operand.vmem [shape: bf16[32,128], index: 3, kind: input, shape index: {}]   ;;  %s2541_s2 = inlined_call_operand.vmem [shape: f32[1,32], index: 2, kind: input, shape index: {}]   ;;  %s2542_s4 = inlined_call_operand.vmem [shape: f32[1,128], index: 4, kind: input, shape index: {}]   ;;  %s2543_s5 = inlined_call_operand.vmem [shape: f32[341,128], index: 5, kind: output, shape index: {}]  }
   0x1   :  { %650 = vmatprep.subr.bf16.mxu0 %v1859_v0  ;;  %v1752_v1 = vld [vmem:[%s2538_s1 + $0x38] sm:$0xff]   ;;  %v1753_v2 = vld [vmem:[%s2538_s1 + $0x30] sm:$0xff]   ;;  %v1754_v3 = vld [vmem:[%s2538_s1 + $0x28] sm:$0xff]  }
   0x2   :  { %651 = vmatpush1.bf16.msra.mxu0 %v1752_v1  ;;  %v1755_v4 = vld [vmem:[%s2538_s1 + $0x20] sm:$0xff]   ;;  %v1756_v5 = vld [vmem:[%s2538_s1 + $0x18] sm:$0xff]   ;;  %v1766_v6 = vld [vmem:[%s2538_s1 + $0x88] sm:$0xff]  }
   0x3   :  { %652 = vmatprep.subr.bf16.mxu0 %v1859_v0  ;;  %1655 = vmatprep.subr.bf16.mxu1 %v1766_v6  ;;  %v1768_v7 = vld [vmem:[%s2538_s1 + $0x80] sm:$0xff]   ;;  %v1757_v8 = vld [vmem:[%s2538_s1 + $0x10] sm:$0xff]   ;;  %v1758_v12 = vld [vmem:[%s2538_s1 + $0x8] sm:$0xff]  }
   0x4   :  { %1656 = vmatpush3.bf16.msra.mxu1 %v1766_v6  ;;  %v1772_v9 = vld [vmem:[%s2539_s0 + $0x4] ss:$12 sps:$4 sm:$0xff]   ;;  %v1773_v10 = vld [vmem:[%s2539_s0 + $0x8] ss:$12 sps:$4 sm:$0xff]   ;;  %v1774_v11 = vld [vmem:[%s2539_s0 + $0x20] ss:$12 sps:$4 sm:$0xff]  }
   0x5   :  { %1657 = vmatprep.subr.bf16.mxu1 %v1768_v7  ;;  %682 = vmatprep.mubr.bf16.mxu0 %v1772_v9  ;;  %v1780_v13 = vld [vmem:[%s2539_s0 + $0x38] ss:$12 sps:$4 sm:$0xff]   ;;  %v1782_v15 = vld [vmem:[%s2539_s0 + $0x50] ss:$12 sps:$4 sm:$0xff]   ;;  %v1788_v16 = vld [vmem:[%s2539_s0 + $0x68] ss:$12 sps:$4 sm:$0xff]  }
   0x6   :  { %653 = vmatpush1.bf16.msra.mxu0 %v1753_v2  ;;  %1659 = vmatprep.mubr.msk.bf16.mxu1 %vm583_vm0, %v1773_v10  ;;  %v1759_v14 = vld [vmem:[%s2538_s1] sm:$0xff]   ;;  %v1760_v17 = vld [vmem:[%s2538_s1 + $0x78] sm:$0xff]   ;;  %v1761_v18 = vld [vmem:[%s2538_s1 + $0x70] sm:$0xff]  }
   0x7   :  { %654 = vmatprep.subr.bf16.mxu0 %v1859_v0  ;;  %v1790_v19 = vld [vmem:[%s2539_s0 + $0x80] ss:$12 sps:$4 sm:$0xff]   ;;  %v1796_v20 = vld [vmem:[%s2539_s0 + $0x98] ss:$12 sps:$4 sm:$0xff]   ;;  %v1798_v23 = vld [vmem:[%s2539_s0 + $0xb0] ss:$12 sps:$4 sm:$0xff]  }
   0x8   :  { %1658 = vmatpush3.bf16.msra.mxu1 %v1768_v7  ;;  %v1762_v21 = vld [vmem:[%s2538_s1 + $0x68] sm:$0xff]   ;;  %v1763_v22 = vld [vmem:[%s2538_s1 + $0x60] sm:$0xff]   ;;  %v1764_v25 = vld [vmem:[%s2538_s1 + $0x58] sm:$0xff]  }
   0x9   :  { %v1804_v24 = vld [vmem:[%s2539_s0 + $0xc8] ss:$12 sps:$4 sm:$0xff]   ;;  %v1806_v27 = vld [vmem:[%s2539_s0 + $0xe0] ss:$12 sps:$4 sm:$0xff]   ;;  %v1812_v28 = vld [vmem:[%s2539_s0 + $0xf8] ss:$12 sps:$4 sm:$0xff]  }
   0xa   :  { %655 = vmatpush1.bf16.msra.mxu0 %v1754_v3  ;;  %v1765_v26 = vld [vmem:[%s2538_s1 + $0x50] sm:$0xff]   ;;  %v1767_v29 = vld [vmem:[%s2538_s1 + $0x48] sm:$0xff]   ;;  %v1769_v30 = vld [vmem:[%s2538_s1 + $0x40] sm:$0xff]  }
   0xb   :  { %656 = vmatprep.subr.bf16.mxu0 %v1859_v0  ;;  %1660 = vmatmul.mubr.msk.bf16.vlgmr.msra.gmra.mxu1 %vm583_vm0, %v1774_v11  ;;  %v1814_v31 = vld [vmem:[%s2539_s0 + $0x110] ss:$12 sps:$4 sm:$0xff]   ;;  %v1770_v32 = vld [vmem:[%s2539_s0] ss:$12 sps:$4 sm:$0xff]   ;;  %v1820_v33 = vld [vmem:[%s2539_s0 + $0x128] ss:$12 sps:$4 sm:$0xff]  }
   0xc   :  { %1663 = vmatprep.mubr.msk.bf16.mxu1 %vm583_vm0, %v1780_v13  ;;  %v1775_v34 = vld [vmem:[%s2539_s0 + $0x1c] ss:$12 sps:$4 sm:$0xff]   ;;  %v1822_v35 = vld [vmem:[%s2539_s0 + $0x140] ss:$12 sps:$4 sm:$0xff]   ;;  %v1777_v36 = vld [vmem:[%s2539_s0 + $0x18] ss:$12 sps:$4 sm:$0xff]  }
   0xd   :  { %v1828_v37 = vld [vmem:[%s2539_s0 + $0x158] ss:$12 sps:$4 sm:$0xff]   ;;  %v1778_v38 = vld [vmem:[%s2539_s0 + $0x34] ss:$12 sps:$4 sm:$0xff]   ;;  %v1830_v39 = vld [vmem:[%s2539_s0 + $0x170] ss:$12 sps:$4 sm:$0xff]  }
   0xe   :  { %657 = vmatpush1.bf16.msra.mxu0 %v1755_v4  ;;  %v1781_v40 = vld [vmem:[%s2539_s0 + $0x30] ss:$12 sps:$4 sm:$0xff]   ;;  %v1836_v41 = vld [vmem:[%s2539_s0 + $0x188] ss:$12 sps:$4 sm:$0xff]   ;;  %v1783_v42 = vld [vmem:[%s2539_s0 + $0x4c] ss:$12 sps:$4 sm:$0xff]  }
   0xf   :  { %658 = vmatprep.subr.bf16.mxu0 %v1859_v0  ;;  %v1838_v43 = vld [vmem:[%s2539_s0 + $0x1a0] ss:$12 sps:$4 sm:$0xff]   ;;  %v1785_v44 = vld [vmem:[%s2539_s0 + $0x48] ss:$12 sps:$4 sm:$0xff]   ;;  %v1844_v45 = vld [vmem:[%s2539_s0 + $0x1b8] ss:$12 sps:$4 sm:$0xff]  }
  0x10   :  { %v1786_v46 = vld [vmem:[%s2539_s0 + $0x64] ss:$12 sps:$4 sm:$0xff]   ;;  %v1789_v48 = vld [vmem:[%s2539_s0 + $0x60] ss:$12 sps:$4 sm:$0xff]   ;;  %v1850_v49 = vld [vmem:[%s2539_s0 + $0x1e8] ss:$12 sps:$4 sm:$0xff]  }
  0x11   :  { %v1846_v47 = vld [vmem:[%s2539_s0 + $0x1d0] ss:$12 sps:$4 sm:$0xff]   ;;  %v1851_v51 = vld [vmem:[%s2539_s0 + $0x200] ss:$0 sps:$4 sm:$0x77]   ;;  %v1857_v62 = vld [vmem:[%s2540_s3 + $0x8] sm:$0xff]  }
  0x12   :  { %659 = vmatpush1.bf16.msra.mxu0 %v1756_v5  ;;  %v1791_v50 = vld [vmem:[%s2539_s0 + $0x7c] ss:$12 sps:$4 sm:$0xff]   ;;  %v1793_v52 = vld [vmem:[%s2539_s0 + $0x78] ss:$12 sps:$4 sm:$0xff]   ;;  %v1794_v53 = vld [vmem:[%s2539_s0 + $0x94] ss:$12 sps:$4 sm:$0xff]   ;;  %1703 = vmatprep.subr.bf16.mxu1 %v1857_v62 }
  0x13   :  { %660 = vmatprep.subr.bf16.mxu0 %v1859_v0  ;;  %1664 = vmatmul.mubr.msk.bf16.gmra.mxu1 %vm583_vm0, %v1782_v15  ;;  %v1797_v54 = vld [vmem:[%s2539_s0 + $0x90] ss:$12 sps:$4 sm:$0xff]   ;;  %v1799_v55 = vld [vmem:[%s2539_s0 + $0xac] ss:$12 sps:$4 sm:$0xff]   ;;  %v1801_v56 = vld [vmem:[%s2539_s0 + $0xa8] ss:$12 sps:$4 sm:$0xff]  }
  0x14   :  { %1667 = vmatprep.mubr.msk.bf16.mxu1 %vm583_vm0, %v1788_v16  ;;  %v1802_v57 = vld [vmem:[%s2539_s0 + $0xc4] ss:$12 sps:$4 sm:$0xff]   ;;  %v1805_v58 = vld [vmem:[%s2539_s0 + $0xc0] ss:$12 sps:$4 sm:$0xff]   ;;  %v1807_v59 = vld [vmem:[%s2539_s0 + $0xdc] ss:$12 sps:$4 sm:$0xff]   ;;  %1704 = vmatpush3.bf16.msra.mxu1 %v1857_v62 }
  0x15   :  { %v1809_v60 = vld [vmem:[%s2539_s0 + $0xd8] ss:$12 sps:$4 sm:$0xff]   ;;  %v1810_v61 = vld [vmem:[%s2539_s0 + $0xf4] ss:$12 sps:$4 sm:$0xff]   ;;  %v1813_v63 = vld [vmem:[%s2539_s0 + $0xf0] ss:$12 sps:$4 sm:$0xff]  }
  0x16   :  { %661 = vmatpush1.bf16.msra.mxu0 %v1757_v8  ;;  %v1858_v1 = vld [vmem:[%s2540_s3] sm:$0xff]   ;;  %v1817_v2 = vld [vmem:[%s2539_s0 + $0x108] ss:$12 sps:$4 sm:$0xff]   ;;  %v1829_v8 = vld [vmem:[%s2539_s0 + $0x150] ss:$12 sps:$4 sm:$0xff]  }
  0x17   :  { %662 = vmatprep.subr.bf16.mxu0 %v1859_v0  ;;  %1705 = vmatprep.subr.bf16.mxu1 %v1858_v1  ;;  %v1818_v3 = vld [vmem:[%s2539_s0 + $0x124] ss:$12 sps:$4 sm:$0xff]   ;;  %v1821_v4 = vld [vmem:[%s2539_s0 + $0x120] ss:$12 sps:$4 sm:$0xff]   ;;  %v1823_v5 = vld [vmem:[%s2539_s0 + $0x13c] ss:$12 sps:$4 sm:$0xff]  }
  0x18   :  { %1706 = vmatpush3.bf16.msra.mxu1 %v1858_v1  ;;  %v1825_v6 = vld [vmem:[%s2539_s0 + $0x138] ss:$12 sps:$4 sm:$0xff]   ;;  %v1826_v7 = vld [vmem:[%s2539_s0 + $0x154] ss:$12 sps:$4 sm:$0xff]   ;;  %v1839_v13 = vld [vmem:[%s2539_s0 + $0x19c] ss:$12 sps:$4 sm:$0xff]  }
  0x19   :  { %v1831_v9 = vld [vmem:[%s2539_s0 + $0x16c] ss:$12 sps:$4 sm:$0xff]   ;;  %v1833_v10 = vld [vmem:[%s2539_s0 + $0x168] ss:$12 sps:$4 sm:$0xff]   ;;  %v1834_v11 = vld [vmem:[%s2539_s0 + $0x184] ss:$12 sps:$4 sm:$0xff]  }
  0x1a   :  { %663 = vmatpush1.bf16.msra.mxu0 %v1758_v12  ;;  %v1837_v12 = vld [vmem:[%s2539_s0 + $0x180] ss:$12 sps:$4 sm:$0xff]   ;;  %v1845_v16 = vld [vmem:[%s2539_s0 + $0x1b0] ss:$12 sps:$4 sm:$0xff]  }
  0x1b   :  { %664 = vmatprep.subr.bf16.mxu0 %v1859_v0  ;;  %1668 = vmatmul.mubr.msk.bf16.gmra.mxu1 %vm583_vm0, %v1790_v19  ;;  %v1842_v15 = vld [vmem:[%s2539_s0 + $0x1b4] ss:$12 sps:$4 sm:$0xff]   ;;  %v1852_v19 = vld [vmem:[%s2539_s0 + $0x1e4] ss:$12 sps:$4 sm:$0xff]  }
  0x1c   :  { %1671 = vmatprep.mubr.msk.bf16.mxu1 %vm583_vm0, %v1796_v20 }
  0x1e   :  { %665 = vmatpush1.bf16.msra.mxu0 %v1759_v14  ;;  %v1841_v14 = vld [vmem:[%s2539_s0 + $0x198] ss:$12 sps:$4 sm:$0xff]  }
  0x1f   :  { %666 = vmatprep.subr.bf16.mxu0 %v1859_v0 }
  0x22   :  { %667 = vmatpush2.bf16.msra.mxu0 %v1760_v17  ;;  %v1847_v17 = vld [vmem:[%s2539_s0 + $0x1cc] ss:$12 sps:$4 sm:$0xff]  }
  0x23   :  { %668 = vmatprep.subr.bf16.mxu0 %v1859_v0  ;;  %1672 = vmatmul.mubr.msk.bf16.gmra.mxu1 %vm583_vm0, %v1798_v23 }
  0x24   :  { %1675 = vmatprep.mubr.msk.bf16.mxu1 %vm583_vm0, %v1804_v24  ;;  %v1854_v24 = vld [vmem:[%s2539_s0 + $0x1e0] ss:$12 sps:$4 sm:$0xff]  }
  0x26   :  { %669 = vmatpush2.bf16.msra.mxu0 %v1761_v18  ;;  %v1849_v18 = vld [vmem:[%s2539_s0 + $0x1c8] ss:$12 sps:$4 sm:$0xff]  }
  0x27   :  { %670 = vmatprep.subr.bf16.mxu0 %v1859_v0 }
  0x2a   :  { %671 = vmatpush2.bf16.msra.mxu0 %v1762_v21 }
  0x2b   :  { %672 = vmatprep.subr.bf16.mxu0 %v1859_v0  ;;  %1676 = vmatmul.mubr.msk.bf16.gmra.mxu1 %vm583_vm0, %v1806_v27 }
  0x2c   :  { %1679 = vmatprep.mubr.msk.bf16.mxu1 %vm583_vm0, %v1812_v28 }
  0x2e   :  { %673 = vmatpush2.bf16.msra.mxu0 %v1763_v22  ;;  %v105_v22 = vld [vmem:[%s2539_s0 + $0x1f8] sm:$0x77] }
  0x2f   :  { %674 = vmatprep.subr.bf16.mxu0 %v1859_v0 }
  0x32   :  { %675 = vmatpush2.bf16.msra.mxu0 %v1764_v25  ;;  %v1540_v25 = vcombine.high %v105_v22, %v105_v22 }
  0x33   :  { %676 = vmatprep.subr.bf16.mxu0 %v1859_v0  ;;  %1680 = vmatmul.mubr.msk.bf16.gmra.mxu1 %vm583_vm0, %v1814_v31 }
  0x34   :  { %1683 = vmatprep.mubr.msk.bf16.mxu1 %vm583_vm0, %v1820_v33 }
  0x36   :  { %677 = vmatpush2.bf16.msra.mxu0 %v1765_v26 }
  0x37   :  { %678 = vmatprep.subr.bf16.mxu0 %v1859_v0 }
  0x3a   :  { %679 = vmatpush2.bf16.msra.mxu0 %v1767_v29 }
  0x3b   :  { %680 = vmatprep.subr.bf16.mxu0 %v1859_v0  ;;  %1684 = vmatmul.mubr.msk.bf16.gmra.mxu1 %vm583_vm0, %v1822_v35  ;;  %v1815_v0 = vld [vmem:[%s2539_s0 + $0x10c] ss:$12 sps:$4 sm:$0xff]  }
  0x3c   :  { %1687 = vmatprep.mubr.msk.bf16.mxu1 %vm583_vm0, %v1828_v37 }
  0x3e   :  { %681 = vmatpush2.bf16.msra.mxu0 %v1769_v30  ;;  %v1539_v30 = vcombine.low %v105_v22, %v105_v22 }
  0x41   :  { %683 = vmatmul.mubr.bf16.vlgmr.msra.gmra.mxu0 %v1770_v32 }
  0x42   :  { %690 = vmatprep.mubr.bf16.mxu0 %v1775_v34 }
  0x43   :  { %1688 = vmatmul.mubr.msk.bf16.gmra.mxu1 %vm583_vm0, %v1830_v39 }
  0x44   :  { %1691 = vmatprep.mubr.msk.bf16.mxu1 %vm583_vm0, %v1836_v41 }
  0x49   :  { %691 = vmatmul.mubr.bf16.gmra.mxu0 %v1777_v36 }
  0x4a   :  { %698 = vmatprep.mubr.bf16.mxu0 %v1778_v38 }
  0x4b   :  { %1692 = vmatmul.mubr.msk.bf16.gmra.mxu1 %vm583_vm0, %v1838_v43 }
  0x4c   :  { %1695 = vmatprep.mubr.msk.bf16.mxu1 %vm583_vm0, %v1844_v45 }
  0x51   :  { %699 = vmatmul.mubr.bf16.gmra.mxu0 %v1781_v40 }
  0x52   :  { %706 = vmatprep.mubr.bf16.mxu0 %v1783_v42 }
  0x53   :  { %1696 = vmatmul.mubr.msk.bf16.gmra.mxu1 %vm583_vm0, %v1846_v47 }
  0x54   :  { %1699 = vmatprep.mubr.msk.bf16.mxu1 %vm583_vm0, %v1850_v49 }
  0x59   :  { %707 = vmatmul.mubr.bf16.gmra.mxu0 %v1785_v44  ;;  %v2214_v44 = vld [vmem:[%s2541_s2] ss:$0 sm:$0xff] }
  0x5a   :  { %714 = vmatprep.mubr.bf16.mxu0 %v1786_v46 }
  0x5b   :  { %1700 = vmatmul.mubr.msk.bf16.gmra.mxu1 %vm583_vm0, %v1851_v51 }
  0x61   :  { %715 = vmatmul.mubr.bf16.gmra.mxu0 %v1789_v48 }
  0x62   :  { %722 = vmatprep.mubr.bf16.mxu0 %v1791_v50 }
  0x69   :  { %723 = vmatmul.mubr.bf16.gmra.mxu0 %v1793_v52 }
  0x6a   :  { %730 = vmatprep.mubr.bf16.mxu0 %v1794_v53 }
  0x71   :  { %731 = vmatmul.mubr.bf16.gmra.mxu0 %v1797_v54 }
  0x72   :  { %738 = vmatprep.mubr.bf16.mxu0 %v1799_v55 }
  0x79   :  { %739 = vmatmul.mubr.bf16.gmra.mxu0 %v1801_v56 }
  0x7a   :  { %746 = vmatprep.mubr.bf16.mxu0 %v1802_v57 }
  0x81   :  { %747 = vmatmul.mubr.bf16.gmra.mxu0 %v1805_v58 }
  0x82   :  { %754 = vmatprep.mubr.bf16.mxu0 %v1807_v59 }
  0x89   :  { %755 = vmatmul.mubr.bf16.gmra.mxu0 %v1809_v60 }
  0x8a   :  { %762 = vmatprep.mubr.bf16.mxu0 %v1810_v61 }
  0x91   :  { %763 = vmatmul.mubr.bf16.gmra.mxu0 %v1813_v63 }
  0x92   :  { %770 = vmatprep.mubr.bf16.mxu0 %v1815_v0 }
  0x99   :  { %771 = vmatmul.mubr.bf16.gmra.mxu0 %v1817_v2 }
  0x9a   :  { %778 = vmatprep.mubr.bf16.mxu0 %v1818_v3 }
  0xa1   :  { %779 = vmatmul.mubr.bf16.gmra.mxu0 %v1821_v4 }
  0xa2   :  { %786 = vmatprep.mubr.bf16.mxu0 %v1823_v5 }
  0xa9   :  { %787 = vmatmul.mubr.bf16.gmra.mxu0 %v1825_v6 }
  0xaa   :  { %794 = vmatprep.mubr.bf16.mxu0 %v1826_v7 }
  0xb1   :  { %795 = vmatmul.mubr.bf16.gmra.mxu0 %v1829_v8 }
  0xb2   :  { %802 = vmatprep.mubr.bf16.mxu0 %v1831_v9 }
  0xb9   :  { %803 = vmatmul.mubr.bf16.gmra.mxu0 %v1833_v10 }
  0xba   :  { %810 = vmatprep.mubr.bf16.mxu0 %v1834_v11 }
  0xc1   :  { %811 = vmatmul.mubr.bf16.gmra.mxu0 %v1837_v12 }
  0xc2   :  { %818 = vmatprep.mubr.bf16.mxu0 %v1839_v13 }
  0xc9   :  { %819 = vmatmul.mubr.bf16.gmra.mxu0 %v1841_v14 }
  0xca   :  { %826 = vmatprep.mubr.bf16.mxu0 %v1842_v15 }
  0xcb   :  { %v1661_v20 = vpop.f32.mrf.mxu1 }
  0xcd   :  { %v892_v21 = vpop.f32.mrf.mxu1 }
  0xcf   :  { %v1662_v23 = vpop.f32.mrf.mxu1 }
  0xd1   :  { %827 = vmatmul.mubr.bf16.gmra.mxu0 %v1845_v16  ;;  %v895_v26 = vpop.f32.mrf.mxu1 }
  0xd2   :  { %834 = vmatprep.mubr.bf16.mxu0 %v1847_v17 }
  0xd3   :  { %v2183_v27 = vpop.f32.mrf.mxu1 }
  0xd5   :  { %v908_v28 = vpop.f32.mrf.mxu1 }
  0xd7   :  { %v2185_v29 = vpop.f32.mrf.mxu1 }
  0xd9   :  { %835 = vmatmul.mubr.bf16.gmra.mxu0 %v1849_v18  ;;  %v911_v31 = vpop.f32.mrf.mxu1 }
  0xda   :  { %842 = vmatprep.mubr.bf16.mxu0 %v1852_v19 }
  0xdb   :  { %v2187_v32 = vpop.f32.mrf.mxu1 }
  0xdd   :  { %v2189_v33 = vpop.f32.mrf.mxu1 }
  0xdf   :  { %v2191_v34 = vpop.f32.mrf.mxu1 }
  0xe1   :  { %843 = vmatmul.mubr.bf16.gmra.mxu0 %v1854_v24  ;;  %v2193_v35 = vpop.f32.mrf.mxu1 }
  0xe2   :  { %850 = vmatprep.mubr.bf16.mxu0 %v1540_v25 }
  0xe3   :  { %v2195_v36 = vpop.f32.mrf.mxu1 }
  0xe5   :  { %v2197_v37 = vpop.f32.mrf.mxu1 }
  0xe7   :  { %v2199_v38 = vpop.f32.mrf.mxu1 }
  0xe9   :  { %851 = vmatmul.mubr.bf16.gmra.mxu0 %v1539_v30  ;;  %v2201_v39 = vpop.f32.mrf.mxu1 }
  0xeb   :  { %v2203_v40 = vpop.f32.mrf.mxu1 }
  0xed   :  { %v2205_v41 = vpop.f32.mrf.mxu1 }
  0xef   :  { %v2207_v42 = vpop.f32.mrf.mxu1 }
  0xf1   :  { %v2209_v43 = vpop.f32.mrf.mxu1 }
  0xf3   :  { %v2216_v45 = vpop.f32.mrf.mxu1 }
  0xf5   :  { %v2219_v48 = vpop.f32.mrf.mxu1 }
  0xf7   :  { %v2221_v50 = vpop.f32.mrf.mxu1 }
  0xf9   :  { %v2224_v54 = vpop.f32.mrf.mxu1 }
  0xfb   :  { %v2226_v57 = vpop.f32.mrf.mxu1 }
  0xfd   :  { %v2229_v62 = vpop.f32.mrf.mxu1 }
  0xff   :  { %v2231_v1 = vpop.f32.mrf.mxu1 }
 0x101   :  { %v684_v46 = vpop.f32.mrf.mxu0  ;;  %v2235_v5 = vpop.f32.mrf.mxu1 }
 0x102   :  { %v685_v47 = vadd.f32 %v2214_v44, %v684_v46 }
 0x103   :  { %v686_v49 = vpop.f32.mrf.mxu0  ;;  %v2237_v8 = vpop.f32.mrf.mxu1 }
 0x104   :  { %v893_v52 = vadd.f32 %v892_v21, %v685_v47 }
 0x105   :  { %v687_v51 = vpop.f32.mrf.mxu0  ;;  %v2240_v13 = vpop.f32.mrf.mxu1 }
 0x106   :  { %v688_v53 = vadd.f32 %v2214_v44, %v687_v51  ;;  %v1066_v59 = vmax.f32 %v893_v52, 0.0 }
 0x107   :  { %v689_v55 = vpop.f32.mrf.mxu0  ;;  %v2242_v16 = vpop.f32.mrf.mxu1 }
 0x108   :  { %v896_v56 = vadd.f32 %v895_v26, %v688_v53 }
 0x109   :  { %v692_v58 = vpop.f32.mrf.mxu0 }
 0x10a   :  { %v1067_v60 = vmax.f32 %v896_v56, 0.0  ;;  %v693_v61 = vadd.f32 %v2214_v44, %v692_v58 }
 0x10b   :  { %v694_v63 = vpop.f32.mrf.mxu0 }
 0x10c   :  { %v1109_v0 = vpack.c.bf16 %v1067_v60, %v1066_v59  ;;  %v901_v3 = vadd.f32 %v1661_v20, %v693_v61  ;;  %v2246_v20 = vpop.f32.mrf.mxu1 }
 0x10d   :  { %v695_v2 = vpop.f32.mrf.mxu0 }
 0x10e   :  { %v696_v4 = vadd.f32 %v2214_v44, %v695_v2  ;;  %1707 = vmatprep.mubr.msk.bf16.mxu1 %vm583_vm0, %v1109_v0  ;;  %v1068_v10 = vmax.f32 %v901_v3, 0.0 }
 0x10f   :  { %v697_v6 = vpop.f32.mrf.mxu0 }
 0x110   :  { %v904_v7 = vadd.f32 %v1662_v23, %v696_v4  ;;  %v2248_v23 = vpop.f32.mrf.mxu1 }
 0x111   :  { %v700_v9 = vpop.f32.mrf.mxu0 }
 0x112   :  { %v1069_v11 = vmax.f32 %v904_v7, 0.0  ;;  %v701_v12 = vadd.f32 %v2214_v44, %v700_v9  ;;  %v2251_v46 = vpop.f32.mrf.mxu1 }
 0x113   :  { %v702_v14 = vpop.f32.mrf.mxu0 }
 0x114   :  { %v1110_v15 = vpack.c.bf16 %v1069_v11, %v1068_v10  ;;  %v909_v18 = vadd.f32 %v908_v28, %v701_v12  ;;  %v2253_v28 = vpop.f32.mrf.mxu1 }
 0x115   :  { %v703_v17 = vpop.f32.mrf.mxu0 }
 0x116   :  { %v704_v19 = vadd.f32 %v2214_v44, %v703_v17  ;;  %1708 = vmatmul.mubr.msk.bf16.vlgmr.msra.gmra.mxu1 %vm583_vm0, %v1110_v15  ;;  %v1070_v25 = vmax.f32 %v909_v18, 0.0 }
 0x117   :  { %v705_v21 = vpop.f32.mrf.mxu0 }
 0x118   :  { %v912_v22 = vadd.f32 %v911_v31, %v704_v19  ;;  %v2258_v31 = vpop.f32.mrf.mxu1 }
 0x119   :  { %v708_v24 = vpop.f32.mrf.mxu0 }
 0x11a   :  { %v1071_v26 = vmax.f32 %v912_v22, 0.0  ;;  %v709_v30 = vadd.f32 %v2214_v44, %v708_v24  ;;  %v2261_v58 = vpop.f32.mrf.mxu1 }
 0x11b   :  { %v710_v47 = vpop.f32.mrf.mxu0 }
 0x11c   :  { %v1111_v49 = vpack.c.bf16 %v1071_v26, %v1070_v25  ;;  %v917_v52 = vadd.f32 %v2183_v27, %v709_v30  ;;  %v2264_v0 = vpop.f32.mrf.mxu1 }
 0x11d   :  { %v711_v51 = vpop.f32.mrf.mxu0 }
 0x11e   :  { %v712_v53 = vadd.f32 %v2214_v44, %v711_v51  ;;  %1711 = vmatprep.mubr.msk.bf16.mxu1 %vm583_vm0, %v1111_v49  ;;  %v1072_v60 = vmax.f32 %v917_v52, 0.0  ;;  %v2266_v3 = vpop.f32.mrf.mxu1 }
 0x11f   :  { %v713_v55 = vpop.f32.mrf.mxu0 }
 0x120   :  { %v920_v56 = vadd.f32 %v2185_v29, %v712_v53  ;;  %v2271_v29 = vpop.f32.mrf.mxu1 }
 0x121   :  { %v716_v59 = vpop.f32.mrf.mxu0 }
 0x122   :  { %v1073_v61 = vmax.f32 %v920_v56, 0.0  ;;  %v717_v63 = vadd.f32 %v2214_v44, %v716_v59  ;;  %v2274_v11 = vpop.f32.mrf.mxu1 }
 0x123   :  { %v718_v2 = vpop.f32.mrf.mxu0 }
 0x124   :  { %v1112_v27 = vpack.c.bf16 %v1073_v61, %v1072_v60  ;;  %v925_v6 = vadd.f32 %v2189_v33, %v717_v63  ;;  %v2277_v18 = vpop.f32.mrf.mxu1 }
 0x125   :  { %v719_v4 = vpop.f32.mrf.mxu0 }
 0x126   :  { %v720_v7 = vadd.f32 %v2214_v44, %v719_v4  ;;  %1712 = vmatmul.mubr.msk.bf16.gmra.mxu1 %vm583_vm0, %v1112_v27  ;;  %v1074_v14 = vmax.f32 %v925_v6, 0.0  ;;  %v1702_v21 = vpop.f32.mrf.mxu1 }
 0x127   :  { %v721_v9 = vpop.f32.mrf.mxu0 }
 0x128   :  { %v928_v10 = vadd.f32 %v2193_v35, %v720_v7 }
 0x129   :  { %v724_v12 = vpop.f32.mrf.mxu0 }
 0x12a   :  { %v1075_v15 = vmax.f32 %v928_v10, 0.0  ;;  %v725_v17 = vadd.f32 %v2214_v44, %v724_v12 }
 0x12b   :  { %v726_v19 = vpop.f32.mrf.mxu0 }
 0x12c   :  { %v1113_v33 = vpack.c.bf16 %v1075_v15, %v1074_v14  ;;  %v933_v24 = vadd.f32 %v2187_v32, %v725_v17 }
 0x12d   :  { %v727_v22 = vpop.f32.mrf.mxu0 }
 0x12e   :  { %v728_v25 = vadd.f32 %v2214_v44, %v727_v22  ;;  %1715 = vmatprep.mubr.msk.bf16.mxu1 %vm583_vm0, %v1113_v33  ;;  %v1076_v47 = vmax.f32 %v933_v24, 0.0 }
 0x12f   :  { %v729_v35 = vpop.f32.mrf.mxu0 }
 0x130   :  { %v936_v26 = vadd.f32 %v2191_v34, %v728_v25 }
 0x131   :  { %v732_v30 = vpop.f32.mrf.mxu0 }
 0x132   :  { %v1077_v49 = vmax.f32 %v936_v26, 0.0  ;;  %v733_v51 = vadd.f32 %v2214_v44, %v732_v30 }
 0x133   :  { %v734_v52 = vpop.f32.mrf.mxu0 }
 0x134   :  { %v1114_v53 = vpack.c.bf16 %v1077_v49, %v1076_v47  ;;  %v941_v56 = vadd.f32 %v2197_v37, %v733_v51 }
 0x135   :  { %v735_v55 = vpop.f32.mrf.mxu0 }
 0x136   :  { %v736_v59 = vadd.f32 %v2214_v44, %v735_v55  ;;  %1716 = vmatmul.mubr.msk.bf16.gmra.mxu1 %vm583_vm0, %v1114_v53  ;;  %v1078_v63 = vmax.f32 %v941_v56, 0.0 }
 0x137   :  { %v737_v32 = vpop.f32.mrf.mxu0 }
 0x138   :  { %v944_v60 = vadd.f32 %v2201_v39, %v736_v59 }
 0x139   :  { %v740_v61 = vpop.f32.mrf.mxu0 }
 0x13a   :  { %v1079_v34 = vmax.f32 %v944_v60, 0.0  ;;  %v741_v2 = vadd.f32 %v2214_v44, %v740_v61 }
 0x13b   :  { %v742_v27 = vpop.f32.mrf.mxu0 }
 0x13c   :  { %v1115_v4 = vpack.c.bf16 %v1079_v34, %v1078_v63  ;;  %v949_v7 = vadd.f32 %v2195_v36, %v741_v2 }
 0x13d   :  { %v743_v6 = vpop.f32.mrf.mxu0 }
 0x13e   :  { %v744_v9 = vadd.f32 %v2214_v44, %v743_v6  ;;  %1719 = vmatprep.mubr.msk.bf16.mxu1 %vm583_vm0, %v1115_v4  ;;  %v1080_v14 = vmax.f32 %v949_v7, 0.0 }
 0x13f   :  { %v745_v37 = vpop.f32.mrf.mxu0 }
 0x140   :  { %v952_v10 = vadd.f32 %v2199_v38, %v744_v9 }
 0x141   :  { %v748_v12 = vpop.f32.mrf.mxu0 }
 0x142   :  { %v1081_v39 = vmax.f32 %v952_v10, 0.0  ;;  %v749_v15 = vadd.f32 %v2214_v44, %v748_v12 }
 0x143   :  { %v750_v17 = vpop.f32.mrf.mxu0 }
 0x144   :  { %v1116_v19 = vpack.c.bf16 %v1081_v39, %v1080_v14  ;;  %v957_v21 = vadd.f32 %v2205_v41, %v749_v15 }
 0x145   :  { %v751_v33 = vpop.f32.mrf.mxu0 }
 0x146   :  { %v752_v22 = vadd.f32 %v2214_v44, %v751_v33  ;;  %1720 = vmatmul.mubr.msk.bf16.gmra.mxu1 %vm583_vm0, %v1116_v19  ;;  %v1082_v35 = vmax.f32 %v957_v21, 0.0 }
 0x147   :  { %v753_v36 = vpop.f32.mrf.mxu0 }
 0x148   :  { %v960_v24 = vadd.f32 %v2209_v43, %v752_v22 }
 0x149   :  { %v756_v25 = vpop.f32.mrf.mxu0 }
 0x14a   :  { %v1083_v38 = vmax.f32 %v960_v24, 0.0  ;;  %v757_v26 = vadd.f32 %v2214_v44, %v756_v25 }
 0x14b   :  { %v758_v30 = vpop.f32.mrf.mxu0 }
 0x14c   :  { %v1117_v47 = vpack.c.bf16 %v1083_v38, %v1082_v35  ;;  %v965_v51 = vadd.f32 %v2203_v40, %v757_v26 }
 0x14d   :  { %v759_v49 = vpop.f32.mrf.mxu0 }
 0x14e   :  { %v760_v52 = vadd.f32 %v2214_v44, %v759_v49  ;;  %1723 = vmatprep.mubr.msk.bf16.mxu1 %vm583_vm0, %v1117_v47  ;;  %v1084_v56 = vmax.f32 %v965_v51, 0.0 }
 0x14f   :  { %v761_v41 = vpop.f32.mrf.mxu0 }
 0x150   :  { %v968_v53 = vadd.f32 %v2207_v42, %v760_v52 }
 0x151   :  { %v764_v55 = vpop.f32.mrf.mxu0 }
 0x152   :  { %v1085_v43 = vmax.f32 %v968_v53, 0.0  ;;  %v765_v59 = vadd.f32 %v2214_v44, %v764_v55 }
 0x153   :  { %v766_v32 = vpop.f32.mrf.mxu0 }
 0x154   :  { %v1118_v60 = vpack.c.bf16 %v1085_v43, %v1084_v56  ;;  %v973_v63 = vadd.f32 %v2219_v48, %v765_v59 }
 0x155   :  { %v767_v61 = vpop.f32.mrf.mxu0 }
 0x156   :  { %v768_v34 = vadd.f32 %v2214_v44, %v767_v61  ;;  %1724 = vmatmul.mubr.msk.bf16.gmra.mxu1 %vm583_vm0, %v1118_v60  ;;  %v1086_v4 = vmax.f32 %v973_v63, 0.0 }
 0x157   :  { %v769_v40 = vpop.f32.mrf.mxu0 }
 0x158   :  { %v976_v2 = vadd.f32 %v2224_v54, %v768_v34 }
 0x159   :  { %v772_v27 = vpop.f32.mrf.mxu0 }
 0x15a   :  { %v1087_v42 = vmax.f32 %v976_v2, 0.0  ;;  %v773_v6 = vadd.f32 %v2214_v44, %v772_v27 }
 0x15b   :  { %v774_v7 = vpop.f32.mrf.mxu0 }
 0x15c   :  { %v1119_v9 = vpack.c.bf16 %v1087_v42, %v1086_v4  ;;  %v981_v10 = vadd.f32 %v2216_v45, %v773_v6 }
 0x15d   :  { %v775_v37 = vpop.f32.mrf.mxu0 }
 0x15e   :  { %v776_v12 = vadd.f32 %v2214_v44, %v775_v37  ;;  %1727 = vmatprep.mubr.msk.bf16.mxu1 %vm583_vm0, %v1119_v9  ;;  %v1088_v15 = vmax.f32 %v981_v10, 0.0 }
 0x15f   :  { %v777_v48 = vpop.f32.mrf.mxu0 }
 0x160   :  { %v984_v14 = vadd.f32 %v2221_v50, %v776_v12 }
 0x161   :  { %v780_v39 = vpop.f32.mrf.mxu0 }
 0x162   :  { %v1089_v54 = vmax.f32 %v984_v14, 0.0  ;;  %v781_v17 = vadd.f32 %v2214_v44, %v780_v39 }
 0x163   :  { %v782_v19 = vpop.f32.mrf.mxu0 }
 0x164   :  { %v1120_v33 = vpack.c.bf16 %v1089_v54, %v1088_v15  ;;  %v989_v22 = vadd.f32 %v2229_v62, %v781_v17 }
 0x165   :  { %v783_v21 = vpop.f32.mrf.mxu0 }
 0x166   :  { %v784_v36 = vadd.f32 %v2214_v44, %v783_v21  ;;  %1728 = vmatmul.mubr.msk.bf16.gmra.mxu1 %vm583_vm0, %v1120_v33  ;;  %v1090_v35 = vmax.f32 %v989_v22, 0.0 }
 0x167   :  { %v785_v45 = vpop.f32.mrf.mxu0 }
 0x168   :  { %v992_v24 = vadd.f32 %v2235_v5, %v784_v36 }
 0x169   :  { %v788_v25 = vpop.f32.mrf.mxu0 }
 0x16a   :  { %v1091_v50 = vmax.f32 %v992_v24, 0.0  ;;  %v789_v38 = vadd.f32 %v2214_v44, %v788_v25 }
 0x16b   :  { %v790_v26 = vpop.f32.mrf.mxu0 }
 0x16c   :  { %v1121_v30 = vpack.c.bf16 %v1091_v50, %v1090_v35  ;;  %v997_v49 = vadd.f32 %v2226_v57, %v789_v38 }
 0x16d   :  { %v791_v47 = vpop.f32.mrf.mxu0 }
 0x16e   :  { %v792_v51 = vadd.f32 %v2214_v44, %v791_v47  ;;  %1731 = vmatprep.mubr.msk.bf16.mxu1 %vm583_vm0, %v1121_v30  ;;  %v1092_v53 = vmax.f32 %v997_v49, 0.0 }
 0x16f   :  { %v793_v62 = vpop.f32.mrf.mxu0 }
 0x170   :  { %v1000_v52 = vadd.f32 %v2231_v1, %v792_v51 }
 0x171   :  { %v796_v41 = vpop.f32.mrf.mxu0 }
 0x172   :  { %v1093_v5 = vmax.f32 %v1000_v52, 0.0  ;;  %v797_v55 = vadd.f32 %v2214_v44, %v796_v41 }
 0x173   :  { %v798_v56 = vpop.f32.mrf.mxu0 }
 0x174   :  { %v1122_v43 = vpack.c.bf16 %v1093_v5, %v1092_v53  ;;  %v1005_v32 = vadd.f32 %v2240_v13, %v797_v55 }
 0x175   :  { %v799_v59 = vpop.f32.mrf.mxu0 }
 0x176   :  { %v800_v60 = vadd.f32 %v2214_v44, %v799_v59  ;;  %1732 = vmatmul.mubr.msk.bf16.gmra.mxu1 %vm583_vm0, %v1122_v43  ;;  %v1094_v34 = vmax.f32 %v1005_v32, 0.0 }
 0x177   :  { %v801_v57 = vpop.f32.mrf.mxu0 }
 0x178   :  { %v1008_v61 = vadd.f32 %v2246_v20, %v800_v60 }
 0x179   :  { %v804_v63 = vpop.f32.mrf.mxu0 }
 0x17a   :  { %v1095_v1 = vmax.f32 %v1008_v61, 0.0  ;;  %v805_v40 = vadd.f32 %v2214_v44, %v804_v63 }
 0x17b   :  { %v806_v2 = vpop.f32.mrf.mxu0 }
 0x17c   :  { %v1123_v27 = vpack.c.bf16 %v1095_v1, %v1094_v34  ;;  %v1013_v42 = vadd.f32 %v2237_v8, %v805_v40 }
 0x17d   :  { %v807_v4 = vpop.f32.mrf.mxu0 }
 0x17e   :  { %v808_v6 = vadd.f32 %v2214_v44, %v807_v4  ;;  %1735 = vmatprep.mubr.msk.bf16.mxu1 %vm583_vm0, %v1123_v27  ;;  %v1096_v37 = vmax.f32 %v1013_v42, 0.0 }
 0x17f   :  { %v809_v13 = vpop.f32.mrf.mxu0 }
 0x180   :  { %v1016_v7 = vadd.f32 %v2242_v16, %v808_v6 }
 0x181   :  { %v812_v9 = vpop.f32.mrf.mxu0 }
 0x182   :  { %v1097_v20 = vmax.f32 %v1016_v7, 0.0  ;;  %v813_v10 = vadd.f32 %v2214_v44, %v812_v9 }
 0x183   :  { %v814_v12 = vpop.f32.mrf.mxu0 }
 0x184   :  { %v1124_v48 = vpack.c.bf16 %v1097_v20, %v1096_v37  ;;  %v1021_v39 = vadd.f32 %v2251_v46, %v813_v10 }
 0x185   :  { %v815_v14 = vpop.f32.mrf.mxu0 }
 0x186   :  { %v816_v15 = vadd.f32 %v2214_v44, %v815_v14  ;;  %1736 = vmatmul.mubr.msk.bf16.gmra.mxu1 %vm583_vm0, %v1124_v48  ;;  %v1098_v19 = vmax.f32 %v1021_v39, 0.0  ;;  %v2364_v48 = vld [vmem:[%s2542_s4] ss:$0 sm:$0xff] }
 0x187   :  { %v817_v8 = vpop.f32.mrf.mxu0 }
 0x188   :  { %v1024_v54 = vadd.f32 %v2258_v31, %v816_v15 }
 0x189   :  { %v820_v17 = vpop.f32.mrf.mxu0 }
 0x18a   :  { %v1099_v16 = vmax.f32 %v1024_v54, 0.0  ;;  %v821_v33 = vadd.f32 %v2214_v44, %v820_v17 }
 0x18b   :  { %v822_v21 = vpop.f32.mrf.mxu0 }
 0x18c   :  { %v1125_v22 = vpack.c.bf16 %v1099_v16, %v1098_v19  ;;  %v1029_v45 = vadd.f32 %v2248_v23, %v821_v33 }
 0x18d   :  { %v823_v36 = vpop.f32.mrf.mxu0 }
 0x18e   :  { %v824_v24 = vadd.f32 %v2214_v44, %v823_v36  ;;  %1739 = vmatprep.mubr.msk.bf16.mxu1 %vm583_vm0, %v1125_v22  ;;  %v1100_v50 = vmax.f32 %v1029_v45, 0.0 }
 0x18f   :  { %v825_v46 = vpop.f32.mrf.mxu0 }
 0x190   :  { %v1032_v25 = vadd.f32 %v2253_v28, %v824_v24 }
 0x191   :  { %v828_v35 = vpop.f32.mrf.mxu0 }
 0x192   :  { %v1101_v31 = vmax.f32 %v1032_v25, 0.0  ;;  %v829_v38 = vadd.f32 %v2214_v44, %v828_v35 }
 0x193   :  { %v830_v26 = vpop.f32.mrf.mxu0 }
 0x194   :  { %v1126_v30 = vpack.c.bf16 %v1101_v31, %v1100_v50  ;;  %v1037_v49 = vadd.f32 %v2264_v0, %v829_v38 }
 0x195   :  { %v831_v47 = vpop.f32.mrf.mxu0 }
 0x196   :  { %v832_v51 = vadd.f32 %v2214_v44, %v831_v47  ;;  %1740 = vmatmul.mubr.msk.bf16.gmra.mxu1 %vm583_vm0, %v1126_v30  ;;  %v1102_v41 = vmax.f32 %v1037_v49, 0.0 }
 0x197   :  { %v833_v23 = vpop.f32.mrf.mxu0 }
 0x198   :  { %v1040_v62 = vadd.f32 %v2271_v29, %v832_v51 }
 0x199   :  { %v836_v52 = vpop.f32.mrf.mxu0 }
 0x19a   :  { %v1103_v28 = vmax.f32 %v1040_v62, 0.0  ;;  %v837_v53 = vadd.f32 %v2214_v44, %v836_v52 }
 0x19b   :  { %v838_v5 = vpop.f32.mrf.mxu0 }
 0x19c   :  { %v1127_v55 = vpack.c.bf16 %v1103_v28, %v1102_v41  ;;  %v1045_v43 = vadd.f32 %v2261_v58, %v837_v53  ;;  %v1055_v58 = vpop.f32.mrf.mxu1 }
 0x19d   :  { %v839_v56 = vpop.f32.mrf.mxu0 }
 0x19e   :  { %v840_v59 = vadd.f32 %v2214_v44, %v839_v56  ;;  %1743 = vmatprep.mubr.msk.bf16.mxu1 %vm583_vm0, %v1127_v55  ;;  %v1104_v57 = vmax.f32 %v1045_v43, 0.0 }
 0x19f   :  { %v841_v0 = vpop.f32.mrf.mxu0 }
 0x1a0   :  { %v1048_v32 = vadd.f32 %v2266_v3, %v840_v59 }
 0x1a1   :  { %v844_v60 = vpop.f32.mrf.mxu0 }
 0x1a2   :  { %v1105_v29 = vmax.f32 %v1048_v32, 0.0  ;;  %v845_v61 = vadd.f32 %v2214_v44, %v844_v60 }
 0x1a3   :  { %v846_v63 = vpop.f32.mrf.mxu0 }
 0x1a4   :  { %v1128_v34 = vpack.c.bf16 %v1105_v29, %v1104_v57  ;;  %v1053_v40 = vadd.f32 %v2277_v18, %v845_v61 }
 0x1a5   :  { %v847_v1 = vpop.f32.mrf.mxu0 }
 0x1a6   :  { %v848_v2 = vadd.f32 %v2214_v44, %v847_v1  ;;  %1744 = vmatmul.mubr.msk.bf16.gmra.mxu1 %vm583_vm0, %v1128_v34  ;;  %v1106_v6 = vmax.f32 %v1053_v40, 0.0 }
 0x1a7   :  { %v849_v27 = vpop.f32.mrf.mxu0 }
 0x1a8   :  { %v1056_v4 = vadd.f32 %v1055_v58, %v848_v2 }
 0x1a9   :  { %v852_v42 = vpop.f32.mrf.mxu0 }
 0x1aa   :  { %v1107_v3 = vmax.f32 %v1056_v4, 0.0  ;;  %v853_v13 = vadd.f32 %v2214_v44, %v852_v42 }
 0x1ab   :  { %v854_v7 = vpop.f32.mrf.mxu0 }
 0x1ac   :  { %v1129_v9 = vpack.c.bf16 %v1107_v3, %v1106_v6  ;;  %v1061_v37 = vadd.f32 %v2274_v11, %v853_v13 }
 0x1ad   :  { %v855_v20 = vpop.f32.mrf.mxu0 }
 0x1ae   :  { %v1108_v10 = vmax.f32 %v1061_v37, 0.0  ;;  %1747 = vmatprep.mubr.msk.bf16.mxu1 %vm583_vm0, %v1129_v9 }
 0x1af   :  { %v856_v18 = vpop.f32.mrf.mxu0 }
 0x1b0   :  { %v1130_v12 = vpack.c.bf16 %v1108_v10, %v1108_v10 }
 0x1b2   :  { %1748 = vmatmul.mubr.msk.bf16.gmra.mxu1 %vm583_vm0, %v1130_v12 }
 0x1d6   :  { %v1709_v14 = vpop.f32.mrf.mxu1 }
 0x1d7   :  { %v1263_v44 = vadd.f32 %v1709_v14, %v2364_v48 }
 0x1d8   :  { %v1254_v39 = vpop.f32.mrf.mxu1 }
 0x1d9   :  { %1430 = vst [vmem:[%s2543_s5 + $0x10] sm:$0xff] %v1263_v44  ;;  %v1255_v11 = vadd.f32 %v2364_v48, %v1254_v39 }
 0x1da   :  { %v1710_v15 = vpop.f32.mrf.mxu1 }
 0x1db   :  { %1428 = vst [vmem:[%s2543_s5] sm:$0xff] %v1255_v11  ;;  %v1266_v8 = vadd.f32 %v1710_v15, %v2364_v48 }
 0x1dc   :  { %v1257_v54 = vpop.f32.mrf.mxu1 }
 0x1dd   :  { %1431 = vst [vmem:[%s2543_s5 + $0x18] sm:$0xff] %v1266_v8  ;;  %v1258_v17 = vadd.f32 %v2364_v48, %v1257_v54 }
 0x1df   :  { %1429 = vst [vmem:[%s2543_s5 + $0x8] sm:$0xff] %v1258_v17 }
 0x1e6   :  { %v1713_v19 = vpop.f32.mrf.mxu1 }
 0x1e7   :  { %v1279_v16 = vadd.f32 %v1713_v19, %v2364_v48 }
 0x1e8   :  { %v1270_v33 = vpop.f32.mrf.mxu1 }
 0x1e9   :  { %1434 = vst [vmem:[%s2543_s5 + $0x30] sm:$0xff] %v1279_v16  ;;  %v1271_v21 = vadd.f32 %v2364_v48, %v1270_v33 }
 0x1ea   :  { %v1714_v22 = vpop.f32.mrf.mxu1 }
 0x1eb   :  { %1432 = vst [vmem:[%s2543_s5 + $0x20] sm:$0xff] %v1271_v21  ;;  %v1282_v36 = vadd.f32 %v1714_v22, %v2364_v48 }
 0x1ec   :  { %v1273_v45 = vpop.f32.mrf.mxu1 }
 0x1ed   :  { %1435 = vst [vmem:[%s2543_s5 + $0x38] sm:$0xff] %v1282_v36  ;;  %v1274_v24 = vadd.f32 %v2364_v48, %v1273_v45 }
 0x1ef   :  { %1433 = vst [vmem:[%s2543_s5 + $0x28] sm:$0xff] %v1274_v24 }
 0x1f6   :  { %v1717_v46 = vpop.f32.mrf.mxu1 }
 0x1f7   :  { %v1295_v25 = vadd.f32 %v1717_v46, %v2364_v48 }
 0x1f8   :  { %v1286_v35 = vpop.f32.mrf.mxu1 }
 0x1f9   :  { %1438 = vst [vmem:[%s2543_s5 + $0x50] sm:$0xff] %v1295_v25  ;;  %v1287_v50 = vadd.f32 %v2364_v48, %v1286_v35 }
 0x1fa   :  { %v1718_v31 = vpop.f32.mrf.mxu1 }
 0x1fb   :  { %1436 = vst [vmem:[%s2543_s5 + $0x40] sm:$0xff] %v1287_v50  ;;  %v1298_v38 = vadd.f32 %v1718_v31, %v2364_v48 }
 0x1fc   :  { %v1289_v26 = vpop.f32.mrf.mxu1 }
 0x1fd   :  { %1439 = vst [vmem:[%s2543_s5 + $0x58] sm:$0xff] %v1298_v38  ;;  %v1290_v30 = vadd.f32 %v2364_v48, %v1289_v26 }
 0x1ff   :  { %1437 = vst [vmem:[%s2543_s5 + $0x48] sm:$0xff] %v1290_v30 }
 0x206   :  { %v1721_v47 = vpop.f32.mrf.mxu1 }
 0x207   :  { %v1311_v49 = vadd.f32 %v1721_v47, %v2364_v48 }
 0x208   :  { %v1302_v51 = vpop.f32.mrf.mxu1 }
 0x209   :  { %1442 = vst [vmem:[%s2543_s5 + $0x70] sm:$0xff] %v1311_v49  ;;  %v1303_v23 = vadd.f32 %v2364_v48, %v1302_v51 }
 0x20a   :  { %v1722_v62 = vpop.f32.mrf.mxu1 }
 0x20b   :  { %1440 = vst [vmem:[%s2543_s5 + $0x60] sm:$0xff] %v1303_v23  ;;  %v1314_v52 = vadd.f32 %v1722_v62, %v2364_v48 }
 0x20c   :  { %v1305_v41 = vpop.f32.mrf.mxu1 }
 0x20d   :  { %1443 = vst [vmem:[%s2543_s5 + $0x78] sm:$0xff] %v1314_v52  ;;  %v1306_v28 = vadd.f32 %v2364_v48, %v1305_v41 }
 0x20f   :  { %1441 = vst [vmem:[%s2543_s5 + $0x68] sm:$0xff] %v1306_v28 }
 0x216   :  { %v1725_v53 = vpop.f32.mrf.mxu1 }
 0x217   :  { %v1327_v5 = vadd.f32 %v1725_v53, %v2364_v48 }
 0x218   :  { %v1318_v55 = vpop.f32.mrf.mxu1 }
 0x219   :  { %1446 = vst [vmem:[%s2543_s5 + $0x90] sm:$0xff] %v1327_v5  ;;  %v1319_v56 = vadd.f32 %v2364_v48, %v1318_v55 }
 0x21a   :  { %v1726_v43 = vpop.f32.mrf.mxu1 }
 0x21b   :  { %1444 = vst [vmem:[%s2543_s5 + $0x80] sm:$0xff] %v1319_v56  ;;  %v1330_v59 = vadd.f32 %v1726_v43, %v2364_v48 }
 0x21c   :  { %v1321_v0 = vpop.f32.mrf.mxu1 }
 0x21d   :  { %1447 = vst [vmem:[%s2543_s5 + $0x98] sm:$0xff] %v1330_v59  ;;  %v1322_v32 = vadd.f32 %v2364_v48, %v1321_v0 }
 0x21f   :  { %1445 = vst [vmem:[%s2543_s5 + $0x88] sm:$0xff] %v1322_v32 }
 0x226   :  { %v1729_v60 = vpop.f32.mrf.mxu1 }
 0x227   :  { %v1343_v57 = vadd.f32 %v1729_v60, %v2364_v48 }
 0x228   :  { %v1334_v29 = vpop.f32.mrf.mxu1 }
 0x229   :  { %1450 = vst [vmem:[%s2543_s5 + $0xb0] sm:$0xff] %v1343_v57  ;;  %v1335_v61 = vadd.f32 %v2364_v48, %v1334_v29 }
 0x22a   :  { %v1730_v63 = vpop.f32.mrf.mxu1 }
 0x22b   :  { %1448 = vst [vmem:[%s2543_s5 + $0xa0] sm:$0xff] %v1335_v61  ;;  %v1346_v34 = vadd.f32 %v1730_v63, %v2364_v48 }
 0x22c   :  { %v1337_v1 = vpop.f32.mrf.mxu1 }
 0x22d   :  { %1451 = vst [vmem:[%s2543_s5 + $0xb8] sm:$0xff] %v1346_v34  ;;  %v1338_v40 = vadd.f32 %v2364_v48, %v1337_v1 }
 0x22f   :  { %1449 = vst [vmem:[%s2543_s5 + $0xa8] sm:$0xff] %v1338_v40 }
 0x236   :  { %v1733_v2 = vpop.f32.mrf.mxu1 }
 0x237   :  { %v1359_v58 = vadd.f32 %v1733_v2, %v2364_v48 }
 0x238   :  { %v1350_v27 = vpop.f32.mrf.mxu1 }
 0x239   :  { %1454 = vst [vmem:[%s2543_s5 + $0xd0] sm:$0xff] %v1359_v58  ;;  %v1351_v4 = vadd.f32 %v2364_v48, %v1350_v27 }
 0x23a   :  { %v1734_v42 = vpop.f32.mrf.mxu1 }
 0x23b   :  { %1452 = vst [vmem:[%s2543_s5 + $0xc0] sm:$0xff] %v1351_v4  ;;  %v1362_v6 = vadd.f32 %v1734_v42, %v2364_v48 }
 0x23c   :  { %v1353_v3 = vpop.f32.mrf.mxu1 }
 0x23d   :  { %1455 = vst [vmem:[%s2543_s5 + $0xd8] sm:$0xff] %v1362_v6  ;;  %v1354_v13 = vadd.f32 %v2364_v48, %v1353_v3 }
 0x23f   :  { %1453 = vst [vmem:[%s2543_s5 + $0xc8] sm:$0xff] %v1354_v13 }
 0x246   :  { %v1737_v7 = vpop.f32.mrf.mxu1 }
 0x247   :  { %v1375_v9 = vadd.f32 %v1737_v7, %v2364_v48 }
 0x248   :  { %v1366_v37 = vpop.f32.mrf.mxu1 }
 0x249   :  { %1458 = vst [vmem:[%s2543_s5 + $0xf0] sm:$0xff] %v1375_v9  ;;  %v1367_v20 = vadd.f32 %v2364_v48, %v1366_v37 }
 0x24a   :  { %v1738_v10 = vpop.f32.mrf.mxu1 }
 0x24b   :  { %1456 = vst [vmem:[%s2543_s5 + $0xe0] sm:$0xff] %v1367_v20  ;;  %v1378_v18 = vadd.f32 %v1738_v10, %v2364_v48 }
 0x24c   :  { %v1369_v12 = vpop.f32.mrf.mxu1 }
 0x24d   :  { %1459 = vst [vmem:[%s2543_s5 + $0xf8] sm:$0xff] %v1378_v18  ;;  %v1370_v14 = vadd.f32 %v2364_v48, %v1369_v12 }
 0x24f   :  { %1457 = vst [vmem:[%s2543_s5 + $0xe8] sm:$0xff] %v1370_v14 }
 0x256   :  { %v1741_v44 = vpop.f32.mrf.mxu1 }
 0x257   :  { %v1391_v39 = vadd.f32 %v1741_v44, %v2364_v48 }
 0x258   :  { %v1382_v11 = vpop.f32.mrf.mxu1 }
 0x259   :  { %1462 = vst [vmem:[%s2543_s5 + $0x110] sm:$0xff] %v1391_v39  ;;  %v1383_v15 = vadd.f32 %v2364_v48, %v1382_v11 }
 0x25a   :  { %v1742_v8 = vpop.f32.mrf.mxu1 }
 0x25b   :  { %1460 = vst [vmem:[%s2543_s5 + $0x100] sm:$0xff] %v1383_v15  ;;  %v1394_v54 = vadd.f32 %v1742_v8, %v2364_v48 }
 0x25c   :  { %v1385_v17 = vpop.f32.mrf.mxu1 }
 0x25d   :  { %1463 = vst [vmem:[%s2543_s5 + $0x118] sm:$0xff] %v1394_v54  ;;  %v1386_v19 = vadd.f32 %v2364_v48, %v1385_v17 }
 0x25f   :  { %1461 = vst [vmem:[%s2543_s5 + $0x108] sm:$0xff] %v1386_v19 }
 0x266   :  { %v1745_v16 = vpop.f32.mrf.mxu1 }
 0x267   :  { %v1407_v33 = vadd.f32 %v1745_v16, %v2364_v48 }
 0x268   :  { %v1398_v21 = vpop.f32.mrf.mxu1 }
 0x269   :  { %1466 = vst [vmem:[%s2543_s5 + $0x130] sm:$0xff] %v1407_v33  ;;  %v1399_v22 = vadd.f32 %v2364_v48, %v1398_v21 }
 0x26a   :  { %v1746_v36 = vpop.f32.mrf.mxu1 }
 0x26b   :  { %1464 = vst [vmem:[%s2543_s5 + $0x120] sm:$0xff] %v1399_v22  ;;  %v1410_v45 = vadd.f32 %v1746_v36, %v2364_v48 }
 0x26c   :  { %v1401_v24 = vpop.f32.mrf.mxu1 }
 0x26d   :  { %1467 = vst [vmem:[%s2543_s5 + $0x138] sm:$0xff] %v1410_v45  ;;  %v1402_v46 = vadd.f32 %v2364_v48, %v1401_v24 }
 0x26f   :  { %1465 = vst [vmem:[%s2543_s5 + $0x128] sm:$0xff] %v1402_v46 }
 0x272   :  { %v1749_v25 = vpop.f32.mrf.mxu1 }
 0x273   :  { %v1423_v35 = vadd.f32 %v1749_v25, %v2364_v48 }
 0x274   :  { %v1414_v50 = vpop.f32.mrf.mxu1 }
 0x275   :  { %1470 = vst [vmem:[%s2543_s5 + $0x150] sm:$0x1f] %v1423_v35  ;;  %v1415_v31 = vadd.f32 %v2364_v48, %v1414_v50 }
 0x276   :  { %v1750_v38 = vpop.f32.mrf.mxu1 }
 0x277   :  { %1468 = vst [vmem:[%s2543_s5 + $0x140] sm:$0xff] %v1415_v31 }
 0x278   :  { %v1417_v26 = vpop.f32.mrf.mxu1 }
 0x279   :  { %v1418_v30 = vadd.f32 %v2364_v48, %v1417_v26 }
 0x27b   :  { %1469 = vst [vmem:[%s2543_s5 + $0x148] sm:$0xff] %v1418_v30 }

// kernel: _lambda_.30
= control target key start
LH: loop header
LB: loop body
LE: loop exit
PB: predicated region body
PF: predicated region fallthrough
CT: control target
= control target key end

     0   :  { %vm1797_vm0 = vmmov 0   ;;  %vm897_vm1 = vcmask 261120   ;;  %vm1230_vm2 = vcmask 523264   ;;  %s2225_s1 = inlined_call_operand.vmem [shape: bf16[1568,64], index: 1, kind: input, shape index: {}]   ;;  %s2226_s0 = inlined_call_operand.vmem [shape: bf16[16,1568], index: 0, kind: input, shape index: {}]   ;;  %s2227_s3 = inlined_call_operand.vmem [shape: bf16[64,64], index: 3, kind: input, shape index: {}]   ;;  %s2228_s5 = inlined_call_operand.vmem [shape: bf16[64,128], index: 5, kind: input, shape index: {}]   ;;  %s2229_s2 = inlined_call_operand.vmem [shape: f32[1,64], index: 2, kind: input, shape index: {}]   ;;  %s2230_s4 = inlined_call_operand.vmem [shape: f32[1,64], index: 4, kind: input, shape index: {}]   ;;  %s2231_s6 = inlined_call_operand.vmem [shape: f32[1,128], index: 6, kind: input, shape index: {}]   ;;  %s2232_s7 = inlined_call_operand.vmem [shape: f32[16,128], index: 7, kind: output, shape index: {}]  }
   0x1   :  { %v1671_v0 = vld [vmem:[%s2225_s1 + $0x78] sm:$0xff]   ;;  %v1675_v4 = vld [vmem:[%s2225_s1 + $0x70] sm:$0xff]   ;;  %v1679_v8 = vld [vmem:[%s2225_s1 + $0x68] sm:$0xff]  }
   0x2   :  { %v1672_v1 = vld [vmem:[%s2225_s1 + $0xf8] sm:$0xff]   ;;  %1492 = vmatprep.subr.bf16.mxu0 %v1671_v0  ;;  %v1676_v5 = vld [vmem:[%s2225_s1 + $0xf0] sm:$0xff]   ;;  %v1680_v9 = vld [vmem:[%s2225_s1 + $0xe8] sm:$0xff]  }
   0x3   :  { %v1673_v2 = vld [vmem:[%s2225_s1 + $0x38] sm:$0xff]   ;;  %1514 = vmatprep.subr.bf16.mxu1 %v1672_v1  ;;  %v1677_v6 = vld [vmem:[%s2225_s1 + $0x30] sm:$0xff]   ;;  %v1681_v10 = vld [vmem:[%s2225_s1 + $0x28] sm:$0xff]  }
   0x4   :  { %v1674_v3 = vld [vmem:[%s2225_s1 + $0xb8] sm:$0xff]   ;;  %1493 = vmatpush3.bf16.msra.mxu0 %v1673_v2  ;;  %v1678_v7 = vld [vmem:[%s2225_s1 + $0xb0] sm:$0xff]   ;;  %v1682_v11 = vld [vmem:[%s2225_s1 + $0xa8] sm:$0xff]  }
   0x5   :  { %1515 = vmatpush3.bf16.msra.mxu1 %v1674_v3  ;;  %1494 = vmatprep.subr.bf16.mxu0 %v1675_v4  ;;  %v1683_v12 = vld [vmem:[%s2225_s1 + $0x60] sm:$0xff]   ;;  %v1687_v16 = vld [vmem:[%s2225_s1 + $0x58] sm:$0xff]   ;;  %v1691_v20 = vld [vmem:[%s2225_s1 + $0x50] sm:$0xff]  }
   0x6   :  { %1516 = vmatprep.subr.bf16.mxu1 %v1676_v5  ;;  %v1684_v13 = vld [vmem:[%s2225_s1 + $0xe0] sm:$0xff]   ;;  %v1688_v17 = vld [vmem:[%s2225_s1 + $0xd8] sm:$0xff]   ;;  %v1692_v21 = vld [vmem:[%s2225_s1 + $0xd0] sm:$0xff]  }
   0x7   :  { %v1685_v14 = vld [vmem:[%s2225_s1 + $0x20] sm:$0xff]   ;;  %v1689_v18 = vld [vmem:[%s2225_s1 + $0x18] sm:$0xff]   ;;  %v1693_v22 = vld [vmem:[%s2225_s1 + $0x10] sm:$0xff]  }
   0x8   :  { %1495 = vmatpush3.bf16.msra.mxu0 %v1677_v6  ;;  %v1686_v15 = vld [vmem:[%s2225_s1 + $0xa0] sm:$0xff]   ;;  %v1690_v19 = vld [vmem:[%s2225_s1 + $0x98] sm:$0xff]   ;;  %v1694_v23 = vld [vmem:[%s2225_s1 + $0x90] sm:$0xff]  }
   0x9   :  { %1517 = vmatpush3.bf16.msra.mxu1 %v1678_v7  ;;  %1496 = vmatprep.subr.bf16.mxu0 %v1679_v8  ;;  %v1695_v24 = vld [vmem:[%s2225_s1 + $0x48] sm:$0xff]   ;;  %v1699_v28 = vld [vmem:[%s2225_s1 + $0x40] sm:$0xff]   ;;  %v1709_v36 = vld [vmem:[%s2225_s1 + $0x178] sm:$0xff]  }
   0xa   :  { %1518 = vmatprep.subr.bf16.mxu1 %v1680_v9  ;;  %v1696_v25 = vld [vmem:[%s2225_s1 + $0xc8] sm:$0xff]   ;;  %v1700_v29 = vld [vmem:[%s2225_s1 + $0xc0] sm:$0xff]   ;;  %v1710_v37 = vld [vmem:[%s2225_s1 + $0x1f8] sm:$0xff]  }
   0xb   :  { %v1697_v26 = vld [vmem:[%s2225_s1 + $0x8] sm:$0xff]   ;;  %v1701_v30 = vld [vmem:[%s2225_s1] sm:$0xff]   ;;  %v1711_v38 = vld [vmem:[%s2225_s1 + $0x138] sm:$0xff]  }
   0xc   :  { %1497 = vmatpush3.bf16.msra.mxu0 %v1681_v10  ;;  %v1698_v27 = vld [vmem:[%s2225_s1 + $0x88] sm:$0xff]   ;;  %v1702_v31 = vld [vmem:[%s2225_s1 + $0x80] sm:$0xff]   ;;  %v1712_v39 = vld [vmem:[%s2225_s1 + $0x1b8] sm:$0xff]  }
   0xd   :  { %1519 = vmatpush3.bf16.msra.mxu1 %v1682_v11  ;;  %1498 = vmatprep.subr.bf16.mxu0 %v1683_v12  ;;  %v1703_v32 = vld [vmem:[%s2226_s0] ss:$52 sps:$4 sm:$0xff]   ;;  %v1705_v33 = vld [vmem:[%s2226_s0 + $0x4] ss:$52 sps:$4 sm:$0xff]   ;;  %v1706_v34 = vld [vmem:[%s2226_s0 + $0x8] ss:$52 sps:$4 sm:$0xff]  }
   0xe   :  { %1520 = vmatprep.subr.bf16.mxu1 %v1684_v13  ;;  %v1708_v35 = vld [vmem:[%s2226_s0 + $0xc] ss:$52 sps:$4 sm:$0xff]   ;;  %933 = vmatprep.mubr.bf16.mxu0 %v1705_v33  ;;  %v1713_v40 = vld [vmem:[%s2225_s1 + $0x170] sm:$0xff]   ;;  %v1725_v52 = vld [vmem:[%s2225_s1 + $0x158] sm:$0xff]  }
   0xf   :  { %974 = vmatprep.mubr.bf16.mxu1 %v1708_v35  ;;  %v1714_v41 = vld [vmem:[%s2225_s1 + $0x1f0] sm:$0xff]   ;;  %v1717_v44 = vld [vmem:[%s2225_s1 + $0x168] sm:$0xff]   ;;  %v1721_v48 = vld [vmem:[%s2225_s1 + $0x160] sm:$0xff]  }
  0x10   :  { %1499 = vmatpush3.bf16.msra.mxu0 %v1685_v14  ;;  %v1715_v42 = vld [vmem:[%s2225_s1 + $0x130] sm:$0xff]   ;;  %v1718_v45 = vld [vmem:[%s2225_s1 + $0x1e8] sm:$0xff]   ;;  %v1722_v49 = vld [vmem:[%s2225_s1 + $0x1e0] sm:$0xff]  }
  0x11   :  { %1521 = vmatpush3.bf16.msra.mxu1 %v1686_v15  ;;  %1500 = vmatprep.subr.bf16.mxu0 %v1687_v16  ;;  %v1716_v43 = vld [vmem:[%s2225_s1 + $0x1b0] sm:$0xff]   ;;  %v1719_v46 = vld [vmem:[%s2225_s1 + $0x128] sm:$0xff]   ;;  %v1723_v50 = vld [vmem:[%s2225_s1 + $0x120] sm:$0xff]  }
  0x12   :  { %1522 = vmatprep.subr.bf16.mxu1 %v1688_v17  ;;  %v1720_v47 = vld [vmem:[%s2225_s1 + $0x1a8] sm:$0xff]   ;;  %v1724_v51 = vld [vmem:[%s2225_s1 + $0x1a0] sm:$0xff]   ;;  %v1726_v53 = vld [vmem:[%s2225_s1 + $0x1d8] sm:$0xff]  }
  0x13   :  { %v1727_v54 = vld [vmem:[%s2225_s1 + $0x118] sm:$0xff]   ;;  %v1729_v56 = vld [vmem:[%s2225_s1 + $0x150] sm:$0xff]   ;;  %v1733_v60 = vld [vmem:[%s2225_s1 + $0x148] sm:$0xff]  }
  0x14   :  { %1501 = vmatpush3.bf16.msra.mxu0 %v1689_v18  ;;  %v1728_v55 = vld [vmem:[%s2225_s1 + $0x198] sm:$0xff]   ;;  %v1730_v57 = vld [vmem:[%s2225_s1 + $0x1d0] sm:$0xff]   ;;  %v1734_v61 = vld [vmem:[%s2225_s1 + $0x1c8] sm:$0xff]  }
  0x15   :  { %1523 = vmatpush3.bf16.msra.mxu1 %v1690_v19  ;;  %1502 = vmatprep.subr.bf16.mxu0 %v1691_v20  ;;  %v1731_v58 = vld [vmem:[%s2225_s1 + $0x110] sm:$0xff]   ;;  %v1735_v62 = vld [vmem:[%s2225_s1 + $0x108] sm:$0xff]   ;;  %v1737_v0 = vld [vmem:[%s2225_s1 + $0x140] sm:$0xff]  }
  0x16   :  { %1524 = vmatprep.subr.bf16.mxu1 %v1692_v21  ;;  %v1732_v59 = vld [vmem:[%s2225_s1 + $0x190] sm:$0xff]   ;;  %v1736_v63 = vld [vmem:[%s2225_s1 + $0x188] sm:$0xff]   ;;  %v1738_v1 = vld [vmem:[%s2225_s1 + $0x1c0] sm:$0xff]  }
  0x17   :  { %v1739_v2 = vld [vmem:[%s2225_s1 + $0x100] sm:$0xff]   ;;  %v1743_v5 = vld [vmem:[%s2226_s0 + $0x14] ss:$52 sps:$4 sm:$0xff]   ;;  %v1744_v6 = vld [vmem:[%s2226_s0 + $0x18] ss:$52 sps:$4 sm:$0xff]  }
  0x18   :  { %1503 = vmatpush3.bf16.msra.mxu0 %v1693_v22  ;;  %v1740_v3 = vld [vmem:[%s2225_s1 + $0x180] sm:$0xff]   ;;  %v1746_v7 = vld [vmem:[%s2226_s0 + $0x1c] ss:$52 sps:$4 sm:$0xff]   ;;  %v1755_v16 = vld [vmem:[%s2225_s1 + $0x268] sm:$0xff]  }
  0x19   :  { %1525 = vmatpush3.bf16.msra.mxu1 %v1694_v23  ;;  %1504 = vmatprep.subr.bf16.mxu0 %v1695_v24  ;;  %v1741_v4 = vld [vmem:[%s2226_s0 + $0x10] ss:$52 sps:$4 sm:$0xff]   ;;  %v1747_v8 = vld [vmem:[%s2225_s1 + $0x278] sm:$0xff]   ;;  %v1756_v17 = vld [vmem:[%s2225_s1 + $0x2e8] sm:$0xff]  }
  0x1a   :  { %1526 = vmatprep.subr.bf16.mxu1 %v1696_v25  ;;  %v1748_v9 = vld [vmem:[%s2225_s1 + $0x2f8] sm:$0xff]   ;;  %v1751_v12 = vld [vmem:[%s2225_s1 + $0x270] sm:$0xff]   ;;  %v1757_v18 = vld [vmem:[%s2225_s1 + $0x228] sm:$0xff]  }
  0x1b   :  { %v1749_v10 = vld [vmem:[%s2225_s1 + $0x238] sm:$0xff]   ;;  %v1752_v13 = vld [vmem:[%s2225_s1 + $0x2f0] sm:$0xff]   ;;  %v1758_v19 = vld [vmem:[%s2225_s1 + $0x2a8] sm:$0xff]  }
  0x1c   :  { %1505 = vmatpush3.bf16.msra.mxu0 %v1697_v26  ;;  %v1750_v11 = vld [vmem:[%s2225_s1 + $0x2b8] sm:$0xff]   ;;  %v1753_v14 = vld [vmem:[%s2225_s1 + $0x230] sm:$0xff]   ;;  %v1759_v20 = vld [vmem:[%s2225_s1 + $0x260] sm:$0xff]  }
  0x1d   :  { %1527 = vmatpush3.bf16.msra.mxu1 %v1698_v27  ;;  %1506 = vmatprep.subr.bf16.mxu0 %v1699_v28  ;;  %v1754_v15 = vld [vmem:[%s2225_s1 + $0x2b0] sm:$0xff]   ;;  %v1760_v21 = vld [vmem:[%s2225_s1 + $0x2e0] sm:$0xff]   ;;  %v1763_v24 = vld [vmem:[%s2225_s1 + $0x258] sm:$0xff]  }
  0x1e   :  { %1528 = vmatprep.subr.bf16.mxu1 %v1700_v29  ;;  %v1761_v22 = vld [vmem:[%s2225_s1 + $0x220] sm:$0xff]   ;;  %v1764_v25 = vld [vmem:[%s2225_s1 + $0x2d8] sm:$0xff]   ;;  %v1767_v28 = vld [vmem:[%s2225_s1 + $0x250] sm:$0xff]  }
  0x1f   :  { %v1762_v23 = vld [vmem:[%s2225_s1 + $0x2a0] sm:$0xff]   ;;  %v1765_v26 = vld [vmem:[%s2225_s1 + $0x218] sm:$0xff]   ;;  %v1768_v29 = vld [vmem:[%s2225_s1 + $0x2d0] sm:$0xff]  }
  0x20   :  { %1507 = vmatpush3.bf16.msra.mxu0 %v1701_v30  ;;  %v1766_v27 = vld [vmem:[%s2225_s1 + $0x298] sm:$0xff]   ;;  %v1769_v30 = vld [vmem:[%s2225_s1 + $0x210] sm:$0xff]   ;;  %v1772_v33 = vld [vmem:[%s2225_s1 + $0x2c8] sm:$0xff]  }
  0x21   :  { %1529 = vmatpush3.bf16.msra.mxu1 %v1702_v31  ;;  %1536 = vmatprep.subr.bf16.mxu0 %v1709_v36  ;;  %v1770_v31 = vld [vmem:[%s2225_s1 + $0x290] sm:$0xff]   ;;  %v1774_v35 = vld [vmem:[%s2225_s1 + $0x288] sm:$0xff]   ;;  %v1775_v36 = vld [vmem:[%s2225_s1 + $0x240] sm:$0xff]  }
  0x22   :  { %1558 = vmatprep.subr.bf16.mxu1 %v1710_v37  ;;  %v1776_v37 = vld [vmem:[%s2225_s1 + $0x2c0] sm:$0xff]  }
  0x23   :  { %934 = vmatmul.mubr.bf16.vlgmr.msra.gmra.mxu0 %v1703_v32  ;;  %v1771_v32 = vld [vmem:[%s2225_s1 + $0x248] sm:$0xff]  }
  0x24   :  { %975 = vmatmul.mubr.bf16.vlgmr.msra.gmra.mxu1 %v1706_v34  ;;  %1537 = vmatpush3.bf16.msra.mxu0 %v1711_v38  ;;  %v1773_v34 = vld [vmem:[%s2225_s1 + $0x208] sm:$0xff]   ;;  %v1777_v38 = vld [vmem:[%s2225_s1 + $0x200] sm:$0xff]  }
  0x25   :  { %1559 = vmatpush3.bf16.msra.mxu1 %v1712_v39  ;;  %1538 = vmatprep.subr.bf16.mxu0 %v1713_v40  ;;  %v1778_v39 = vld [vmem:[%s2225_s1 + $0x280] sm:$0xff]  }
  0x26   :  { %1560 = vmatprep.subr.bf16.mxu1 %v1714_v41  ;;  %1015 = vmatprep.mubr.bf16.mxu0 %v1743_v5  ;;  %v1779_v40 = vld [vmem:[%s2226_s0 + $0x20] ss:$52 sps:$4 sm:$0xff]   ;;  %v1781_v41 = vld [vmem:[%s2226_s0 + $0x24] ss:$52 sps:$4 sm:$0xff]  }
  0x27   :  { %1056 = vmatprep.mubr.bf16.mxu1 %v1746_v7 }
  0x28   :  { %1539 = vmatpush3.bf16.msra.mxu0 %v1715_v42  ;;  %v1782_v42 = vld [vmem:[%s2226_s0 + $0x28] ss:$52 sps:$4 sm:$0xff]  }
  0x29   :  { %1561 = vmatpush3.bf16.msra.mxu1 %v1716_v43  ;;  %1540 = vmatprep.subr.bf16.mxu0 %v1717_v44  ;;  %v1784_v43 = vld [vmem:[%s2226_s0 + $0x2c] ss:$52 sps:$4 sm:$0xff]   ;;  %v1796_v44 = vmov 0.0  }
  0x2a   :  { %1562 = vmatprep.subr.bf16.mxu1 %v1718_v45  ;;  %v1785_v45 = vld [vmem:[%s2225_s1 + $0x308] sm:$0xff]  }
  0x2c   :  { %1541 = vmatpush3.bf16.msra.mxu0 %v1719_v46  ;;  %v1786_v46 = vld [vmem:[%s2225_s1 + $0x300] sm:$0xff]  }
  0x2d   :  { %1563 = vmatpush3.bf16.msra.mxu1 %v1720_v47  ;;  %1542 = vmatprep.subr.bf16.mxu0 %v1721_v48  ;;  %v1787_v47 = vld [vmem:[%s2226_s0 + $0x30] ss:$52 sps:$4 sm:$0xff]   ;;  %v1788_v48 = vld [vmem:[%s2227_s3 + $0x18] sm:$0xff]  }
  0x2e   :  { %1564 = vmatprep.subr.bf16.mxu1 %v1722_v49  ;;  %v1789_v49 = vld [vmem:[%s2227_s3 + $0x10] sm:$0xff]  }
  0x30   :  { %1543 = vmatpush3.bf16.msra.mxu0 %v1723_v50  ;;  %v1790_v50 = vld [vmem:[%s2227_s3 + $0x8] sm:$0xff]  }
  0x31   :  { %1565 = vmatpush3.bf16.msra.mxu1 %v1724_v51  ;;  %1544 = vmatprep.subr.bf16.mxu0 %v1725_v52  ;;  %v1791_v51 = vld [vmem:[%s2227_s3] sm:$0xff]   ;;  %v1792_v52 = vld [vmem:[%s2228_s5 + $0x18] sm:$0xff]  }
  0x32   :  { %1566 = vmatprep.subr.bf16.mxu1 %v1726_v53 }
  0x34   :  { %1545 = vmatpush3.bf16.msra.mxu0 %v1727_v54 }
  0x35   :  { %1567 = vmatpush3.bf16.msra.mxu1 %v1728_v55  ;;  %1546 = vmatprep.subr.bf16.mxu0 %v1729_v56 }
  0x36   :  { %1568 = vmatprep.subr.bf16.mxu1 %v1730_v57 }
  0x38   :  { %1547 = vmatpush3.bf16.msra.mxu0 %v1731_v58 }
  0x39   :  { %1569 = vmatpush3.bf16.msra.mxu1 %v1732_v59  ;;  %1548 = vmatprep.subr.bf16.mxu0 %v1733_v60 }
  0x3a   :  { %1570 = vmatprep.subr.bf16.mxu1 %v1734_v61 }
  0x3c   :  { %1549 = vmatpush3.bf16.msra.mxu0 %v1735_v62 }
  0x3d   :  { %1571 = vmatpush3.bf16.msra.mxu1 %v1736_v63  ;;  %1550 = vmatprep.subr.bf16.mxu0 %v1737_v0 }
  0x3e   :  { %1572 = vmatprep.subr.bf16.mxu1 %v1738_v1  ;;  %v1367_v1 = vld [vmem:[%s2229_s2] ss:$0 sm:$0xff] }
  0x40   :  { %1551 = vmatpush3.bf16.msra.mxu0 %v1739_v2 }
  0x41   :  { %1573 = vmatpush3.bf16.msra.mxu1 %v1740_v3  ;;  %1580 = vmatprep.subr.bf16.mxu0 %v1747_v8 }
  0x42   :  { %1602 = vmatprep.subr.bf16.mxu1 %v1748_v9 }
  0x43   :  { %1016 = vmatmul.mubr.bf16.vlgmr.msra.gmra.mxu0 %v1741_v4 }
  0x44   :  { %1057 = vmatmul.mubr.bf16.vlgmr.msra.gmra.mxu1 %v1744_v6  ;;  %1581 = vmatpush3.bf16.msra.mxu0 %v1749_v10 }
  0x45   :  { %1603 = vmatpush3.bf16.msra.mxu1 %v1750_v11  ;;  %1582 = vmatprep.subr.bf16.mxu0 %v1751_v12 }
  0x46   :  { %1604 = vmatprep.subr.bf16.mxu1 %v1752_v13  ;;  %1097 = vmatprep.mubr.bf16.mxu0 %v1781_v41 }
  0x47   :  { %1138 = vmatprep.mubr.bf16.mxu1 %v1784_v43 }
  0x48   :  { %1583 = vmatpush3.bf16.msra.mxu0 %v1753_v14 }
  0x49   :  { %1605 = vmatpush3.bf16.msra.mxu1 %v1754_v15  ;;  %1584 = vmatprep.subr.bf16.mxu0 %v1755_v16 }
  0x4a   :  { %1606 = vmatprep.subr.bf16.mxu1 %v1756_v17 }
  0x4c   :  { %1585 = vmatpush3.bf16.msra.mxu0 %v1757_v18 }
  0x4d   :  { %1607 = vmatpush3.bf16.msra.mxu1 %v1758_v19  ;;  %1586 = vmatprep.subr.bf16.mxu0 %v1759_v20 }
  0x4e   :  { %1608 = vmatprep.subr.bf16.mxu1 %v1760_v21 }
  0x50   :  { %1587 = vmatpush3.bf16.msra.mxu0 %v1761_v22 }
  0x51   :  { %1609 = vmatpush3.bf16.msra.mxu1 %v1762_v23  ;;  %1588 = vmatprep.subr.bf16.mxu0 %v1763_v24 }
  0x52   :  { %1610 = vmatprep.subr.bf16.mxu1 %v1764_v25 }
  0x54   :  { %1589 = vmatpush3.bf16.msra.mxu0 %v1765_v26 }
  0x55   :  { %1611 = vmatpush3.bf16.msra.mxu1 %v1766_v27  ;;  %1590 = vmatprep.subr.bf16.mxu0 %v1767_v28 }
  0x56   :  { %1612 = vmatprep.subr.bf16.mxu1 %v1768_v29 }
  0x58   :  { %1591 = vmatpush3.bf16.msra.mxu0 %v1769_v30 }
  0x59   :  { %1613 = vmatpush3.bf16.msra.mxu1 %v1770_v31  ;;  %1592 = vmatprep.subr.bf16.mxu0 %v1771_v32 }
  0x5a   :  { %1614 = vmatprep.subr.bf16.mxu1 %v1772_v33 }
  0x5c   :  { %1593 = vmatpush3.bf16.msra.mxu0 %v1773_v34 }
  0x5d   :  { %1615 = vmatpush3.bf16.msra.mxu1 %v1774_v35  ;;  %1594 = vmatprep.subr.bf16.mxu0 %v1775_v36 }
  0x5e   :  { %1616 = vmatprep.subr.bf16.mxu1 %v1776_v37 }
  0x60   :  { %1595 = vmatpush3.bf16.msra.mxu0 %v1777_v38 }
  0x61   :  { %1617 = vmatpush3.bf16.msra.mxu1 %v1778_v39  ;;  %1637 = vmatprep.subr.bf16.mxu0 %v1796_v44 }
  0x62   :  { %1645 = vmatprep.subr.bf16.mxu1 %v1796_v44 }
  0x63   :  { %1098 = vmatmul.mubr.bf16.vlgmr.msra.gmra.mxu0 %v1779_v40 }
  0x64   :  { %1139 = vmatmul.mubr.bf16.vlgmr.msra.gmra.mxu1 %v1782_v42  ;;  %1638 = vmatpush3.bf16.msra.mxu0 %v1785_v45 }
  0x65   :  { %1639 = vmatprep.subr.bf16.mxu0 %v1796_v44  ;;  %1641 = vmatprep.mubr.msk.bf16.mxu0 %vm1797_vm0, %v1796_v44 }
  0x66   :  { %1653 = vmatprep.mubr.msk.bf16.mxu1 %vm1797_vm0, %v1796_v44  ;;  %1646 = vmatpush3.bf16.msra.mxu1 %v1788_v48  ;;  %v1793_v48 = vld [vmem:[%s2228_s5 + $0x10] sm:$0xff]  }
  0x67   :  { %1647 = vmatprep.subr.bf16.mxu1 %v1796_v44 }
  0x68   :  { %1640 = vmatpush3.bf16.msra.mxu0 %v1786_v46 }
  0x69   :  { %1657 = vmatprep.subr.bf16.mxu0 %v1796_v44 }
  0x6a   :  { %1648 = vmatpush3.bf16.msra.mxu1 %v1789_v49  ;;  %v1794_v49 = vld [vmem:[%s2228_s5 + $0x8] sm:$0xff]  }
  0x6b   :  { %1642 = vmatmul.mubr.msk.bf16.vlgmr.msra.gmra.mxu0 %vm897_vm1, %v1787_v47  ;;  %1649 = vmatprep.subr.bf16.mxu1 %v1796_v44 }
  0x6c   :  { %1665 = vmatprep.mubr.msk.bf16.mxu0 %vm1797_vm0, %v1796_v44  ;;  %1658 = vmatpush3.bf16.msra.mxu0 %v1792_v52 }
  0x6d   :  { %1659 = vmatprep.subr.bf16.mxu0 %v1796_v44 }
  0x6e   :  { %1650 = vmatpush3.bf16.msra.mxu1 %v1790_v50  ;;  %v1795_v50 = vld [vmem:[%s2228_s5] sm:$0xff]  }
  0x6f   :  { %1651 = vmatprep.subr.bf16.mxu1 %v1796_v44 }
  0x70   :  { %1660 = vmatpush3.bf16.msra.mxu0 %v1793_v48 }
  0x71   :  { %1661 = vmatprep.subr.bf16.mxu0 %v1796_v44 }
  0x72   :  { %1652 = vmatpush3.bf16.msra.mxu1 %v1791_v51  ;;  %v1480_v51 = vld [vmem:[%s2230_s4] ss:$0 sm:$0xff] }
  0x74   :  { %1662 = vmatpush3.bf16.msra.mxu0 %v1794_v49 }
  0x75   :  { %1663 = vmatprep.subr.bf16.mxu0 %v1796_v44  ;;  %v1486_v44 = vld [vmem:[%s2231_s6] ss:$0 sm:$0xff] }
  0x78   :  { %1664 = vmatpush3.bf16.msra.mxu0 %v1795_v50 }
  0xe3   :  { %v1508_v53 = vpop.f32.mrf.mxu0 }
  0xe4   :  { %v1530_v54 = vpop.f32.mrf.mxu1 }
  0xe5   :  { %v1509_v55 = vpop.f32.mrf.mxu0 }
  0xe6   :  { %v1531_v56 = vpop.f32.mrf.mxu1  ;;  %v1510_v0 = vadd.f32 %v1509_v55, %v1508_v53 }
  0xe7   :  { %v1511_v57 = vpop.f32.mrf.mxu0  ;;  %v1532_v5 = vadd.f32 %v1531_v56, %v1530_v54 }
  0xe8   :  { %v1533_v58 = vpop.f32.mrf.mxu1  ;;  %v936_v4 = vadd.f32 %v1510_v0, %v1367_v1 }
  0xe9   :  { %v1512_v59 = vpop.f32.mrf.mxu0 }
  0xea   :  { %v1534_v61 = vpop.f32.mrf.mxu1  ;;  %v1513_v6 = vadd.f32 %v1512_v59, %v1511_v57  ;;  %v977_v10 = vadd.f32 %v1532_v5, %v936_v4 }
  0xeb   :  { %v1535_v12 = vadd.f32 %v1534_v61, %v1533_v58 }
  0xec   :  { %v939_v11 = vadd.f32 %v1513_v6, %v1367_v1 }
  0xee   :  { %v980_v18 = vadd.f32 %v1535_v12, %v939_v11 }
 0x103   :  { %v1552_v60 = vpop.f32.mrf.mxu0 }
 0x104   :  { %v1574_v62 = vpop.f32.mrf.mxu1 }
 0x105   :  { %v1553_v63 = vpop.f32.mrf.mxu0 }
 0x106   :  { %v1575_v2 = vpop.f32.mrf.mxu1  ;;  %v1554_v7 = vadd.f32 %v1553_v63, %v1552_v60 }
 0x107   :  { %v1555_v3 = vpop.f32.mrf.mxu0  ;;  %v1576_v14 = vadd.f32 %v1575_v2, %v1574_v62 }
 0x108   :  { %v1577_v8 = vpop.f32.mrf.mxu1  ;;  %v1018_v13 = vadd.f32 %v1554_v7, %v977_v10 }
 0x109   :  { %v1556_v9 = vpop.f32.mrf.mxu0 }
 0x10a   :  { %v1557_v15 = vadd.f32 %v1556_v9, %v1555_v3  ;;  %v1578_v16 = vpop.f32.mrf.mxu1  ;;  %v1059_v21 = vadd.f32 %v1576_v14, %v1018_v13 }
 0x10b   :  { %v1579_v26 = vadd.f32 %v1578_v16, %v1577_v8 }
 0x10c   :  { %v1021_v22 = vadd.f32 %v1557_v15, %v980_v18 }
 0x10e   :  { %v1062_v31 = vadd.f32 %v1579_v26, %v1021_v22 }
 0x123   :  { %v1596_v17 = vpop.f32.mrf.mxu0 }
 0x124   :  { %v1618_v19 = vpop.f32.mrf.mxu1 }
 0x125   :  { %v1597_v20 = vpop.f32.mrf.mxu0 }
 0x126   :  { %v1598_v23 = vadd.f32 %v1597_v20, %v1596_v17  ;;  %v1619_v24 = vpop.f32.mrf.mxu1 }
 0x127   :  { %v1599_v25 = vpop.f32.mrf.mxu0  ;;  %v1620_v28 = vadd.f32 %v1619_v24, %v1618_v19 }
 0x128   :  { %v1100_v27 = vadd.f32 %v1598_v23, %v1059_v21  ;;  %v1621_v29 = vpop.f32.mrf.mxu1 }
 0x129   :  { %v1600_v30 = vpop.f32.mrf.mxu0 }
 0x12a   :  { %v1601_v32 = vadd.f32 %v1600_v30, %v1599_v25  ;;  %v1622_v33 = vpop.f32.mrf.mxu1  ;;  %v1141_v34 = vadd.f32 %v1620_v28, %v1100_v27 }
 0x12b   :  { %v1181_v35 = vpop.f32.mrf.mxu0  ;;  %v1623_v37 = vadd.f32 %v1622_v33, %v1621_v29 }
 0x12c   :  { %v1103_v36 = vadd.f32 %v1601_v32, %v1062_v31  ;;  %v1182_v39 = vadd.f32 %v1181_v35, %v1141_v34 }
 0x12d   :  { %v1643_v38 = vpop.f32.mrf.mxu0 }
 0x12e   :  { %v1144_v40 = vadd.f32 %v1623_v37, %v1103_v36  ;;  %v1188_v45 = vmax.f32 %v1182_v39, 0.0 }
 0x12f   :  { %v1184_v41 = vpop.f32.mrf.mxu0 }
 0x130   :  { %v1185_v42 = vadd.f32 %v1184_v41, %v1144_v40 }
 0x131   :  { %v1644_v43 = vpop.f32.mrf.mxu0 }
 0x132   :  { %v1189_v46 = vmax.f32 %v1185_v42, 0.0 }
 0x134   :  { %v1190_v47 = vpack.c.bf16 %v1189_v46, %v1188_v45 }
 0x136   :  { %1654 = vmatmul.mubr.msk.bf16.vlgmr.msra.gmra.mxu1 %vm1230_vm2, %v1190_v47 }
 0x1f6   :  { %v1268_v52 = vpop.f32.mrf.mxu1 }
 0x1f7   :  { %v1269_v54 = vadd.f32 %v1480_v51, %v1268_v52 }
 0x1f8   :  { %v1655_v53 = vpop.f32.mrf.mxu1 }
 0x1f9   :  { %v1275_v58 = vmax.f32 %v1269_v54, 0.0 }
 0x1fa   :  { %v1271_v55 = vpop.f32.mrf.mxu1 }
 0x1fb   :  { %v1272_v56 = vadd.f32 %v1480_v51, %v1271_v55 }
 0x1fc   :  { %v1656_v57 = vpop.f32.mrf.mxu1 }
 0x1fd   :  { %v1276_v59 = vmax.f32 %v1272_v56, 0.0 }
 0x1ff   :  { %v1277_v60 = vpack.c.bf16 %v1276_v59, %v1275_v58 }
 0x201   :  { %1666 = vmatmul.mubr.msk.bf16.vlgmr.msra.gmra.mxu0 %vm1230_vm2, %v1277_v60 }
 0x2c1   :  { %v1354_v61 = vpop.f32.mrf.mxu0 }
 0x2c2   :  { %v1355_v62 = vadd.f32 %v1486_v44, %v1354_v61 }
 0x2c3   :  { %v1667_v63 = vpop.f32.mrf.mxu0 }
 0x2c4   :  { %1361 = vst [vmem:[%s2232_s7] sm:$0xff] %v1355_v62 }
 0x2c5   :  { %v1357_v0 = vpop.f32.mrf.mxu0 }
 0x2c6   :  { %v1358_v1 = vadd.f32 %v1486_v44, %v1357_v0 }
 0x2c7   :  { %v1668_v2 = vpop.f32.mrf.mxu0 }
 0x2c8   :  { %1362 = vst [vmem:[%s2232_s7 + $0x8] sm:$0xff] %v1358_v1 }

// kernel: _lambda_.33
= control target key start
LH: loop header
LB: loop body
LE: loop exit
PB: predicated region body
PF: predicated region fallthrough
CT: control target
= control target key end

     0   :  { %s3269_s12 = smov 0   ;;  %s3271_s13 = smov 0   ;;  %s4044_s0 = inlined_call_operand.vmem [shape: bf16[1568,288], index: 0, kind: input, shape index: {}]   ;;  %s4045_s1 = inlined_call_operand.vmem [shape: bf16[288,32], index: 1, kind: input, shape index: {}]   ;;  %s4046_s2 = inlined_call_operand.vmem [shape: f32[1,32], index: 2, kind: input, shape index: {}]   ;;  %s4047_s3 = inlined_call_operand.vmem [shape: bf16[1568,32], index: 3, kind: output, shape index: {}]  }
   0x1   :  { %s3273_s14 = smov 0  }
   0x2 LB: > { %s3282_s15 = sadd.s32 4294967295, %s3214_s14   ;;  %s3284_s16 = sadd.s32 1, %s3214_s14   ;;  %s3214_s14 = sphi %s3273_s14, %s4054_s14   ;;  %s3210_s13 = sphi %s3271_s13, %s4053_s13   ;;  %s3206_s12 = sphi %s3269_s12, %s4052_s12  }
   0x3   : > { %s85_s17 = ssub.s32 %s3214_s14, %s3284_s16  ;;  %s88_s18 = sadd.s32 1, %s3210_s13 }
   0x4   : > { %p86_p0 = scmp.eq.s32.totalorder %s85_s17, 0  ;;  %p98_p1 = scmp.ne.s32.totalorder %s3210_s13, %s3206_s12 }
   0x5   : > { %p99_p2 = scmp.eq.s32.totalorder %s3282_s15, 3  ;;  %p2491_p3 = scmp.ge.s32.totalorder %s3214_s14, 1 }
   0x6   : > { %s3292_s19 = scalar_select %p86_p0, %s3210_s13, %s88_s18  }
   0x7   : > { %p3294_p4 = por %p99_p2, %p98_p1  ;;  %p149_p5 = scmp.lt.s32.totalorder %s3214_s14, 5 }
   0x9   : > { %p150_p6 = pnand %p2491_p3, %p149_p5 }
   0xa   : > { %s3304_s23 = sshll.u32 (!%p150_p6), %s3282_s15, 6  ;;  %s175_s25 = sand.u32 (!%p150_p6), 1, %s3206_s12  }
   0xb   : > { %153 = sbr.rel (%p150_p6) target bundleno = 553 (0x229), region = 32  ;;  %p184_p7 = scmp.lt.s32.totalorder (!%p150_p6), %s3304_s23, 195 }
   0xc   : > { %s2492_s26 = sshll.u32 (!%p150_p6), %s175_s25, 8 }
   0xd   : > { %s3597_s12 = scalar_lea.vmem (!%p150_p6), [#allocation2], %s2492_s26  }
  0x10   : > { %v3014_v0 = vld [vmem:[%s4045_s1 + $0x38] sm:$0xff]   ;;  %v3248_v1 = vmov 0   ;;  %v3015_v2 = vld [vmem:[%s4045_s1 + $0x30] sm:$0xff]   ;;  %v3016_v3 = vld [vmem:[%s4045_s1 + $0x28] sm:$0xff]   ;;  %s185_s28 = scalar_select %p184_p7, %s3304_s23, 195  ;;  %vm960_vm0 = vcmask 261120  }
  0x11   : > { %1057 = vmatprep.subr.bf16.mxu0 %v3248_v1  ;;  %2892 = vmatprep.subr.bf16.mxu1 %v3248_v1  ;;  %v3017_v4 = vld [vmem:[%s4045_s1 + $0x20] sm:$0xff]   ;;  %v3018_v5 = vld [vmem:[%s4045_s1 + $0x18] sm:$0xff]   ;;  %v3019_v7 = vld [vmem:[%s4045_s1 + $0x10] sm:$0xff]   ;;  %vm1955_vm1 = vcmask 257024   ;;  %s2028_s27 = ssub.s32 (%p3294_p4), 196, %s3304_s23 }
  0x12   : > { %1058 = vmatpush1.bf16.msra.mxu0 %v3014_v0  ;;  %2908 = vmatpush1.bf16.msra.mxu1 %v3014_v0  ;;  %s2924_s4 = smul.u32 12, %s185_s28  ;;  %v3020_v9 = vld [vmem:[%s4045_s1 + $0x8] sm:$0xff]   ;;  %v3021_v10 = vld [vmem:[%s4045_s1] sm:$0xff]   ;;  %v3022_v11 = vld [vmem:[%s4045_s1 + $0x78] sm:$0xff]   ;;  %s2787_s28 = sshll.u32 (%p3294_p4), %s3282_s15, 8 }
  0x13   : > { %1059 = vmatprep.subr.bf16.mxu0 %v3248_v1  ;;  %2893 = vmatprep.subr.bf16.mxu1 %v3248_v1  ;;  %v3023_v12 = vld [vmem:[%s4045_s1 + $0x70] sm:$0xff]   ;;  %v3024_v13 = vld [vmem:[%s4045_s1 + $0x68] sm:$0xff]   ;;  %v3025_v14 = vld [vmem:[%s4045_s1 + $0x60] sm:$0xff]   ;;  %p2029_p8 = scmp.lt.s32.totalorder (%p3294_p4), %s2028_s27, 64 }
  0x14   : > { %s3329_s9 = scalar_lea.vmem %s4044_s0, %s2924_s4  ;;  %v3026_v15 = vld [vmem:[%s4045_s1 + $0x58] sm:$0xff]   ;;  %v3027_v16 = vld [vmem:[%s4045_s1 + $0x50] sm:$0xff]   ;;  %v3028_v17 = vld [vmem:[%s4045_s1 + $0x48] sm:$0xff]   ;;  %s3852_s4 = scalar_lea.vmem (%p3294_p4), %s4047_s3, %s2787_s28  }
  0x15   : > { %v3032_v6 = vld [vmem:[%s3329_s9 + $0x4] ss:$12 sps:$4 sm:$0xff]   ;;  %v3036_v19 = vld [vmem:[%s4045_s1 + $0x88] sm:$0xff]   ;;  %v3043_v27 = vld [vmem:[%s3329_s9 + $0x34] ss:$12 sps:$4 sm:$0xff]  }
  0x16   : > { %1060 = vmatpush1.bf16.msra.mxu0 %v3015_v2  ;;  %2909 = vmatpush1.bf16.msra.mxu1 %v3015_v2  ;;  %v3035_v8 = vld [vmem:[%s3329_s9 + $0x244] ss:$12 sps:$4 sm:$0xff]   ;;  %v3030_v20 = vld [vmem:[%s3329_s9] ss:$12 sps:$4 sm:$0xff]   ;;  %v3037_v22 = vld [vmem:[%s3329_s9 + $0x1c] ss:$12 sps:$4 sm:$0xff]  }
  0x17   : > { %1061 = vmatprep.subr.bf16.mxu0 %v3248_v1  ;;  %2894 = vmatprep.subr.bf16.mxu1 %v3248_v1  ;;  %v3029_v18 = vld [vmem:[%s4045_s1 + $0x40] sm:$0xff]   ;;  %v3039_v23 = vld [vmem:[%s3329_s9 + $0x25c] ss:$12 sps:$4 sm:$0xff]   ;;  %v3049_v31 = vld [vmem:[%s3329_s9 + $0x4c] ss:$12 sps:$4 sm:$0xff]  }
  0x18   : > { %1089 = vmatprep.mubr.bf16.mxu0 %v3032_v6  ;;  %1281 = vmatprep.mubr.bf16.mxu1 %v3035_v8  ;;  %v3033_v21 = vld [vmem:[%s3329_s9 + $0x240] ss:$12 sps:$4 sm:$0xff]   ;;  %v3041_v25 = vld [vmem:[%s3329_s9 + $0x18] ss:$12 sps:$4 sm:$0xff]   ;;  %v3047_v29 = vld [vmem:[%s3329_s9 + $0x30] ss:$12 sps:$4 sm:$0xff]  }
  0x19   : > { %v3061_v24 = vld [vmem:[%s4045_s1 + $0x80] sm:$0xff]   ;;  %v3048_v30 = vld [vmem:[%s3329_s9 + $0x270] ss:$12 sps:$4 sm:$0xff]   ;;  %v3051_v32 = vld [vmem:[%s3329_s9 + $0x28c] ss:$12 sps:$4 sm:$0xff]  }
  0x1a   : > { %1062 = vmatpush1.bf16.msra.mxu0 %v3016_v3  ;;  %2910 = vmatpush1.bf16.msra.mxu1 %v3016_v3  ;;  %v3042_v26 = vld [vmem:[%s3329_s9 + $0x258] ss:$12 sps:$4 sm:$0xff]   ;;  %v3045_v28 = vld [vmem:[%s3329_s9 + $0x274] ss:$12 sps:$4 sm:$0xff]   ;;  %v3062_v39 = vld [vmem:[%s3329_s9 + $0x7c] ss:$12 sps:$4 sm:$0xff]  }
  0x1b   : > { %1063 = vmatprep.subr.bf16.mxu0 %v3248_v1  ;;  %2895 = vmatprep.subr.bf16.mxu1 %v3248_v1  ;;  %v3053_v33 = vld [vmem:[%s3329_s9 + $0x48] ss:$12 sps:$4 sm:$0xff]   ;;  %v3055_v35 = vld [vmem:[%s3329_s9 + $0x64] ss:$12 sps:$4 sm:$0xff]   ;;  %v3059_v37 = vld [vmem:[%s3329_s9 + $0x60] ss:$12 sps:$4 sm:$0xff]  }
  0x1c   : > { %v3054_v34 = vld [vmem:[%s3329_s9 + $0x288] ss:$12 sps:$4 sm:$0xff]   ;;  %v3057_v36 = vld [vmem:[%s3329_s9 + $0x2a4] ss:$12 sps:$4 sm:$0xff]   ;;  %v3060_v38 = vld [vmem:[%s3329_s9 + $0x2a0] ss:$12 sps:$4 sm:$0xff]  }
  0x1d   : > { %v3064_v40 = vld [vmem:[%s3329_s9 + $0x2bc] ss:$12 sps:$4 sm:$0xff]   ;;  %v3066_v41 = vld [vmem:[%s3329_s9 + $0x78] ss:$12 sps:$4 sm:$0xff]   ;;  %v3068_v43 = vld [vmem:[%s3329_s9 + $0x94] ss:$12 sps:$4 sm:$0xff]  }
  0x1e   : > { %1064 = vmatpush1.bf16.msra.mxu0 %v3017_v4  ;;  %2911 = vmatpush1.bf16.msra.mxu1 %v3017_v4  ;;  %v3067_v42 = vld [vmem:[%s3329_s9 + $0x2b8] ss:$12 sps:$4 sm:$0xff]   ;;  %v3070_v44 = vld [vmem:[%s3329_s9 + $0x2d4] ss:$12 sps:$4 sm:$0xff]   ;;  %v3072_v45 = vld [vmem:[%s3329_s9 + $0x90] ss:$12 sps:$4 sm:$0xff]  }
  0x1f   : > { %1065 = vmatprep.subr.bf16.mxu0 %v3248_v1  ;;  %2896 = vmatprep.subr.bf16.mxu1 %v3248_v1  ;;  %v3073_v46 = vld [vmem:[%s3329_s9 + $0x2d0] ss:$12 sps:$4 sm:$0xff]   ;;  %v3074_v47 = vld [vmem:[%s3329_s9 + $0xac] ss:$12 sps:$4 sm:$0xff]   ;;  %v3078_v49 = vld [vmem:[%s3329_s9 + $0xa8] ss:$12 sps:$4 sm:$0xff]  }
  0x20   : > { %v3076_v48 = vld [vmem:[%s3329_s9 + $0x2ec] ss:$12 sps:$4 sm:$0xff]   ;;  %v3079_v50 = vld [vmem:[%s3329_s9 + $0x2e8] ss:$12 sps:$4 sm:$0xff]   ;;  %v3080_v51 = vld [vmem:[%s3329_s9 + $0xc4] ss:$12 sps:$4 sm:$0xff]  }
  0x21   : > { %v3082_v52 = vld [vmem:[%s3329_s9 + $0x8] ss:$12 sps:$4 sm:$0xff]   ;;  %v3083_v53 = vld [vmem:[%s3329_s9 + $0xc0] ss:$12 sps:$4 sm:$0xff]   ;;  %v3087_v56 = vld [vmem:[%s3329_s9 + $0x38] ss:$12 sps:$4 sm:$0xff]  }
  0x22   : > { %1066 = vmatpush1.bf16.msra.mxu0 %v3018_v5  ;;  %2912 = vmatpush1.bf16.msra.mxu1 %v3018_v5  ;;  %v3084_v54 = vld [vmem:[%s3329_s9 + $0x20] ss:$12 sps:$4 sm:$0xff]   ;;  %v3085_v55 = vld [vmem:[%s3329_s9 + $0xdc] ss:$12 sps:$4 sm:$0xff]   ;;  %v3088_v57 = vld [vmem:[%s3329_s9 + $0xd8] ss:$12 sps:$4 sm:$0xff]  }
  0x23   : > { %1067 = vmatprep.subr.bf16.mxu0 %v3248_v1  ;;  %2897 = vmatprep.subr.bf16.mxu1 %v3248_v1  ;;  %v3089_v58 = vld [vmem:[%s3329_s9 + $0x50] ss:$12 sps:$4 sm:$0xff]   ;;  %v3090_v59 = vld [vmem:[%s3329_s9 + $0xf4] ss:$12 sps:$4 sm:$0xff]   ;;  %v3095_v63 = vld [vmem:[%s3329_s9 + $0x10c] ss:$12 sps:$4 sm:$0xff]  }
  0x24   : > { %v3092_v60 = vld [vmem:[%s3329_s9 + $0x68] ss:$12 sps:$4 sm:$0xff]   ;;  %v3093_v61 = vld [vmem:[%s3329_s9 + $0xf0] ss:$12 sps:$4 sm:$0xff]   ;;  %v3094_v62 = vld [vmem:[%s3329_s9 + $0x80] ss:$12 sps:$4 sm:$0xff]  }
  0x25   : > { %v3097_v0 = vld [vmem:[%s3329_s9 + $0x98] ss:$12 sps:$4 sm:$0xff]   ;;  %v3099_v2 = vld [vmem:[%s3329_s9 + $0xb0] ss:$12 sps:$4 sm:$0xff]   ;;  %v3102_v4 = vld [vmem:[%s3329_s9 + $0xc8] ss:$12 sps:$4 sm:$0xff]  }
  0x26   : > { %1068 = vmatpush1.bf16.msra.mxu0 %v3019_v7  ;;  %2913 = vmatpush1.bf16.msra.mxu1 %v3019_v7  ;;  %v3100_v3 = vld [vmem:[%s3329_s9 + $0x124] ss:$12 sps:$4 sm:$0xff]   ;;  %v3103_v5 = vld [vmem:[%s3329_s9 + $0x120] ss:$12 sps:$4 sm:$0xff]   ;;  %v3105_v7 = vld [vmem:[%s3329_s9 + $0x13c] ss:$12 sps:$4 sm:$0xff]  }
  0x27   : > { %1069 = vmatprep.subr.bf16.mxu0 %v3248_v1  ;;  %2898 = vmatprep.subr.bf16.mxu1 %v3248_v1  ;;  %v3104_v6 = vld [vmem:[%s3329_s9 + $0xe0] ss:$12 sps:$4 sm:$0xff]   ;;  %v3107_v8 = vld [vmem:[%s3329_s9 + $0xf8] ss:$12 sps:$4 sm:$0xff]  }
  0x2a   : > { %1070 = vmatpush1.bf16.msra.mxu0 %v3020_v9  ;;  %2914 = vmatpush1.bf16.msra.mxu1 %v3020_v9  ;;  %v3108_v9 = vld [vmem:[%s3329_s9 + $0x138] ss:$12 sps:$4 sm:$0xff]  }
  0x2b   : > { %1071 = vmatprep.subr.bf16.mxu0 %v3248_v1  ;;  %2899 = vmatprep.subr.bf16.mxu1 %v3248_v1 }
  0x2e   : > { %1072 = vmatpush1.bf16.msra.mxu0 %v3021_v10  ;;  %2915 = vmatpush1.bf16.msra.mxu1 %v3021_v10  ;;  %v3109_v10 = vld [vmem:[%s3329_s9 + $0x110] ss:$12 sps:$4 sm:$0xff]  }
  0x2f   : > { %1073 = vmatprep.subr.bf16.mxu0 %v3248_v1  ;;  %2900 = vmatprep.subr.bf16.mxu1 %v3248_v1 }
  0x32   : > { %1074 = vmatpush2.bf16.msra.mxu0 %v3022_v11  ;;  %2916 = vmatpush2.bf16.msra.mxu1 %v3022_v11  ;;  %v3110_v11 = vld [vmem:[%s3329_s9 + $0x154] ss:$12 sps:$4 sm:$0xff]  }
  0x33   : > { %1075 = vmatprep.subr.bf16.mxu0 %v3248_v1  ;;  %2901 = vmatprep.subr.bf16.mxu1 %v3248_v1 }
  0x36   : > { %1076 = vmatpush2.bf16.msra.mxu0 %v3023_v12  ;;  %2917 = vmatpush2.bf16.msra.mxu1 %v3023_v12  ;;  %v3112_v12 = vld [vmem:[%s3329_s9 + $0x128] ss:$12 sps:$4 sm:$0xff]  }
  0x37   : > { %1077 = vmatprep.subr.bf16.mxu0 %v3248_v1  ;;  %2902 = vmatprep.subr.bf16.mxu1 %v3248_v1 }
  0x3a   : > { %1078 = vmatpush2.bf16.msra.mxu0 %v3024_v13  ;;  %2918 = vmatpush2.bf16.msra.mxu1 %v3024_v13  ;;  %v3113_v13 = vld [vmem:[%s3329_s9 + $0x150] ss:$12 sps:$4 sm:$0xff]  }
  0x3b   : > { %1079 = vmatprep.subr.bf16.mxu0 %v3248_v1  ;;  %2903 = vmatprep.subr.bf16.mxu1 %v3248_v1 }
  0x3e   : > { %1080 = vmatpush2.bf16.msra.mxu0 %v3025_v14  ;;  %2919 = vmatpush2.bf16.msra.mxu1 %v3025_v14  ;;  %v3114_v14 = vld [vmem:[%s3329_s9 + $0x140] ss:$12 sps:$4 sm:$0xff]  }
  0x3f   : > { %1081 = vmatprep.subr.bf16.mxu0 %v3248_v1  ;;  %2904 = vmatprep.subr.bf16.mxu1 %v3248_v1 }
  0x42   : > { %1082 = vmatpush2.bf16.msra.mxu0 %v3026_v15  ;;  %2920 = vmatpush2.bf16.msra.mxu1 %v3026_v15  ;;  %v3115_v15 = vld [vmem:[%s3329_s9 + $0x16c] ss:$12 sps:$4 sm:$0xff]  }
  0x43   : > { %1083 = vmatprep.subr.bf16.mxu0 %v3248_v1  ;;  %2905 = vmatprep.subr.bf16.mxu1 %v3248_v1 }
  0x46   : > { %1084 = vmatpush2.bf16.msra.mxu0 %v3027_v16  ;;  %2921 = vmatpush2.bf16.msra.mxu1 %v3027_v16  ;;  %v3117_v16 = vld [vmem:[%s3329_s9 + $0x158] ss:$12 sps:$4 sm:$0xff]  }
  0x47   : > { %1085 = vmatprep.subr.bf16.mxu0 %v3248_v1  ;;  %2906 = vmatprep.subr.bf16.mxu1 %v3248_v1 }
  0x4a   : > { %1086 = vmatpush2.bf16.msra.mxu0 %v3028_v17  ;;  %2922 = vmatpush2.bf16.msra.mxu1 %v3028_v17  ;;  %v3118_v17 = vld [vmem:[%s3329_s9 + $0x168] ss:$12 sps:$4 sm:$0xff]  }
  0x4b   : > { %1087 = vmatprep.subr.bf16.mxu0 %v3248_v1  ;;  %2907 = vmatprep.subr.bf16.mxu1 %v3248_v1  ;;  %v3098_v1 = vld [vmem:[%s3329_s9 + $0x108] ss:$12 sps:$4 sm:$0xff]  }
  0x4e   : > { %1088 = vmatpush2.bf16.msra.mxu0 %v3029_v18  ;;  %2923 = vmatpush2.bf16.msra.mxu1 %v3029_v18  ;;  %v3119_v18 = vld [vmem:[%s3329_s9 + $0x170] ss:$12 sps:$4 sm:$0xff]  }
  0x4f   : > { %2824 = vmatprep.subr.bf16.mxu1 %v3036_v19 }
  0x51   : > { %1090 = vmatmul.mubr.bf16.vlgmr.msra.gmra.mxu0 %v3030_v20  ;;  %1282 = vmatmul.mubr.bf16.vlgmr.msra.gmra.mxu1 %v3033_v21  ;;  %v3122_v20 = vld [vmem:[%s3329_s9 + $0x188] ss:$12 sps:$4 sm:$0xff]   ;;  %v3123_v21 = vld [vmem:[%s3329_s9 + $0x180] ss:$12 sps:$4 sm:$0xff]  }
  0x52   : > { %2825 = vmatpush3.bf16.msra.mxu1 %v3036_v19  ;;  %1097 = vmatprep.mubr.bf16.mxu0 %v3037_v22  ;;  %v3120_v19 = vld [vmem:[%s3329_s9 + $0x184] ss:$12 sps:$4 sm:$0xff]   ;;  %v3124_v22 = vld [vmem:[%s3329_s9 + $0x1a0] ss:$12 sps:$4 sm:$0xff]  }
  0x53   : > { %1289 = vmatprep.mubr.bf16.mxu1 %v3039_v23  ;;  %2826 = vmatprep.subr.bf16.mxu1 %v3061_v24  ;;  %v3125_v23 = vld [vmem:[%s3329_s9 + $0x19c] ss:$12 sps:$4 sm:$0xff]  }
  0x56   : > { %2827 = vmatpush3.bf16.msra.mxu1 %v3061_v24  ;;  %v3127_v24 = vld [vmem:[%s3329_s9 + $0x1b8] ss:$12 sps:$4 sm:$0xff]  }
  0x59   : > { %1098 = vmatmul.mubr.bf16.gmra.mxu0 %v3041_v25  ;;  %1290 = vmatmul.mubr.bf16.gmra.mxu1 %v3042_v26  ;;  %v3128_v25 = vld [vmem:[%s3329_s9 + $0x198] ss:$12 sps:$4 sm:$0xff]   ;;  %v3129_v26 = vld [vmem:[%s3329_s9 + $0x1d0] ss:$12 sps:$4 sm:$0xff]  }
  0x5a   : > { %1105 = vmatprep.mubr.bf16.mxu0 %v3043_v27  ;;  %1297 = vmatprep.mubr.bf16.mxu1 %v3045_v28  ;;  %v3130_v27 = vld [vmem:[%s3329_s9 + $0x1b4] ss:$12 sps:$4 sm:$0xff]  }
  0x5b   : > { %v3132_v28 = vld [vmem:[%s3329_s9 + $0x1e8] ss:$12 sps:$4 sm:$0xff]  }
  0x61   : > { %1106 = vmatmul.mubr.bf16.gmra.mxu0 %v3047_v29  ;;  %1298 = vmatmul.mubr.bf16.gmra.mxu1 %v3048_v30  ;;  %v3133_v29 = vld [vmem:[%s3329_s9 + $0x1b0] ss:$12 sps:$4 sm:$0xff]   ;;  %v3134_v30 = vld [vmem:[%s3329_s9 + $0x200] ss:$12 sps:$4 sm:$0xff]  }
  0x62   : > { %1113 = vmatprep.mubr.bf16.mxu0 %v3049_v31  ;;  %1305 = vmatprep.mubr.bf16.mxu1 %v3051_v32  ;;  %v3135_v31 = vld [vmem:[%s3329_s9 + $0x1cc] ss:$12 sps:$4 sm:$0xff]  }
  0x63   : > { %v3137_v32 = vld [vmem:[%s3329_s9 + $0x218] ss:$12 sps:$4 sm:$0xff]  }
  0x69   : > { %1114 = vmatmul.mubr.bf16.gmra.mxu0 %v3053_v33  ;;  %1306 = vmatmul.mubr.bf16.gmra.mxu1 %v3054_v34  ;;  %v3138_v33 = vld [vmem:[%s3329_s9 + $0x1c8] ss:$12 sps:$4 sm:$0xff]   ;;  %v3139_v34 = vld [vmem:[%s3329_s9 + $0x230] ss:$12 sps:$4 sm:$0xff]  }
  0x6a   : > { %1121 = vmatprep.mubr.bf16.mxu0 %v3055_v35  ;;  %1313 = vmatprep.mubr.bf16.mxu1 %v3057_v36  ;;  %v3140_v35 = vld [vmem:[%s3329_s9 + $0x1e4] ss:$12 sps:$4 sm:$0xff]   ;;  %v3142_v36 = vld [vmem:[%s3329_s9 + $0x248] ss:$12 sps:$4 sm:$0xff]  }
  0x71   : > { %1122 = vmatmul.mubr.bf16.gmra.mxu0 %v3059_v37  ;;  %1314 = vmatmul.mubr.bf16.gmra.mxu1 %v3060_v38  ;;  %v3143_v37 = vld [vmem:[%s3329_s9 + $0x1e0] ss:$12 sps:$4 sm:$0xff]  }
  0x72   : > { %1129 = vmatprep.mubr.bf16.mxu0 %v3062_v39  ;;  %1321 = vmatprep.mubr.bf16.mxu1 %v3064_v40  ;;  %v3144_v38 = vld [vmem:[%s3329_s9 + $0x260] ss:$12 sps:$4 sm:$0xff]   ;;  %v3145_v39 = vld [vmem:[%s3329_s9 + $0x1fc] ss:$12 sps:$4 sm:$0xff]   ;;  %v3147_v40 = vld [vmem:[%s3329_s9 + $0x278] ss:$12 sps:$4 sm:$0xff]  }
  0x79   : > { %1130 = vmatmul.mubr.bf16.gmra.mxu0 %v3066_v41  ;;  %1322 = vmatmul.mubr.bf16.gmra.mxu1 %v3067_v42  ;;  %v3148_v41 = vld [vmem:[%s3329_s9 + $0x1f8] ss:$12 sps:$4 sm:$0xff]   ;;  %v3149_v42 = vld [vmem:[%s3329_s9 + $0x290] ss:$12 sps:$4 sm:$0xff]  }
  0x7a   : > { %1137 = vmatprep.mubr.bf16.mxu0 %v3068_v43  ;;  %1329 = vmatprep.mubr.bf16.mxu1 %v3070_v44  ;;  %v3150_v43 = vld [vmem:[%s3329_s9 + $0x214] ss:$12 sps:$4 sm:$0xff]  }
  0x7b   : > { %v3152_v44 = vld [vmem:[%s3329_s9 + $0x2a8] ss:$12 sps:$4 sm:$0xff]  }
  0x81   : > { %1138 = vmatmul.mubr.bf16.gmra.mxu0 %v3072_v45  ;;  %1330 = vmatmul.mubr.bf16.gmra.mxu1 %v3073_v46  ;;  %v3153_v45 = vld [vmem:[%s3329_s9 + $0x210] ss:$12 sps:$4 sm:$0xff]   ;;  %v3154_v46 = vld [vmem:[%s3329_s9 + $0x2c0] ss:$12 sps:$4 sm:$0xff]  }
  0x82   : > { %1145 = vmatprep.mubr.bf16.mxu0 %v3074_v47  ;;  %1337 = vmatprep.mubr.bf16.mxu1 %v3076_v48  ;;  %v3155_v47 = vld [vmem:[%s3329_s9 + $0x22c] ss:$12 sps:$4 sm:$0xff]  }
  0x83   : > { %v3157_v48 = vld [vmem:[%s3329_s9 + $0x2d8] ss:$12 sps:$4 sm:$0xff]  }
  0x89   : > { %1146 = vmatmul.mubr.bf16.gmra.mxu0 %v3078_v49  ;;  %1338 = vmatmul.mubr.bf16.gmra.mxu1 %v3079_v50  ;;  %v3158_v49 = vld [vmem:[%s3329_s9 + $0x228] ss:$12 sps:$4 sm:$0xff]   ;;  %v3159_v50 = vld [vmem:[%s3329_s9 + $0x2f0] ss:$12 sps:$4 sm:$0xff]  }
  0x8a   : > { %1153 = vmatprep.mubr.bf16.mxu0 %v3080_v51  ;;  %2828 = vmatprep.mubr.msk.bf16.mxu1 %vm960_vm0, %v3082_v52 }
  0x91   : > { %1154 = vmatmul.mubr.bf16.gmra.mxu0 %v3083_v53  ;;  %2829 = vmatmul.mubr.msk.bf16.vlgmr.msra.gmra.mxu1 %vm960_vm0, %v3084_v54 }
  0x92   : > { %1161 = vmatprep.mubr.bf16.mxu0 %v3085_v55  ;;  %2832 = vmatprep.mubr.msk.bf16.mxu1 %vm960_vm0, %v3087_v56 }
  0x99   : > { %1162 = vmatmul.mubr.bf16.gmra.mxu0 %v3088_v57  ;;  %2833 = vmatmul.mubr.msk.bf16.gmra.mxu1 %vm960_vm0, %v3089_v58 }
  0x9a   : > { %1169 = vmatprep.mubr.bf16.mxu0 %v3090_v59  ;;  %2836 = vmatprep.mubr.msk.bf16.mxu1 %vm960_vm0, %v3092_v60 }
  0xa1   : > { %1170 = vmatmul.mubr.bf16.gmra.mxu0 %v3093_v61  ;;  %2837 = vmatmul.mubr.msk.bf16.gmra.mxu1 %vm960_vm0, %v3094_v62 }
  0xa2   : > { %1177 = vmatprep.mubr.bf16.mxu0 %v3095_v63  ;;  %2840 = vmatprep.mubr.msk.bf16.mxu1 %vm960_vm0, %v3097_v0 }
  0xa9   : > { %1178 = vmatmul.mubr.bf16.gmra.mxu0 %v3098_v1  ;;  %2841 = vmatmul.mubr.msk.bf16.gmra.mxu1 %vm960_vm0, %v3099_v2 }
  0xaa   : > { %1185 = vmatprep.mubr.bf16.mxu0 %v3100_v3  ;;  %2844 = vmatprep.mubr.msk.bf16.mxu1 %vm960_vm0, %v3102_v4 }
  0xb1   : > { %1186 = vmatmul.mubr.bf16.gmra.mxu0 %v3103_v5  ;;  %2845 = vmatmul.mubr.msk.bf16.gmra.mxu1 %vm960_vm0, %v3104_v6 }
  0xb2   : > { %1193 = vmatprep.mubr.bf16.mxu0 %v3105_v7  ;;  %2848 = vmatprep.mubr.msk.bf16.mxu1 %vm960_vm0, %v3107_v8 }
  0xb9   : > { %1194 = vmatmul.mubr.bf16.gmra.mxu0 %v3108_v9  ;;  %2849 = vmatmul.mubr.msk.bf16.gmra.mxu1 %vm960_vm0, %v3109_v10 }
  0xba   : > { %1201 = vmatprep.mubr.bf16.mxu0 %v3110_v11  ;;  %2852 = vmatprep.mubr.msk.bf16.mxu1 %vm960_vm0, %v3112_v12 }
  0xc1   : > { %1202 = vmatmul.mubr.bf16.gmra.mxu0 %v3113_v13  ;;  %2853 = vmatmul.mubr.msk.bf16.gmra.mxu1 %vm960_vm0, %v3114_v14 }
  0xc2   : > { %1209 = vmatprep.mubr.bf16.mxu0 %v3115_v15  ;;  %2856 = vmatprep.mubr.msk.bf16.mxu1 %vm960_vm0, %v3117_v16 }
  0xc9   : > { %1210 = vmatmul.mubr.bf16.gmra.mxu0 %v3118_v17  ;;  %2857 = vmatmul.mubr.msk.bf16.gmra.mxu1 %vm960_vm0, %v3119_v18 }
  0xca   : > { %1217 = vmatprep.mubr.bf16.mxu0 %v3120_v19  ;;  %2860 = vmatprep.mubr.msk.bf16.mxu1 %vm960_vm0, %v3122_v20 }
  0xd1   : > { %1218 = vmatmul.mubr.bf16.gmra.mxu0 %v3123_v21  ;;  %2861 = vmatmul.mubr.msk.bf16.gmra.mxu1 %vm960_vm0, %v3124_v22 }
  0xd2   : > { %1225 = vmatprep.mubr.bf16.mxu0 %v3125_v23  ;;  %2864 = vmatprep.mubr.msk.bf16.mxu1 %vm960_vm0, %v3127_v24 }
  0xd9   : > { %1226 = vmatmul.mubr.bf16.gmra.mxu0 %v3128_v25  ;;  %2865 = vmatmul.mubr.msk.bf16.gmra.mxu1 %vm960_vm0, %v3129_v26 }
  0xda   : > { %1233 = vmatprep.mubr.bf16.mxu0 %v3130_v27  ;;  %2868 = vmatprep.mubr.msk.bf16.mxu1 %vm960_vm0, %v3132_v28 }
  0xe1   : > { %1234 = vmatmul.mubr.bf16.gmra.mxu0 %v3133_v29  ;;  %2869 = vmatmul.mubr.msk.bf16.gmra.mxu1 %vm960_vm0, %v3134_v30 }
  0xe2   : > { %1241 = vmatprep.mubr.bf16.mxu0 %v3135_v31  ;;  %2872 = vmatprep.mubr.msk.bf16.mxu1 %vm960_vm0, %v3137_v32 }
  0xe9   : > { %1242 = vmatmul.mubr.bf16.gmra.mxu0 %v3138_v33  ;;  %2873 = vmatmul.mubr.msk.bf16.gmra.mxu1 %vm960_vm0, %v3139_v34 }
  0xea   : > { %1249 = vmatprep.mubr.bf16.mxu0 %v3140_v35  ;;  %2876 = vmatprep.mubr.msk.bf16.mxu1 %vm960_vm0, %v3142_v36 }
  0xf1   : > { %1250 = vmatmul.mubr.bf16.gmra.mxu0 %v3143_v37  ;;  %2877 = vmatmul.mubr.msk.bf16.gmra.mxu1 %vm960_vm0, %v3144_v38 }
  0xf2   : > { %1257 = vmatprep.mubr.bf16.mxu0 %v3145_v39  ;;  %2880 = vmatprep.mubr.msk.bf16.mxu1 %vm960_vm0, %v3147_v40 }
  0xf9   : > { %1258 = vmatmul.mubr.bf16.gmra.mxu0 %v3148_v41  ;;  %2881 = vmatmul.mubr.msk.bf16.gmra.mxu1 %vm960_vm0, %v3149_v42 }
  0xfa   : > { %1265 = vmatprep.mubr.bf16.mxu0 %v3150_v43  ;;  %2884 = vmatprep.mubr.msk.bf16.mxu1 %vm960_vm0, %v3152_v44 }
 0x101   : > { %1266 = vmatmul.mubr.bf16.gmra.mxu0 %v3153_v45  ;;  %2885 = vmatmul.mubr.msk.bf16.gmra.mxu1 %vm960_vm0, %v3154_v46 }
 0x102   : > { %1273 = vmatprep.mubr.bf16.mxu0 %v3155_v47  ;;  %2888 = vmatprep.mubr.msk.bf16.mxu1 %vm960_vm0, %v3157_v48 }
 0x109   : > { %1274 = vmatmul.mubr.bf16.gmra.mxu0 %v3158_v49  ;;  %2889 = vmatmul.mubr.msk.bf16.gmra.mxu1 %vm960_vm0, %v3159_v50  ;;  %v3583_v49 = vld [vmem:[%s4046_s2] ss:$0 sm:$0xff] }
 0x111   : > { %v3522_v51 = vpop.f32.mrf.mxu0  ;;  %v3524_v52 = vpop.f32.mrf.mxu1 }
 0x113   : > { %v1093_v53 = vpop.f32.mrf.mxu0  ;;  %v1285_v54 = vpop.f32.mrf.mxu1 }
 0x115   : > { %v3526_v55 = vpop.f32.mrf.mxu0  ;;  %v3528_v56 = vpop.f32.mrf.mxu1 }
 0x117   : > { %v1096_v57 = vpop.f32.mrf.mxu0  ;;  %v1288_v58 = vpop.f32.mrf.mxu1 }
 0x119   : > { %v1099_v59 = vpop.f32.mrf.mxu0  ;;  %v3530_v60 = vpop.f32.mrf.mxu1 }
 0x11a   : > { %v1100_v54 = vadd.f32 %v3583_v49, %v1099_v59  ;;  %v1095_v59 = vadd.f32 %v3583_v49, %v3526_v55 }
 0x11b   : > { %v1101_v61 = vpop.f32.mrf.mxu0  ;;  %v1293_v62 = vpop.f32.mrf.mxu1 }
 0x11c   : > { %v1092_v61 = vadd.f32 %v3583_v49, %v3522_v51 }
 0x11d   : > { %v1102_v63 = vpop.f32.mrf.mxu0  ;;  %v3532_v0 = vpop.f32.mrf.mxu1 }
 0x11f   : > { %v1104_v1 = vpop.f32.mrf.mxu0  ;;  %v1296_v2 = vpop.f32.mrf.mxu1 }
 0x121   : > { %v3534_v3 = vpop.f32.mrf.mxu0  ;;  %v3536_v4 = vpop.f32.mrf.mxu1 }
 0x123   : > { %v1109_v5 = vpop.f32.mrf.mxu0  ;;  %v1301_v6 = vpop.f32.mrf.mxu1 }
 0x124   : > { %v1103_v5 = vadd.f32 %v3583_v49, %v1102_v63 }
 0x125   : > { %v3538_v7 = vpop.f32.mrf.mxu0  ;;  %v3540_v8 = vpop.f32.mrf.mxu1 }
 0x127   : > { %v1112_v9 = vpop.f32.mrf.mxu0  ;;  %v1304_v10 = vpop.f32.mrf.mxu1 }
 0x129   : > { %v1115_v11 = vpop.f32.mrf.mxu0  ;;  %v3542_v12 = vpop.f32.mrf.mxu1 }
 0x12b   : > { %v1117_v13 = vpop.f32.mrf.mxu0  ;;  %v1309_v14 = vpop.f32.mrf.mxu1 }
 0x12d   : > { %v3544_v15 = vpop.f32.mrf.mxu0  ;;  %v3546_v16 = vpop.f32.mrf.mxu1 }
 0x12f   : > { %v1120_v17 = vpop.f32.mrf.mxu0  ;;  %v1312_v18 = vpop.f32.mrf.mxu1 }
 0x131   : > { %v3548_v19 = vpop.f32.mrf.mxu0  ;;  %v3550_v20 = vpop.f32.mrf.mxu1 }
 0x133   : > { %v1125_v21 = vpop.f32.mrf.mxu0  ;;  %v1317_v22 = vpop.f32.mrf.mxu1 }
 0x134   : > { %v1116_v22 = vadd.f32 %v3583_v49, %v1115_v11 }
 0x135   : > { %v3552_v23 = vpop.f32.mrf.mxu0  ;;  %v3554_v24 = vpop.f32.mrf.mxu1 }
 0x137   : > { %v1128_v25 = vpop.f32.mrf.mxu0  ;;  %v1320_v26 = vpop.f32.mrf.mxu1 }
 0x139   : > { %v3556_v27 = vpop.f32.mrf.mxu0  ;;  %v3558_v28 = vpop.f32.mrf.mxu1 }
 0x13b   : > { %v1133_v29 = vpop.f32.mrf.mxu0  ;;  %v1325_v30 = vpop.f32.mrf.mxu1 }
 0x13c   : > { %v1108_v30 = vadd.f32 %v3583_v49, %v3534_v3  ;;  %v1111_v3 = vadd.f32 %v3583_v49, %v3538_v7  ;;  %v1124_v7 = vadd.f32 %v3583_v49, %v3548_v19  ;;  %v1127_v19 = vadd.f32 %v3583_v49, %v3552_v23 }
 0x13d   : > { %v3560_v31 = vpop.f32.mrf.mxu0  ;;  %v3562_v32 = vpop.f32.mrf.mxu1 }
 0x13f   : > { %v1136_v33 = vpop.f32.mrf.mxu0  ;;  %v1328_v34 = vpop.f32.mrf.mxu1 }
 0x141   : > { %v3564_v35 = vpop.f32.mrf.mxu0  ;;  %v3566_v36 = vpop.f32.mrf.mxu1 }
 0x142   : > { %v1140_v23 = vadd.f32 %v3583_v49, %v3564_v35 }
 0x143   : > { %v1141_v37 = vpop.f32.mrf.mxu0  ;;  %v1333_v38 = vpop.f32.mrf.mxu1 }
 0x145   : > { %v3568_v39 = vpop.f32.mrf.mxu0  ;;  %v3570_v40 = vpop.f32.mrf.mxu1 }
 0x146   : > { %v1143_v35 = vadd.f32 %v3583_v49, %v3568_v39 }
 0x147   : > { %v1144_v41 = vpop.f32.mrf.mxu0  ;;  %v1336_v42 = vpop.f32.mrf.mxu1 }
 0x148   : > { %v1119_v41 = vadd.f32 %v3583_v49, %v3544_v15  ;;  %v1132_v15 = vadd.f32 %v3583_v49, %v3556_v27  ;;  %v1135_v27 = vadd.f32 %v3583_v49, %v3560_v31 }
 0x149   : > { %v3572_v43 = vpop.f32.mrf.mxu0  ;;  %v3574_v44 = vpop.f32.mrf.mxu1 }
 0x14a   : > { %v1148_v31 = vadd.f32 %v3583_v49, %v3572_v43 }
 0x14b   : > { %v1149_v45 = vpop.f32.mrf.mxu0  ;;  %v1341_v46 = vpop.f32.mrf.mxu1 }
 0x14d   : > { %v3576_v47 = vpop.f32.mrf.mxu0  ;;  %v3578_v48 = vpop.f32.mrf.mxu1 }
 0x14e   : > { %v1151_v43 = vadd.f32 %v3583_v49, %v3576_v47 }
 0x14f   : > { %v1152_v50 = vpop.f32.mrf.mxu0  ;;  %v1344_v53 = vpop.f32.mrf.mxu1 }
 0x151   : > { %v3587_v57 = vpop.f32.mrf.mxu0  ;;  %v2830_v58 = vpop.f32.mrf.mxu1 }
 0x152   : > { %v1389_v62 = vadd.f32 %v2830_v58, %v1100_v54  ;;  %v1156_v39 = vadd.f32 %v3583_v49, %v3587_v57 }
 0x153   : > { %v1157_v1 = vpop.f32.mrf.mxu0  ;;  %v1380_v2 = vpop.f32.mrf.mxu1 }
 0x154   : > { %v1637_v6 = vmax.f32 %v1389_v62, 0.0  ;;  %v1381_v9 = vadd.f32 %v1380_v2, %v1092_v61 }
 0x155   : > { %v3592_v10 = vpop.f32.mrf.mxu0  ;;  %v2831_v13 = vpop.f32.mrf.mxu1 }
 0x156   : > { %v2725_v14 = vpack.c.bf16 %v1637_v6, %v1637_v6  ;;  %v1635_v17 = vmax.f32 %v1381_v9, 0.0  ;;  %v1392_v18 = vadd.f32 %v2831_v13, %v1103_v5  ;;  %v1159_v57 = vadd.f32 %v3583_v49, %v3592_v10 }
 0x157   : > { %v1160_v21 = vpop.f32.mrf.mxu0  ;;  %v1383_v51 = vpop.f32.mrf.mxu1 }
 0x158   : > { %1958 = vst.msk [vmem:[%s3597_s12 + $0x8] sm:$0xf] %vm1955_vm1, %v2725_v14  ;;  %v2723_v63 = vpack.c.bf16 %v1635_v17, %v1635_v17  ;;  %v1638_v25 = vmax.f32 %v1392_v18, 0.0  ;;  %v1384_v26 = vadd.f32 %v1383_v51, %v1095_v59 }
 0x159   : > { %v3601_v29 = vpop.f32.mrf.mxu0  ;;  %v2834_v55 = vpop.f32.mrf.mxu1 }
 0x15a   : > { %1956 = vst.msk [vmem:[%s3597_s12] sm:$0xf] %vm1955_vm1, %v2723_v63  ;;  %v2726_v11 = vpack.c.bf16 %v1638_v25, %v1638_v25  ;;  %v1636_v33 = vmax.f32 %v1384_v26, 0.0  ;;  %v1405_v34 = vadd.f32 %v2834_v55, %v1116_v22  ;;  %v1164_v47 = vadd.f32 %v3583_v49, %v3601_v29 }
 0x15b   : > { %v1165_v37 = vpop.f32.mrf.mxu0  ;;  %v1396_v38 = vpop.f32.mrf.mxu1 }
 0x15c   : > { %1959 = vst.msk [vmem:[%s3597_s12 + $0xc] sm:$0xf] %vm1955_vm1, %v2726_v11  ;;  %v2724_v42 = vpack.c.bf16 %v1636_v33, %v1636_v33  ;;  %v1641_v45 = vmax.f32 %v1405_v34, 0.0  ;;  %v1397_v46 = vadd.f32 %v1396_v38, %v1108_v30 }
 0x15d   : > { %v3611_v50 = vpop.f32.mrf.mxu0  ;;  %v2835_v53 = vpop.f32.mrf.mxu1 }
 0x15e   : > { %1957 = vst.msk [vmem:[%s3597_s12 + $0x4] sm:$0xf] %vm1955_vm1, %v2724_v42  ;;  %v2729_v54 = vpack.c.bf16 %v1641_v45, %v1641_v45  ;;  %v1639_v58 = vmax.f32 %v1397_v46, 0.0  ;;  %v1408_v61 = vadd.f32 %v2835_v53, %v1119_v41  ;;  %v1167_v29 = vadd.f32 %v3583_v49, %v3611_v50 }
 0x15f   : > { %v1168_v62 = vpop.f32.mrf.mxu0  ;;  %v1399_v1 = vpop.f32.mrf.mxu1 }
 0x160   : > { %1962 = vst.msk [vmem:[%s3597_s12 + $0x18] sm:$0xf] %vm1955_vm1, %v2729_v54  ;;  %v2727_v2 = vpack.c.bf16 %v1639_v58, %v1639_v58  ;;  %v1642_v5 = vmax.f32 %v1408_v61, 0.0  ;;  %v1400_v6 = vadd.f32 %v1399_v1, %v1111_v3 }
 0x161   : > { %v3621_v9 = vpop.f32.mrf.mxu0  ;;  %v2838_v13 = vpop.f32.mrf.mxu1 }
 0x162   : > { %1960 = vst.msk [vmem:[%s3597_s12 + $0x10] sm:$0xf] %vm1955_vm1, %v2727_v2  ;;  %v2730_v59 = vpack.c.bf16 %v1642_v5, %v1642_v5  ;;  %v1640_v14 = vmax.f32 %v1400_v6, 0.0  ;;  %v1421_v17 = vadd.f32 %v2838_v13, %v1132_v15  ;;  %v1172_v10 = vadd.f32 %v3583_v49, %v3621_v9 }
 0x163   : > { %v1173_v18 = vpop.f32.mrf.mxu0  ;;  %v1412_v21 = vpop.f32.mrf.mxu1 }
 0x164   : > { %1963 = vst.msk [vmem:[%s3597_s12 + $0x1c] sm:$0xf] %vm1955_vm1, %v2730_v59  ;;  %v2728_v51 = vpack.c.bf16 %v1640_v14, %v1640_v14  ;;  %v1645_v22 = vmax.f32 %v1421_v17, 0.0  ;;  %v1413_v63 = vadd.f32 %v1412_v21, %v1124_v7 }
 0x165   : > { %v3631_v25 = vpop.f32.mrf.mxu0  ;;  %v2839_v26 = vpop.f32.mrf.mxu1 }
 0x166   : > { %1961 = vst.msk [vmem:[%s3597_s12 + $0x14] sm:$0xf] %vm1955_vm1, %v2728_v51  ;;  %v2733_v55 = vpack.c.bf16 %v1645_v22, %v1645_v22  ;;  %v1643_v30 = vmax.f32 %v1413_v63, 0.0  ;;  %v1424_v11 = vadd.f32 %v2839_v26, %v1135_v27  ;;  %v1175_v9 = vadd.f32 %v3583_v49, %v3631_v25 }
 0x167   : > { %v1176_v33 = vpop.f32.mrf.mxu0  ;;  %v1415_v34 = vpop.f32.mrf.mxu1 }
 0x168   : > { %1966 = vst.msk [vmem:[%s3597_s12 + $0x28] sm:$0xf] %vm1955_vm1, %v2733_v55  ;;  %v2731_v37 = vpack.c.bf16 %v1643_v30, %v1643_v30  ;;  %v1646_v38 = vmax.f32 %v1424_v11, 0.0  ;;  %v1416_v41 = vadd.f32 %v1415_v34, %v1127_v19 }
 0x169   : > { %v1179_v42 = vpop.f32.mrf.mxu0  ;;  %v2842_v45 = vpop.f32.mrf.mxu1 }
 0x16a   : > { %1964 = vst.msk [vmem:[%s3597_s12 + $0x20] sm:$0xf] %vm1955_vm1, %v2731_v37  ;;  %v2734_v46 = vpack.c.bf16 %v1646_v38, %v1646_v38  ;;  %v1644_v53 = vmax.f32 %v1416_v41, 0.0  ;;  %v1437_v3 = vadd.f32 %v2842_v45, %v1148_v31  ;;  %v1180_v50 = vadd.f32 %v3583_v49, %v1179_v42 }
 0x16b   : > { %v1181_v54 = vpop.f32.mrf.mxu0  ;;  %v1428_v58 = vpop.f32.mrf.mxu1 }
 0x16c   : > { %1967 = vst.msk [vmem:[%s3597_s12 + $0x2c] sm:$0xf] %vm1955_vm1, %v2734_v46  ;;  %v2732_v61 = vpack.c.bf16 %v1644_v53, %v1644_v53  ;;  %v1649_v62 = vmax.f32 %v1437_v3, 0.0  ;;  %v1429_v1 = vadd.f32 %v1428_v58, %v1140_v23 }
 0x16d   : > { %v1182_v15 = vpop.f32.mrf.mxu0  ;;  %v2843_v2 = vpop.f32.mrf.mxu1 }
 0x16e   : > { %1965 = vst.msk [vmem:[%s3597_s12 + $0x24] sm:$0xf] %vm1955_vm1, %v2732_v61  ;;  %v2737_v5 = vpack.c.bf16 %v1649_v62, %v1649_v62  ;;  %v1647_v6 = vmax.f32 %v1429_v1, 0.0  ;;  %v1440_v13 = vadd.f32 %v2843_v2, %v1151_v43  ;;  %v1183_v42 = vadd.f32 %v3583_v49, %v1182_v15 }
 0x16f   : > { %v1184_v7 = vpop.f32.mrf.mxu0  ;;  %v1431_v59 = vpop.f32.mrf.mxu1 }
 0x170   : > { %1970 = vst.msk [vmem:[%s3597_s12 + $0x38] sm:$0xf] %vm1955_vm1, %v2737_v5  ;;  %v2735_v14 = vpack.c.bf16 %v1647_v6, %v1647_v6  ;;  %v1650_v17 = vmax.f32 %v1440_v13, 0.0  ;;  %v1432_v18 = vadd.f32 %v1431_v59, %v1143_v35 }
 0x171   : > { %v1187_v21 = vpop.f32.mrf.mxu0  ;;  %v2846_v27 = vpop.f32.mrf.mxu1 }
 0x172   : > { %1968 = vst.msk [vmem:[%s3597_s12 + $0x30] sm:$0xf] %vm1955_vm1, %v2735_v14  ;;  %v2738_v51 = vpack.c.bf16 %v1650_v17, %v1650_v17  ;;  %v1648_v22 = vmax.f32 %v1432_v18, 0.0  ;;  %v1453_v63 = vadd.f32 %v2846_v27, %v1164_v47  ;;  %v1188_v25 = vadd.f32 %v3583_v49, %v1187_v21 }
 0x173   : > { %v1189_v26 = vpop.f32.mrf.mxu0  ;;  %v1444_v19 = vpop.f32.mrf.mxu1 }
 0x174   : > { %1971 = vst.msk [vmem:[%s3597_s12 + $0x3c] sm:$0xf] %vm1955_vm1, %v2738_v51  ;;  %v2736_v55 = vpack.c.bf16 %v1648_v22, %v1648_v22  ;;  %v1653_v30 = vmax.f32 %v1453_v63, 0.0  ;;  %v1445_v11 = vadd.f32 %v1444_v19, %v1156_v39 }
 0x175   : > { %v1190_v33 = vpop.f32.mrf.mxu0  ;;  %v2847_v34 = vpop.f32.mrf.mxu1 }
 0x176   : > { %1969 = vst.msk [vmem:[%s3597_s12 + $0x34] sm:$0xf] %vm1955_vm1, %v2736_v55  ;;  %v2741_v31 = vpack.c.bf16 %v1653_v30, %v1653_v30  ;;  %v1651_v37 = vmax.f32 %v1445_v11, 0.0  ;;  %v1456_v38 = vadd.f32 %v2847_v34, %v1167_v29  ;;  %v1191_v21 = vadd.f32 %v3583_v49, %v1190_v33 }
 0x177   : > { %v1192_v41 = vpop.f32.mrf.mxu0  ;;  %v1447_v45 = vpop.f32.mrf.mxu1 }
 0x178   : > { %1974 = vst.msk [vmem:[%s3597_s12 + $0x48] sm:$0xf] %vm1955_vm1, %v2741_v31  ;;  %v2739_v23 = vpack.c.bf16 %v1651_v37, %v1651_v37  ;;  %v1654_v46 = vmax.f32 %v1456_v38, 0.0  ;;  %v1448_v53 = vadd.f32 %v1447_v45, %v1159_v57 }
 0x179   : > { %v1195_v3 = vpop.f32.mrf.mxu0  ;;  %v2850_v54 = vpop.f32.mrf.mxu1 }
 0x17a   : > { %1972 = vst.msk [vmem:[%s3597_s12 + $0x40] sm:$0xf] %vm1955_vm1, %v2739_v23  ;;  %v2742_v58 = vpack.c.bf16 %v1654_v46, %v1654_v46  ;;  %v1652_v43 = vmax.f32 %v1448_v53, 0.0  ;;  %v1469_v61 = vadd.f32 %v2850_v54, %v1180_v50  ;;  %v1196_v15 = vadd.f32 %v3583_v49, %v1195_v3 }
 0x17b   : > { %v1197_v62 = vpop.f32.mrf.mxu0  ;;  %v1460_v1 = vpop.f32.mrf.mxu1 }
 0x17c   : > { %1975 = vst.msk [vmem:[%s3597_s12 + $0x4c] sm:$0xf] %vm1955_vm1, %v2742_v58  ;;  %v2740_v2 = vpack.c.bf16 %v1652_v43, %v1652_v43  ;;  %v1657_v35 = vmax.f32 %v1469_v61, 0.0  ;;  %v1461_v5 = vadd.f32 %v1460_v1, %v1172_v10 }
 0x17d   : > { %v1198_v6 = vpop.f32.mrf.mxu0  ;;  %v2851_v13 = vpop.f32.mrf.mxu1 }
 0x17e   : > { %1973 = vst.msk [vmem:[%s3597_s12 + $0x44] sm:$0xf] %vm1955_vm1, %v2740_v2  ;;  %v2745_v7 = vpack.c.bf16 %v1657_v35, %v1657_v35  ;;  %v1655_v59 = vmax.f32 %v1461_v5, 0.0  ;;  %v1472_v47 = vadd.f32 %v2851_v13, %v1183_v42  ;;  %v1199_v30 = vadd.f32 %v3583_v49, %v1198_v6 }
 0x17f   : > { %v1200_v14 = vpop.f32.mrf.mxu0  ;;  %v1463_v17 = vpop.f32.mrf.mxu1 }
 0x180   : > { %1978 = vst.msk [vmem:[%s3597_s12 + $0x58] sm:$0xf] %vm1955_vm1, %v2745_v7  ;;  %v2743_v18 = vpack.c.bf16 %v1655_v59, %v1655_v59  ;;  %v1658_v27 = vmax.f32 %v1472_v47, 0.0  ;;  %v1464_v39 = vadd.f32 %v1463_v17, %v1175_v9 }
 0x181   : > { %v1203_v51 = vpop.f32.mrf.mxu0  ;;  %v2854_v22 = vpop.f32.mrf.mxu1 }
 0x182   : > { %1976 = vst.msk [vmem:[%s3597_s12 + $0x50] sm:$0xf] %vm1955_vm1, %v2743_v18  ;;  %v2746_v63 = vpack.c.bf16 %v1658_v27, %v1658_v27  ;;  %v1656_v26 = vmax.f32 %v1464_v39, 0.0  ;;  %v1485_v19 = vadd.f32 %v2854_v22, %v1196_v15  ;;  %v1204_v58 = vadd.f32 %v3583_v49, %v1203_v51 }
 0x183   : > { %v1205_v29 = vpop.f32.mrf.mxu0  ;;  %v1476_v55 = vpop.f32.mrf.mxu1 }
 0x184   : > { %1979 = vst.msk [vmem:[%s3597_s12 + $0x5c] sm:$0xf] %vm1955_vm1, %v2746_v63  ;;  %v2744_v11 = vpack.c.bf16 %v1656_v26, %v1656_v26  ;;  %v1661_v34 = vmax.f32 %v1485_v19, 0.0  ;;  %v1477_v57 = vadd.f32 %v1476_v55, %v1188_v25 }
 0x185   : > { %v1206_v31 = vpop.f32.mrf.mxu0  ;;  %v2855_v37 = vpop.f32.mrf.mxu1 }
 0x186   : > { %1977 = vst.msk [vmem:[%s3597_s12 + $0x54] sm:$0xf] %vm1955_vm1, %v2744_v11  ;;  %v2749_v38 = vpack.c.bf16 %v1661_v34, %v1661_v34  ;;  %v1659_v41 = vmax.f32 %v1477_v57, 0.0  ;;  %v1488_v45 = vadd.f32 %v2855_v37, %v1199_v30  ;;  %v1207_v13 = vadd.f32 %v3583_v49, %v1206_v31 }
 0x187   : > { %v1208_v50 = vpop.f32.mrf.mxu0  ;;  %v1479_v23 = vpop.f32.mrf.mxu1 }
 0x188   : > { %1982 = vst.msk [vmem:[%s3597_s12 + $0x68] sm:$0xf] %vm1955_vm1, %v2749_v38  ;;  %v2747_v46 = vpack.c.bf16 %v1659_v41, %v1659_v41  ;;  %v1662_v53 = vmax.f32 %v1488_v45, 0.0  ;;  %v1480_v3 = vadd.f32 %v1479_v23, %v1191_v21 }
 0x189   : > { %v1211_v54 = vpop.f32.mrf.mxu0  ;;  %v2858_v10 = vpop.f32.mrf.mxu1 }
 0x18a   : > { %1980 = vst.msk [vmem:[%s3597_s12 + $0x60] sm:$0xf] %vm1955_vm1, %v2747_v46  ;;  %v2750_v33 = vpack.c.bf16 %v1662_v53, %v1662_v53  ;;  %v1660_v43 = vmax.f32 %v1480_v3, 0.0  ;;  %v1212_v61 = vadd.f32 %v3583_v49, %v1211_v54 }
 0x18b   : > { %v1213_v62 = vpop.f32.mrf.mxu0  ;;  %v1492_v1 = vpop.f32.mrf.mxu1 }
 0x18c   : > { %1983 = vst.msk [vmem:[%s3597_s12 + $0x6c] sm:$0xf] %vm1955_vm1, %v2750_v33  ;;  %v2748_v42 = vpack.c.bf16 %v1660_v43, %v1660_v43  ;;  %v1501_v2 = vadd.f32 %v2858_v10, %v1212_v61  ;;  %v1493_v35 = vadd.f32 %v1492_v1, %v1204_v58 }
 0x18d   : > { %v1214_v5 = vpop.f32.mrf.mxu0  ;;  %v2859_v6 = vpop.f32.mrf.mxu1 }
 0x18e   : > { %1981 = vst.msk [vmem:[%s3597_s12 + $0x64] sm:$0xf] %vm1955_vm1, %v2748_v42  ;;  %v1665_v9 = vmax.f32 %v1501_v2, 0.0  ;;  %v1663_v7 = vmax.f32 %v1493_v35, 0.0  ;;  %v1215_v59 = vadd.f32 %v3583_v49, %v1214_v5 }
 0x18f   : > { %v1216_v47 = vpop.f32.mrf.mxu0  ;;  %v1495_v14 = vpop.f32.mrf.mxu1 }
 0x190   : > { %v2753_v17 = vpack.c.bf16 %v1665_v9, %v1665_v9  ;;  %v2751_v15 = vpack.c.bf16 %v1663_v7, %v1663_v7  ;;  %v1504_v18 = vadd.f32 %v2859_v6, %v1215_v59  ;;  %v1496_v27 = vadd.f32 %v1495_v14, %v1207_v13 }
 0x191   : > { %v1219_v39 = vpop.f32.mrf.mxu0  ;;  %v2862_v51 = vpop.f32.mrf.mxu1 }
 0x192   : > { %1986 = vst.msk [vmem:[%s3597_s12 + $0x78] sm:$0xf] %vm1955_vm1, %v2753_v17  ;;  %1984 = vst.msk [vmem:[%s3597_s12 + $0x70] sm:$0xf] %vm1955_vm1, %v2751_v15  ;;  %v1666_v22 = vmax.f32 %v1504_v18, 0.0  ;;  %v1664_v25 = vmax.f32 %v1496_v27, 0.0  ;;  %v1220_v63 = vadd.f32 %v3583_v49, %v1219_v39 }
 0x193   : > { %v1221_v26 = vpop.f32.mrf.mxu0  ;;  %v1508_v19 = vpop.f32.mrf.mxu1 }
 0x194   : > { %v2754_v29 = vpack.c.bf16 %v1666_v22, %v1666_v22  ;;  %v2752_v55 = vpack.c.bf16 %v1664_v25, %v1664_v25  ;;  %v1509_v30 = vadd.f32 %v1508_v19, %v1220_v63 }
 0x195   : > { %v1222_v11 = vpop.f32.mrf.mxu0  ;;  %v2863_v34 = vpop.f32.mrf.mxu1 }
 0x196   : > { %1987 = vst.msk [vmem:[%s3597_s12 + $0x7c] sm:$0xf] %vm1955_vm1, %v2754_v29  ;;  %1985 = vst.msk [vmem:[%s3597_s12 + $0x74] sm:$0xf] %vm1955_vm1, %v2752_v55  ;;  %v1667_v57 = vmax.f32 %v1509_v30, 0.0  ;;  %v1223_v31 = vadd.f32 %v3583_v49, %v1222_v11 }
 0x197   : > { %v1224_v37 = vpop.f32.mrf.mxu0  ;;  %v1511_v21 = vpop.f32.mrf.mxu1 }
 0x198   : > { %v2755_v38 = vpack.c.bf16 %v1667_v57, %v1667_v57  ;;  %v1512_v41 = vadd.f32 %v1511_v21, %v1223_v31 }
 0x199   : > { %v1227_v45 = vpop.f32.mrf.mxu0  ;;  %v2866_v50 = vpop.f32.mrf.mxu1 }
 0x19a   : > { %1988 = vst.msk [vmem:[%s3597_s12 + $0x80] sm:$0xf] %vm1955_vm1, %v2755_v38  ;;  %v1668_v23 = vmax.f32 %v1512_v41, 0.0  ;;  %v1228_v46 = vadd.f32 %v3583_v49, %v1227_v45  ;;  %v1292_v41 = vadd.f32 %v3583_v49, %v3530_v60 }
 0x19b   : > { %v1229_v53 = vpop.f32.mrf.mxu0  ;;  %v1524_v3 = vpop.f32.mrf.mxu1 }
 0x19c   : > { %v2756_v54 = vpack.c.bf16 %v1668_v23, %v1668_v23  ;;  %v1517_v10 = vadd.f32 %v2862_v51, %v1228_v46 }
 0x19d   : > { %v1230_v58 = vpop.f32.mrf.mxu0  ;;  %v2867_v33 = vpop.f32.mrf.mxu1 }
 0x19e   : > { %1989 = vst.msk [vmem:[%s3597_s12 + $0x84] sm:$0xf] %vm1955_vm1, %v2756_v54  ;;  %v1669_v43 = vmax.f32 %v1517_v10, 0.0  ;;  %v1231_v61 = vadd.f32 %v3583_v49, %v1230_v58 }
 0x19f   : > { %v1232_v62 = vpop.f32.mrf.mxu0  ;;  %v1527_v1 = vpop.f32.mrf.mxu1 }
 0x1a0   : > { %v2757_v42 = vpack.c.bf16 %v1669_v43, %v1669_v43  ;;  %v1520_v2 = vadd.f32 %v2863_v34, %v1231_v61 }
 0x1a1   : > { %v1235_v35 = vpop.f32.mrf.mxu0  ;;  %v3723_v5 = vpop.f32.mrf.mxu1 }
 0x1a2   : > { %1990 = vst.msk [vmem:[%s3597_s12 + $0x88] sm:$0xf] %vm1955_vm1, %v2757_v42  ;;  %v1670_v6 = vmax.f32 %v1520_v2, 0.0  ;;  %v1236_v13 = vadd.f32 %v3583_v49, %v1235_v35  ;;  %v1295_v42 = vadd.f32 %v3583_v49, %v3532_v0 }
 0x1a3   : > { %v1237_v9 = vpop.f32.mrf.mxu0  ;;  %v1540_v7 = vpop.f32.mrf.mxu1 }
 0x1a4   : > { %v2758_v59 = vpack.c.bf16 %v1670_v6, %v1670_v6  ;;  %v1525_v47 = vadd.f32 %v1524_v3, %v1236_v13 }
 0x1a5   : > { %v1238_v14 = vpop.f32.mrf.mxu0  ;;  %v3728_v17 = vpop.f32.mrf.mxu1 }
 0x1a6   : > { %1991 = vst.msk [vmem:[%s3597_s12 + $0x8c] sm:$0xf] %vm1955_vm1, %v2758_v59  ;;  %v1671_v15 = vmax.f32 %v1525_v47, 0.0  ;;  %v1239_v18 = vadd.f32 %v3583_v49, %v1238_v14 }
 0x1a7   : > { %v1240_v27 = vpop.f32.mrf.mxu0  ;;  %v1543_v39 = vpop.f32.mrf.mxu1 }
 0x1a8   : > { %v2759_v51 = vpack.c.bf16 %v1671_v15, %v1671_v15  ;;  %v1528_v22 = vadd.f32 %v1527_v1, %v1239_v18 }
 0x1a9   : > { %v1243_v25 = vpop.f32.mrf.mxu0  ;;  %v3733_v63 = vpop.f32.mrf.mxu1 }
 0x1aa   : > { %1992 = vst.msk [vmem:[%s3597_s12 + $0x90] sm:$0xf] %vm1955_vm1, %v2759_v51  ;;  %v1672_v26 = vmax.f32 %v1528_v22, 0.0  ;;  %v1244_v19 = vadd.f32 %v3583_v49, %v1243_v25 }
 0x1ab   : > { %v1245_v29 = vpop.f32.mrf.mxu0  ;;  %v3738_v55 = vpop.f32.mrf.mxu1 }
 0x1ac   : > { %v2760_v30 = vpack.c.bf16 %v1672_v26, %v1672_v26  ;;  %v1533_v11 = vadd.f32 %v2866_v50, %v1244_v19  ;;  %v1284_v50 = vadd.f32 %v3583_v49, %v3524_v52  ;;  %v1300_v29 = vadd.f32 %v3583_v49, %v3536_v4 }
 0x1ad   : > { %v1246_v34 = vpop.f32.mrf.mxu0  ;;  %v3740_v57 = vpop.f32.mrf.mxu1 }
 0x1ae   : > { %1993 = vst.msk [vmem:[%s3597_s12 + $0x94] sm:$0xf] %vm1955_vm1, %v2760_v30  ;;  %v1673_v31 = vmax.f32 %v1533_v11, 0.0  ;;  %v1247_v37 = vadd.f32 %v3583_v49, %v1246_v34 }
 0x1af   : > { %v1248_v21 = vpop.f32.mrf.mxu0  ;;  %v3745_v38 = vpop.f32.mrf.mxu1 }
 0x1b0   : > { %v2761_v45 = vpack.c.bf16 %v1673_v31, %v1673_v31  ;;  %v1536_v23 = vadd.f32 %v2867_v33, %v1247_v37  ;;  %v1287_v33 = vadd.f32 %v3583_v49, %v3528_v56 }
 0x1b1   : > { %v1251_v46 = vpop.f32.mrf.mxu0  ;;  %v2878_v53 = vpop.f32.mrf.mxu1 }
 0x1b2   : > { %1994 = vst.msk [vmem:[%s3597_s12 + $0x98] sm:$0xf] %vm1955_vm1, %v2761_v45  ;;  %v1674_v3 = vmax.f32 %v1536_v23, 0.0  ;;  %v1252_v54 = vadd.f32 %v3583_v49, %v1251_v46  ;;  %v1581_v10 = vadd.f32 %v2878_v53, %v1292_v41  ;;  %v1303_v45 = vadd.f32 %v3583_v49, %v3540_v8 }
 0x1b3   : > { %v1253_v58 = vpop.f32.mrf.mxu0  ;;  %v1572_v43 = vpop.f32.mrf.mxu1 }
 0x1b4   : > { %v2762_v61 = vpack.c.bf16 %v1674_v3, %v1674_v3  ;;  %v1541_v62 = vadd.f32 %v1540_v7, %v1252_v54  ;;  %v1685_v1 = vmax.f32 %v1581_v10, 0.0  ;;  %v1573_v60 = vadd.f32 %v1572_v43, %v1284_v50 }
 0x1b5   : > { %v1254_v52 = vpop.f32.mrf.mxu0  ;;  %v2879_v2 = vpop.f32.mrf.mxu1  ;;  %v1308_v7 = vadd.f32 %v3583_v49, %v3542_v12 }
 0x1b6   : > { %1995 = vst.msk [vmem:[%s3597_s12 + $0x9c] sm:$0xf] %vm1955_vm1, %v2762_v61  ;;  %v1675_v35 = vmax.f32 %v1541_v62, 0.0  ;;  %v2773_v6 = vpack.c.bf16 %v1685_v1, %v1685_v1  ;;  %v1683_v13 = vmax.f32 %v1573_v60, 0.0  ;;  %v1255_v9 = vadd.f32 %v3583_v49, %v1254_v52 }
 0x1b7   : > { %v1584_v59 = vadd.f32 %v2879_v2, %v1295_v42  ;;  %v1256_v47 = vpop.f32.mrf.mxu0  ;;  %v1575_v56 = vpop.f32.mrf.mxu1  ;;  %v1316_v62 = vadd.f32 %v3583_v49, %v3550_v20  ;;  %v1324_v1 = vadd.f32 %v3583_v49, %v3558_v28 }
 0x1b8   : > { %v2763_v14 = vpack.c.bf16 %v1675_v35, %v1675_v35  ;;  %2006 = vst.msk [vmem:[%s3597_s12 + $0xc8] sm:$0xf] %vm1955_vm1, %v2773_v6  ;;  %v2771_v0 = vpack.c.bf16 %v1683_v13, %v1683_v13  ;;  %v1544_v15 = vadd.f32 %v1543_v39, %v1255_v9  ;;  %v1576_v18 = vadd.f32 %v1575_v56, %v1287_v33 }
 0x1b9   : > { %v1686_v27 = vmax.f32 %v1584_v59, 0.0  ;;  %v1259_v51 = vpop.f32.mrf.mxu0  ;;  %v2882_v22 = vpop.f32.mrf.mxu1  ;;  %v1311_v39 = vadd.f32 %v3583_v49, %v3546_v16  ;;  %v1327_v6 = vadd.f32 %v3583_v49, %v3562_v32 }
 0x1ba   : > { %1996 = vst.msk [vmem:[%s3597_s12 + $0xa0] sm:$0xf] %vm1955_vm1, %v2763_v14  ;;  %2004 = vst.msk [vmem:[%s3597_s12 + $0xc0] sm:$0xf] %vm1955_vm1, %v2771_v0  ;;  %v1676_v25 = vmax.f32 %v1544_v15, 0.0  ;;  %v1684_v26 = vmax.f32 %v1576_v18, 0.0  ;;  %v1260_v12 = vadd.f32 %v3583_v49, %v1259_v51  ;;  %v1597_v19 = vadd.f32 %v2882_v22, %v1308_v7 }
 0x1bb   : > { %v2774_v30 = vpack.c.bf16 %v1686_v27, %v1686_v27  ;;  %v1261_v11 = vpop.f32.mrf.mxu0  ;;  %v1588_v34 = vpop.f32.mrf.mxu1  ;;  %v1319_v51 = vadd.f32 %v3583_v49, %v3554_v24 }
 0x1bc   : > { %v2764_v31 = vpack.c.bf16 %v1676_v25, %v1676_v25  ;;  %v2772_v37 = vpack.c.bf16 %v1684_v26, %v1684_v26  ;;  %v1549_v21 = vadd.f32 %v3723_v5, %v1260_v12  ;;  %v1689_v41 = vmax.f32 %v1597_v19, 0.0 }
 0x1bd   : > { %2007 = vst.msk [vmem:[%s3597_s12 + $0xcc] sm:$0xf] %vm1955_vm1, %v2774_v30  ;;  %v1589_v23 = vadd.f32 %v1588_v34, %v1300_v29  ;;  %v1262_v46 = vpop.f32.mrf.mxu0  ;;  %v2883_v4 = vpop.f32.mrf.mxu1  ;;  %v1332_v30 = vadd.f32 %v3583_v49, %v3566_v36 }
 0x1be   : > { %1997 = vst.msk [vmem:[%s3597_s12 + $0xa4] sm:$0xf] %vm1955_vm1, %v2764_v31  ;;  %2005 = vst.msk [vmem:[%s3597_s12 + $0xc4] sm:$0xf] %vm1955_vm1, %v2772_v37  ;;  %v1677_v16 = vmax.f32 %v1549_v21, 0.0  ;;  %v2777_v53 = vpack.c.bf16 %v1689_v41, %v1689_v41  ;;  %v1263_v50 = vadd.f32 %v3583_v49, %v1262_v46  ;;  %v1600_v5 = vadd.f32 %v2883_v4, %v1311_v39 }
 0x1bf   : > { %v1687_v3 = vmax.f32 %v1589_v23, 0.0  ;;  %v1264_v54 = vpop.f32.mrf.mxu0  ;;  %v1591_v10 = vpop.f32.mrf.mxu1 }
 0x1c0   : > { %v2765_v58 = vpack.c.bf16 %v1677_v16, %v1677_v16  ;;  %2010 = vst.msk [vmem:[%s3597_s12 + $0xd8] sm:$0xf] %vm1955_vm1, %v2777_v53  ;;  %v1552_v8 = vadd.f32 %v3728_v17, %v1263_v50  ;;  %v1690_v43 = vmax.f32 %v1600_v5, 0.0  ;;  %v1592_v61 = vadd.f32 %v1591_v10, %v1303_v45 }
 0x1c1   : > { %v2775_v60 = vpack.c.bf16 %v1687_v3, %v1687_v3  ;;  %v1267_v33 = vpop.f32.mrf.mxu0  ;;  %v2886_v42 = vpop.f32.mrf.mxu1  ;;  %v1335_v16 = vadd.f32 %v3583_v49, %v3570_v40  ;;  %v1343_v53 = vadd.f32 %v3583_v49, %v3578_v48 }
 0x1c2   : > { %1998 = vst.msk [vmem:[%s3597_s12 + $0xa8] sm:$0xf] %vm1955_vm1, %v2765_v58  ;;  %v1678_v52 = vmax.f32 %v1552_v8, 0.0  ;;  %v2778_v2 = vpack.c.bf16 %v1690_v43, %v1690_v43  ;;  %v1688_v35 = vmax.f32 %v1592_v61, 0.0  ;;  %v1268_v17 = vadd.f32 %v3583_v49, %v1267_v33 }
 0x1c3   : > { %2008 = vst.msk [vmem:[%s3597_s12 + $0xd0] sm:$0xf] %vm1955_vm1, %v2775_v60  ;;  %v1613_v20 = vadd.f32 %v2886_v42, %v1324_v1  ;;  %v1269_v13 = vpop.f32.mrf.mxu0  ;;  %v1604_v28 = vpop.f32.mrf.mxu1 }
 0x1c4   : > { %v2766_v9 = vpack.c.bf16 %v1678_v52, %v1678_v52  ;;  %2011 = vst.msk [vmem:[%s3597_s12 + $0xdc] sm:$0xf] %vm1955_vm1, %v2778_v2  ;;  %v2776_v7 = vpack.c.bf16 %v1688_v35, %v1688_v35  ;;  %v1557_v59 = vadd.f32 %v3738_v55, %v1268_v17  ;;  %v1605_v47 = vadd.f32 %v1604_v28, %v1316_v62 }
 0x1c5   : > { %v1693_v56 = vmax.f32 %v1613_v20, 0.0  ;;  %v1270_v14 = vpop.f32.mrf.mxu0  ;;  %v2887_v0 = vpop.f32.mrf.mxu1  ;;  %v1340_v55 = vadd.f32 %v3583_v49, %v3574_v44 }
 0x1c6   : > { %1999 = vst.msk [vmem:[%s3597_s12 + $0xac] sm:$0xf] %vm1955_vm1, %v2766_v9  ;;  %2009 = vst.msk [vmem:[%s3597_s12 + $0xd4] sm:$0xf] %vm1955_vm1, %v2776_v7  ;;  %v1679_v32 = vmax.f32 %v1557_v59, 0.0  ;;  %v1691_v15 = vmax.f32 %v1605_v47, 0.0  ;;  %v1271_v18 = vadd.f32 %v3583_v49, %v1270_v14  ;;  %v1616_v27 = vadd.f32 %v2887_v0, %v1327_v6 }
 0x1c7   : > { %v2781_v22 = vpack.c.bf16 %v1693_v56, %v1693_v56  ;;  %v1272_v25 = vpop.f32.mrf.mxu0  ;;  %v1607_v26 = vpop.f32.mrf.mxu1 }
 0x1c8   : > { %v2767_v12 = vpack.c.bf16 %v1679_v32, %v1679_v32  ;;  %v2779_v19 = vpack.c.bf16 %v1691_v15, %v1691_v15  ;;  %v1560_v29 = vadd.f32 %v3745_v38, %v1271_v18  ;;  %v1694_v39 = vmax.f32 %v1616_v27, 0.0 }
 0x1c9   : > { %2014 = vst.msk [vmem:[%s3597_s12 + $0xe8] sm:$0xf] %vm1955_vm1, %v2781_v22  ;;  %v1608_v11 = vadd.f32 %v1607_v26, %v1319_v51  ;;  %v1275_v34 = vpop.f32.mrf.mxu0  ;;  %v2890_v24 = vpop.f32.mrf.mxu1 }
 0x1ca   : > { %2000 = vst.msk [vmem:[%s3597_s12 + $0xb0] sm:$0xf] %vm1955_vm1, %v2767_v12  ;;  %2012 = vst.msk [vmem:[%s3597_s12 + $0xe0] sm:$0xf] %vm1955_vm1, %v2779_v19  ;;  %v1680_v44 = vmax.f32 %v1560_v29, 0.0  ;;  %v2782_v31 = vpack.c.bf16 %v1694_v39, %v1694_v39  ;;  %v1276_v37 = vadd.f32 %v3583_v49, %v1275_v34  ;;  %v1629_v38 = vadd.f32 %v2890_v24, %v1340_v55 }
 0x1cb   : > { %v1692_v21 = vmax.f32 %v1608_v11, 0.0  ;;  %v1277_v41 = vpop.f32.mrf.mxu0  ;;  %v1620_v45 = vpop.f32.mrf.mxu1 }
 0x1cc   : > { %v2768_v36 = vpack.c.bf16 %v1680_v44, %v1680_v44  ;;  %2015 = vst.msk [vmem:[%s3597_s12 + $0xec] sm:$0xf] %vm1955_vm1, %v2782_v31  ;;  %v1565_v23 = vadd.f32 %v3733_v63, %v1276_v37  ;;  %v1697_v46 = vmax.f32 %v1629_v38, 0.0  ;;  %v1621_v4 = vadd.f32 %v1620_v45, %v1332_v30 }
 0x1cd   : > { %v2780_v50 = vpack.c.bf16 %v1692_v21, %v1692_v21  ;;  %v1278_v5 = vpop.f32.mrf.mxu0  ;;  %v2891_v3 = vpop.f32.mrf.mxu1 }
 0x1ce   : > { %2001 = vst.msk [vmem:[%s3597_s12 + $0xb4] sm:$0xf] %vm1955_vm1, %v2768_v36  ;;  %v1681_v54 = vmax.f32 %v1565_v23, 0.0  ;;  %v2785_v10 = vpack.c.bf16 %v1697_v46, %v1697_v46  ;;  %v1695_v58 = vmax.f32 %v1621_v4, 0.0  ;;  %v1279_v63 = vadd.f32 %v3583_v49, %v1278_v5 }
 0x1cf   : > { %2013 = vst.msk [vmem:[%s3597_s12 + $0xe4] sm:$0xf] %vm1955_vm1, %v2780_v50  ;;  %v1632_v8 = vadd.f32 %v2891_v3, %v1343_v53  ;;  %v1280_v40 = vpop.f32.mrf.mxu0  ;;  %v1623_v43 = vpop.f32.mrf.mxu1 }
 0x1d0   : > { %v2769_v48 = vpack.c.bf16 %v1681_v54, %v1681_v54  ;;  %2018 = vst.msk [vmem:[%s3597_s12 + $0xf8] sm:$0xf] %vm1955_vm1, %v2785_v10  ;;  %v2783_v61 = vpack.c.bf16 %v1695_v58, %v1695_v58  ;;  %v1568_v62 = vadd.f32 %v3740_v57, %v1279_v63  ;;  %v1624_v1 = vadd.f32 %v1623_v43, %v1335_v16 }
 0x1d1   : > { %v1698_v60 = vmax.f32 %v1632_v8, 0.0 }
 0x1d2   : > { %2002 = vst.msk [vmem:[%s3597_s12 + $0xb8] sm:$0xf] %vm1955_vm1, %v2769_v48  ;;  %2016 = vst.msk [vmem:[%s3597_s12 + $0xf0] sm:$0xf] %vm1955_vm1, %v2783_v61  ;;  %v1682_v49 = vmax.f32 %v1568_v62, 0.0  ;;  %v1696_v33 = vmax.f32 %v1624_v1, 0.0 }
 0x1d3   : > { %v2786_v42 = vpack.c.bf16 %v1698_v60, %v1698_v60  ;;  %2026 = sbr.rel (!%p3294_p4) target bundleno = 553 (0x229), region = 36 }
 0x1d4   : > { %v2770_v52 = vpack.c.bf16 %v1682_v49, %v1682_v49  ;;  %v2784_v2 = vpack.c.bf16 %v1696_v33, %v1696_v33 }
 0x1d5   : > { %2019 = vst.msk [vmem:[%s3597_s12 + $0xfc] sm:$0xf] %vm1955_vm1, %v2786_v42 }
 0x1d6   : > { %2003 = vst.msk [vmem:[%s3597_s12 + $0xbc] sm:$0xf] %vm1955_vm1, %v2770_v52  ;;  %2017 = vst.msk [vmem:[%s3597_s12 + $0xf4] sm:$0xf] %vm1955_vm1, %v2784_v2 }
 0x1d8   : > { %s4056_s27 = smov (!%p2029_p8, %s2028_s27), 64 }
 0x1d9   : > { %s2708_s5 = sshll.u32 %s4056_s27, 6 }
 0x1da   : > { %p2711_p9 = scmp.eq.s32.totalorder %s2708_s5, 0 }
 0x1db   : > { %s3858_s6 = sshrl.u32 (!%p2711_p9), %s4056_s27, 6 }
 0x1dc   : > { %2037 = sbr.rel (%p2711_p9) target bundleno = 553 (0x229), region = 40  ;;  %p2712_p10 = scmp.le.s32.totalorder (!%p2711_p9), %s3858_s6, 0 }
 0x1e1   : > { %2444 = sbr.rel (%p2712_p10) target bundleno = 536 (0x218), region = 112  ;;  %s4049_s15 = smov (!%p2712_p10), %s3852_s4 }
 0x1e2   : > { %s4050_s20 = smov (!%p2712_p10), %s3597_s12  ;;  %s3867_s23 = smov (!%p2712_p10), 0  }
 0x1e3   : > { %s3869_s7 = smov (!%p2712_p10), 0  }
 0x1e6 LB: >> { %v2054_v57 = vld [vmem:[%s3222_s20] sm:$0xf]  ;;  %v2056_v35 = vld [vmem:[%s3222_s20 + $0x4] sm:$0xf]  ;;  %v2058_v17 = vld [vmem:[%s3222_s20 + $0x8] sm:$0xf]  ;;  %s3230_s7 = sphi %s3869_s7, %s2048_s7   ;;  %s3226_s23 = sphi %s3867_s23, %s4051_s23   ;;  %s3222_s20 = sphi %s4050_s20, %s2187_s20   ;;  %s3218_s15 = sphi %s4049_s15, %s2188_s15  }
 0x1e7   : >> { %2055 = vst [vmem:[%s3218_s15] sm:$0xf] %v2054_v57  ;;  %2057 = vst [vmem:[%s3218_s15 + $0x4] sm:$0xf] %v2056_v35  ;;  %v2060_v6 = vld [vmem:[%s3222_s20 + $0xc] sm:$0xf]  ;;  %s2182_s8 = sadd.s32 1, %s3226_s23 }
 0x1e8   : >> { %2059 = vst [vmem:[%s3218_s15 + $0x8] sm:$0xf] %v2058_v17  ;;  %v2062_v20 = vld [vmem:[%s3222_s20 + $0x10] sm:$0xf]  ;;  %v2064_v13 = vld [vmem:[%s3222_s20 + $0x14] sm:$0xf]  ;;  %p2183_p11 = scmp.ge.s32.totalorder %s2182_s8, %s3858_s6 }
 0x1e9   : >> { %2061 = vst [vmem:[%s3218_s15 + $0xc] sm:$0xf] %v2060_v6  ;;  %2063 = vst [vmem:[%s3218_s15 + $0x10] sm:$0xf] %v2062_v20  ;;  %v2066_v28 = vld [vmem:[%s3222_s20 + $0x18] sm:$0xf] }
 0x1ea   : >> { %2065 = vst [vmem:[%s3218_s15 + $0x14] sm:$0xf] %v2064_v13  ;;  %v2068_v9 = vld [vmem:[%s3222_s20 + $0x1c] sm:$0xf]  ;;  %v2070_v7 = vld [vmem:[%s3222_s20 + $0x20] sm:$0xf] }
 0x1eb   : >> { %2067 = vst [vmem:[%s3218_s15 + $0x18] sm:$0xf] %v2066_v28  ;;  %2069 = vst [vmem:[%s3218_s15 + $0x1c] sm:$0xf] %v2068_v9  ;;  %v2072_v59 = vld [vmem:[%s3222_s20 + $0x24] sm:$0xf] }
 0x1ec   : >> { %2071 = vst [vmem:[%s3218_s15 + $0x20] sm:$0xf] %v2070_v7  ;;  %v2074_v47 = vld [vmem:[%s3222_s20 + $0x28] sm:$0xf]  ;;  %v2076_v56 = vld [vmem:[%s3222_s20 + $0x2c] sm:$0xf] }
 0x1ed   : >> { %2073 = vst [vmem:[%s3218_s15 + $0x24] sm:$0xf] %v2072_v59  ;;  %2075 = vst [vmem:[%s3218_s15 + $0x28] sm:$0xf] %v2074_v47  ;;  %v2078_v14 = vld [vmem:[%s3222_s20 + $0x30] sm:$0xf] }
 0x1ee   : >> { %2077 = vst [vmem:[%s3218_s15 + $0x2c] sm:$0xf] %v2076_v56  ;;  %v2080_v0 = vld [vmem:[%s3222_s20 + $0x34] sm:$0xf]  ;;  %v2082_v32 = vld [vmem:[%s3222_s20 + $0x38] sm:$0xf] }
 0x1ef   : >> { %2079 = vst [vmem:[%s3218_s15 + $0x30] sm:$0xf] %v2078_v14  ;;  %2081 = vst [vmem:[%s3218_s15 + $0x34] sm:$0xf] %v2080_v0  ;;  %v2084_v15 = vld [vmem:[%s3222_s20 + $0x3c] sm:$0xf] }
 0x1f0   : >> { %2083 = vst [vmem:[%s3218_s15 + $0x38] sm:$0xf] %v2082_v32  ;;  %v2086_v18 = vld [vmem:[%s3222_s20 + $0x40] sm:$0xf]  ;;  %v2088_v27 = vld [vmem:[%s3222_s20 + $0x44] sm:$0xf] }
 0x1f1   : >> { %2085 = vst [vmem:[%s3218_s15 + $0x3c] sm:$0xf] %v2084_v15  ;;  %2087 = vst [vmem:[%s3218_s15 + $0x40] sm:$0xf] %v2086_v18  ;;  %v2090_v51 = vld [vmem:[%s3222_s20 + $0x48] sm:$0xf] }
 0x1f2   : >> { %2089 = vst [vmem:[%s3218_s15 + $0x44] sm:$0xf] %v2088_v27  ;;  %v2092_v55 = vld [vmem:[%s3222_s20 + $0x4c] sm:$0xf]  ;;  %v2094_v22 = vld [vmem:[%s3222_s20 + $0x50] sm:$0xf] }
 0x1f3   : >> { %2091 = vst [vmem:[%s3218_s15 + $0x48] sm:$0xf] %v2090_v51  ;;  %2093 = vst [vmem:[%s3218_s15 + $0x4c] sm:$0xf] %v2092_v55  ;;  %v2096_v25 = vld [vmem:[%s3222_s20 + $0x54] sm:$0xf] }
 0x1f4   : >> { %2095 = vst [vmem:[%s3218_s15 + $0x50] sm:$0xf] %v2094_v22  ;;  %v2098_v26 = vld [vmem:[%s3222_s20 + $0x58] sm:$0xf]  ;;  %v2100_v12 = vld [vmem:[%s3222_s20 + $0x5c] sm:$0xf] }
 0x1f5   : >> { %2097 = vst [vmem:[%s3218_s15 + $0x54] sm:$0xf] %v2096_v25  ;;  %2099 = vst [vmem:[%s3218_s15 + $0x58] sm:$0xf] %v2098_v26  ;;  %v2102_v19 = vld [vmem:[%s3222_s20 + $0x60] sm:$0xf] }
 0x1f6   : >> { %2101 = vst [vmem:[%s3218_s15 + $0x5c] sm:$0xf] %v2100_v12  ;;  %v2104_v29 = vld [vmem:[%s3222_s20 + $0x64] sm:$0xf]  ;;  %v2106_v39 = vld [vmem:[%s3222_s20 + $0x68] sm:$0xf] }
 0x1f7   : >> { %2103 = vst [vmem:[%s3218_s15 + $0x60] sm:$0xf] %v2102_v19  ;;  %2105 = vst [vmem:[%s3218_s15 + $0x64] sm:$0xf] %v2104_v29  ;;  %v2108_v30 = vld [vmem:[%s3222_s20 + $0x6c] sm:$0xf] }
 0x1f8   : >> { %2107 = vst [vmem:[%s3218_s15 + $0x68] sm:$0xf] %v2106_v39  ;;  %v2110_v11 = vld [vmem:[%s3222_s20 + $0x70] sm:$0xf]  ;;  %v2112_v34 = vld [vmem:[%s3222_s20 + $0x74] sm:$0xf] }
 0x1f9   : >> { %2109 = vst [vmem:[%s3218_s15 + $0x6c] sm:$0xf] %v2108_v30  ;;  %2111 = vst [vmem:[%s3218_s15 + $0x70] sm:$0xf] %v2110_v11  ;;  %v2114_v24 = vld [vmem:[%s3222_s20 + $0x78] sm:$0xf] }
 0x1fa   : >> { %2113 = vst [vmem:[%s3218_s15 + $0x74] sm:$0xf] %v2112_v34  ;;  %v2116_v44 = vld [vmem:[%s3222_s20 + $0x7c] sm:$0xf]  ;;  %v2118_v31 = vld [vmem:[%s3222_s20 + $0x80] sm:$0xf] }
 0x1fb   : >> { %2115 = vst [vmem:[%s3218_s15 + $0x78] sm:$0xf] %v2114_v24  ;;  %2117 = vst [vmem:[%s3218_s15 + $0x7c] sm:$0xf] %v2116_v44  ;;  %v2120_v37 = vld [vmem:[%s3222_s20 + $0x84] sm:$0xf] }
 0x1fc   : >> { %2119 = vst [vmem:[%s3218_s15 + $0x80] sm:$0xf] %v2118_v31  ;;  %v2122_v38 = vld [vmem:[%s3222_s20 + $0x88] sm:$0xf]  ;;  %v2124_v21 = vld [vmem:[%s3222_s20 + $0x8c] sm:$0xf] }
 0x1fd   : >> { %2121 = vst [vmem:[%s3218_s15 + $0x84] sm:$0xf] %v2120_v37  ;;  %2123 = vst [vmem:[%s3218_s15 + $0x88] sm:$0xf] %v2122_v38  ;;  %v2126_v41 = vld [vmem:[%s3222_s20 + $0x90] sm:$0xf] }
 0x1fe   : >> { %2125 = vst [vmem:[%s3218_s15 + $0x8c] sm:$0xf] %v2124_v21  ;;  %v2128_v45 = vld [vmem:[%s3222_s20 + $0x94] sm:$0xf]  ;;  %v2130_v36 = vld [vmem:[%s3222_s20 + $0x98] sm:$0xf] }
 0x1ff   : >> { %2127 = vst [vmem:[%s3218_s15 + $0x90] sm:$0xf] %v2126_v41  ;;  %2129 = vst [vmem:[%s3218_s15 + $0x94] sm:$0xf] %v2128_v45  ;;  %v2132_v23 = vld [vmem:[%s3222_s20 + $0x9c] sm:$0xf] }
 0x200   : >> { %2131 = vst [vmem:[%s3218_s15 + $0x98] sm:$0xf] %v2130_v36  ;;  %v2134_v46 = vld [vmem:[%s3222_s20 + $0xa0] sm:$0xf]  ;;  %v2136_v4 = vld [vmem:[%s3222_s20 + $0xa4] sm:$0xf] }
 0x201   : >> { %2133 = vst [vmem:[%s3218_s15 + $0x9c] sm:$0xf] %v2132_v23  ;;  %2135 = vst [vmem:[%s3218_s15 + $0xa0] sm:$0xf] %v2134_v46  ;;  %v2138_v16 = vld [vmem:[%s3222_s20 + $0xa8] sm:$0xf] }
 0x202   : >> { %2137 = vst [vmem:[%s3218_s15 + $0xa4] sm:$0xf] %v2136_v4  ;;  %v2140_v53 = vld [vmem:[%s3222_s20 + $0xac] sm:$0xf]  ;;  %v2142_v50 = vld [vmem:[%s3222_s20 + $0xb0] sm:$0xf] }
 0x203   : >> { %2139 = vst [vmem:[%s3218_s15 + $0xa8] sm:$0xf] %v2138_v16  ;;  %2141 = vst [vmem:[%s3218_s15 + $0xac] sm:$0xf] %v2140_v53  ;;  %v2144_v5 = vld [vmem:[%s3222_s20 + $0xb4] sm:$0xf] }
 0x204   : >> { %2143 = vst [vmem:[%s3218_s15 + $0xb0] sm:$0xf] %v2142_v50  ;;  %v2146_v3 = vld [vmem:[%s3222_s20 + $0xb8] sm:$0xf]  ;;  %v2148_v54 = vld [vmem:[%s3222_s20 + $0xbc] sm:$0xf] }
 0x205   : >> { %2145 = vst [vmem:[%s3218_s15 + $0xb4] sm:$0xf] %v2144_v5  ;;  %2147 = vst [vmem:[%s3218_s15 + $0xb8] sm:$0xf] %v2146_v3  ;;  %v2150_v10 = vld [vmem:[%s3222_s20 + $0xc0] sm:$0xf] }
 0x206   : >> { %2149 = vst [vmem:[%s3218_s15 + $0xbc] sm:$0xf] %v2148_v54  ;;  %v2152_v58 = vld [vmem:[%s3222_s20 + $0xc4] sm:$0xf]  ;;  %v2154_v63 = vld [vmem:[%s3222_s20 + $0xc8] sm:$0xf] }
 0x207   : >> { %2151 = vst [vmem:[%s3218_s15 + $0xc0] sm:$0xf] %v2150_v10  ;;  %2153 = vst [vmem:[%s3218_s15 + $0xc4] sm:$0xf] %v2152_v58  ;;  %v2156_v8 = vld [vmem:[%s3222_s20 + $0xcc] sm:$0xf] }
 0x208   : >> { %2155 = vst [vmem:[%s3218_s15 + $0xc8] sm:$0xf] %v2154_v63  ;;  %v2158_v40 = vld [vmem:[%s3222_s20 + $0xd0] sm:$0xf]  ;;  %v2160_v43 = vld [vmem:[%s3222_s20 + $0xd4] sm:$0xf] }
 0x209   : >> { %2157 = vst [vmem:[%s3218_s15 + $0xcc] sm:$0xf] %v2156_v8  ;;  %2159 = vst [vmem:[%s3218_s15 + $0xd0] sm:$0xf] %v2158_v40  ;;  %v2162_v48 = vld [vmem:[%s3222_s20 + $0xd8] sm:$0xf] }
 0x20a   : >> { %2161 = vst [vmem:[%s3218_s15 + $0xd4] sm:$0xf] %v2160_v43  ;;  %v2164_v61 = vld [vmem:[%s3222_s20 + $0xdc] sm:$0xf]  ;;  %v2166_v62 = vld [vmem:[%s3222_s20 + $0xe0] sm:$0xf] }
 0x20b   : >> { %2163 = vst [vmem:[%s3218_s15 + $0xd8] sm:$0xf] %v2162_v48  ;;  %2165 = vst [vmem:[%s3218_s15 + $0xdc] sm:$0xf] %v2164_v61  ;;  %v2168_v1 = vld [vmem:[%s3222_s20 + $0xe4] sm:$0xf] }
 0x20c   : >> { %2167 = vst [vmem:[%s3218_s15 + $0xe0] sm:$0xf] %v2166_v62  ;;  %v2170_v60 = vld [vmem:[%s3222_s20 + $0xe8] sm:$0xf]  ;;  %v2172_v49 = vld [vmem:[%s3222_s20 + $0xec] sm:$0xf] }
 0x20d   : >> { %2169 = vst [vmem:[%s3218_s15 + $0xe4] sm:$0xf] %v2168_v1  ;;  %2171 = vst [vmem:[%s3218_s15 + $0xe8] sm:$0xf] %v2170_v60  ;;  %v2174_v33 = vld [vmem:[%s3222_s20 + $0xf0] sm:$0xf] }
 0x20e   : >> { %2173 = vst [vmem:[%s3218_s15 + $0xec] sm:$0xf] %v2172_v49  ;;  %v2176_v42 = vld [vmem:[%s3222_s20 + $0xf4] sm:$0xf]  ;;  %v2178_v52 = vld [vmem:[%s3222_s20 + $0xf8] sm:$0xf] }
 0x20f   : >> { %2175 = vst [vmem:[%s3218_s15 + $0xf0] sm:$0xf] %v2174_v33  ;;  %2177 = vst [vmem:[%s3218_s15 + $0xf4] sm:$0xf] %v2176_v42  ;;  %v2180_v2 = vld [vmem:[%s3222_s20 + $0xfc] sm:$0xf] }
 0x210   : >> { %2179 = vst [vmem:[%s3218_s15 + $0xf8] sm:$0xf] %v2178_v52  ;;  %2181 = vst [vmem:[%s3218_s15 + $0xfc] sm:$0xf] %v2180_v2  ;;  %s4058_s8 = smov (%p2183_p11, %s2182_s8), 0  ;;  %s2048_s7 = sadd.s32 1, %s3230_s7  }
 0x211   : >> { %s2713_s10 = sshll.u32 %s4058_s8, 8  ;;  %p2047_p12 = scmp.ge.s32.totalorder %s2048_s7, %s3858_s6 }
 0x212   : >> { %s2187_s20 = scalar_lea.vmem %s3597_s12, %s2713_s10 [#allocation2]   ;;  %s2188_s15 = scalar_lea.vmem %s3852_s4, %s2713_s10  }
 0x213   : >> { %s4051_s23 = smov %s4058_s8  ;;  %2050 = sbr.rel (!%p2047_p12) target bundleno = 486 (0x1e6), region = 118 }
 0x218 PF: > { %s4026_s11 = sand.u32 63, %s4056_s27   ;;  %s2788_s14 = sshll.u32 %s3858_s6, 8 }
 0x219   : > { %s2193_s17 = scalar_lea.vmem %s3597_s12, %s2788_s14 [#allocation2]   ;;  %s2195_s18 = scalar_lea.vmem %s3852_s4, %s2788_s14  }
 0x21a   : > { %p2718_p13 = scmp.le.s32.totalorder %s4026_s11, 0 }
 0x21b   : > { %s3232_s21 = smov (!%p2718_p13), %s2195_s18   ;;  %s3236_s22 = smov (!%p2718_p13), %s2193_s17  }
 0x21c   : > { %2458 = sbr.rel (%p2718_p13) target bundleno = 553 (0x229), region = 123  ;;  %s3240_s9 = smov (!%p2718_p13), 0  }
 0x21d   : > { %s3244_s24 = smov (!%p2718_p13), 0  }
 0x221 LB: >> { %v2205_v57 = vld [vmem:[%s3238_s22] sm:$0xf]  ;;  %s2207_s25 = sadd.s32 1, %s3242_s9  ;;  %s2199_s24 = sadd.s32 1, %s3246_s24   ;;  %s3246_s24 = sphi %s3244_s24, %s2199_s24   ;;  %s3242_s9 = sphi %s3240_s9, %s3241_s9   ;;  %s3238_s22 = sphi %s3236_s22, %s2212_s22   ;;  %s3234_s21 = sphi %s3232_s21, %s2213_s21  }
 0x222   : >> { %2206 = vst [vmem:[%s3234_s21] sm:$0xf] %v2205_v57  ;;  %p2208_p0 = scmp.ge.s32.totalorder %s2207_s25, %s4026_s11  ;;  %p2198_p1 = scmp.ge.s32.totalorder %s2199_s24, %s4026_s11 }
 0x224   : >> { %s4060_s25 = smov (%p2208_p0, %s2207_s25), 0  ;;  %2201 = sbr.rel (!%p2198_p1) target bundleno = 545 (0x221), region = 129 }
 0x225   : >> { %s2719_s26 = sshll.u32 %s4060_s25, 2  ;;  %s3241_s9 = smov %s4060_s25  }
 0x226   : >> { %s2212_s22 = scalar_lea.vmem %s2193_s17, %s2719_s26 [#allocation2]   ;;  %s2213_s21 = scalar_lea.vmem %s2195_s18, %s2719_s26  }
 0x229 PF: > { %p10_p2 = scmp.ge.s32.totalorder %s3284_s16, 6   ;;  %s4052_s12 = smov %s3210_s13 }
 0x22a   : > { %s4053_s13 = smov %s3292_s19  ;;  %s4054_s14 = smov %s3284_s16 }
 0x22b   :  { %12 = sbr.rel (!%p10_p2) target bundleno = 2 (0x2), region = 140 }

// kernel: _lambda_.37
= control target key start
LH: loop header
LB: loop body
LE: loop exit
PB: predicated region body
PF: predicated region fallthrough
CT: control target
= control target key end

     0   :  { %s2457_s18 = smov 0   ;;  %s2459_s19 = smov 0   ;;  %s3001_s0 = inlined_call_operand.vmem [shape: bf16[1568,32], index: 0, kind: input, shape index: {}]   ;;  %s3002_s1 = inlined_call_operand.vmem [shape: bf16[32,128], index: 1, kind: input, shape index: {}]   ;;  %s3003_s2 = inlined_call_operand.vmem [shape: f32[1,128], index: 2, kind: input, shape index: {}]   ;;  %s3004_s3 = inlined_call_operand.vmem [shape: bf16[128,128], index: 3, kind: input, shape index: {}]   ;;  %s3005_s4 = inlined_call_operand.vmem [shape: f32[1,128], index: 4, kind: input, shape index: {}]   ;;  %s3006_s5 = inlined_call_operand.vmem [shape: f32[1568,128], index: 5, kind: output, shape index: {}]  }
   0x1   :  { %s2461_s20 = smov 0  }
   0x2 LB: > { %s2470_s21 = sadd.s32 4294967295, %s2393_s20   ;;  %s2472_s22 = sadd.s32 1, %s2393_s20   ;;  %s2393_s20 = sphi %s2461_s20, %s3015_s20   ;;  %s2389_s19 = sphi %s2459_s19, %s3014_s19   ;;  %s2385_s18 = sphi %s2457_s18, %s3013_s18  }
   0x3   : > { %s129_s23 = ssub.s32 %s2393_s20, %s2472_s22  ;;  %s132_s24 = sadd.s32 1, %s2389_s19 }
   0x4   : > { %p130_p0 = scmp.eq.s32.totalorder %s129_s23, 0  ;;  %p142_p1 = scmp.ne.s32.totalorder %s2389_s19, %s2385_s18 }
   0x5   : > { %p143_p2 = scmp.eq.s32.totalorder %s2470_s21, 3  ;;  %p1871_p3 = scmp.ge.s32.totalorder %s2393_s20, 1 }
   0x6   : > { %s2480_s25 = scalar_select %p130_p0, %s2389_s19, %s132_s24  }
   0x7   : > { %p2482_p4 = por %p143_p2, %p142_p1  ;;  %p196_p5 = scmp.lt.s32.totalorder %s2393_s20, 5 }
   0x9   : > { %p197_p6 = pnand %p1871_p3, %p196_p5 }
   0xa   : > { %s2490_s29 = sshll.u32 (!%p197_p6), %s2470_s21, 6 }
   0xb   : > { %200 = sbr.rel (%p197_p6) target bundleno = 617 (0x269), region = 40  ;;  %p232_p7 = scmp.lt.s32.totalorder (!%p197_p6), %s2490_s29, 195 }
  0x10   : > { %v2297_v0 = vld [vmem:[%s3002_s1 + $0x8] sm:$0xff]   ;;  %v2298_v1 = vld [vmem:[%s3002_s1] sm:$0xff]   ;;  %v2331_v2 = vld [vmem:[%s3004_s3 + $0x38] sm:$0xff]   ;;  %s233_s9 = scalar_select %p232_p7, %s2490_s29, 195  ;;  %vm494_vm0 = vcmask 261120  }
  0x11   : > { %2045 = vmatprep.subr.bf16.mxu0 %v2297_v0  ;;  %v2332_v3 = vld [vmem:[%s3004_s3 + $0x30] sm:$0xff]   ;;  %2193 = vmatprep.subr.bf16.mxu1 %v2331_v2  ;;  %v2333_v4 = vld [vmem:[%s3004_s3 + $0x28] sm:$0xff]   ;;  %v2334_v8 = vld [vmem:[%s3004_s3 + $0x20] sm:$0xff]   ;;  %s1968_s17 = sshll.u32 (%p2482_p4), %s2470_s21, 9 }
  0x12   : > { %2046 = vmatpush3.bf16.msra.mxu0 %v2297_v0  ;;  %s1874_s12 = sshll.u32 %s233_s9, 2  ;;  %2201 = vmatpush3.bf16.msra.mxu1 %v2331_v2  ;;  %v2335_v11 = vld [vmem:[%s3004_s3 + $0x18] sm:$0xff]   ;;  %v2336_v26 = vld [vmem:[%s3004_s3 + $0x10] sm:$0xff]   ;;  %v2337_v28 = vld [vmem:[%s3004_s3 + $0x8] sm:$0xff]   ;;  %s2802_s24 = scalar_lea.vmem (%p2482_p4), %s3006_s5, %s1968_s17  }
  0x13   : > { %2047 = vmatprep.subr.bf16.mxu0 %v2298_v1  ;;  %s2506_s15 = scalar_lea.vmem %s3001_s0, %s1874_s12  ;;  %2194 = vmatprep.subr.bf16.mxu1 %v2332_v3  ;;  %v2338_v30 = vld [vmem:[%s3004_s3] sm:$0xff]   ;;  %s224_s12 = sand.u32 1, %s2385_s18  }
  0x14   : > { %v2299_v5 = vld [vmem:[%s2506_s15] sm:$0xff]   ;;  %v2300_v6 = vld [vmem:[%s2506_s15 + $0x8] sm:$0xff]   ;;  %v2301_v7 = vld [vmem:[%s2506_s15 + $0x10] sm:$0xff]   ;;  %s1872_s13 = sshll.u32 %s224_s12, 9  ;;  %s1408_s18 = ssub.s32 (%p2482_p4), 196, %s2490_s29 }
  0x15   : > { %2049 = vmatprep.mubr.msk.bf16.mxu0 %vm494_vm0, %v2299_v5  ;;  %v2302_v9 = vld [vmem:[%s2506_s15 + $0x18] sm:$0xff]   ;;  %v2303_v10 = vld [vmem:[%s2506_s15 + $0x20] sm:$0xff]   ;;  %v2304_v12 = vld [vmem:[%s2506_s15 + $0x28] sm:$0xff]   ;;  %s2666_s16 = scalar_lea.vmem [#allocation2], %s1872_s13   ;;  %p1409_p8 = scmp.lt.s32.totalorder (%p2482_p4), %s1408_s18, 64 }
  0x16   : > { %2048 = vmatpush3.bf16.msra.mxu0 %v2298_v1  ;;  %2202 = vmatpush3.bf16.msra.mxu1 %v2332_v3  ;;  %v2305_v13 = vld [vmem:[%s2506_s15 + $0x30] sm:$0xff]   ;;  %v2306_v14 = vld [vmem:[%s2506_s15 + $0x38] sm:$0xff]   ;;  %v2307_v15 = vld [vmem:[%s2506_s15 + $0x40] sm:$0xff]  }
  0x17   : > { %2113 = vmatprep.subr.bf16.mxu0 %v2331_v2  ;;  %2195 = vmatprep.subr.bf16.mxu1 %v2333_v4  ;;  %v2308_v16 = vld [vmem:[%s2506_s15 + $0x48] sm:$0xff]   ;;  %v2309_v17 = vld [vmem:[%s2506_s15 + $0x50] sm:$0xff]   ;;  %v2310_v18 = vld [vmem:[%s2506_s15 + $0x58] sm:$0xff]  }
  0x18   : > { %v2311_v19 = vld [vmem:[%s2506_s15 + $0x60] sm:$0xff]   ;;  %v2312_v20 = vld [vmem:[%s2506_s15 + $0x68] sm:$0xff]   ;;  %v2313_v21 = vld [vmem:[%s2506_s15 + $0x70] sm:$0xff]  }
  0x19   : > { %2050 = vmatmul.mubr.msk.bf16.vlgmr.msra.gmra.mxu0 %vm494_vm0, %v2300_v6  ;;  %v2314_v22 = vld [vmem:[%s2506_s15 + $0x78] sm:$0xff]   ;;  %v2315_v23 = vld [vmem:[%s2506_s15 + $0x80] sm:$0xff]   ;;  %v2316_v24 = vld [vmem:[%s2506_s15 + $0x88] sm:$0xff]  }
  0x1a   : > { %2053 = vmatprep.mubr.msk.bf16.mxu0 %vm494_vm0, %v2301_v7  ;;  %2114 = vmatpush3.bf16.msra.mxu0 %v2331_v2  ;;  %v2317_v25 = vld [vmem:[%s2506_s15 + $0x90] sm:$0xff]   ;;  %v2318_v27 = vld [vmem:[%s2506_s15 + $0x98] sm:$0xff]   ;;  %v2319_v29 = vld [vmem:[%s2506_s15 + $0xa0] sm:$0xff]  }
  0x1b   : > { %2115 = vmatprep.subr.bf16.mxu0 %v2332_v3  ;;  %2203 = vmatpush3.bf16.msra.mxu1 %v2333_v4  ;;  %v2320_v31 = vld [vmem:[%s2506_s15 + $0xa8] sm:$0xff]   ;;  %v2321_v32 = vld [vmem:[%s2506_s15 + $0xb0] sm:$0xff]   ;;  %v2322_v33 = vld [vmem:[%s2506_s15 + $0xb8] sm:$0xff]  }
  0x1c   : > { %2196 = vmatprep.subr.bf16.mxu1 %v2334_v8  ;;  %v2323_v34 = vld [vmem:[%s2506_s15 + $0xc0] sm:$0xff]   ;;  %v2324_v35 = vld [vmem:[%s2506_s15 + $0xc8] sm:$0xff]   ;;  %v2325_v36 = vld [vmem:[%s2506_s15 + $0xd0] sm:$0xff]  }
  0x1d   : > { %v2326_v37 = vld [vmem:[%s2506_s15 + $0xd8] sm:$0xff]   ;;  %v2327_v38 = vld [vmem:[%s2506_s15 + $0xe0] sm:$0xff]   ;;  %v2328_v39 = vld [vmem:[%s2506_s15 + $0xe8] sm:$0xff]  }
  0x1e   : > { %2116 = vmatpush3.bf16.msra.mxu0 %v2332_v3  ;;  %v2329_v40 = vld [vmem:[%s2506_s15 + $0xf0] sm:$0xff]   ;;  %v2330_v41 = vld [vmem:[%s2506_s15 + $0xf8] sm:$0xff]   ;;  %v2593_v44 = vld [vmem:[%s3003_s2] ss:$0 sm:$0xff] }
  0x1f   : > { %2117 = vmatprep.subr.bf16.mxu0 %v2333_v4  ;;  %2204 = vmatpush3.bf16.msra.mxu1 %v2334_v8 }
  0x20   : > { %2197 = vmatprep.subr.bf16.mxu1 %v2335_v11 }
  0x21   : > { %2054 = vmatmul.mubr.msk.bf16.gmra.mxu0 %vm494_vm0, %v2302_v9 }
  0x22   : > { %2057 = vmatprep.mubr.msk.bf16.mxu0 %vm494_vm0, %v2303_v10  ;;  %2118 = vmatpush3.bf16.msra.mxu0 %v2333_v4 }
  0x23   : > { %2119 = vmatprep.subr.bf16.mxu0 %v2334_v8  ;;  %2205 = vmatpush3.bf16.msra.mxu1 %v2335_v11 }
  0x24   : > { %2198 = vmatprep.subr.bf16.mxu1 %v2336_v26 }
  0x26   : > { %2120 = vmatpush3.bf16.msra.mxu0 %v2334_v8 }
  0x27   : > { %2121 = vmatprep.subr.bf16.mxu0 %v2335_v11  ;;  %2206 = vmatpush3.bf16.msra.mxu1 %v2336_v26 }
  0x28   : > { %2199 = vmatprep.subr.bf16.mxu1 %v2337_v28 }
  0x29   : > { %2058 = vmatmul.mubr.msk.bf16.gmra.mxu0 %vm494_vm0, %v2304_v12 }
  0x2a   : > { %2061 = vmatprep.mubr.msk.bf16.mxu0 %vm494_vm0, %v2305_v13  ;;  %2122 = vmatpush3.bf16.msra.mxu0 %v2335_v11 }
  0x2b   : > { %2123 = vmatprep.subr.bf16.mxu0 %v2336_v26  ;;  %2207 = vmatpush3.bf16.msra.mxu1 %v2337_v28 }
  0x2c   : > { %2200 = vmatprep.subr.bf16.mxu1 %v2338_v30 }
  0x2e   : > { %2124 = vmatpush3.bf16.msra.mxu0 %v2336_v26 }
  0x2f   : > { %2125 = vmatprep.subr.bf16.mxu0 %v2337_v28  ;;  %2208 = vmatpush3.bf16.msra.mxu1 %v2338_v30 }
  0x31   : > { %2062 = vmatmul.mubr.msk.bf16.gmra.mxu0 %vm494_vm0, %v2306_v14 }
  0x32   : > { %2065 = vmatprep.mubr.msk.bf16.mxu0 %vm494_vm0, %v2307_v15  ;;  %2126 = vmatpush3.bf16.msra.mxu0 %v2337_v28 }
  0x33   : > { %2127 = vmatprep.subr.bf16.mxu0 %v2338_v30 }
  0x36   : > { %2128 = vmatpush3.bf16.msra.mxu0 %v2338_v30 }
  0x39   : > { %2066 = vmatmul.mubr.msk.bf16.gmra.mxu0 %vm494_vm0, %v2308_v16 }
  0x3a   : > { %2069 = vmatprep.mubr.msk.bf16.mxu0 %vm494_vm0, %v2309_v17 }
  0x41   : > { %2070 = vmatmul.mubr.msk.bf16.gmra.mxu0 %vm494_vm0, %v2310_v18 }
  0x42   : > { %2073 = vmatprep.mubr.msk.bf16.mxu0 %vm494_vm0, %v2311_v19 }
  0x49   : > { %2074 = vmatmul.mubr.msk.bf16.gmra.mxu0 %vm494_vm0, %v2312_v20 }
  0x4a   : > { %2077 = vmatprep.mubr.msk.bf16.mxu0 %vm494_vm0, %v2313_v21 }
  0x51   : > { %2078 = vmatmul.mubr.msk.bf16.gmra.mxu0 %vm494_vm0, %v2314_v22 }
  0x52   : > { %2081 = vmatprep.mubr.msk.bf16.mxu0 %vm494_vm0, %v2315_v23 }
  0x59   : > { %2082 = vmatmul.mubr.msk.bf16.gmra.mxu0 %vm494_vm0, %v2316_v24 }
  0x5a   : > { %2085 = vmatprep.mubr.msk.bf16.mxu0 %vm494_vm0, %v2317_v25 }
  0x61   : > { %2086 = vmatmul.mubr.msk.bf16.gmra.mxu0 %vm494_vm0, %v2318_v27 }
  0x62   : > { %2089 = vmatprep.mubr.msk.bf16.mxu0 %vm494_vm0, %v2319_v29 }
  0x69   : > { %2090 = vmatmul.mubr.msk.bf16.gmra.mxu0 %vm494_vm0, %v2320_v31 }
  0x6a   : > { %2093 = vmatprep.mubr.msk.bf16.mxu0 %vm494_vm0, %v2321_v32 }
  0x71   : > { %2094 = vmatmul.mubr.msk.bf16.gmra.mxu0 %vm494_vm0, %v2322_v33 }
  0x72   : > { %2097 = vmatprep.mubr.msk.bf16.mxu0 %vm494_vm0, %v2323_v34 }
  0x79   : > { %2098 = vmatmul.mubr.msk.bf16.gmra.mxu0 %vm494_vm0, %v2324_v35 }
  0x7a   : > { %2101 = vmatprep.mubr.msk.bf16.mxu0 %vm494_vm0, %v2325_v36 }
  0x81   : > { %2102 = vmatmul.mubr.msk.bf16.gmra.mxu0 %vm494_vm0, %v2326_v37 }
  0x82   : > { %2105 = vmatprep.mubr.msk.bf16.mxu0 %vm494_vm0, %v2327_v38 }
  0x89   : > { %2106 = vmatmul.mubr.msk.bf16.gmra.mxu0 %vm494_vm0, %v2328_v39 }
  0x8a   : > { %2109 = vmatprep.mubr.msk.bf16.mxu0 %vm494_vm0, %v2329_v40 }
  0x91   : > { %2110 = vmatmul.mubr.msk.bf16.gmra.mxu0 %vm494_vm0, %v2330_v41 }
  0xd9   : > { %v2051_v42 = vpop.f32.mrf.mxu0 }
  0xda   : > { %v634_v48 = vadd.f32 %v2051_v42, %v2593_v44 }
  0xdb   : > { %v625_v43 = vpop.f32.mrf.mxu0 }
  0xdc   : > { %v626_v46 = vadd.f32 %v2593_v44, %v625_v43  ;;  %v882_v55 = vmax.f32 %v634_v48, 0.0 }
  0xdd   : > { %v2052_v45 = vpop.f32.mrf.mxu0 }
  0xde   : > { %v637_v47 = vadd.f32 %v2052_v45, %v2593_v44  ;;  %v880_v53 = vmax.f32 %v626_v46, 0.0 }
  0xdf   : > { %v628_v49 = vpop.f32.mrf.mxu0 }
  0xe0   : > { %v629_v50 = vadd.f32 %v2593_v44, %v628_v49  ;;  %v883_v51 = vmax.f32 %v637_v47, 0.0 }
  0xe1   : > { %v2055_v52 = vpop.f32.mrf.mxu0 }
  0xe2   : > { %v881_v54 = vmax.f32 %v629_v50, 0.0  ;;  %v945_v58 = vpack.c.bf16 %v883_v51, %v882_v55  ;;  %v650_v62 = vadd.f32 %v2055_v52, %v2593_v44 }
  0xe3   : > { %v641_v56 = vpop.f32.mrf.mxu0 }
  0xe4   : > { %v944_v57 = vpack.c.bf16 %v881_v54, %v880_v53  ;;  %v642_v60 = vadd.f32 %v2593_v44, %v641_v56  ;;  %v886_v5 = vmax.f32 %v650_v62, 0.0 }
  0xe5   : > { %v2056_v59 = vpop.f32.mrf.mxu0 }
  0xe6   : > { %v653_v61 = vadd.f32 %v2056_v59, %v2593_v44  ;;  %2129 = vmatprep.mubr.bf16.mxu0 %v944_v57  ;;  %v884_v3 = vmax.f32 %v642_v60, 0.0 }
  0xe7   : > { %v644_v63 = vpop.f32.mrf.mxu0  ;;  %2130 = vmatmul.mubr.bf16.vlgmr.msra.gmra.mxu0 %v945_v58 }
  0xe8   : > { %v645_v0 = vadd.f32 %v2593_v44, %v644_v63  ;;  %v887_v1 = vmax.f32 %v653_v61, 0.0 }
  0xe9   : > { %v2059_v2 = vpop.f32.mrf.mxu0 }
  0xea   : > { %v885_v4 = vmax.f32 %v645_v0, 0.0  ;;  %v947_v8 = vpack.c.bf16 %v887_v1, %v886_v5  ;;  %v666_v12 = vadd.f32 %v2059_v2, %v2593_v44 }
  0xeb   : > { %v657_v6 = vpop.f32.mrf.mxu0 }
  0xec   : > { %v946_v7 = vpack.c.bf16 %v885_v4, %v884_v3  ;;  %v658_v10 = vadd.f32 %v2593_v44, %v657_v6  ;;  %v890_v19 = vmax.f32 %v666_v12, 0.0 }
  0xed   : > { %v2060_v9 = vpop.f32.mrf.mxu0 }
  0xee   : > { %v669_v11 = vadd.f32 %v2060_v9, %v2593_v44  ;;  %2133 = vmatprep.mubr.bf16.mxu1 %v946_v7  ;;  %v888_v17 = vmax.f32 %v658_v10, 0.0 }
  0xef   : > { %v660_v13 = vpop.f32.mrf.mxu0  ;;  %2134 = vmatmul.mubr.bf16.vlgmr.msra.gmra.mxu1 %v947_v8 }
  0xf0   : > { %v661_v14 = vadd.f32 %v2593_v44, %v660_v13  ;;  %v891_v15 = vmax.f32 %v669_v11, 0.0 }
  0xf1   : > { %v2063_v16 = vpop.f32.mrf.mxu0 }
  0xf2   : > { %v889_v18 = vmax.f32 %v661_v14, 0.0  ;;  %v949_v22 = vpack.c.bf16 %v891_v15, %v890_v19  ;;  %v682_v26 = vadd.f32 %v2063_v16, %v2593_v44 }
  0xf3   : > { %v673_v20 = vpop.f32.mrf.mxu0 }
  0xf4   : > { %v948_v21 = vpack.c.bf16 %v889_v18, %v888_v17  ;;  %v674_v24 = vadd.f32 %v2593_v44, %v673_v20  ;;  %v894_v33 = vmax.f32 %v682_v26, 0.0 }
  0xf5   : > { %v2064_v23 = vpop.f32.mrf.mxu0 }
  0xf6   : > { %v685_v25 = vadd.f32 %v2064_v23, %v2593_v44  ;;  %2137 = vmatprep.mubr.bf16.mxu1 %v948_v21  ;;  %v892_v31 = vmax.f32 %v674_v24, 0.0 }
  0xf7   : > { %v676_v27 = vpop.f32.mrf.mxu0  ;;  %2138 = vmatmul.mubr.bf16.gmra.mxu1 %v949_v22 }
  0xf8   : > { %v677_v28 = vadd.f32 %v2593_v44, %v676_v27  ;;  %v895_v29 = vmax.f32 %v685_v25, 0.0 }
  0xf9   : > { %v2067_v30 = vpop.f32.mrf.mxu0 }
  0xfa   : > { %v893_v32 = vmax.f32 %v677_v28, 0.0  ;;  %v951_v36 = vpack.c.bf16 %v895_v29, %v894_v33  ;;  %v698_v40 = vadd.f32 %v2067_v30, %v2593_v44 }
  0xfb   : > { %v689_v34 = vpop.f32.mrf.mxu0 }
  0xfc   : > { %v950_v35 = vpack.c.bf16 %v893_v32, %v892_v31  ;;  %v690_v38 = vadd.f32 %v2593_v44, %v689_v34  ;;  %v898_v48 = vmax.f32 %v698_v40, 0.0 }
  0xfd   : > { %v2068_v37 = vpop.f32.mrf.mxu0 }
  0xfe   : > { %v701_v39 = vadd.f32 %v2068_v37, %v2593_v44  ;;  %2141 = vmatprep.mubr.bf16.mxu1 %v950_v35  ;;  %v896_v46 = vmax.f32 %v690_v38, 0.0 }
  0xff   : > { %v692_v41 = vpop.f32.mrf.mxu0  ;;  %2142 = vmatmul.mubr.bf16.gmra.mxu1 %v951_v36 }
 0x100   : > { %v693_v42 = vadd.f32 %v2593_v44, %v692_v41  ;;  %v899_v43 = vmax.f32 %v701_v39, 0.0 }
 0x101   : > { %v2071_v45 = vpop.f32.mrf.mxu0 }
 0x102   : > { %v897_v47 = vmax.f32 %v693_v42, 0.0  ;;  %v953_v51 = vpack.c.bf16 %v899_v43, %v898_v48  ;;  %v714_v55 = vadd.f32 %v2071_v45, %v2593_v44 }
 0x103   : > { %v705_v49 = vpop.f32.mrf.mxu0 }
 0x104   : > { %v952_v50 = vpack.c.bf16 %v897_v47, %v896_v46  ;;  %v706_v53 = vadd.f32 %v2593_v44, %v705_v49  ;;  %v902_v62 = vmax.f32 %v714_v55, 0.0 }
 0x105   : > { %v2072_v52 = vpop.f32.mrf.mxu0 }
 0x106   : > { %v717_v54 = vadd.f32 %v2072_v52, %v2593_v44  ;;  %2145 = vmatprep.mubr.bf16.mxu1 %v952_v50  ;;  %v900_v60 = vmax.f32 %v706_v53, 0.0 }
 0x107   : > { %v708_v56 = vpop.f32.mrf.mxu0  ;;  %2146 = vmatmul.mubr.bf16.gmra.mxu1 %v953_v51 }
 0x108   : > { %v709_v57 = vadd.f32 %v2593_v44, %v708_v56  ;;  %v903_v58 = vmax.f32 %v717_v54, 0.0 }
 0x109   : > { %v2075_v59 = vpop.f32.mrf.mxu0 }
 0x10a   : > { %v901_v61 = vmax.f32 %v709_v57, 0.0  ;;  %v955_v1 = vpack.c.bf16 %v903_v58, %v902_v62  ;;  %v730_v5 = vadd.f32 %v2075_v59, %v2593_v44 }
 0x10b   : > { %v721_v63 = vpop.f32.mrf.mxu0 }
 0x10c   : > { %v954_v0 = vpack.c.bf16 %v901_v61, %v900_v60  ;;  %v722_v3 = vadd.f32 %v2593_v44, %v721_v63  ;;  %v906_v12 = vmax.f32 %v730_v5, 0.0 }
 0x10d   : > { %v2076_v2 = vpop.f32.mrf.mxu0 }
 0x10e   : > { %v733_v4 = vadd.f32 %v2076_v2, %v2593_v44  ;;  %2149 = vmatprep.mubr.bf16.mxu1 %v954_v0  ;;  %v904_v10 = vmax.f32 %v722_v3, 0.0 }
 0x10f   : > { %v724_v6 = vpop.f32.mrf.mxu0  ;;  %2150 = vmatmul.mubr.bf16.gmra.mxu1 %v955_v1 }
 0x110   : > { %v725_v7 = vadd.f32 %v2593_v44, %v724_v6  ;;  %v907_v8 = vmax.f32 %v733_v4, 0.0 }
 0x111   : > { %v2079_v9 = vpop.f32.mrf.mxu0 }
 0x112   : > { %v905_v11 = vmax.f32 %v725_v7, 0.0  ;;  %v957_v15 = vpack.c.bf16 %v907_v8, %v906_v12  ;;  %v746_v19 = vadd.f32 %v2079_v9, %v2593_v44 }
 0x113   : > { %v737_v13 = vpop.f32.mrf.mxu0 }
 0x114   : > { %v956_v14 = vpack.c.bf16 %v905_v11, %v904_v10  ;;  %v738_v17 = vadd.f32 %v2593_v44, %v737_v13  ;;  %v910_v26 = vmax.f32 %v746_v19, 0.0 }
 0x115   : > { %v2080_v16 = vpop.f32.mrf.mxu0 }
 0x116   : > { %v749_v18 = vadd.f32 %v2080_v16, %v2593_v44  ;;  %2153 = vmatprep.mubr.bf16.mxu1 %v956_v14  ;;  %v908_v24 = vmax.f32 %v738_v17, 0.0 }
 0x117   : > { %v740_v20 = vpop.f32.mrf.mxu0  ;;  %2154 = vmatmul.mubr.bf16.gmra.mxu1 %v957_v15 }
 0x118   : > { %v741_v21 = vadd.f32 %v2593_v44, %v740_v20  ;;  %v911_v22 = vmax.f32 %v749_v18, 0.0 }
 0x119   : > { %v2083_v23 = vpop.f32.mrf.mxu0 }
 0x11a   : > { %v909_v25 = vmax.f32 %v741_v21, 0.0  ;;  %v959_v29 = vpack.c.bf16 %v911_v22, %v910_v26  ;;  %v762_v33 = vadd.f32 %v2083_v23, %v2593_v44 }
 0x11b   : > { %v753_v27 = vpop.f32.mrf.mxu0 }
 0x11c   : > { %v958_v28 = vpack.c.bf16 %v909_v25, %v908_v24  ;;  %v754_v31 = vadd.f32 %v2593_v44, %v753_v27  ;;  %v914_v40 = vmax.f32 %v762_v33, 0.0 }
 0x11d   : > { %v2084_v30 = vpop.f32.mrf.mxu0 }
 0x11e   : > { %v765_v32 = vadd.f32 %v2084_v30, %v2593_v44  ;;  %2157 = vmatprep.mubr.bf16.mxu1 %v958_v28  ;;  %v912_v38 = vmax.f32 %v754_v31, 0.0 }
 0x11f   : > { %v756_v34 = vpop.f32.mrf.mxu0  ;;  %2158 = vmatmul.mubr.bf16.gmra.mxu1 %v959_v29 }
 0x120   : > { %v757_v35 = vadd.f32 %v2593_v44, %v756_v34  ;;  %v915_v36 = vmax.f32 %v765_v32, 0.0 }
 0x121   : > { %v2087_v37 = vpop.f32.mrf.mxu0 }
 0x122   : > { %v913_v39 = vmax.f32 %v757_v35, 0.0  ;;  %v961_v43 = vpack.c.bf16 %v915_v36, %v914_v40  ;;  %v778_v48 = vadd.f32 %v2087_v37, %v2593_v44 }
 0x123   : > { %v769_v41 = vpop.f32.mrf.mxu0 }
 0x124   : > { %v960_v42 = vpack.c.bf16 %v913_v39, %v912_v38  ;;  %v770_v46 = vadd.f32 %v2593_v44, %v769_v41  ;;  %v918_v55 = vmax.f32 %v778_v48, 0.0 }
 0x125   : > { %v2088_v45 = vpop.f32.mrf.mxu0 }
 0x126   : > { %v781_v47 = vadd.f32 %v2088_v45, %v2593_v44  ;;  %2161 = vmatprep.mubr.bf16.mxu1 %v960_v42  ;;  %v916_v53 = vmax.f32 %v770_v46, 0.0 }
 0x127   : > { %v772_v49 = vpop.f32.mrf.mxu0  ;;  %2162 = vmatmul.mubr.bf16.gmra.mxu1 %v961_v43 }
 0x128   : > { %v773_v50 = vadd.f32 %v2593_v44, %v772_v49  ;;  %v919_v51 = vmax.f32 %v781_v47, 0.0 }
 0x129   : > { %v2091_v52 = vpop.f32.mrf.mxu0 }
 0x12a   : > { %v917_v54 = vmax.f32 %v773_v50, 0.0  ;;  %v963_v58 = vpack.c.bf16 %v919_v51, %v918_v55  ;;  %v794_v62 = vadd.f32 %v2091_v52, %v2593_v44 }
 0x12b   : > { %v785_v56 = vpop.f32.mrf.mxu0 }
 0x12c   : > { %v962_v57 = vpack.c.bf16 %v917_v54, %v916_v53  ;;  %v786_v60 = vadd.f32 %v2593_v44, %v785_v56  ;;  %v922_v5 = vmax.f32 %v794_v62, 0.0 }
 0x12d   : > { %v2092_v59 = vpop.f32.mrf.mxu0 }
 0x12e   : > { %v797_v61 = vadd.f32 %v2092_v59, %v2593_v44  ;;  %2165 = vmatprep.mubr.bf16.mxu1 %v962_v57  ;;  %v920_v3 = vmax.f32 %v786_v60, 0.0 }
 0x12f   : > { %v788_v63 = vpop.f32.mrf.mxu0  ;;  %2166 = vmatmul.mubr.bf16.gmra.mxu1 %v963_v58 }
 0x130   : > { %v789_v0 = vadd.f32 %v2593_v44, %v788_v63  ;;  %v923_v1 = vmax.f32 %v797_v61, 0.0 }
 0x131   : > { %v2095_v2 = vpop.f32.mrf.mxu0 }
 0x132   : > { %v921_v4 = vmax.f32 %v789_v0, 0.0  ;;  %v965_v8 = vpack.c.bf16 %v923_v1, %v922_v5  ;;  %v810_v12 = vadd.f32 %v2095_v2, %v2593_v44 }
 0x133   : > { %v801_v6 = vpop.f32.mrf.mxu0 }
 0x134   : > { %v964_v7 = vpack.c.bf16 %v921_v4, %v920_v3  ;;  %v802_v10 = vadd.f32 %v2593_v44, %v801_v6  ;;  %v926_v19 = vmax.f32 %v810_v12, 0.0 }
 0x135   : > { %v2096_v9 = vpop.f32.mrf.mxu0 }
 0x136   : > { %v813_v11 = vadd.f32 %v2096_v9, %v2593_v44  ;;  %2169 = vmatprep.mubr.bf16.mxu1 %v964_v7  ;;  %v924_v17 = vmax.f32 %v802_v10, 0.0 }
 0x137   : > { %v804_v13 = vpop.f32.mrf.mxu0  ;;  %2170 = vmatmul.mubr.bf16.gmra.mxu1 %v965_v8 }
 0x138   : > { %v805_v14 = vadd.f32 %v2593_v44, %v804_v13  ;;  %v927_v15 = vmax.f32 %v813_v11, 0.0 }
 0x139   : > { %v2099_v16 = vpop.f32.mrf.mxu0 }
 0x13a   : > { %v925_v18 = vmax.f32 %v805_v14, 0.0  ;;  %v967_v22 = vpack.c.bf16 %v927_v15, %v926_v19  ;;  %v826_v26 = vadd.f32 %v2099_v16, %v2593_v44  ;;  %v2663_v14 = vld [vmem:[%s3005_s4] ss:$0 sm:$0xff] }
 0x13b   : > { %v817_v20 = vpop.f32.mrf.mxu0 }
 0x13c   : > { %v966_v21 = vpack.c.bf16 %v925_v18, %v924_v17  ;;  %v818_v24 = vadd.f32 %v2593_v44, %v817_v20  ;;  %v930_v33 = vmax.f32 %v826_v26, 0.0 }
 0x13d   : > { %v2100_v23 = vpop.f32.mrf.mxu0 }
 0x13e   : > { %v829_v25 = vadd.f32 %v2100_v23, %v2593_v44  ;;  %2173 = vmatprep.mubr.bf16.mxu1 %v966_v21  ;;  %v928_v31 = vmax.f32 %v818_v24, 0.0 }
 0x13f   : > { %v820_v27 = vpop.f32.mrf.mxu0  ;;  %2174 = vmatmul.mubr.bf16.gmra.mxu1 %v967_v22 }
 0x140   : > { %v821_v28 = vadd.f32 %v2593_v44, %v820_v27  ;;  %v931_v29 = vmax.f32 %v829_v25, 0.0 }
 0x141   : > { %v2103_v30 = vpop.f32.mrf.mxu0 }
 0x142   : > { %v929_v32 = vmax.f32 %v821_v28, 0.0  ;;  %v969_v36 = vpack.c.bf16 %v931_v29, %v930_v33  ;;  %v842_v40 = vadd.f32 %v2103_v30, %v2593_v44 }
 0x143   : > { %v833_v34 = vpop.f32.mrf.mxu0 }
 0x144   : > { %v968_v35 = vpack.c.bf16 %v929_v32, %v928_v31  ;;  %v834_v38 = vadd.f32 %v2593_v44, %v833_v34  ;;  %v934_v48 = vmax.f32 %v842_v40, 0.0 }
 0x145   : > { %v2104_v37 = vpop.f32.mrf.mxu0 }
 0x146   : > { %v845_v39 = vadd.f32 %v2104_v37, %v2593_v44  ;;  %2177 = vmatprep.mubr.bf16.mxu1 %v968_v35  ;;  %v932_v46 = vmax.f32 %v834_v38, 0.0 }
 0x147   : > { %v836_v41 = vpop.f32.mrf.mxu0  ;;  %2178 = vmatmul.mubr.bf16.gmra.mxu1 %v969_v36 }
 0x148   : > { %v837_v42 = vadd.f32 %v2593_v44, %v836_v41  ;;  %v935_v43 = vmax.f32 %v845_v39, 0.0 }
 0x149   : > { %v2107_v45 = vpop.f32.mrf.mxu0 }
 0x14a   : > { %v933_v47 = vmax.f32 %v837_v42, 0.0  ;;  %v971_v51 = vpack.c.bf16 %v935_v43, %v934_v48  ;;  %v858_v55 = vadd.f32 %v2107_v45, %v2593_v44 }
 0x14b   : > { %v849_v49 = vpop.f32.mrf.mxu0 }
 0x14c   : > { %v970_v50 = vpack.c.bf16 %v933_v47, %v932_v46  ;;  %v850_v53 = vadd.f32 %v2593_v44, %v849_v49  ;;  %v938_v62 = vmax.f32 %v858_v55, 0.0 }
 0x14d   : > { %v2108_v52 = vpop.f32.mrf.mxu0 }
 0x14e   : > { %v861_v54 = vadd.f32 %v2108_v52, %v2593_v44  ;;  %2181 = vmatprep.mubr.bf16.mxu1 %v970_v50  ;;  %v936_v60 = vmax.f32 %v850_v53, 0.0 }
 0x14f   : > { %v852_v56 = vpop.f32.mrf.mxu0  ;;  %2182 = vmatmul.mubr.bf16.gmra.mxu1 %v971_v51 }
 0x150   : > { %v853_v57 = vadd.f32 %v2593_v44, %v852_v56  ;;  %v939_v58 = vmax.f32 %v861_v54, 0.0 }
 0x151   : > { %v2111_v59 = vpop.f32.mrf.mxu0 }
 0x152   : > { %v937_v61 = vmax.f32 %v853_v57, 0.0  ;;  %v973_v1 = vpack.c.bf16 %v939_v58, %v938_v62  ;;  %v874_v5 = vadd.f32 %v2111_v59, %v2593_v44 }
 0x153   : > { %v865_v63 = vpop.f32.mrf.mxu0 }
 0x154   : > { %v972_v0 = vpack.c.bf16 %v937_v61, %v936_v60  ;;  %v866_v3 = vadd.f32 %v2593_v44, %v865_v63  ;;  %v942_v11 = vmax.f32 %v874_v5, 0.0 }
 0x155   : > { %v2112_v2 = vpop.f32.mrf.mxu0 }
 0x156   : > { %v877_v4 = vadd.f32 %v2112_v2, %v2593_v44  ;;  %2185 = vmatprep.mubr.bf16.mxu1 %v972_v0  ;;  %v940_v9 = vmax.f32 %v866_v3, 0.0 }
 0x157   : > { %v868_v6 = vpop.f32.mrf.mxu0  ;;  %2186 = vmatmul.mubr.bf16.gmra.mxu1 %v973_v1 }
 0x158   : > { %v869_v7 = vadd.f32 %v2593_v44, %v868_v6  ;;  %v943_v8 = vmax.f32 %v877_v4, 0.0 }
 0x15a   : > { %v941_v10 = vmax.f32 %v869_v7, 0.0  ;;  %v975_v13 = vpack.c.bf16 %v943_v8, %v942_v11 }
 0x15c   : > { %v974_v12 = vpack.c.bf16 %v941_v10, %v940_v9 }
 0x15e   : > { %2189 = vmatprep.mubr.bf16.mxu1 %v974_v12 }
 0x15f   : > { %2190 = vmatmul.mubr.bf16.gmra.mxu1 %v975_v13 }
 0x1a7   : > { %v2131_v15 = vpop.f32.mrf.mxu0 }
 0x1a8   : > { %v1090_v16 = vadd.f32 %v2131_v15, %v2663_v14 }
 0x1a9   : > { %v1081_v17 = vpop.f32.mrf.mxu0 }
 0x1aa   : > { %1338 = vst [vmem:[%s2666_s16 + $0x10] sm:$0xff] %v1090_v16  ;;  %v1082_v44 = vadd.f32 %v2663_v14, %v1081_v17 }
 0x1ab   : > { %v2132_v18 = vpop.f32.mrf.mxu0 }
 0x1ac   : > { %1336 = vst [vmem:[%s2666_s16] sm:$0xff] %v1082_v44  ;;  %v1093_v19 = vadd.f32 %v2132_v18, %v2663_v14 }
 0x1ad   : > { %v1084_v20 = vpop.f32.mrf.mxu0 }
 0x1ae   : > { %1339 = vst [vmem:[%s2666_s16 + $0x18] sm:$0xff] %v1093_v19  ;;  %v1085_v21 = vadd.f32 %v2663_v14, %v1084_v20 }
 0x1af   : > { %v2135_v22 = vpop.f32.mrf.mxu1 }
 0x1b0   : > { %1337 = vst [vmem:[%s2666_s16 + $0x8] sm:$0xff] %v1085_v21  ;;  %v1106_v23 = vadd.f32 %v2135_v22, %v2663_v14 }
 0x1b1   : > { %v1097_v24 = vpop.f32.mrf.mxu1 }
 0x1b2   : > { %1342 = vst [vmem:[%s2666_s16 + $0x30] sm:$0xff] %v1106_v23  ;;  %v1098_v25 = vadd.f32 %v2663_v14, %v1097_v24 }
 0x1b3   : > { %v2136_v26 = vpop.f32.mrf.mxu1 }
 0x1b4   : > { %1340 = vst [vmem:[%s2666_s16 + $0x20] sm:$0xff] %v1098_v25  ;;  %v1109_v27 = vadd.f32 %v2136_v26, %v2663_v14 }
 0x1b5   : > { %v1100_v28 = vpop.f32.mrf.mxu1 }
 0x1b6   : > { %1343 = vst [vmem:[%s2666_s16 + $0x38] sm:$0xff] %v1109_v27  ;;  %v1101_v29 = vadd.f32 %v2663_v14, %v1100_v28 }
 0x1b7   : > { %v2139_v30 = vpop.f32.mrf.mxu1 }
 0x1b8   : > { %1341 = vst [vmem:[%s2666_s16 + $0x28] sm:$0xff] %v1101_v29  ;;  %v1122_v31 = vadd.f32 %v2139_v30, %v2663_v14 }
 0x1b9   : > { %v1113_v32 = vpop.f32.mrf.mxu1 }
 0x1ba   : > { %1346 = vst [vmem:[%s2666_s16 + $0x50] sm:$0xff] %v1122_v31  ;;  %v1114_v33 = vadd.f32 %v2663_v14, %v1113_v32 }
 0x1bb   : > { %v2140_v34 = vpop.f32.mrf.mxu1 }
 0x1bc   : > { %1344 = vst [vmem:[%s2666_s16 + $0x40] sm:$0xff] %v1114_v33  ;;  %v1125_v35 = vadd.f32 %v2140_v34, %v2663_v14 }
 0x1bd   : > { %v1116_v36 = vpop.f32.mrf.mxu1 }
 0x1be   : > { %1347 = vst [vmem:[%s2666_s16 + $0x58] sm:$0xff] %v1125_v35  ;;  %v1117_v37 = vadd.f32 %v2663_v14, %v1116_v36 }
 0x1bf   : > { %v2143_v38 = vpop.f32.mrf.mxu1 }
 0x1c0   : > { %1345 = vst [vmem:[%s2666_s16 + $0x48] sm:$0xff] %v1117_v37  ;;  %v1138_v39 = vadd.f32 %v2143_v38, %v2663_v14 }
 0x1c1   : > { %v1129_v40 = vpop.f32.mrf.mxu1 }
 0x1c2   : > { %1350 = vst [vmem:[%s2666_s16 + $0x70] sm:$0xff] %v1138_v39  ;;  %v1130_v41 = vadd.f32 %v2663_v14, %v1129_v40 }
 0x1c3   : > { %v2144_v42 = vpop.f32.mrf.mxu1 }
 0x1c4   : > { %1348 = vst [vmem:[%s2666_s16 + $0x60] sm:$0xff] %v1130_v41  ;;  %v1141_v43 = vadd.f32 %v2144_v42, %v2663_v14 }
 0x1c5   : > { %v1132_v45 = vpop.f32.mrf.mxu1 }
 0x1c6   : > { %1351 = vst [vmem:[%s2666_s16 + $0x78] sm:$0xff] %v1141_v43  ;;  %v1133_v46 = vadd.f32 %v2663_v14, %v1132_v45 }
 0x1c7   : > { %v2147_v47 = vpop.f32.mrf.mxu1 }
 0x1c8   : > { %1349 = vst [vmem:[%s2666_s16 + $0x68] sm:$0xff] %v1133_v46  ;;  %v1154_v48 = vadd.f32 %v2147_v47, %v2663_v14 }
 0x1c9   : > { %v1145_v49 = vpop.f32.mrf.mxu1 }
 0x1ca   : > { %1354 = vst [vmem:[%s2666_s16 + $0x90] sm:$0xff] %v1154_v48  ;;  %v1146_v50 = vadd.f32 %v2663_v14, %v1145_v49 }
 0x1cb   : > { %v2148_v51 = vpop.f32.mrf.mxu1 }
 0x1cc   : > { %1352 = vst [vmem:[%s2666_s16 + $0x80] sm:$0xff] %v1146_v50  ;;  %v1157_v52 = vadd.f32 %v2148_v51, %v2663_v14 }
 0x1cd   : > { %v1148_v53 = vpop.f32.mrf.mxu1 }
 0x1ce   : > { %1355 = vst [vmem:[%s2666_s16 + $0x98] sm:$0xff] %v1157_v52  ;;  %v1149_v54 = vadd.f32 %v2663_v14, %v1148_v53 }
 0x1cf   : > { %v2151_v55 = vpop.f32.mrf.mxu1 }
 0x1d0   : > { %1353 = vst [vmem:[%s2666_s16 + $0x88] sm:$0xff] %v1149_v54  ;;  %v1170_v56 = vadd.f32 %v2151_v55, %v2663_v14 }
 0x1d1   : > { %v1161_v57 = vpop.f32.mrf.mxu1 }
 0x1d2   : > { %1358 = vst [vmem:[%s2666_s16 + $0xb0] sm:$0xff] %v1170_v56  ;;  %v1162_v58 = vadd.f32 %v2663_v14, %v1161_v57 }
 0x1d3   : > { %v2152_v59 = vpop.f32.mrf.mxu1 }
 0x1d4   : > { %1356 = vst [vmem:[%s2666_s16 + $0xa0] sm:$0xff] %v1162_v58  ;;  %v1173_v60 = vadd.f32 %v2152_v59, %v2663_v14 }
 0x1d5   : > { %v1164_v61 = vpop.f32.mrf.mxu1 }
 0x1d6   : > { %1359 = vst [vmem:[%s2666_s16 + $0xb8] sm:$0xff] %v1173_v60  ;;  %v1165_v62 = vadd.f32 %v2663_v14, %v1164_v61 }
 0x1d7   : > { %v2155_v63 = vpop.f32.mrf.mxu1 }
 0x1d8   : > { %1357 = vst [vmem:[%s2666_s16 + $0xa8] sm:$0xff] %v1165_v62  ;;  %v1186_v0 = vadd.f32 %v2155_v63, %v2663_v14 }
 0x1d9   : > { %v1177_v1 = vpop.f32.mrf.mxu1 }
 0x1da   : > { %1362 = vst [vmem:[%s2666_s16 + $0xd0] sm:$0xff] %v1186_v0  ;;  %v1178_v2 = vadd.f32 %v2663_v14, %v1177_v1 }
 0x1db   : > { %v2156_v3 = vpop.f32.mrf.mxu1 }
 0x1dc   : > { %1360 = vst [vmem:[%s2666_s16 + $0xc0] sm:$0xff] %v1178_v2  ;;  %v1189_v4 = vadd.f32 %v2156_v3, %v2663_v14 }
 0x1dd   : > { %v1180_v5 = vpop.f32.mrf.mxu1 }
 0x1de   : > { %1363 = vst [vmem:[%s2666_s16 + $0xd8] sm:$0xff] %v1189_v4  ;;  %v1181_v6 = vadd.f32 %v2663_v14, %v1180_v5 }
 0x1df   : > { %v2159_v7 = vpop.f32.mrf.mxu1 }
 0x1e0   : > { %1361 = vst [vmem:[%s2666_s16 + $0xc8] sm:$0xff] %v1181_v6  ;;  %v1202_v8 = vadd.f32 %v2159_v7, %v2663_v14 }
 0x1e1   : > { %v1193_v9 = vpop.f32.mrf.mxu1 }
 0x1e2   : > { %1366 = vst [vmem:[%s2666_s16 + $0xf0] sm:$0xff] %v1202_v8  ;;  %v1194_v10 = vadd.f32 %v2663_v14, %v1193_v9 }
 0x1e3   : > { %v2160_v11 = vpop.f32.mrf.mxu1 }
 0x1e4   : > { %1364 = vst [vmem:[%s2666_s16 + $0xe0] sm:$0xff] %v1194_v10  ;;  %v1205_v12 = vadd.f32 %v2160_v11, %v2663_v14 }
 0x1e5   : > { %v1196_v13 = vpop.f32.mrf.mxu1 }
 0x1e6   : > { %1367 = vst [vmem:[%s2666_s16 + $0xf8] sm:$0xff] %v1205_v12  ;;  %v1197_v15 = vadd.f32 %v2663_v14, %v1196_v13 }
 0x1e7   : > { %v2163_v16 = vpop.f32.mrf.mxu1 }
 0x1e8   : > { %1365 = vst [vmem:[%s2666_s16 + $0xe8] sm:$0xff] %v1197_v15  ;;  %v1218_v17 = vadd.f32 %v2163_v16, %v2663_v14 }
 0x1e9   : > { %v1209_v44 = vpop.f32.mrf.mxu1 }
 0x1ea   : > { %1370 = vst [vmem:[%s2666_s16 + $0x110] sm:$0xff] %v1218_v17  ;;  %v1210_v18 = vadd.f32 %v2663_v14, %v1209_v44 }
 0x1eb   : > { %v2164_v19 = vpop.f32.mrf.mxu1 }
 0x1ec   : > { %1368 = vst [vmem:[%s2666_s16 + $0x100] sm:$0xff] %v1210_v18  ;;  %v1221_v20 = vadd.f32 %v2164_v19, %v2663_v14 }
 0x1ed   : > { %v1212_v21 = vpop.f32.mrf.mxu1 }
 0x1ee   : > { %1371 = vst [vmem:[%s2666_s16 + $0x118] sm:$0xff] %v1221_v20  ;;  %v1213_v22 = vadd.f32 %v2663_v14, %v1212_v21 }
 0x1ef   : > { %v2167_v23 = vpop.f32.mrf.mxu1 }
 0x1f0   : > { %1369 = vst [vmem:[%s2666_s16 + $0x108] sm:$0xff] %v1213_v22  ;;  %v1234_v24 = vadd.f32 %v2167_v23, %v2663_v14 }
 0x1f1   : > { %v1225_v25 = vpop.f32.mrf.mxu1 }
 0x1f2   : > { %1374 = vst [vmem:[%s2666_s16 + $0x130] sm:$0xff] %v1234_v24  ;;  %v1226_v26 = vadd.f32 %v2663_v14, %v1225_v25 }
 0x1f3   : > { %v2168_v27 = vpop.f32.mrf.mxu1 }
 0x1f4   : > { %1372 = vst [vmem:[%s2666_s16 + $0x120] sm:$0xff] %v1226_v26  ;;  %v1237_v28 = vadd.f32 %v2168_v27, %v2663_v14 }
 0x1f5   : > { %v1228_v29 = vpop.f32.mrf.mxu1 }
 0x1f6   : > { %1375 = vst [vmem:[%s2666_s16 + $0x138] sm:$0xff] %v1237_v28  ;;  %v1229_v30 = vadd.f32 %v2663_v14, %v1228_v29 }
 0x1f7   : > { %v2171_v31 = vpop.f32.mrf.mxu1 }
 0x1f8   : > { %1373 = vst [vmem:[%s2666_s16 + $0x128] sm:$0xff] %v1229_v30  ;;  %v1250_v32 = vadd.f32 %v2171_v31, %v2663_v14 }
 0x1f9   : > { %v1241_v33 = vpop.f32.mrf.mxu1 }
 0x1fa   : > { %1378 = vst [vmem:[%s2666_s16 + $0x150] sm:$0xff] %v1250_v32  ;;  %v1242_v34 = vadd.f32 %v2663_v14, %v1241_v33 }
 0x1fb   : > { %v2172_v35 = vpop.f32.mrf.mxu1 }
 0x1fc   : > { %1376 = vst [vmem:[%s2666_s16 + $0x140] sm:$0xff] %v1242_v34  ;;  %v1253_v36 = vadd.f32 %v2172_v35, %v2663_v14 }
 0x1fd   : > { %v1244_v37 = vpop.f32.mrf.mxu1 }
 0x1fe   : > { %1379 = vst [vmem:[%s2666_s16 + $0x158] sm:$0xff] %v1253_v36  ;;  %v1245_v38 = vadd.f32 %v2663_v14, %v1244_v37 }
 0x1ff   : > { %v2175_v39 = vpop.f32.mrf.mxu1 }
 0x200   : > { %1377 = vst [vmem:[%s2666_s16 + $0x148] sm:$0xff] %v1245_v38  ;;  %v1266_v40 = vadd.f32 %v2175_v39, %v2663_v14 }
 0x201   : > { %v1257_v41 = vpop.f32.mrf.mxu1 }
 0x202   : > { %1382 = vst [vmem:[%s2666_s16 + $0x170] sm:$0xff] %v1266_v40  ;;  %v1258_v42 = vadd.f32 %v2663_v14, %v1257_v41 }
 0x203   : > { %v2176_v43 = vpop.f32.mrf.mxu1 }
 0x204   : > { %1380 = vst [vmem:[%s2666_s16 + $0x160] sm:$0xff] %v1258_v42  ;;  %v1269_v45 = vadd.f32 %v2176_v43, %v2663_v14 }
 0x205   : > { %v1260_v46 = vpop.f32.mrf.mxu1 }
 0x206   : > { %1383 = vst [vmem:[%s2666_s16 + $0x178] sm:$0xff] %v1269_v45  ;;  %v1261_v47 = vadd.f32 %v2663_v14, %v1260_v46 }
 0x207   : > { %v2179_v48 = vpop.f32.mrf.mxu1 }
 0x208   : > { %1381 = vst [vmem:[%s2666_s16 + $0x168] sm:$0xff] %v1261_v47  ;;  %v1282_v49 = vadd.f32 %v2179_v48, %v2663_v14 }
 0x209   : > { %v1273_v50 = vpop.f32.mrf.mxu1 }
 0x20a   : > { %1386 = vst [vmem:[%s2666_s16 + $0x190] sm:$0xff] %v1282_v49  ;;  %v1274_v51 = vadd.f32 %v2663_v14, %v1273_v50 }
 0x20b   : > { %v2180_v52 = vpop.f32.mrf.mxu1 }
 0x20c   : > { %1384 = vst [vmem:[%s2666_s16 + $0x180] sm:$0xff] %v1274_v51  ;;  %v1285_v53 = vadd.f32 %v2180_v52, %v2663_v14 }
 0x20d   : > { %v1276_v54 = vpop.f32.mrf.mxu1 }
 0x20e   : > { %1387 = vst [vmem:[%s2666_s16 + $0x198] sm:$0xff] %v1285_v53  ;;  %v1277_v55 = vadd.f32 %v2663_v14, %v1276_v54 }
 0x20f   : > { %v2183_v56 = vpop.f32.mrf.mxu1 }
 0x210   : > { %1385 = vst [vmem:[%s2666_s16 + $0x188] sm:$0xff] %v1277_v55  ;;  %v1298_v57 = vadd.f32 %v2183_v56, %v2663_v14 }
 0x211   : > { %v1289_v58 = vpop.f32.mrf.mxu1 }
 0x212   : > { %1390 = vst [vmem:[%s2666_s16 + $0x1b0] sm:$0xff] %v1298_v57  ;;  %v1290_v59 = vadd.f32 %v2663_v14, %v1289_v58 }
 0x213   : > { %v2184_v60 = vpop.f32.mrf.mxu1 }
 0x214   : > { %1388 = vst [vmem:[%s2666_s16 + $0x1a0] sm:$0xff] %v1290_v59  ;;  %v1301_v61 = vadd.f32 %v2184_v60, %v2663_v14 }
 0x215   : > { %v1292_v62 = vpop.f32.mrf.mxu1 }
 0x216   : > { %1391 = vst [vmem:[%s2666_s16 + $0x1b8] sm:$0xff] %v1301_v61  ;;  %v1293_v63 = vadd.f32 %v2663_v14, %v1292_v62 }
 0x217   : > { %v2187_v0 = vpop.f32.mrf.mxu1 }
 0x218   : > { %1389 = vst [vmem:[%s2666_s16 + $0x1a8] sm:$0xff] %v1293_v63  ;;  %v1314_v1 = vadd.f32 %v2187_v0, %v2663_v14 }
 0x219   : > { %v1305_v2 = vpop.f32.mrf.mxu1 }
 0x21a   : > { %1394 = vst [vmem:[%s2666_s16 + $0x1d0] sm:$0xff] %v1314_v1  ;;  %v1306_v3 = vadd.f32 %v2663_v14, %v1305_v2 }
 0x21b   : > { %v2188_v4 = vpop.f32.mrf.mxu1 }
 0x21c   : > { %1392 = vst [vmem:[%s2666_s16 + $0x1c0] sm:$0xff] %v1306_v3  ;;  %v1317_v5 = vadd.f32 %v2188_v4, %v2663_v14 }
 0x21d   : > { %v1308_v6 = vpop.f32.mrf.mxu1 }
 0x21e   : > { %1395 = vst [vmem:[%s2666_s16 + $0x1d8] sm:$0xff] %v1317_v5  ;;  %v1309_v7 = vadd.f32 %v2663_v14, %v1308_v6 }
 0x21f   : > { %v2191_v8 = vpop.f32.mrf.mxu1 }
 0x220   : > { %1393 = vst [vmem:[%s2666_s16 + $0x1c8] sm:$0xff] %v1309_v7  ;;  %v1330_v9 = vadd.f32 %v2191_v8, %v2663_v14 }
 0x221   : > { %v1321_v10 = vpop.f32.mrf.mxu1 }
 0x222   : > { %1398 = vst [vmem:[%s2666_s16 + $0x1f0] sm:$0xff] %v1330_v9  ;;  %v1322_v11 = vadd.f32 %v2663_v14, %v1321_v10 }
 0x223   : > { %v2192_v12 = vpop.f32.mrf.mxu1 }
 0x224   : > { %1396 = vst [vmem:[%s2666_s16 + $0x1e0] sm:$0xff] %v1322_v11  ;;  %v1333_v13 = vadd.f32 %v2192_v12, %v2663_v14  ;;  %1406 = sbr.rel (!%p2482_p4) target bundleno = 617 (0x269), region = 44 }
 0x225   : > { %v1324_v15 = vpop.f32.mrf.mxu1 }
 0x226   : > { %1399 = vst [vmem:[%s2666_s16 + $0x1f8] sm:$0xff] %v1333_v13  ;;  %v1325_v16 = vadd.f32 %v2663_v14, %v1324_v15 }
 0x228   : > { %1397 = vst [vmem:[%s2666_s16 + $0x1e8] sm:$0xff] %v1325_v16 }
 0x229   : > { %s3017_s18 = smov (!%p1409_p8, %s1408_s18), 64 }
 0x22a   : > { %s1953_s27 = sshll.u32 %s3017_s18, 7 }
 0x22b   : > { %p1956_p9 = scmp.eq.s32.totalorder %s1953_s27, 0 }
 0x22c   : > { %s2808_s28 = sshrl.u32 (!%p1956_p9), %s3017_s18, 6 }
 0x22d   : > { %1417 = sbr.rel (%p1956_p9) target bundleno = 617 (0x269), region = 48  ;;  %p1957_p10 = scmp.le.s32.totalorder (!%p1956_p9), %s2808_s28, 0 }
 0x232   : > { %1824 = sbr.rel (%p1957_p10) target bundleno = 600 (0x258), region = 124  ;;  %s3008_s21 = smov (!%p1957_p10), %s2802_s24 }
 0x233   : > { %s3009_s26 = smov (!%p1957_p10), %s2666_s16  ;;  %s2817_s29 = smov (!%p1957_p10), 0  }
 0x234   : > { %s2819_s30 = smov (!%p1957_p10), 0  }
 0x237 LB: >> { %v1606_v14 = vld [vmem:[%s2401_s26] sm:$0xff]  ;;  %v1608_v17 = vld [vmem:[%s2401_s26 + $0x8] sm:$0xff]  ;;  %v1610_v44 = vld [vmem:[%s2401_s26 + $0x10] sm:$0xff]  ;;  %s1734_s6 = sadd.s32 1, %s2405_s29  ;;  %s1600_s30 = sadd.s32 1, %s2409_s30   ;;  %s2409_s30 = sphi %s2819_s30, %s1600_s30   ;;  %s2405_s29 = sphi %s2817_s29, %s3012_s29   ;;  %s2401_s26 = sphi %s3009_s26, %s3011_s26   ;;  %s2397_s21 = sphi %s3008_s21, %s3010_s21  }
 0x238   : >> { %1607 = vst [vmem:[%s2397_s21] sm:$0xff] %v1606_v14  ;;  %1609 = vst [vmem:[%s2397_s21 + $0x8] sm:$0xff] %v1608_v17  ;;  %v1612_v18 = vld [vmem:[%s2401_s26 + $0x18] sm:$0xff]  ;;  %v1614_v19 = vld [vmem:[%s2401_s26 + $0x20] sm:$0xff]  ;;  %p1735_p11 = scmp.ge.s32.totalorder %s1734_s6, %s2808_s28  ;;  %p1599_p12 = scmp.ge.s32.totalorder %s1600_s30, %s2808_s28 }
 0x239   : >> { %1611 = vst [vmem:[%s2397_s21 + $0x10] sm:$0xff] %v1610_v44  ;;  %v1616_v20 = vld [vmem:[%s2401_s26 + $0x28] sm:$0xff]  ;;  %1613 = vst [vmem:[%s2397_s21 + $0x18] sm:$0xff] %v1612_v18  ;;  %v1618_v21 = vld [vmem:[%s2401_s26 + $0x30] sm:$0xff] }
 0x23a   : >> { %1615 = vst [vmem:[%s2397_s21 + $0x20] sm:$0xff] %v1614_v19  ;;  %1617 = vst [vmem:[%s2397_s21 + $0x28] sm:$0xff] %v1616_v20  ;;  %v1620_v22 = vld [vmem:[%s2401_s26 + $0x38] sm:$0xff]  ;;  %v1622_v23 = vld [vmem:[%s2401_s26 + $0x40] sm:$0xff]  ;;  %s3019_s6 = smov (%p1735_p11, %s1734_s6), 0 }
 0x23b   : >> { %1619 = vst [vmem:[%s2397_s21 + $0x30] sm:$0xff] %v1618_v21  ;;  %1621 = vst [vmem:[%s2397_s21 + $0x38] sm:$0xff] %v1620_v22  ;;  %v1624_v24 = vld [vmem:[%s2401_s26 + $0x48] sm:$0xff]  ;;  %v1626_v25 = vld [vmem:[%s2401_s26 + $0x50] sm:$0xff]  ;;  %s1958_s7 = sshll.u32 %s3019_s6, 9  ;;  %s3012_s29 = smov %s3019_s6 }
 0x23c   : >> { %1623 = vst [vmem:[%s2397_s21 + $0x40] sm:$0xff] %v1622_v23  ;;  %v1628_v26 = vld [vmem:[%s2401_s26 + $0x58] sm:$0xff]  ;;  %1625 = vst [vmem:[%s2397_s21 + $0x48] sm:$0xff] %v1624_v24  ;;  %v1630_v27 = vld [vmem:[%s2401_s26 + $0x60] sm:$0xff]  ;;  %s2875_s8 = scalar_lea.vmem %s2666_s16, %s1958_s7 [#allocation2]   ;;  %s2878_s9 = scalar_lea.vmem %s2802_s24, %s1958_s7  }
 0x23d   : >> { %1627 = vst [vmem:[%s2397_s21 + $0x50] sm:$0xff] %v1626_v25  ;;  %1629 = vst [vmem:[%s2397_s21 + $0x58] sm:$0xff] %v1628_v26  ;;  %v1632_v28 = vld [vmem:[%s2401_s26 + $0x68] sm:$0xff]  ;;  %v1634_v29 = vld [vmem:[%s2401_s26 + $0x70] sm:$0xff] }
 0x23e   : >> { %1631 = vst [vmem:[%s2397_s21 + $0x60] sm:$0xff] %v1630_v27  ;;  %1633 = vst [vmem:[%s2397_s21 + $0x68] sm:$0xff] %v1632_v28  ;;  %v1636_v30 = vld [vmem:[%s2401_s26 + $0x78] sm:$0xff]  ;;  %v1638_v31 = vld [vmem:[%s2401_s26 + $0x80] sm:$0xff] }
 0x23f   : >> { %1635 = vst [vmem:[%s2397_s21 + $0x70] sm:$0xff] %v1634_v29  ;;  %v1640_v32 = vld [vmem:[%s2401_s26 + $0x88] sm:$0xff]  ;;  %1637 = vst [vmem:[%s2397_s21 + $0x78] sm:$0xff] %v1636_v30  ;;  %v1642_v33 = vld [vmem:[%s2401_s26 + $0x90] sm:$0xff] }
 0x240   : >> { %1639 = vst [vmem:[%s2397_s21 + $0x80] sm:$0xff] %v1638_v31  ;;  %1641 = vst [vmem:[%s2397_s21 + $0x88] sm:$0xff] %v1640_v32  ;;  %v1644_v34 = vld [vmem:[%s2401_s26 + $0x98] sm:$0xff]  ;;  %v1646_v35 = vld [vmem:[%s2401_s26 + $0xa0] sm:$0xff] }
 0x241   : >> { %1643 = vst [vmem:[%s2397_s21 + $0x90] sm:$0xff] %v1642_v33  ;;  %1645 = vst [vmem:[%s2397_s21 + $0x98] sm:$0xff] %v1644_v34  ;;  %v1648_v36 = vld [vmem:[%s2401_s26 + $0xa8] sm:$0xff]  ;;  %v1650_v37 = vld [vmem:[%s2401_s26 + $0xb0] sm:$0xff] }
 0x242   : >> { %1647 = vst [vmem:[%s2397_s21 + $0xa0] sm:$0xff] %v1646_v35  ;;  %v1652_v38 = vld [vmem:[%s2401_s26 + $0xb8] sm:$0xff]  ;;  %1649 = vst [vmem:[%s2397_s21 + $0xa8] sm:$0xff] %v1648_v36  ;;  %v1654_v39 = vld [vmem:[%s2401_s26 + $0xc0] sm:$0xff] }
 0x243   : >> { %1651 = vst [vmem:[%s2397_s21 + $0xb0] sm:$0xff] %v1650_v37  ;;  %1653 = vst [vmem:[%s2397_s21 + $0xb8] sm:$0xff] %v1652_v38  ;;  %v1656_v40 = vld [vmem:[%s2401_s26 + $0xc8] sm:$0xff]  ;;  %v1658_v41 = vld [vmem:[%s2401_s26 + $0xd0] sm:$0xff] }
 0x244   : >> { %1655 = vst [vmem:[%s2397_s21 + $0xc0] sm:$0xff] %v1654_v39  ;;  %1657 = vst [vmem:[%s2397_s21 + $0xc8] sm:$0xff] %v1656_v40  ;;  %v1660_v42 = vld [vmem:[%s2401_s26 + $0xd8] sm:$0xff]  ;;  %v1662_v43 = vld [vmem:[%s2401_s26 + $0xe0] sm:$0xff] }
 0x245   : >> { %1659 = vst [vmem:[%s2397_s21 + $0xd0] sm:$0xff] %v1658_v41  ;;  %v1664_v45 = vld [vmem:[%s2401_s26 + $0xe8] sm:$0xff]  ;;  %1661 = vst [vmem:[%s2397_s21 + $0xd8] sm:$0xff] %v1660_v42  ;;  %v1666_v46 = vld [vmem:[%s2401_s26 + $0xf0] sm:$0xff] }
 0x246   : >> { %1663 = vst [vmem:[%s2397_s21 + $0xe0] sm:$0xff] %v1662_v43  ;;  %1665 = vst [vmem:[%s2397_s21 + $0xe8] sm:$0xff] %v1664_v45  ;;  %v1668_v47 = vld [vmem:[%s2401_s26 + $0xf8] sm:$0xff]  ;;  %v1670_v48 = vld [vmem:[%s2401_s26 + $0x100] sm:$0xff] }
 0x247   : >> { %1667 = vst [vmem:[%s2397_s21 + $0xf0] sm:$0xff] %v1666_v46  ;;  %1669 = vst [vmem:[%s2397_s21 + $0xf8] sm:$0xff] %v1668_v47  ;;  %v1672_v49 = vld [vmem:[%s2401_s26 + $0x108] sm:$0xff]  ;;  %v1674_v50 = vld [vmem:[%s2401_s26 + $0x110] sm:$0xff] }
 0x248   : >> { %1671 = vst [vmem:[%s2397_s21 + $0x100] sm:$0xff] %v1670_v48  ;;  %v1676_v51 = vld [vmem:[%s2401_s26 + $0x118] sm:$0xff]  ;;  %1673 = vst [vmem:[%s2397_s21 + $0x108] sm:$0xff] %v1672_v49  ;;  %v1678_v52 = vld [vmem:[%s2401_s26 + $0x120] sm:$0xff] }
 0x249   : >> { %1675 = vst [vmem:[%s2397_s21 + $0x110] sm:$0xff] %v1674_v50  ;;  %1677 = vst [vmem:[%s2397_s21 + $0x118] sm:$0xff] %v1676_v51  ;;  %v1680_v53 = vld [vmem:[%s2401_s26 + $0x128] sm:$0xff]  ;;  %v1682_v54 = vld [vmem:[%s2401_s26 + $0x130] sm:$0xff] }
 0x24a   : >> { %1679 = vst [vmem:[%s2397_s21 + $0x120] sm:$0xff] %v1678_v52  ;;  %1681 = vst [vmem:[%s2397_s21 + $0x128] sm:$0xff] %v1680_v53  ;;  %v1684_v55 = vld [vmem:[%s2401_s26 + $0x138] sm:$0xff]  ;;  %v1686_v56 = vld [vmem:[%s2401_s26 + $0x140] sm:$0xff] }
 0x24b   : >> { %1683 = vst [vmem:[%s2397_s21 + $0x130] sm:$0xff] %v1682_v54  ;;  %v1688_v57 = vld [vmem:[%s2401_s26 + $0x148] sm:$0xff]  ;;  %1685 = vst [vmem:[%s2397_s21 + $0x138] sm:$0xff] %v1684_v55  ;;  %v1690_v58 = vld [vmem:[%s2401_s26 + $0x150] sm:$0xff] }
 0x24c   : >> { %1687 = vst [vmem:[%s2397_s21 + $0x140] sm:$0xff] %v1686_v56  ;;  %1689 = vst [vmem:[%s2397_s21 + $0x148] sm:$0xff] %v1688_v57  ;;  %v1692_v59 = vld [vmem:[%s2401_s26 + $0x158] sm:$0xff]  ;;  %v1694_v60 = vld [vmem:[%s2401_s26 + $0x160] sm:$0xff] }
 0x24d   : >> { %1691 = vst [vmem:[%s2397_s21 + $0x150] sm:$0xff] %v1690_v58  ;;  %1693 = vst [vmem:[%s2397_s21 + $0x158] sm:$0xff] %v1692_v59  ;;  %v1696_v61 = vld [vmem:[%s2401_s26 + $0x168] sm:$0xff]  ;;  %v1698_v62 = vld [vmem:[%s2401_s26 + $0x170] sm:$0xff] }
 0x24e   : >> { %1695 = vst [vmem:[%s2397_s21 + $0x160] sm:$0xff] %v1694_v60  ;;  %v1700_v63 = vld [vmem:[%s2401_s26 + $0x178] sm:$0xff]  ;;  %1697 = vst [vmem:[%s2397_s21 + $0x168] sm:$0xff] %v1696_v61  ;;  %v1702_v0 = vld [vmem:[%s2401_s26 + $0x180] sm:$0xff] }
 0x24f   : >> { %1699 = vst [vmem:[%s2397_s21 + $0x170] sm:$0xff] %v1698_v62  ;;  %1701 = vst [vmem:[%s2397_s21 + $0x178] sm:$0xff] %v1700_v63  ;;  %v1704_v1 = vld [vmem:[%s2401_s26 + $0x188] sm:$0xff]  ;;  %v1706_v2 = vld [vmem:[%s2401_s26 + $0x190] sm:$0xff] }
 0x250   : >> { %1703 = vst [vmem:[%s2397_s21 + $0x180] sm:$0xff] %v1702_v0  ;;  %1705 = vst [vmem:[%s2397_s21 + $0x188] sm:$0xff] %v1704_v1  ;;  %v1708_v3 = vld [vmem:[%s2401_s26 + $0x198] sm:$0xff]  ;;  %v1710_v4 = vld [vmem:[%s2401_s26 + $0x1a0] sm:$0xff] }
 0x251   : >> { %1707 = vst [vmem:[%s2397_s21 + $0x190] sm:$0xff] %v1706_v2  ;;  %v1712_v5 = vld [vmem:[%s2401_s26 + $0x1a8] sm:$0xff]  ;;  %1709 = vst [vmem:[%s2397_s21 + $0x198] sm:$0xff] %v1708_v3  ;;  %v1714_v6 = vld [vmem:[%s2401_s26 + $0x1b0] sm:$0xff] }
 0x252   : >> { %1711 = vst [vmem:[%s2397_s21 + $0x1a0] sm:$0xff] %v1710_v4  ;;  %1713 = vst [vmem:[%s2397_s21 + $0x1a8] sm:$0xff] %v1712_v5  ;;  %v1716_v7 = vld [vmem:[%s2401_s26 + $0x1b8] sm:$0xff]  ;;  %v1718_v8 = vld [vmem:[%s2401_s26 + $0x1c0] sm:$0xff] }
 0x253   : >> { %1715 = vst [vmem:[%s2397_s21 + $0x1b0] sm:$0xff] %v1714_v6  ;;  %1717 = vst [vmem:[%s2397_s21 + $0x1b8] sm:$0xff] %v1716_v7  ;;  %v1720_v9 = vld [vmem:[%s2401_s26 + $0x1c8] sm:$0xff]  ;;  %v1722_v10 = vld [vmem:[%s2401_s26 + $0x1d0] sm:$0xff]  ;;  %1602 = sbr.rel (!%p1599_p12) target bundleno = 567 (0x237), region = 130 }
 0x254   : >> { %1719 = vst [vmem:[%s2397_s21 + $0x1c0] sm:$0xff] %v1718_v8  ;;  %v1724_v11 = vld [vmem:[%s2401_s26 + $0x1d8] sm:$0xff]  ;;  %1721 = vst [vmem:[%s2397_s21 + $0x1c8] sm:$0xff] %v1720_v9  ;;  %v1726_v12 = vld [vmem:[%s2401_s26 + $0x1e0] sm:$0xff] }
 0x255   : >> { %1723 = vst [vmem:[%s2397_s21 + $0x1d0] sm:$0xff] %v1722_v10  ;;  %1725 = vst [vmem:[%s2397_s21 + $0x1d8] sm:$0xff] %v1724_v11  ;;  %v1728_v13 = vld [vmem:[%s2401_s26 + $0x1e8] sm:$0xff]  ;;  %v1730_v15 = vld [vmem:[%s2401_s26 + $0x1f0] sm:$0xff] }
 0x256   : >> { %1727 = vst [vmem:[%s2397_s21 + $0x1e0] sm:$0xff] %v1726_v12  ;;  %1729 = vst [vmem:[%s2397_s21 + $0x1e8] sm:$0xff] %v1728_v13  ;;  %v1732_v16 = vld [vmem:[%s2401_s26 + $0x1f8] sm:$0xff]  ;;  %s3011_s26 = smov %s2875_s8 }
 0x257   : >> { %1731 = vst [vmem:[%s2397_s21 + $0x1f0] sm:$0xff] %v1730_v15  ;;  %1733 = vst [vmem:[%s2397_s21 + $0x1f8] sm:$0xff] %v1732_v16  ;;  %s3010_s21 = smov %s2878_s9 }
 0x258 PF: > { %s2983_s10 = sand.u32 63, %s3017_s18   ;;  %s1969_s11 = sshll.u32 %s2808_s28, 9 }
 0x259   : > { %s1745_s12 = scalar_lea.vmem %s2666_s16, %s1969_s11 [#allocation2]   ;;  %s1747_s13 = scalar_lea.vmem %s2802_s24, %s1969_s11  }
 0x25a   : > { %p1963_p13 = scmp.le.s32.totalorder %s2983_s10, 0 }
 0x25b   : > { %s2411_s14 = smov (!%p1963_p13), %s1747_s13   ;;  %s2415_s15 = smov (!%p1963_p13), %s1745_s12  }
 0x25c   : > { %1838 = sbr.rel (%p1963_p13) target bundleno = 617 (0x269), region = 135  ;;  %s2419_s17 = smov (!%p1963_p13), 0  }
 0x25d   : > { %s2423_s20 = smov (!%p1963_p13), 0  }
 0x261 LB: >> { %v1757_v14 = vld [vmem:[%s2417_s15] sm:$0xff]  ;;  %s1759_s18 = sadd.s32 1, %s2421_s17  ;;  %s1751_s20 = sadd.s32 1, %s2425_s20   ;;  %s2425_s20 = sphi %s2423_s20, %s1751_s20   ;;  %s2421_s17 = sphi %s2419_s17, %s2420_s17   ;;  %s2417_s15 = sphi %s2415_s15, %s1764_s15   ;;  %s2413_s14 = sphi %s2411_s14, %s1765_s14  }
 0x262   : >> { %1758 = vst [vmem:[%s2413_s14] sm:$0xff] %v1757_v14  ;;  %p1760_p0 = scmp.ge.s32.totalorder %s1759_s18, %s2983_s10  ;;  %p1750_p1 = scmp.ge.s32.totalorder %s1751_s20, %s2983_s10 }
 0x264   : >> { %s3021_s18 = smov (%p1760_p0, %s1759_s18), 0  ;;  %1753 = sbr.rel (!%p1750_p1) target bundleno = 609 (0x261), region = 141 }
 0x265   : >> { %s1964_s16 = sshll.u32 %s3021_s18, 3  ;;  %s2420_s17 = smov %s3021_s18  }
 0x266   : >> { %s1764_s15 = scalar_lea.vmem %s1745_s12, %s1964_s16 [#allocation2]   ;;  %s1765_s14 = scalar_lea.vmem %s1747_s13, %s1964_s16  }
 0x269 PF: > { %p12_p2 = scmp.ge.s32.totalorder %s2472_s22, 6   ;;  %s3013_s18 = smov %s2389_s19 }
 0x26a   : > { %s3014_s19 = smov %s2480_s25  ;;  %s3015_s20 = smov %s2472_s22 }
 0x26b   :  { %14 = sbr.rel (!%p12_p2) target bundleno = 2 (0x2), region = 152 }

</bundles_post_ra>
